<compile_context>
chip_gen: v7x
topology: tpu7x:2x2x1
jax: 0.10.0
libtpu: 0.0.40
codegen_flags: <defaults>
</compile_context>

<pallas_src>
import functools

import jax
import jax.numpy as jnp
from jax.experimental import pallas as pl
from jax.experimental.pallas import tpu as pltpu


# ----------------------------- Pallas kernel ------------------------------

def _mlp_kernel(seed_ref, x_ref, w1_ref, b1_ref, w2_ref, b2_ref, o_ref,
                *, drop, gelu_approximate):
    """fc1 + GELU + dropout + fc2 + dropout for one (RB, C) row block."""
    x = x_ref[...]                                        # (RB, C) fp32
    w1 = w1_ref[...]                                      # (C, Hd) bf16 (cast in wrapper)

    # fc1 on the MXU: bf16 operands, fp32 accumulation.
    h = jnp.dot(x.astype(w1.dtype), w1, preferred_element_type=jnp.float32)
    h = h + b1_ref[...]                                   # fp32 bias, (1, Hd) broadcast

    # tanh GELU routes through the otherwise-idle EUP slot (exact erf would be
    # a VALU polynomial over the full (RB, Hd) intermediate).
    h = jax.nn.gelu(h, approximate=gelu_approximate)

    if drop > 0.0:   # static Python branch; not traced when drop == 0.0
        pltpu.prng_seed(seed_ref[0] + pl.program_id(0))
        thr = jnp.uint32(min(int(drop * (1 << 32)), (1 << 32) - 1))
        keep1 = pltpu.bitcast(pltpu.prng_random_bits(h.shape), jnp.uint32) >= thr
        h = jnp.where(keep1, h, 0.0)   # 1/(1-p) scale folded into w2 (wrapper)

    # fc2 on the MXU.
    w2 = w2_ref[...]                                      # (Hd, Co) bf16
    y = jnp.dot(h.astype(w2.dtype), w2, preferred_element_type=jnp.float32)
    y = y + b2_ref[...]                                   # (RB, Co) fp32

    if drop > 0.0:
        thr = jnp.uint32(min(int(drop * (1 << 32)), (1 << 32) - 1))
        keep2 = pltpu.bitcast(pltpu.prng_random_bits(y.shape), jnp.uint32) >= thr
        y = jnp.where(keep2, y, 0.0)   # 1/(1-p) scale folded into w2/b2 (wrapper)

    o_ref[...] = y.astype(o_ref.dtype)


# ------------------------------- wrapper -----------------------------------

def _pick_row_block(rows):
    # Largest-first: single-TC v5e/v6e want big blocks (the grid is a serial
    # loop).  Prefer a block giving an even grid (>=2) so dual-TC v7x splits
    # work evenly under dimension_semantics=("parallel",).
    candidates = (512, 256, 128, 64, 32, 16, 8)
    for rb in candidates:
        if rows % rb == 0 and (rows // rb) >= 2 and (rows // rb) % 2 == 0:
            return rb
    for rb in candidates:
        if rows % rb == 0:
            return rb
    # Ragged row count: wrapper pads rows up to a multiple of this block.
    return 256 if rows >= 256 else 8 * max(1, pl.cdiv(rows, 8))


def mlp_mc_forward(x, params, *, drop=0.0, seed=0, mxu_dtype=jnp.bfloat16,
                   gelu_approximate=True):
    """MlpMC forward: x @ w1 + b1 -> GELU -> drop -> @ w2 + b2 -> drop."""
    w1, b1 = params['w1'], params['b1']
    w2, b2 = params['w2'], params['b2']
    C = x.shape[-1]
    Hd = w1.shape[1]
    Co = w2.shape[1]
    assert w1.shape[0] == C and w2.shape[0] == Hd

    drop = float(drop)
    if drop > 0.0:
        # Fold both dropout keep-scales (1/(1-p)) into w2 / b2 so the kernel
        # only applies binary masks:  out = m2 * (m1_h @ (s^2 * w2) + s * b2).
        s = 1.0 / (1.0 - drop)
        w2 = w2 * (s * s)
        b2 = b2 * s

    # Cast grid-resident weights to the MXU dtype ONCE here (not per grid step
    # inside the kernel); biases stay fp32 for the VPU bias add.
    w1c = w1.astype(mxu_dtype)
    w2c = w2.astype(mxu_dtype)
    b1r = b1.reshape(1, Hd).astype(jnp.float32)
    b2r = b2.reshape(1, Co).astype(jnp.float32)

    lead = x.shape[:-1]
    rows = 1
    for d in lead:
        rows *= d
    x2 = x.reshape(rows, C)

    RB = _pick_row_block(rows)
    rows_p = pl.cdiv(rows, RB) * RB
    if rows_p != rows:
        x2 = jnp.pad(x2, ((0, rows_p - rows), (0, 0)))
    grid = (rows_p // RB,)

    seed_arr = jnp.array([seed], jnp.int32)

    # Explicit VMEM budget: double-buffered x / out tiles, single-buffered
    # bf16 weights, fp32 hidden intermediate (+ its bf16 copy for fc2).
    w_isz = jnp.dtype(mxu_dtype).itemsize
    vmem_est = (2 * RB * C * 4 + 2 * RB * Co * 4
                + (C * Hd + Hd * Co) * w_isz
                + (Hd + Co) * 4
                + RB * Hd * (4 + w_isz) + RB * Co * 4)
    vmem_limit = int(min(100 << 20, max(32 << 20, int(vmem_est * 1.5) + (4 << 20))))

    resident = dict(pipeline_mode=pl.Buffered(1))   # block index never advances
    grid_spec = pltpu.PrefetchScalarGridSpec(
        num_scalar_prefetch=1,                       # seed -> SMEM
        grid=grid,
        in_specs=[
            pl.BlockSpec((RB, C), lambda i, seed: (i, 0)),                 # x rows
            pl.BlockSpec((C, Hd), lambda i, seed: (0, 0), **resident),     # w1 (bf16, resident)
            pl.BlockSpec((1, Hd), lambda i, seed: (0, 0), **resident),     # b1
            pl.BlockSpec((Hd, Co), lambda i, seed: (0, 0), **resident),    # w2 (bf16, resident)
            pl.BlockSpec((1, Co), lambda i, seed: (0, 0), **resident),     # b2
        ],
        out_specs=pl.BlockSpec((RB, Co), lambda i, seed: (i, 0)),
    )

    out = pl.pallas_call(
        functools.partial(_mlp_kernel, drop=drop,
                          gelu_approximate=gelu_approximate),
        out_shape=jax.ShapeDtypeStruct((rows_p, Co), x.dtype),
        grid_spec=grid_spec,
        compiler_params=pltpu.CompilerParams(
            dimension_semantics=("parallel",),
            vmem_limit_bytes=vmem_limit),
    )(seed_arr, x2, w1c, b1r, w2c, b2r)

    if rows_p != rows:
        out = out[:rows]
    return out.reshape(*lead, Co)


# --------------------------- params / reference ----------------------------

def init_params(key, in_features, hidden_features=None, out_features=None):
    hidden_features = hidden_features or in_features
    out_features = out_features or in_features
    k1, k2 = jax.random.split(key)
    return {
        'w1': 0.02 * jax.random.normal(k1, (in_features, hidden_features), jnp.float32),
        'b1': jnp.zeros((hidden_features,), jnp.float32),
        'w2': 0.02 * jax.random.normal(k2, (hidden_features, out_features), jnp.float32),
        'b2': jnp.zeros((out_features,), jnp.float32),
    }


def reference_forward(x, params):
    # Pure-JAX fp32 reference matching nn.GELU (exact erf); drop=0 -> identity.
    h = jax.nn.gelu(x @ params['w1'] + params['b1'], approximate=False)
    return h @ params['w2'] + params['b2']


# --------------------------------- main ------------------------------------

if __name__ == "__main__":
    key = jax.random.PRNGKey(0)
    B, L = 2, 512                               # 1024 tokens -> grid of 2 x RB=512
    in_features, hidden_features = 256, 512     # C multiple of 256 fills MXU K on v6e/v7x

    k_x, k_p = jax.random.split(key)
    x = jax.random.normal(k_x, (B, L, in_features), jnp.float32)
    params = init_params(k_p, in_features, hidden_features, in_features)

    out = mlp_mc_forward(x, params, drop=0.0)
    out = jax.block_until_ready(out)

    ref = reference_forward(x, params)
    err = float(jnp.max(jnp.abs(out - ref)))
    # Tolerance absorbs the bf16 weight cast and tanh-GELU approximation.
    assert err < 2e-2, f"max abs err too large: {err}"
    print("KERNEL_OK")
</pallas_src>

<mosaic_0001>
module attributes {stable_mosaic.version = 11 : i64} {
  func.func @_mlp_kernel(%arg0: i32, %arg1: memref<1xi32, #tpu.memory_space<smem>>, %arg2: memref<512x256xf32, #tpu.memory_space<vmem>>, %arg3: memref<256x512xbf16, #tpu.memory_space<vmem>>, %arg4: memref<1x512xf32, #tpu.memory_space<vmem>>, %arg5: memref<512x256xbf16, #tpu.memory_space<vmem>>, %arg6: memref<1x256xf32, #tpu.memory_space<vmem>>, %arg7: memref<512x256xf32, #tpu.memory_space<vmem>>) attributes {dimension_semantics = [#tpu.dimension_semantics<parallel>], iteration_bounds = array<i64: 2>, scalar_prefetch = 1 : i64, scratch_operands = 0 : i64, tpu.core_type = #tpu.core_type<tc>, window_params = [{transform_indices = @transform_0, window_bounds = array<i64: 512, 256>}, {pipeline_mode = #tpu.pipeline_mode<synchronous>, transform_indices = @transform_1, window_bounds = array<i64: 256, 512>}, {pipeline_mode = #tpu.pipeline_mode<synchronous>, transform_indices = @transform_2, window_bounds = array<i64: 1, 512>}, {pipeline_mode = #tpu.pipeline_mode<synchronous>, transform_indices = @transform_3, window_bounds = array<i64: 512, 256>}, {pipeline_mode = #tpu.pipeline_mode<synchronous>, transform_indices = @transform_4, window_bounds = array<i64: 1, 256>}, {transform_indices = @transform_5, window_bounds = array<i64: 512, 256>}]} {
    %c0 = arith.constant 0 : index
    %c0_0 = arith.constant 0 : index
    %0 = vector.load %arg2[%c0, %c0_0] : memref<512x256xf32, #tpu.memory_space<vmem>>, vector<512x256xf32>
    %c0_1 = arith.constant 0 : index
    %c0_2 = arith.constant 0 : index
    %1 = vector.load %arg3[%c0_1, %c0_2] : memref<256x512xbf16, #tpu.memory_space<vmem>>, vector<256x512xbf16>
    %2 = arith.truncf %0 : vector<512x256xf32> to vector<512x256xbf16>
    %cst = arith.constant dense<0.000000e+00> : vector<512x512xf32>
    %3 = tpu.matmul %2, %1, %cst {dimension_numbers = #tpu.dot_dimension_numbers<[1], [0], [0], [1], [0, 0, 1, 1], [], []>} : vector<512x256xbf16>, vector<256x512xbf16>, vector<512x512xf32> -> vector<512x512xf32>
    %c0_3 = arith.constant 0 : index
    %c0_4 = arith.constant 0 : index
    %4 = vector.load %arg4[%c0_3, %c0_4] : memref<1x512xf32, #tpu.memory_space<vmem>>, vector<1x512xf32>
    %5 = vector.broadcast %4 : vector<1x512xf32> to vector<512x512xf32>
    %6 = arith.addf %3, %5 : vector<512x512xf32>
    %7 = arith.mulf %6, %6 : vector<512x512xf32>
    %8 = arith.mulf %6, %7 : vector<512x512xf32>
    %cst_5 = arith.constant 4.471500e-02 : f32
    %9 = vector.broadcast %cst_5 : f32 to vector<512x512xf32>
    %10 = arith.mulf %9, %8 : vector<512x512xf32>
    %11 = arith.addf %6, %10 : vector<512x512xf32>
    %cst_6 = arith.constant 0.797884583 : f32
    %12 = vector.broadcast %cst_6 : f32 to vector<512x512xf32>
    %13 = arith.mulf %12, %11 : vector<512x512xf32>
    %14 = math.tanh %13 : vector<512x512xf32>
    %cst_7 = arith.constant 1.000000e+00 : f32
    %15 = vector.broadcast %cst_7 : f32 to vector<512x512xf32>
    %16 = arith.addf %15, %14 : vector<512x512xf32>
    %cst_8 = arith.constant 5.000000e-01 : f32
    %17 = vector.broadcast %cst_8 : f32 to vector<512x512xf32>
    %18 = arith.mulf %17, %16 : vector<512x512xf32>
    %19 = arith.mulf %6, %18 : vector<512x512xf32>
    %c0_9 = arith.constant 0 : index
    %c0_10 = arith.constant 0 : index
    %20 = vector.load %arg5[%c0_9, %c0_10] : memref<512x256xbf16, #tpu.memory_space<vmem>>, vector<512x256xbf16>
    %21 = arith.truncf %19 : vector<512x512xf32> to vector<512x512xbf16>
    %cst_11 = arith.constant dense<0.000000e+00> : vector<512x256xf32>
    %22 = tpu.matmul %21, %20, %cst_11 {dimension_numbers = #tpu.dot_dimension_numbers<[1], [0], [0], [1], [0, 0, 1, 1], [], []>} : vector<512x512xbf16>, vector<512x256xbf16>, vector<512x256xf32> -> vector<512x256xf32>
    %c0_12 = arith.constant 0 : index
    %c0_13 = arith.constant 0 : index
    %23 = vector.load %arg6[%c0_12, %c0_13] : memref<1x256xf32, #tpu.memory_space<vmem>>, vector<1x256xf32>
    %24 = vector.broadcast %23 : vector<1x256xf32> to vector<512x256xf32>
    %25 = arith.addf %22, %24 : vector<512x256xf32>
    %c0_14 = arith.constant 0 : index
    %c0_15 = arith.constant 0 : index
    %26 = vector.load %arg7[%c0_14, %c0_15] : memref<512x256xf32, #tpu.memory_space<vmem>>, vector<512x256xf32>
    tpu.vector_store %arg7[%c0_14, %c0_15], %25 {strides = array<i32>} : memref<512x256xf32, #tpu.memory_space<vmem>>, vector<512x256xf32>,
    return
  }
  func.func @transform_0(%arg0: i32, %arg1: memref<1xi32, #tpu.memory_space<smem>>) -> (i32, i32) {
    %c0_i32 = arith.constant 0 : i32
    %c0_i32_0 = arith.constant 0 : i32
    return %arg0, %c0_i32 : i32, i32
  }
  func.func @transform_1(%arg0: i32, %arg1: memref<1xi32, #tpu.memory_space<smem>>) -> (i32, i32) {
    %c0_i32 = arith.constant 0 : i32
    %c0_i32_0 = arith.constant 0 : i32
    %c0_i32_1 = arith.constant 0 : i32
    return %c0_i32, %c0_i32_0 : i32, i32
  }
  func.func @transform_2(%arg0: i32, %arg1: memref<1xi32, #tpu.memory_space<smem>>) -> (i32, i32) {
    %c0_i32 = arith.constant 0 : i32
    %c0_i32_0 = arith.constant 0 : i32
    %c0_i32_1 = arith.constant 0 : i32
    return %c0_i32, %c0_i32_0 : i32, i32
  }
  func.func @transform_3(%arg0: i32, %arg1: memref<1xi32, #tpu.memory_space<smem>>) -> (i32, i32) {
    %c0_i32 = arith.constant 0 : i32
    %c0_i32_0 = arith.constant 0 : i32
    %c0_i32_1 = arith.constant 0 : i32
    return %c0_i32, %c0_i32_0 : i32, i32
  }
  func.func @transform_4(%arg0: i32, %arg1: memref<1xi32, #tpu.memory_space<smem>>) -> (i32, i32) {
    %c0_i32 = arith.constant 0 : i32
    %c0_i32_0 = arith.constant 0 : i32
    %c0_i32_1 = arith.constant 0 : i32
    return %c0_i32, %c0_i32_0 : i32, i32
  }
  func.func @transform_5(%arg0: i32, %arg1: memref<1xi32, #tpu.memory_space<smem>>) -> (i32, i32) {
    %c0_i32 = arith.constant 0 : i32
    %c0_i32_0 = arith.constant 0 : i32
    return %arg0, %c0_i32 : i32, i32
  }
}

</mosaic_0001>

<bundles_post_ra>
// kernel: tpu_custom_call.1
= control target key start
LH: loop header
LB: loop body
LE: loop exit
PB: predicated region body
PF: predicated region fallthrough
CT: control target
= control target key end

     0   :  { %12 = vsyncpa [#allocation5], 0  ;;  %s11220_s0 = inlined_call_operand.<no memory space> [shape: s32[1], index: 0, kind: input, shape index: {}]   ;;  %s11221_s1 = inlined_call_operand.hbm [shape: f32[1024,256], index: 1, kind: input, shape index: {}]   ;;  %s11222_s2 = inlined_call_operand.hbm [shape: bf16[256,512], index: 2, kind: input, shape index: {}]   ;;  %s11223_s3 = inlined_call_operand.vmem [shape: f32[1,512], index: 3, kind: input, shape index: {}]   ;;  %s11224_s4 = inlined_call_operand.hbm [shape: bf16[512,256], index: 4, kind: input, shape index: {}]   ;;  %s11225_s5 = inlined_call_operand.vmem [shape: f32[1,256], index: 5, kind: input, shape index: {}]   ;;  %s11226_s6 = inlined_call_operand.hbm [shape: f32[1024,256], index: 6, kind: output, shape index: {}]  }
   0x1   :  { %14 = vsyncpa [#allocation5 + $0x1], 0 }
   0x2   :  { %15 = vsyncpa [#allocation8], 0 }
   0x3   :  { %16 = vsyncpa [#allocation6], 0 }
   0x4   :  { %18 = vsyncpa [#allocation6 + $0x1], 0  ;;  %s6739_s0 = smov 0   ;;  %s6741_s21 = smov 0  }
   0x5   :  { %s6743_s22 = smov 0   ;;  %s6745_s23 = smov 0  }
   0x6 LB: > { %s6760_s24 = sadd.s32 4294967295, %s6692_s23   ;;  %s5350_s25 = sadd.s32 4294967294, %s6692_s23   ;;  %s6692_s23 = sphi %s6745_s23, %s11666_s23   ;;  %s6688_s22 = sphi %s6743_s22, %s11665_s22   ;;  %s6684_s21 = sphi %s6741_s21, %s11664_s21   ;;  %s6680_s0 = sphi %s6739_s0, %s11663_s0  }
   0x7   : > { %p44_p0 = scmp.ne.s32.totalorder %s6684_s21, %s6680_s0  ;;  %p11227_p1 = scmp.eq.s32.totalorder %s6760_s24, 0 }
   0x8   : > { %p158_p3 = scmp.eq.s32.totalorder %s5350_s25, 1  ;;  %p5351_p5 = scmp.ge.s32.totalorder %s6692_s23, 1 }
   0x9   : > { %p6769_p4 = por %p11227_p1, %p44_p0  ;;  %p165_p7 = scmp.lt.s32.totalorder %s6692_s23, 3 }
   0xa   : > { %p6774_p6 = por %p158_p3, %p44_p0  ;;  %s6694_s29 = smov [#allocation7]  }
   0xb   : > { %s11290_s26 = scalar_select %p6769_p4, 1, 0 }
   0xc   : > { %s11291_s27 = scalar_select %p6774_p6, 1, 0 }
   0xd   : > { %p6779_p8 = pnand %p5351_p5, %p165_p7  ;;  %s177_s30 = sshll.u32 %s6694_s29, 4  ;;  %s6783_s30 = int_to_ptr.vmem [resolvable:$true] %s177_s30 }
   0xe   : > { %s6695_s8 = smov [#allocation9]   ;;  %s6536_s12 = scalar_lea.hbm %s11222_s2, 8192 }
   0xf   : > { %p5770_p9 = pneg %p6779_p8  ;;  %s193_s9 = sshll.u32 %s6695_s8, 4  ;;  %s6794_s9 = int_to_ptr.vmem [resolvable:$true] %s193_s9 }
  0x10   : > { %p6537_p12 = scmp.ne.s32.totalorder %s11222_s2, %s6536_s12  ;;  %p6543_p5 = scmp.lt.u32.totalorder %s6536_s12, %s11222_s2 }
  0x11   : > { %p6790_p11 = pnand %p5770_p9, %p11227_p1 }
  0x13   : > { %p6538_p13 = pneg %p6790_p11 }
  0x15   : > { %p6539_p0 = pnand %p6538_p13, %p6537_p12 }
  0x17   : > { %p6540_p3 = pneg %p6539_p0 }
  0x19   : > { %p6545_p7 = pnand %p6543_p5, %p6540_p3 }
  0x1b   : > { %6548 = shalt.err (!%p6545_p7)
}
  0x1c   : > { %s6549_s17 = scalar_lea.vmem %s6783_s30, 8192  ;;  %p6557_p2 = scmp.lt.s32.totalorder %s6783_s30, %s6783_s30 }
  0x1d   : > { %p6550_p9 = scmp.ne.s32.totalorder %s6783_s30, %s6549_s17  ;;  %p6558_p12 = scmp.lt.s32.totalorder %s6549_s17, %s6549_s17 }
  0x1f   : > { %p6552_p10 = pnand %p6550_p9, %p6538_p13  ;;  %p6559_p0 = por %p6558_p12, %p6557_p2 }
  0x21   : > { %p6553_p1 = pneg %p6552_p10 }
  0x23   : > { %p6560_p6 = pnand %p6559_p0, %p6553_p1 }
  0x25   : > { %6563 = shalt.err (!%p6560_p6)
}
  0x26   : > { %s6696_s18 = smov 256   ;;  %s6697_s19 = smov 16  }
  0x27   : > { %5773 = dma.hbm_to_vmem [thread:$0]  (!%p6790_p11), %s11222_s2, 8192, %s6783_s30, [#allocation8], %s6696_s18, %s6696_s18, %s6697_s19  }
  0x28   : > { %s6564_s10 = scalar_lea.hbm %s11224_s4, 8192 }
  0x29   : > { %p6565_p1 = scmp.ne.s32.totalorder %s11224_s4, %s6564_s10  ;;  %p6571_p10 = scmp.lt.u32.totalorder %s6564_s10, %s11224_s4 }
  0x2b   : > { %p6567_p2 = pnand %p6565_p1, %p6538_p13 }
  0x2d   : > { %p6568_p6 = pneg %p6567_p2 }
  0x2f   : > { %p6573_p3 = pnand %p6571_p10, %p6568_p6 }
  0x31   : > { %6576 = shalt.err (!%p6573_p3)
}
  0x32   : > { %s6577_s30 = scalar_lea.vmem %s6794_s9, 8192  ;;  %p6585_p12 = scmp.lt.s32.totalorder %s6794_s9, %s6794_s9 }
  0x33   : > { %p6578_p5 = scmp.ne.s32.totalorder %s6794_s9, %s6577_s30  ;;  %p6586_p0 = scmp.lt.s32.totalorder %s6577_s30, %s6577_s30 }
  0x35   : > { %p6580_p7 = pnand %p6578_p5, %p6538_p13  ;;  %p6587_p1 = por %p6586_p0, %p6585_p12 }
  0x37   : > { %p6581_p9 = pneg %p6580_p7 }
  0x39   : > { %p6588_p2 = pnand %p6587_p1, %p6581_p9 }
  0x3b   : > { %6591 = shalt.err (!%p6588_p2)
}
  0x3c   : > { %s6698_s15 = smov 128   ;;  %s6699_s16 = smov 8  }
  0x3d   : > { %5776 = dma.hbm_to_vmem [thread:$0]  (!%p6790_p11), %s11224_s4, 8192, %s6794_s9, [#allocation8], %s6698_s15, %s6698_s15, %s6699_s16  }
  0x3e   : > { %s6852_s25 = sadd.s32 1, %s6692_s23   ;;  %s31_s8 = sadd.s32 1, %s6688_s22 }
  0x3f   : > { %s28_s29 = ssub.s32 %s6692_s23, %s6852_s25  ;;  %p38_p6 = scmp.ne.s32.totalorder %s6688_s22, %s6684_s21 }
  0x40   : > { %p29_p13 = scmp.eq.s32.totalorder %s28_s29, 0  ;;  %p39_p10 = scmp.eq.s32.totalorder %s6692_s23, 0 }
  0x41   : > { %p11294_p5 = scmp.eq.s32.totalorder %s6760_s24, 1  ;;  %p5787_p9 = scmp.lt.s32.totalorder %s6692_s23, 2 }
  0x42   : > { %s6861_s10 = scalar_select %p29_p13, %s6688_s22, %s31_s8  }
  0x43   : > { %p40_p3 = por %p39_p10, %p38_p6  ;;  %p6865_p7 = por %p11294_p5, %p38_p6 }
  0x44   : > { %s210_s7 = sand.u32 1, %s6688_s22   ;;  %s5499_s9 = sshll.u32 %s6692_s23, 14 }
  0x45   : > { %s11295_s11 = scalar_select %p6865_p7, 1, 0 }
  0x46   : > { %s5355_s12 = sshll.u32 %s210_s7, 10  ;;  %s6875_s30 = scalar_lea.hbm %s11221_s1, %s5499_s9 }
  0x47   : > { %s214_s15 = scalar_lea.vmem [#allocation4], %s5355_s12  ;;  %p6879_p11 = pnand %p5787_p9, %p40_p3 }
  0x48   : > { %s222_s16 = sshll.u32 %s214_s15, 4  ;;  %s6883_s20 = scalar_lea.sflag [#allocation5], %s210_s7  ;;  %s6877_s16 = int_to_ptr.vmem [resolvable:$true] %s222_s16 }
  0x49   : > { %s6592_s29 = scalar_lea.hbm %s6875_s30, 16384  ;;  %p6594_p0 = pneg %p6879_p11 }
  0x4a   : > { %p6593_p12 = scmp.ne.s32.totalorder %s6875_s30, %s6592_s29  ;;  %s6597_s9 = scalar_lea.hbm %s11221_s1, 32768 }
  0x4b   : > { %p6598_p13 = scmp.lt.u32.totalorder %s6875_s30, %s11221_s1  ;;  %p6599_p6 = scmp.lt.u32.totalorder %s6597_s9, %s6592_s29 }
  0x4c   : > { %p6595_p1 = pnand %p6594_p0, %p6593_p12  ;;  %p6601_p3 = scmp.lt.u32.totalorder %s6592_s29, %s6875_s30 }
  0x4d   : > { %p6600_p10 = por %p6599_p6, %p6598_p13 }
  0x4e   : > { %p6596_p2 = pneg %p6595_p1 }
  0x4f   : > { %p6602_p5 = por %p6601_p3, %p6600_p10 }
  0x51   : > { %p6603_p9 = pnand %p6602_p5, %p6596_p2 }
  0x53   : > { %6606 = shalt.err (!%p6603_p9)
}
  0x54   : > { %s6607_s7 = scalar_lea.vmem %s6877_s16, 16384  ;;  %s6700_s15 = smov [#allocation4]  }
  0x55   : > { %p6608_p12 = scmp.ne.s32.totalorder %s6877_s16, %s6607_s7  ;;  %s6612_s8 = sshll.u32 %s6700_s15, 4  ;;  %s6613_s8 = int_to_ptr.vmem [resolvable:$false] %s6612_s8 }
  0x56   : > { %s6614_s12 = scalar_lea.vmem %s6613_s8, 32768  ;;  %p6615_p4 = scmp.lt.s32.totalorder %s6877_s16, %s6613_s8 }
  0x57   : > { %p6610_p1 = pnand %p6608_p12, %p6594_p0  ;;  %p6616_p13 = scmp.lt.s32.totalorder %s6614_s12, %s6607_s7 }
  0x59   : > { %p6611_p7 = pneg %p6610_p1  ;;  %p6617_p6 = por %p6616_p13, %p6615_p4 }
  0x5b   : > { %p6618_p10 = pnand %p6617_p6, %p6611_p7 }
  0x5d   : > { %6621 = shalt.err (!%p6618_p10)
}
  0x5e   : > { %5780 = dma.hbm_to_vmem [thread:$0]  (!%p6879_p11), %s6875_s30, 16384, %s6877_s16, %s6883_s20, %s6696_s18, %s6696_s18, %s6697_s19  }
  0x5f   : > { %234 = sbr.rel (%p6779_p8) target bundleno = 1319 (0x527), region = 40 }
  0x66   : > { %s6917_s29 = sand.u32 1, %s6684_s21   ;;  %p11297_p4 = scmp.ne.s32.totalorder %s11290_s26, 0 }
  0x67   : > { %s5360_s9 = sshll.u32 %s6917_s29, 10  ;;  %s237_s13 = scalar_lea.sflag [#allocation5], %s6917_s29 }
  0x68   : > { %s6923_s17 = scalar_lea.vmem [#allocation4], %s5360_s9 }
  0x69   : > { %6667 = dma.done.wait (%p11297_p4), %s237_s13, 16384  }
  0x6a   : > { %6669 = vsyncadd (%p11297_p4), %s237_s13, 4294950912  ;;  %p11298_p7 = scmp.eq.s32.totalorder %s6760_s24, 0 }
  0x6c   : > { %6671 = dma.done.wait (%p11298_p7), [#allocation8], 16384   ;;  %p11299_p8 = pmov %p11298_p7 }
  0x6d   : > { %v5831_v0 = vld [vmem:[#allocation7 + $0x4] ss:$16 sps:$4 sm:$0xff]   ;;  %v5833_v1 = vld [vmem:[#allocation7] ss:$16 sps:$4 sm:$0xff]   ;;  %v278_v13 = vld [vmem:[%s6923_s17 + $0x8] sm:$0xff]  ;;  %s10798_s20 = scalar_lea.vmem [#allocation10], %s5360_s9 }
  0x6e   : > { %6673 = vsyncadd (%p11299_p8), [#allocation8], 4294950912  ;;  %875 = vmatprep.subr.bf16.mxu1 %v5831_v0  ;;  %v5834_v2 = vld [vmem:[#allocation7 + $0x24] ss:$16 sps:$4 sm:$0xff]   ;;  %v5836_v3 = vld [vmem:[#allocation7 + $0x20] ss:$16 sps:$4 sm:$0xff]  }
  0x6f   : > { %876 = vmatpush1.bf16.msra.mxu1 %v5833_v1  ;;  %v5837_v4 = vld [vmem:[#allocation7 + $0x44] ss:$16 sps:$4 sm:$0xff]   ;;  %v5839_v5 = vld [vmem:[#allocation7 + $0x40] ss:$16 sps:$4 sm:$0xff]   ;;  %v280_v14 = vld [vmem:[%s6923_s17 + $0x18] sm:$0xff]  ;;  %s5501_s14 = sshll.u32 %s6760_s24, 14 }
  0x70   : > { %877 = vmatprep.subr.bf16.mxu1 %v5834_v2  ;;  %v5840_v6 = vld [vmem:[#allocation7 + $0x64] ss:$16 sps:$4 sm:$0xff]   ;;  %v5842_v7 = vld [vmem:[#allocation7 + $0x60] ss:$16 sps:$4 sm:$0xff]   ;;  %v6935_v15 = vpack.c.bf16 %v280_v14, %v278_v13  ;;  %v5881_v37 = vld [vmem:[#allocation7 + $0xc] ss:$16 sps:$4 sm:$0xff]   ;;  %s11170_s12 = scalar_lea.hbm %s11226_s6, %s5501_s14 }
  0x71   : > { %v5843_v8 = vld [vmem:[#allocation7 + $0x84] ss:$16 sps:$4 sm:$0xff]   ;;  %v5845_v9 = vld [vmem:[#allocation7 + $0x80] ss:$16 sps:$4 sm:$0xff]   ;;  %v282_v38 = vld [vmem:[%s6923_s17 + $0x28] sm:$0xff]  ;;  %s5258_s7 = sshll.u32 %s10798_s20, 4  ;;  %s11172_s7 = int_to_ptr.vmem [resolvable:$true] %s5258_s7 }
  0x72   : > { %v5846_v10 = vld [vmem:[#allocation7 + $0xa4] ss:$16 sps:$4 sm:$0xff]   ;;  %v5848_v11 = vld [vmem:[#allocation7 + $0xa0] ss:$16 sps:$4 sm:$0xff]   ;;  %907 = vmatprep.mubr.bf16.mxu1 %v6935_v15  ;;  %v284_v39 = vld [vmem:[%s6923_s17 + $0x38] sm:$0xff]  ;;  %s5244_s24 = scalar_lea.sflag [#allocation6], %s6917_s29 }
  0x73   : > { %878 = vmatpush1.bf16.msra.mxu1 %v5836_v3  ;;  %v5849_v12 = vld [vmem:[#allocation7 + $0xc4] ss:$16 sps:$4 sm:$0xff]   ;;  %v5851_v16 = vld [vmem:[#allocation7 + $0xc0] ss:$16 sps:$4 sm:$0xff]   ;;  %v5879_v40 = vld [vmem:[#allocation7 + $0x8] ss:$16 sps:$4 sm:$0xff]   ;;  %v6944_v43 = vpack.c.bf16 %v284_v39, %v282_v38 }
  0x74   : > { %879 = vmatprep.subr.bf16.mxu1 %v5837_v4  ;;  %v5852_v17 = vld [vmem:[#allocation7 + $0xe4] ss:$16 sps:$4 sm:$0xff]   ;;  %v5854_v18 = vld [vmem:[#allocation7 + $0xe0] ss:$16 sps:$4 sm:$0xff]   ;;  %v5884_v42 = vld [vmem:[#allocation7 + $0x2c] ss:$16 sps:$4 sm:$0xff]  }
  0x75   : > { %v5855_v19 = vld [vmem:[#allocation7 + $0x104] ss:$16 sps:$4 sm:$0xff]   ;;  %v5857_v20 = vld [vmem:[#allocation7 + $0x100] ss:$16 sps:$4 sm:$0xff]   ;;  %v286_v46 = vld [vmem:[%s6923_s17 + $0x48] sm:$0xff]  ;;  %s6622_s9 = scalar_lea.vmem %s11172_s7, 16384 }
  0x76   : > { %v5858_v21 = vld [vmem:[#allocation7 + $0x124] ss:$16 sps:$4 sm:$0xff]   ;;  %v5860_v22 = vld [vmem:[#allocation7 + $0x120] ss:$16 sps:$4 sm:$0xff]   ;;  %v288_v47 = vld [vmem:[%s6923_s17 + $0x58] sm:$0xff]  ;;  %p6623_p11 = scmp.ne.s32.totalorder %s11172_s7, %s6622_s9  ;;  %p11660_p0 = scmp.ne.s32.totalorder %s11295_s11, 0 }
  0x77   : > { %880 = vmatpush1.bf16.msra.mxu1 %v5839_v5  ;;  %v5861_v23 = vld [vmem:[#allocation7 + $0x144] ss:$16 sps:$4 sm:$0xff]   ;;  %v5863_v24 = vld [vmem:[#allocation7 + $0x140] ss:$16 sps:$4 sm:$0xff]   ;;  %v5882_v48 = vld [vmem:[#allocation7 + $0x28] ss:$16 sps:$4 sm:$0xff]   ;;  %v6954_v53 = vpack.c.bf16 %v288_v47, %v286_v46 }
  0x78   : > { %881 = vmatprep.subr.bf16.mxu1 %v5840_v6  ;;  %v5864_v25 = vld [vmem:[#allocation7 + $0x164] ss:$16 sps:$4 sm:$0xff]   ;;  %v5866_v26 = vld [vmem:[#allocation7 + $0x160] ss:$16 sps:$4 sm:$0xff]   ;;  %v5887_v49 = vld [vmem:[#allocation7 + $0x4c] ss:$16 sps:$4 sm:$0xff]   ;;  %p6624_p2 = pnand %p6623_p11, %p11660_p0 }
  0x79   : > { %v5867_v27 = vld [vmem:[#allocation7 + $0x184] ss:$16 sps:$4 sm:$0xff]   ;;  %v5869_v28 = vld [vmem:[#allocation7 + $0x180] ss:$16 sps:$4 sm:$0xff]   ;;  %v5885_v50 = vld [vmem:[#allocation7 + $0x48] ss:$16 sps:$4 sm:$0xff]  }
  0x7a   : > { %v5870_v29 = vld [vmem:[#allocation7 + $0x1a4] ss:$16 sps:$4 sm:$0xff]   ;;  %v5872_v30 = vld [vmem:[#allocation7 + $0x1a0] ss:$16 sps:$4 sm:$0xff]   ;;  %v5890_v52 = vld [vmem:[#allocation7 + $0x6c] ss:$16 sps:$4 sm:$0xff]   ;;  %p6625_p3 = pneg %p6624_p2 }
  0x7b   : > { %882 = vmatpush1.bf16.msra.mxu1 %v5842_v7  ;;  %v5873_v31 = vld [vmem:[#allocation7 + $0x1c4] ss:$16 sps:$4 sm:$0xff]   ;;  %v5875_v32 = vld [vmem:[#allocation7 + $0x1c0] ss:$16 sps:$4 sm:$0xff]   ;;  %v290_v56 = vld [vmem:[%s6923_s17 + $0x68] sm:$0xff]  ;;  %s6701_s13 = smov [#allocation10]  }
  0x7c   : > { %883 = vmatprep.subr.bf16.mxu1 %v5843_v8  ;;  %v5876_v33 = vld [vmem:[#allocation7 + $0x1e4] ss:$16 sps:$4 sm:$0xff]   ;;  %v5878_v34 = vld [vmem:[#allocation7 + $0x1e0] ss:$16 sps:$4 sm:$0xff]   ;;  %v292_v57 = vld [vmem:[%s6923_s17 + $0x78] sm:$0xff] }
  0x7d   : > { %v277_v35 = vld [vmem:[%s6923_s17] sm:$0xff]  ;;  %v279_v36 = vld [vmem:[%s6923_s17 + $0x10] sm:$0xff]  ;;  %v5888_v58 = vld [vmem:[#allocation7 + $0x68] ss:$16 sps:$4 sm:$0xff]   ;;  %v6964_v63 = vpack.c.bf16 %v292_v57, %v290_v56 }
  0x7e   : > { %v6942_v41 = vpack.c.bf16 %v279_v36, %v277_v35  ;;  %v281_v44 = vld [vmem:[%s6923_s17 + $0x20] sm:$0xff]  ;;  %v283_v45 = vld [vmem:[%s6923_s17 + $0x30] sm:$0xff]  ;;  %v5893_v59 = vld [vmem:[#allocation7 + $0x8c] ss:$16 sps:$4 sm:$0xff]  }
  0x7f   : > { %884 = vmatpush1.bf16.msra.mxu1 %v5845_v9  ;;  %v6952_v51 = vpack.c.bf16 %v283_v45, %v281_v44  ;;  %v285_v54 = vld [vmem:[%s6923_s17 + $0x40] sm:$0xff]  ;;  %v287_v55 = vld [vmem:[%s6923_s17 + $0x50] sm:$0xff]  ;;  %v5891_v60 = vld [vmem:[#allocation7 + $0x88] ss:$16 sps:$4 sm:$0xff]  }
  0x80   : > { %885 = vmatprep.subr.bf16.mxu1 %v5846_v10  ;;  %v6962_v61 = vpack.c.bf16 %v287_v55, %v285_v54  ;;  %v5896_v62 = vld [vmem:[#allocation7 + $0xac] ss:$16 sps:$4 sm:$0xff]   ;;  %v289_v0 = vld [vmem:[%s6923_s17 + $0x60] sm:$0xff]  ;;  %v291_v1 = vld [vmem:[%s6923_s17 + $0x70] sm:$0xff] }
  0x81   : > { %v294_v2 = vld [vmem:[%s6923_s17 + $0x88] sm:$0xff]  ;;  %v296_v3 = vld [vmem:[%s6923_s17 + $0x98] sm:$0xff]  ;;  %v6972_v6 = vpack.c.bf16 %v291_v1, %v289_v0  ;;  %v293_v10 = vld [vmem:[%s6923_s17 + $0x80] sm:$0xff] }
  0x82   : > { %v5894_v4 = vld [vmem:[#allocation7 + $0xa8] ss:$16 sps:$4 sm:$0xff]   ;;  %v5899_v5 = vld [vmem:[#allocation7 + $0xcc] ss:$16 sps:$4 sm:$0xff]   ;;  %v6974_v7 = vpack.c.bf16 %v296_v3, %v294_v2  ;;  %v305_v38 = vld [vmem:[%s6923_s17 + $0xe0] sm:$0xff] }
  0x83   : > { %886 = vmatpush1.bf16.msra.mxu1 %v5848_v11  ;;  %v5897_v8 = vld [vmem:[#allocation7 + $0xc8] ss:$16 sps:$4 sm:$0xff]   ;;  %v5902_v9 = vld [vmem:[#allocation7 + $0xec] ss:$16 sps:$4 sm:$0xff]   ;;  %v295_v11 = vld [vmem:[%s6923_s17 + $0x90] sm:$0xff] }
  0x84   : > { %887 = vmatprep.subr.bf16.mxu1 %v5849_v12  ;;  %v5900_v12 = vld [vmem:[#allocation7 + $0xe8] ss:$16 sps:$4 sm:$0xff]   ;;  %v307_v39 = vld [vmem:[%s6923_s17 + $0xf0] sm:$0xff]  ;;  %v5921_v54 = vld [vmem:[#allocation9 + $0x24] ss:$8 sps:$4 sm:$0xff]  }
  0x85   : > { %v298_v13 = vld [vmem:[%s6923_s17 + $0xa8] sm:$0xff]  ;;  %v300_v14 = vld [vmem:[%s6923_s17 + $0xb8] sm:$0xff]  ;;  %v7012_v45 = vpack.c.bf16 %v307_v39, %v305_v38  ;;  %v313_v1 = vld [vmem:[%s6923_s17 + $0x120] sm:$0xff] }
  0x86   : > { %v5912_v36 = vld [vmem:[#allocation7 + $0x168] ss:$16 sps:$4 sm:$0xff]   ;;  %v5927_v0 = vld [vmem:[#allocation9 + $0x34] ss:$8 sps:$4 sm:$0xff]   ;;  %v5945_v39 = vld [vmem:[#allocation9 + $0x84] ss:$8 sps:$4 sm:$0xff]  }
  0x87   : > { %888 = vmatpush1.bf16.msra.mxu1 %v5851_v16  ;;  %v5905_v16 = vld [vmem:[#allocation7 + $0x10c] ss:$16 sps:$4 sm:$0xff]   ;;  %11304 = vst [vmem:[#allocation18_spill] sm:$0xff] %v7012_v45  ;;  %v5917_v47 = vld [vmem:[#allocation9] ss:$8 sps:$4 sm:$0xff]   ;;  %v315_v2 = vld [vmem:[%s6923_s17 + $0x130] sm:$0xff] }
  0x88   : > { %889 = vmatprep.subr.bf16.mxu1 %v5852_v17  ;;  %v6982_v17 = vpack.c.bf16 %v295_v11, %v293_v10  ;;  %v312_v44 = vld [vmem:[%s6923_s17 + $0x118] sm:$0xff]  ;;  %v314_v55 = vld [vmem:[%s6923_s17 + $0x128] sm:$0xff] }
  0x89   : > { %v316_v56 = vld [vmem:[%s6923_s17 + $0x138] sm:$0xff]  ;;  %v5932_v11 = vld [vmem:[#allocation9 + $0x40] ss:$8 sps:$4 sm:$0xff]  }
  0x8a   : > { %v5929_v3 = vld [vmem:[#allocation9 + $0x30] ss:$8 sps:$4 sm:$0xff]  }
  0x8b   : > { %890 = vmatpush1.bf16.msra.mxu1 %v5854_v18  ;;  %v6984_v18 = vpack.c.bf16 %v300_v14, %v298_v13  ;;  %v5935_v13 = vld [vmem:[#allocation9 + $0x50] ss:$8 sps:$4 sm:$0xff]   ;;  %v317_v14 = vld [vmem:[%s6923_s17 + $0x140] sm:$0xff] }
  0x8c   : > { %891 = vmatprep.subr.bf16.mxu1 %v5855_v19  ;;  %v5903_v19 = vld [vmem:[#allocation7 + $0x108] ss:$16 sps:$4 sm:$0xff]  }
  0x8f   : > { %892 = vmatpush1.bf16.msra.mxu1 %v5857_v20  ;;  %v5908_v20 = vld [vmem:[#allocation7 + $0x12c] ss:$16 sps:$4 sm:$0xff]  }
  0x90   : > { %893 = vmatprep.subr.bf16.mxu1 %v5858_v21  ;;  %v297_v21 = vld [vmem:[%s6923_s17 + $0xa0] sm:$0xff] }
  0x93   : > { %894 = vmatpush1.bf16.msra.mxu1 %v5860_v22  ;;  %v299_v22 = vld [vmem:[%s6923_s17 + $0xb0] sm:$0xff] }
  0x94   : > { %895 = vmatprep.subr.bf16.mxu1 %v5861_v23  ;;  %v5906_v23 = vld [vmem:[#allocation7 + $0x128] ss:$16 sps:$4 sm:$0xff]  }
  0x97   : > { %896 = vmatpush1.bf16.msra.mxu1 %v5863_v24  ;;  %v302_v24 = vld [vmem:[%s6923_s17 + $0xc8] sm:$0xff] }
  0x98   : > { %897 = vmatprep.subr.bf16.mxu1 %v5864_v25  ;;  %v304_v25 = vld [vmem:[%s6923_s17 + $0xd8] sm:$0xff] }
  0x9b   : > { %898 = vmatpush1.bf16.msra.mxu1 %v5866_v26  ;;  %v5911_v26 = vld [vmem:[#allocation7 + $0x14c] ss:$16 sps:$4 sm:$0xff]  }
  0x9c   : > { %899 = vmatprep.subr.bf16.mxu1 %v5867_v27  ;;  %v6992_v27 = vpack.c.bf16 %v299_v22, %v297_v21  ;;  %v324_v21 = vld [vmem:[%s6923_s17 + $0x178] sm:$0xff] }
  0x9e   : > { %11300 = vst [vmem:[#allocation14_spill] sm:$0xff] %v6992_v27 }
  0x9f   : > { %900 = vmatpush1.bf16.msra.mxu1 %v5869_v28  ;;  %v6994_v28 = vpack.c.bf16 %v304_v25, %v302_v24  ;;  %v5941_v24 = vld [vmem:[#allocation9 + $0x60] ss:$8 sps:$4 sm:$0xff]  }
  0xa0   : > { %901 = vmatprep.subr.bf16.mxu1 %v5870_v29  ;;  %v5909_v29 = vld [vmem:[#allocation7 + $0x148] ss:$16 sps:$4 sm:$0xff]  }
  0xa1   : > { %11301 = vst [vmem:[#allocation15_spill] sm:$0xff] %v6994_v28  ;;  %v5938_v25 = vld [vmem:[#allocation7 + $0x1a8] ss:$16 sps:$4 sm:$0xff]  }
  0xa3   : > { %902 = vmatpush1.bf16.msra.mxu1 %v5872_v30  ;;  %v301_v30 = vld [vmem:[%s6923_s17 + $0xc0] sm:$0xff] }
  0xa4   : > { %903 = vmatprep.subr.bf16.mxu1 %v5873_v31  ;;  %v303_v31 = vld [vmem:[%s6923_s17 + $0xd0] sm:$0xff] }
  0xa7   : > { %904 = vmatpush1.bf16.msra.mxu1 %v5875_v32  ;;  %v306_v32 = vld [vmem:[%s6923_s17 + $0xe8] sm:$0xff] }
  0xa8   : > { %905 = vmatprep.subr.bf16.mxu1 %v5876_v33  ;;  %v308_v33 = vld [vmem:[%s6923_s17 + $0xf8] sm:$0xff] }
  0xa9   : > { %v7004_v35 = vpack.c.bf16 %v308_v33, %v306_v32  ;;  %v326_v32 = vld [vmem:[%s6923_s17 + $0x188] sm:$0xff]  ;;  %v328_v33 = vld [vmem:[%s6923_s17 + $0x198] sm:$0xff] }
  0xaa   : > { %v7054_v38 = vpack.c.bf16 %v328_v33, %v326_v32  ;;  %v5972_v32 = vld [vmem:[#allocation9 + $0xf4] ss:$8 sps:$4 sm:$0xff]   ;;  %v342_v33 = vld [vmem:[%s6923_s17 + $0x208] sm:$0xff] }
  0xab   : > { %906 = vmatpush1.bf16.msra.mxu1 %v5878_v34  ;;  %v7002_v34 = vpack.c.bf16 %v303_v31, %v301_v30  ;;  %11303 = vst [vmem:[#allocation17_spill] sm:$0xff] %v7004_v35  ;;  %v323_v30 = vld [vmem:[%s6923_s17 + $0x170] sm:$0xff] }
  0xac   : > { %1228 = vmatprep.subr.bf16.mxu1 %v5881_v37  ;;  %v5914_v37 = vld [vmem:[#allocation7 + $0x16c] ss:$16 sps:$4 sm:$0xff]   ;;  %11313 = vst [vmem:[#allocation27_spill] sm:$0xff] %v7054_v38 }
  0xad   : > { %11302 = vst [vmem:[#allocation16_spill] sm:$0xff] %v7002_v34  ;;  %v5942_v31 = vld [vmem:[#allocation9 + $0x74] ss:$8 sps:$4 sm:$0xff]  }
  0xae   : > { %908 = vmatmul.mubr.bf16.vlgmr.msra.gmra.mrb[0].mxu1 %v6942_v41 }
  0xaf   : > { %1229 = vmatpush1.bf16.msra.mxu1 %v5879_v40  ;;  %917 = vmatprep.mubr.bf16.mxu1 %v6944_v43  ;;  %v5915_v40 = vld [vmem:[#allocation9 + $0x4] ss:$8 sps:$4 sm:$0xff]  }
  0xb0   : > { %1230 = vmatprep.subr.bf16.mxu1 %v5884_v42  ;;  %v310_v42 = vld [vmem:[%s6923_s17 + $0x108] sm:$0xff]  ;;  %4409 = vmatprep.subr.bf16.mxu0 %v5915_v40 }
  0xb1   : > { %v7014_v46 = vpack.c.bf16 %v312_v44, %v310_v42  ;;  %4410 = vmatpush1.bf16.msra.mxu0 %v5917_v47  ;;  %v5947_v40 = vld [vmem:[#allocation9 + $0x80] ss:$8 sps:$4 sm:$0xff]   ;;  %v327_v44 = vld [vmem:[%s6923_s17 + $0x190] sm:$0xff] }
  0xb2   : > { %v325_v42 = vld [vmem:[%s6923_s17 + $0x180] sm:$0xff]  ;;  %v5948_v47 = vld [vmem:[#allocation9 + $0x94] ss:$8 sps:$4 sm:$0xff]  }
  0xb3   : > { %1231 = vmatpush1.bf16.msra.mxu1 %v5882_v48  ;;  %11305 = vst [vmem:[#allocation19_spill] sm:$0xff] %v7014_v46  ;;  %v5918_v48 = vld [vmem:[#allocation9 + $0x14] ss:$8 sps:$4 sm:$0xff]  }
  0xb4   : > { %1232 = vmatprep.subr.bf16.mxu1 %v5887_v49  ;;  %v5920_v49 = vld [vmem:[#allocation9 + $0x10] ss:$8 sps:$4 sm:$0xff]   ;;  %4411 = vmatprep.subr.bf16.mxu0 %v5918_v48  ;;  %v330_v48 = vld [vmem:[%s6923_s17 + $0x1a8] sm:$0xff] }
  0xb5   : > { %4412 = vmatpush1.bf16.msra.mxu0 %v5920_v49  ;;  %v332_v49 = vld [vmem:[%s6923_s17 + $0x1b8] sm:$0xff] }
  0xb6   : > { %918 = vmatmul.mubr.bf16.gmra.mrb[4].mxu1 %v6952_v51  ;;  %4413 = vmatprep.subr.bf16.mxu0 %v5921_v54  ;;  %v7064_v54 = vpack.c.bf16 %v332_v49, %v330_v48  ;;  %v346_v48 = vld [vmem:[%s6923_s17 + $0x228] sm:$0xff]  ;;  %v348_v49 = vld [vmem:[%s6923_s17 + $0x238] sm:$0xff] }
  0xb7   : > { %927 = vmatprep.mubr.bf16.mxu1 %v6954_v53  ;;  %1233 = vmatpush1.bf16.msra.mxu1 %v5885_v50  ;;  %v309_v50 = vld [vmem:[%s6923_s17 + $0x100] sm:$0xff] }
  0xb8   : > { %1234 = vmatprep.subr.bf16.mxu1 %v5890_v52  ;;  %v311_v52 = vld [vmem:[%s6923_s17 + $0x110] sm:$0xff]  ;;  %11315 = vst [vmem:[#allocation29_spill] sm:$0xff] %v7064_v54 }
  0xb9   : > { %v7022_v57 = vpack.c.bf16 %v311_v52, %v309_v50  ;;  %v5950_v50 = vld [vmem:[#allocation9 + $0x90] ss:$8 sps:$4 sm:$0xff]   ;;  %v7062_v52 = vpack.c.bf16 %v327_v44, %v325_v42  ;;  %v341_v44 = vld [vmem:[%s6923_s17 + $0x200] sm:$0xff] }
  0xbb   : > { %1235 = vmatpush1.bf16.msra.mxu1 %v5888_v58  ;;  %11306 = vst [vmem:[#allocation20_spill] sm:$0xff] %v7022_v57  ;;  %v7024_v58 = vpack.c.bf16 %v316_v56, %v314_v55  ;;  %11314 = vst [vmem:[#allocation28_spill] sm:$0xff] %v7062_v52  ;;  %v5951_v55 = vld [vmem:[#allocation9 + $0xa4] ss:$8 sps:$4 sm:$0xff]   ;;  %v5956_v56 = vld [vmem:[#allocation9 + $0xa0] ss:$8 sps:$4 sm:$0xff]  }
  0xbc   : > { %1236 = vmatprep.subr.bf16.mxu1 %v5893_v59  ;;  %v5926_v59 = vld [vmem:[#allocation9 + $0x20] ss:$8 sps:$4 sm:$0xff]  }
  0xbd   : > { %11307 = vst [vmem:[#allocation21_spill] sm:$0xff] %v7024_v58  ;;  %4414 = vmatpush1.bf16.msra.mxu0 %v5926_v59  ;;  %v329_v59 = vld [vmem:[%s6923_s17 + $0x1a0] sm:$0xff] }
  0xbe   : > { %928 = vmatmul.mubr.bf16.gmra.mrb[8].mxu1 %v6962_v61  ;;  %4415 = vmatprep.subr.bf16.mxu0 %v5927_v0  ;;  %v334_v0 = vld [vmem:[%s6923_s17 + $0x1c8] sm:$0xff] }
  0xbf   : > { %937 = vmatprep.mubr.bf16.mxu1 %v6964_v63  ;;  %1237 = vmatpush1.bf16.msra.mxu1 %v5891_v60  ;;  %v5923_v60 = vld [vmem:[#allocation7 + $0x188] ss:$16 sps:$4 sm:$0xff]  }
  0xc0   : > { %1238 = vmatprep.subr.bf16.mxu1 %v5896_v62  ;;  %v5925_v62 = vld [vmem:[#allocation7 + $0x18c] ss:$16 sps:$4 sm:$0xff]  }
  0xc1   : > { %4416 = vmatpush1.bf16.msra.mxu0 %v5929_v3 }
  0xc3   : > { %1239 = vmatpush1.bf16.msra.mxu1 %v5894_v4  ;;  %v318_v4 = vld [vmem:[%s6923_s17 + $0x148] sm:$0xff] }
  0xc4   : > { %1240 = vmatprep.subr.bf16.mxu1 %v5899_v5  ;;  %v320_v5 = vld [vmem:[%s6923_s17 + $0x158] sm:$0xff] }
  0xc5   : > { %v7034_v10 = vpack.c.bf16 %v320_v5, %v318_v4  ;;  %v5960_v5 = vld [vmem:[#allocation9 + $0xc4] ss:$8 sps:$4 sm:$0xff]  }
  0xc6   : > { %938 = vmatmul.mubr.bf16.gmra.mrb[12].mxu1 %v6972_v6 }
  0xc7   : > { %947 = vmatprep.mubr.bf16.mxu1 %v6974_v7  ;;  %1241 = vmatpush1.bf16.msra.mxu1 %v5897_v8  ;;  %v5930_v8 = vld [vmem:[#allocation9 + $0x44] ss:$8 sps:$4 sm:$0xff]   ;;  %11309 = vst [vmem:[#allocation23_spill] sm:$0xff] %v7034_v10 }
  0xc8   : > { %1242 = vmatprep.subr.bf16.mxu1 %v5902_v9  ;;  %v7032_v9 = vpack.c.bf16 %v315_v2, %v313_v1  ;;  %4417 = vmatprep.subr.bf16.mxu0 %v5930_v8  ;;  %v336_v1 = vld [vmem:[%s6923_s17 + $0x1d8] sm:$0xff]  ;;  %v5962_v8 = vld [vmem:[#allocation9 + $0xc0] ss:$8 sps:$4 sm:$0xff]  }
  0xc9   : > { %4418 = vmatpush1.bf16.msra.mxu0 %v5932_v11  ;;  %v5959_v2 = vld [vmem:[#allocation9 + $0xb0] ss:$8 sps:$4 sm:$0xff]   ;;  %v7074_v4 = vpack.c.bf16 %v336_v1, %v334_v0  ;;  %v333_v11 = vld [vmem:[%s6923_s17 + $0x1c0] sm:$0xff]  ;;  %v350_v0 = vld [vmem:[%s6923_s17 + $0x248] sm:$0xff] }
  0xca   : > { %11308 = vst [vmem:[#allocation22_spill] sm:$0xff] %v7032_v9  ;;  %v352_v1 = vld [vmem:[%s6923_s17 + $0x258] sm:$0xff] }
  0xcb   : > { %1243 = vmatpush1.bf16.msra.mxu1 %v5900_v12  ;;  %v5933_v12 = vld [vmem:[#allocation9 + $0x54] ss:$8 sps:$4 sm:$0xff]   ;;  %11317 = vst [vmem:[#allocation31_spill] sm:$0xff] %v7074_v4 }
  0xcc   : > { %1244 = vmatprep.subr.bf16.mxu1 %v5905_v16  ;;  %v319_v16 = vld [vmem:[%s6923_s17 + $0x150] sm:$0xff]  ;;  %4419 = vmatprep.subr.bf16.mxu0 %v5933_v12 }
  0xcd   : > { %v7042_v22 = vpack.c.bf16 %v319_v16, %v317_v14  ;;  %4420 = vmatpush1.bf16.msra.mxu0 %v5935_v13  ;;  %v335_v12 = vld [vmem:[%s6923_s17 + $0x1d0] sm:$0xff]  ;;  %v338_v14 = vld [vmem:[%s6923_s17 + $0x1e8] sm:$0xff]  ;;  %v340_v16 = vld [vmem:[%s6923_s17 + $0x1f8] sm:$0xff] }
  0xce   : > { %948 = vmatmul.mubr.bf16.gmra.mrb[16].mxu1 %v6982_v17  ;;  %v5963_v13 = vld [vmem:[#allocation9 + $0xd4] ss:$8 sps:$4 sm:$0xff]  }
  0xcf   : > { %957 = vmatprep.mubr.bf16.mxu1 %v6984_v18  ;;  %1245 = vmatpush1.bf16.msra.mxu1 %v5903_v19  ;;  %v5936_v19 = vld [vmem:[#allocation9 + $0x64] ss:$8 sps:$4 sm:$0xff]   ;;  %11310 = vst [vmem:[#allocation24_spill] sm:$0xff] %v7042_v22 }
  0xd0   : > { %1246 = vmatprep.subr.bf16.mxu1 %v5908_v20  ;;  %v322_v20 = vld [vmem:[%s6923_s17 + $0x168] sm:$0xff]  ;;  %4421 = vmatprep.subr.bf16.mxu0 %v5936_v19  ;;  %v5965_v19 = vld [vmem:[#allocation9 + $0xd0] ss:$8 sps:$4 sm:$0xff]  }
  0xd1   : > { %4422 = vmatpush1.bf16.msra.mxu0 %v5941_v24  ;;  %v7082_v24 = vpack.c.bf16 %v335_v12, %v333_v11  ;;  %v349_v11 = vld [vmem:[%s6923_s17 + $0x240] sm:$0xff]  ;;  %v351_v12 = vld [vmem:[%s6923_s17 + $0x250] sm:$0xff] }
  0xd2   : > { %4423 = vmatprep.subr.bf16.mxu0 %v5942_v31  ;;  %v339_v31 = vld [vmem:[%s6923_s17 + $0x1f0] sm:$0xff] }
  0xd3   : > { %1247 = vmatpush1.bf16.msra.mxu1 %v5906_v23  ;;  %v7044_v23 = vpack.c.bf16 %v324_v21, %v322_v20  ;;  %v5953_v20 = vld [vmem:[#allocation7 + $0x1c8] ss:$16 sps:$4 sm:$0xff]   ;;  %v5955_v21 = vld [vmem:[#allocation7 + $0x1cc] ss:$16 sps:$4 sm:$0xff]   ;;  %11318 = vst [vmem:[#allocation32_spill] sm:$0xff] %v7082_v24 }
  0xd4   : > { %1248 = vmatprep.subr.bf16.mxu1 %v5911_v26  ;;  %v5940_v26 = vld [vmem:[#allocation7 + $0x1ac] ss:$16 sps:$4 sm:$0xff]  }
  0xd5   : > { %11311 = vst [vmem:[#allocation25_spill] sm:$0xff] %v7044_v23 }
  0xd6   : > { %958 = vmatmul.mubr.bf16.gmra.mrb[20].mxu1 %v6992_v27 }
  0xd7   : > { %967 = vmatprep.mubr.bf16.mxu1 %v6994_v28  ;;  %1249 = vmatpush1.bf16.msra.mxu1 %v5909_v29  ;;  %v321_v29 = vld [vmem:[%s6923_s17 + $0x160] sm:$0xff] }
  0xd8   : > { %1250 = vmatprep.subr.bf16.mxu1 %v5914_v37  ;;  %v7052_v37 = vpack.c.bf16 %v323_v30, %v321_v29  ;;  %v5971_v29 = vld [vmem:[#allocation9 + $0xe0] ss:$8 sps:$4 sm:$0xff]  }
  0xd9   : > { %v337_v30 = vld [vmem:[%s6923_s17 + $0x1e0] sm:$0xff] }
  0xda   : > { %11312 = vst [vmem:[#allocation26_spill] sm:$0xff] %v7052_v37 }
  0xdb   : > { %1251 = vmatpush1.bf16.msra.mxu1 %v5912_v36  ;;  %v5944_v36 = vld [vmem:[#allocation9 + $0x70] ss:$8 sps:$4 sm:$0xff]  }
  0xdc   : > { %1252 = vmatprep.subr.bf16.mxu1 %v5925_v62  ;;  %4424 = vmatpush1.bf16.msra.mxu0 %v5944_v36  ;;  %v5957_v62 = vld [vmem:[#allocation9 + $0xb4] ss:$8 sps:$4 sm:$0xff]  }
  0xdd   : > { %4425 = vmatprep.subr.bf16.mxu0 %v5945_v39  ;;  %v344_v36 = vld [vmem:[%s6923_s17 + $0x218] sm:$0xff] }
  0xde   : > { %968 = vmatmul.mubr.bf16.gmra.mrb[24].mxu1 %v7002_v34  ;;  %v5974_v39 = vld [vmem:[#allocation9 + $0xf0] ss:$8 sps:$4 sm:$0xff]   ;;  %v7094_v42 = vpack.c.bf16 %v344_v36, %v342_v33  ;;  %v362_v36 = vld [vmem:[%s6923_s17 + $0x2a8] sm:$0xff] }
  0xdf   : > { %977 = vmatprep.mubr.bf16.mxu1 %v7004_v35  ;;  %1253 = vmatpush1.bf16.msra.mxu1 %v5923_v60  ;;  %v331_v60 = vld [vmem:[%s6923_s17 + $0x1b0] sm:$0xff] }
  0xe0   : > { %1254 = vmatprep.subr.bf16.mxu1 %v5940_v26  ;;  %4426 = vmatpush1.bf16.msra.mxu0 %v5947_v40  ;;  %v7072_v3 = vpack.c.bf16 %v331_v60, %v329_v59  ;;  %v5966_v26 = vld [vmem:[#allocation9 + $0xe4] ss:$8 sps:$4 sm:$0xff]   ;;  %v7092_v40 = vpack.c.bf16 %v339_v31, %v337_v30  ;;  %11321 = vst [vmem:[#allocation35_spill] sm:$0xff] %v7094_v42  ;;  %v359_v33 = vld [vmem:[%s6923_s17 + $0x290] sm:$0xff] }
  0xe1   : > { %4427 = vmatprep.subr.bf16.mxu0 %v5948_v47  ;;  %v343_v47 = vld [vmem:[%s6923_s17 + $0x210] sm:$0xff]  ;;  %v7104_v59 = vpack.c.bf16 %v348_v49, %v346_v48  ;;  %v345_v60 = vld [vmem:[%s6923_s17 + $0x220] sm:$0xff] }
  0xe2   : > { %11316 = vst [vmem:[#allocation30_spill] sm:$0xff] %v7072_v3  ;;  %11320 = vst [vmem:[#allocation34_spill] sm:$0xff] %v7092_v40  ;;  %v361_v48 = vld [vmem:[%s6923_s17 + $0x2a0] sm:$0xff]  ;;  %v363_v49 = vld [vmem:[%s6923_s17 + $0x2b0] sm:$0xff] }
  0xe3   : > { %1255 = vmatpush1.bf16.msra.mxu1 %v5938_v25  ;;  %v7084_v25 = vpack.c.bf16 %v340_v16, %v338_v14  ;;  %11323 = vst [vmem:[#allocation37_spill] sm:$0xff] %v7104_v59  ;;  %v356_v14 = vld [vmem:[%s6923_s17 + $0x278] sm:$0xff]  ;;  %v7122_v16 = vpack.c.bf16 %v351_v12, %v349_v11 }
  0xe4   : > { %4428 = vmatpush1.bf16.msra.mxu0 %v5950_v50  ;;  %1256 = vmatprep.subr.bf16.mxu1 %v5955_v21  ;;  %v5970_v50 = vld [vmem:[#allocation7 + $0x1ec] ss:$16 sps:$4 sm:$0xff]   ;;  %v355_v21 = vld [vmem:[%s6923_s17 + $0x270] sm:$0xff] }
  0xe5   : > { %4429 = vmatprep.subr.bf16.mxu0 %v5951_v55  ;;  %11319 = vst [vmem:[#allocation33_spill] sm:$0xff] %v7084_v25  ;;  %v5968_v55 = vld [vmem:[#allocation7 + $0x1e8] ss:$16 sps:$4 sm:$0xff]   ;;  %11326 = vst [vmem:[#allocation40_spill] sm:$0xff] %v7122_v16 }
  0xe6   : > { %978 = vmatmul.mubr.bf16.gmra.mrb[28].mxu1 %v7012_v45  ;;  %v372_v11 = vld [vmem:[%s6923_s17 + $0x2f8] sm:$0xff] }
  0xe7   : > { %987 = vmatprep.mubr.bf16.mxu1 %v7014_v46  ;;  %1257 = vmatpush1.bf16.msra.mxu1 %v5953_v20  ;;  %v353_v20 = vld [vmem:[%s6923_s17 + $0x260] sm:$0xff] }
  0xe8   : > { %4430 = vmatpush1.bf16.msra.mxu0 %v5956_v56  ;;  %v7102_v56 = vpack.c.bf16 %v343_v47, %v341_v44  ;;  %1258 = vmatprep.subr.bf16.mxu1 %v5970_v50  ;;  %v7132_v30 = vpack.c.bf16 %v355_v21, %v353_v20  ;;  %v366_v50 = vld [vmem:[%s6923_s17 + $0x2c8] sm:$0xff]  ;;  %v371_v20 = vld [vmem:[%s6923_s17 + $0x2f0] sm:$0xff] }
  0xe9   : > { %4431 = vmatprep.subr.bf16.mxu0 %v5957_v62  ;;  %v347_v62 = vld [vmem:[%s6923_s17 + $0x230] sm:$0xff]  ;;  %v374_v21 = vld [vmem:[%s6923_s17 + $0x308] sm:$0xff] }
  0xea   : > { %11322 = vst [vmem:[#allocation36_spill] sm:$0xff] %v7102_v56  ;;  %11328 = vst [vmem:[#allocation42_spill] sm:$0xff] %v7132_v30 }
  0xeb   : > { %1259 = vmatpush1.bf16.msra.mxu1 %v5968_v55  ;;  %v368_v55 = vld [vmem:[%s6923_s17 + $0x2d8] sm:$0xff] }
  0xec   : > { %4432 = vmatpush1.bf16.msra.mxu0 %v5959_v2  ;;  %v5977_v2 = vld [vmem:[#allocation9 + $0x104] ss:$8 sps:$4 sm:$0xff]  }
  0xed   : > { %4433 = vmatprep.subr.bf16.mxu0 %v5960_v5  ;;  %v7112_v5 = vpack.c.bf16 %v347_v62, %v345_v60  ;;  %v7152_v60 = vpack.c.bf16 %v363_v49, %v361_v48  ;;  %v7154_v62 = vpack.c.bf16 %v368_v55, %v366_v50  ;;  %v380_v48 = vld [vmem:[%s6923_s17 + $0x338] sm:$0xff]  ;;  %v377_v55 = vld [vmem:[%s6923_s17 + $0x320] sm:$0xff] }
  0xee   : > { %988 = vmatmul.mubr.bf16.gmra.mrb[32].mxu1 %v7022_v57 }
  0xef   : > { %997 = vmatprep.mubr.bf16.mxu1 %v7024_v58  ;;  %11324 = vst [vmem:[#allocation38_spill] sm:$0xff] %v7112_v5  ;;  %11332 = vst [vmem:[#allocation46_spill] sm:$0xff] %v7152_v60 }
  0xf0   : > { %4434 = vmatpush1.bf16.msra.mxu0 %v5962_v8  ;;  %v7114_v8 = vpack.c.bf16 %v352_v1, %v350_v0  ;;  %11333 = vst [vmem:[#allocation47_spill] sm:$0xff] %v7154_v62  ;;  %v365_v0 = vld [vmem:[%s6923_s17 + $0x2c0] sm:$0xff]  ;;  %v367_v1 = vld [vmem:[%s6923_s17 + $0x2d0] sm:$0xff] }
  0xf1   : > { %4435 = vmatprep.subr.bf16.mxu0 %v5963_v13  ;;  %v354_v13 = vld [vmem:[%s6923_s17 + $0x268] sm:$0xff]  ;;  %v7162_v12 = vpack.c.bf16 %v367_v1, %v365_v0  ;;  %v379_v0 = vld [vmem:[%s6923_s17 + $0x330] sm:$0xff] }
  0xf2   : > { %11325 = vst [vmem:[#allocation39_spill] sm:$0xff] %v7114_v8  ;;  %v382_v1 = vld [vmem:[%s6923_s17 + $0x348] sm:$0xff] }
  0xf3   : > { %11334 = vst [vmem:[#allocation48_spill] sm:$0xff] %v7162_v12 }
  0xf4   : > { %4436 = vmatpush1.bf16.msra.mxu0 %v5965_v19  ;;  %v7124_v19 = vpack.c.bf16 %v356_v14, %v354_v13  ;;  %v369_v14 = vld [vmem:[%s6923_s17 + $0x2e0] sm:$0xff] }
  0xf5   : > { %4437 = vmatprep.subr.bf16.mxu0 %v5966_v26  ;;  %v358_v26 = vld [vmem:[%s6923_s17 + $0x288] sm:$0xff] }
  0xf6   : > { %998 = vmatmul.mubr.bf16.gmra.mrb[36].mxu1 %v7032_v9  ;;  %11327 = vst [vmem:[#allocation41_spill] sm:$0xff] %v7124_v19 }
  0xf7   : > { %1007 = vmatprep.mubr.bf16.mxu1 %v7034_v10 }
  0xf8   : > { %4438 = vmatpush1.bf16.msra.mxu0 %v5971_v29  ;;  %v360_v29 = vld [vmem:[%s6923_s17 + $0x298] sm:$0xff] }
  0xf9   : > { %4439 = vmatprep.subr.bf16.mxu0 %v5972_v32  ;;  %v7134_v31 = vpack.c.bf16 %v360_v29, %v358_v26  ;;  %v357_v32 = vld [vmem:[%s6923_s17 + $0x280] sm:$0xff]  ;;  %v376_v26 = vld [vmem:[%s6923_s17 + $0x318] sm:$0xff]  ;;  %v7172_v29 = vpack.c.bf16 %v371_v20, %v369_v14  ;;  %v535_v14 = vlaneseq }
  0xfa   : > { %v7142_v44 = vpack.c.bf16 %v359_v33, %v357_v32  ;;  %v7174_v32 = vpack.c.bf16 %v376_v26, %v374_v21  ;;  %v373_v33 = vld [vmem:[%s6923_s17 + $0x300] sm:$0xff] }
  0xfb   : > { %11329 = vst [vmem:[#allocation43_spill] sm:$0xff] %v7134_v31  ;;  %11336 = vst [vmem:[#allocation50_spill] sm:$0xff] %v7172_v29  ;;  %v7197_v21 = vshrl.u32 %v535_v14, 7  ;;  %v381_v26 = vld [vmem:[%s6923_s17 + $0x340] sm:$0xff] }
  0xfc   : > { %4440 = vmatpush1.bf16.msra.mxu0 %v5974_v39  ;;  %v364_v39 = vld [vmem:[%s6923_s17 + $0x2b8] sm:$0xff]  ;;  %11330 = vst [vmem:[#allocation44_spill] sm:$0xff] %v7142_v44  ;;  %11337 = vst [vmem:[#allocation51_spill] sm:$0xff] %v7174_v32 }
  0xfd   : > { %4762 = vmatprep.subr.bf16.mxu0 %v5977_v2  ;;  %v7144_v47 = vpack.c.bf16 %v364_v39, %v362_v36  ;;  %v370_v2 = vld [vmem:[%s6923_s17 + $0x2e8] sm:$0xff]  ;;  %v375_v36 = vld [vmem:[%s6923_s17 + $0x310] sm:$0xff]  ;;  %11342 = vst [vmem:[#allocation56_spill] sm:$0xff] %v7197_v21 }
  0xfe   : > { %1008 = vmatmul.mubr.bf16.gmra.mrb[40].mxu1 %v7042_v22  ;;  %v7164_v13 = vpack.c.bf16 %v372_v11, %v370_v2  ;;  %v378_v39 = vld [vmem:[%s6923_s17 + $0x328] sm:$0xff]  ;;  %v7182_v49 = vpack.c.bf16 %v375_v36, %v373_v33  ;;  %v384_v2 = vld [vmem:[%s6923_s17 + $0x358] sm:$0xff]  ;;  %v7192_v11 = vpack.c.bf16 %v379_v0, %v377_v55  ;;  %v383_v33 = vld [vmem:[%s6923_s17 + $0x350] sm:$0xff]  ;;  %v11235_v55 = vsub.s32 0, %v7197_v21 }
  0xff   : > { %1017 = vmatprep.mubr.bf16.mxu1 %v7044_v23  ;;  %11331 = vst [vmem:[#allocation45_spill] sm:$0xff] %v7144_v47  ;;  %v7184_v50 = vpack.c.bf16 %v380_v48, %v378_v39  ;;  %v7194_v20 = vpack.c.bf16 %v384_v2, %v382_v1  ;;  %v386_v36 = vld [vmem:[%s6923_s17 + $0x368] sm:$0xff]  ;;  %v388_v39 = vld [vmem:[%s6923_s17 + $0x378] sm:$0xff]  ;;  %v7204_v48 = vpack.c.bf16 %v383_v33, %v381_v26  ;;  %v533_v0 = vld [vmem:[%s11223_s3] sm:$0xf]  ;;  %v11236_v1 = vsub.s32 1, %v7197_v21 }
 0x100   : > { %11335 = vst [vmem:[#allocation49_spill] sm:$0xff] %v7164_v13  ;;  %11338 = vst [vmem:[#allocation52_spill] sm:$0xff] %v7182_v49  ;;  %v7211_v2 = vpack.c.bf16 %v388_v39, %v386_v36  ;;  %v7216_v14 = vrot.slane %v533_v0, %v11235_v55  ;;  %v385_v33 = vld [vmem:[%s6923_s17 + $0x360] sm:$0xff] }
 0x101   : > { %11339 = vst [vmem:[#allocation53_spill] sm:$0xff] %v7184_v50  ;;  %11340 = vst [vmem:[#allocation54_spill] sm:$0xff] %v7192_v11  ;;  %v7220_v26 = vrot.slane %v533_v0, %v11236_v1 }
 0x102   : > { %11341 = vst [vmem:[#allocation55_spill] sm:$0xff] %v7194_v20  ;;  %11343 = vst [vmem:[#allocation57_spill] sm:$0xff] %v7204_v48 }
 0x103   : > { %11344 = vst [vmem:[#allocation58_spill] sm:$0xff] %v7211_v2 }
 0x106   : > { %1018 = vmatmul.mubr.bf16.gmra.mrb[44].mxu1 %v7052_v37 }
 0x107   : > { %1027 = vmatprep.mubr.bf16.mxu1 %v7054_v38 }
 0x10e   : > { %1028 = vmatmul.mubr.bf16.gmra.mrb[48].mxu1 %v7062_v52 }
 0x10f   : > { %1037 = vmatprep.mubr.bf16.mxu1 %v7064_v54 }
 0x116   : > { %1038 = vmatmul.mubr.bf16.gmra.mrb[52].mxu1 %v7072_v3 }
 0x117   : > { %1047 = vmatprep.mubr.bf16.mxu1 %v7074_v4 }
 0x11e   : > { %1048 = vmatmul.mubr.bf16.gmra.mrb[56].mxu1 %v7082_v24 }
 0x11f   : > { %1057 = vmatprep.mubr.bf16.mxu1 %v7084_v25 }
 0x126   : > { %1058 = vmatmul.mubr.bf16.gmra.mrb[60].mxu1 %v7092_v40 }
 0x127   : > { %1067 = vmatprep.mubr.bf16.mxu1 %v7094_v42 }
 0x12e   : > { %1068 = vmatmul.mubr.bf16.gmra.mrb[64].mxu1 %v7102_v56 }
 0x12f   : > { %1077 = vmatprep.mubr.bf16.mxu1 %v7104_v59 }
 0x136   : > { %1078 = vmatmul.mubr.bf16.gmra.mrb[68].mxu1 %v7112_v5  ;;  %v399_v5 = vld [vmem:[%s6923_s17 + $0x3d0] sm:$0xff] }
 0x137   : > { %1087 = vmatprep.mubr.bf16.mxu1 %v7114_v8  ;;  %v400_v8 = vld [vmem:[%s6923_s17 + $0x3d8] sm:$0xff] }
 0x13e   : > { %1088 = vmatmul.mubr.bf16.gmra.mrb[72].mxu1 %v7122_v16 }
 0x13f   : > { %1097 = vmatprep.mubr.bf16.mxu1 %v7124_v19 }
 0x146   : > { %1098 = vmatmul.mubr.bf16.gmra.mrb[76].mxu1 %v7132_v30 }
 0x147   : > { %1107 = vmatprep.mubr.bf16.mxu1 %v7134_v31 }
 0x14e   : > { %1108 = vmatmul.mubr.bf16.gmra.mrb[80].mxu1 %v7142_v44 }
 0x14f   : > { %1117 = vmatprep.mubr.bf16.mxu1 %v7144_v47 }
 0x156   : > { %1118 = vmatmul.mubr.bf16.gmra.mrb[84].mxu1 %v7152_v60 }
 0x157   : > { %1127 = vmatprep.mubr.bf16.mxu1 %v7154_v62  ;;  %v396_v62 = vld [vmem:[%s6923_s17 + $0x3b8] sm:$0xff] }
 0x15e   : > { %1128 = vmatmul.mubr.bf16.gmra.mrb[88].mxu1 %v7162_v12  ;;  %v394_v12 = vld [vmem:[%s6923_s17 + $0x3a8] sm:$0xff] }
 0x15f   : > { %1137 = vmatprep.mubr.bf16.mxu1 %v7164_v13  ;;  %v7270_v30 = vpack.c.bf16 %v396_v62, %v394_v12  ;;  %v393_v12 = vld [vmem:[%s6923_s17 + $0x3a0] sm:$0xff] }
 0x161   : > { %11348 = vst [vmem:[#allocation62_spill] sm:$0xff] %v7270_v30 }
 0x166   : > { %1138 = vmatmul.mubr.bf16.gmra.mrb[92].mxu1 %v7172_v29  ;;  %v391_v29 = vld [vmem:[%s6923_s17 + $0x390] sm:$0xff] }
 0x167   : > { %1147 = vmatprep.mubr.bf16.mxu1 %v7174_v32  ;;  %v389_v32 = vld [vmem:[%s6923_s17 + $0x380] sm:$0xff] }
 0x168   : > { %v7265_v31 = vpack.c.bf16 %v391_v29, %v389_v32 }
 0x16a   : > { %11347 = vst [vmem:[#allocation61_spill] sm:$0xff] %v7265_v31 }
 0x16e   : > { %1148 = vmatmul.mubr.bf16.gmra.mrb[96].mxu1 %v7182_v49 }
 0x16f   : > { %1157 = vmatprep.mubr.bf16.mxu1 %v7184_v50  ;;  %v392_v50 = vld [vmem:[%s6923_s17 + $0x398] sm:$0xff] }
 0x176   : > { %1158 = vmatmul.mubr.bf16.gmra.mrb[100].mxu1 %v7192_v11  ;;  %v390_v11 = vld [vmem:[%s6923_s17 + $0x388] sm:$0xff] }
 0x177   : > { %1167 = vmatprep.mubr.bf16.mxu1 %v7194_v20  ;;  %v387_v20 = vld [vmem:[%s6923_s17 + $0x370] sm:$0xff]  ;;  %v7235_v1 = vpack.c.bf16 %v392_v50, %v390_v11 }
 0x179   : > { %11346 = vst [vmem:[#allocation60_spill] sm:$0xff] %v7235_v1 }
 0x17e   : > { %1168 = vmatmul.mubr.bf16.gmra.mrb[104].mxu1 %v7204_v48  ;;  %v7230_v48 = vpack.c.bf16 %v387_v20, %v385_v33 }
 0x17f   : > { %1177 = vmatprep.mubr.bf16.mxu1 %v7211_v2 }
 0x180   : > { %11345 = vst [vmem:[#allocation59_spill] sm:$0xff] %v7230_v48 }
 0x181   : > { %v909_v49 = vpop.f32.mrb[0].mxu1 }
 0x182   : > { %v7228_v36 = vadd.f32 %v909_v49, %v7216_v14  ;;  %v911_v39 = vpop.f32.mrb[1].mxu1 }
 0x183   : > { %v7233_v55 = vadd.f32 %v911_v39, %v7220_v26  ;;  %v913_v0 = vpop.f32.mrb[2].mxu1 }
 0x184   : > { %v1581_v21 = vmul.f32 %v7228_v36, %v7228_v36  ;;  %v7240_v2 = vadd.f32 %v913_v0, %v7216_v14  ;;  %v915_v49 = vpop.f32.mrb[3].mxu1 }
 0x185   : > { %v1582_v20 = vmul.f32 %v7233_v55, %v7233_v55  ;;  %v7245_v33 = vadd.f32 %v915_v49, %v7220_v26 }
 0x186   : > { %v1837_v39 = vmul.f32 %v1581_v21, %v7228_v36  ;;  %v1585_v50 = vmul.f32 %v7240_v2, %v7240_v2  ;;  %1178 = vmatmul.mubr.bf16.gmra.mrb[108].mxu1 %v7230_v48 }
 0x187   : > { %v1838_v11 = vmul.f32 %v1582_v20, %v7233_v55  ;;  %v1586_v0 = vmul.f32 %v7245_v33, %v7245_v33  ;;  %1187 = vmatprep.mubr.bf16.mxu1 %v7235_v1 }
 0x188   : > { %v2093_v13 = vmul.f32 0.044715, %v1837_v39  ;;  %v1841_v49 = vmul.f32 %v1585_v50, %v7240_v2 }
 0x189   : > { %v2094_v21 = vmul.f32 0.044715, %v1838_v11  ;;  %v1842_v60 = vmul.f32 %v1586_v0, %v7245_v33  ;;  %v919_v47 = vpop.f32.mrb[4].mxu1 }
 0x18a   : > { %v2349_v48 = vadd.f32 %v2093_v13, %v7228_v36  ;;  %v2097_v44 = vmul.f32 0.044715, %v1841_v49  ;;  %v7263_v20 = vadd.f32 %v919_v47, %v7216_v14  ;;  %v921_v1 = vpop.f32.mrb[5].mxu1 }
 0x18b   : > { %v2098_v39 = vmul.f32 0.044715, %v1842_v60  ;;  %v7268_v50 = vadd.f32 %v921_v1, %v7220_v26  ;;  %v923_v11 = vpop.f32.mrb[6].mxu1  ;;  %v2350_v0 = vadd.f32 %v2094_v21, %v7233_v55  ;;  %v398_v1 = vld [vmem:[%s6923_s17 + $0x3c8] sm:$0xff] }
 0x18c   : > { %v2605_v13 = vmul.f32 0.7978846, %v2349_v48  ;;  %v2353_v49 = vadd.f32 %v2097_v44, %v7240_v2  ;;  %v1589_v47 = vmul.f32 %v7263_v20, %v7263_v20  ;;  %v7277_v29 = vadd.f32 %v923_v11, %v7216_v14  ;;  %v925_v60 = vpop.f32.mrb[7].mxu1  ;;  %v395_v48 = vld [vmem:[%s6923_s17 + $0x3b0] sm:$0xff] }
 0x18d   : > { %v1590_v32 = vmul.f32 %v7268_v50, %v7268_v50  ;;  %v7282_v62 = vadd.f32 %v925_v60, %v7220_v26  ;;  %v2354_v44 = vadd.f32 %v2098_v39, %v7245_v33  ;;  %v2606_v21 = vmul.f32 0.7978846, %v2350_v0  ;;  %v397_v60 = vld [vmem:[%s6923_s17 + $0x3c0] sm:$0xff]  ;;  %v402_v0 = vld [vmem:[%s6923_s17 + $0x3e8] sm:$0xff] }
 0x18e   : > { %6023 = vtanh.f32 %v2605_v13  ;;  %v2609_v19 = vmul.f32 0.7978846, %v2353_v49  ;;  %v1845_v11 = vmul.f32 %v1589_v47, %v7263_v20  ;;  %v1593_v16 = vmul.f32 %v7277_v29, %v7277_v29  ;;  %1188 = vmatmul.mubr.bf16.gmra.mrb[112].mxu1 %v7265_v31  ;;  %v404_v13 = vld [vmem:[%s6923_s17 + $0x3f8] sm:$0xff] }
 0x18f   : > { %v1846_v59 = vmul.f32 %v1590_v32, %v7268_v50  ;;  %v1594_v56 = vmul.f32 %v7282_v62, %v7282_v62  ;;  %1197 = vmatprep.mubr.bf16.mxu1 %v7270_v30  ;;  %v2610_v39 = vmul.f32 0.7978846, %v2354_v44  ;;  %6025 = vtanh.f32 %v2606_v21 }
 0x190   : > { %6027 = vtanh.f32 %v2609_v19  ;;  %v2101_v49 = vmul.f32 0.044715, %v1845_v11  ;;  %v1849_v47 = vmul.f32 %v1593_v16, %v7277_v29  ;;  %v7302_v42 = vpack.c.bf16 %v395_v48, %v393_v12 }
 0x191   : > { %v2102_v31 = vmul.f32 0.044715, %v1846_v59  ;;  %v1850_v40 = vmul.f32 %v1594_v56, %v7282_v62  ;;  %v929_v25 = vpop.f32.mrb[8].mxu1  ;;  %v7305_v32 = vpack.c.bf16 %v400_v8, %v398_v1  ;;  %v7307_v24 = vpack.c.bf16 %v399_v5, %v397_v60 }
 0x192   : > { %11349 = vst [vmem:[#allocation63_spill] sm:$0xff] %v7302_v42  ;;  %v2357_v30 = vadd.f32 %v2101_v49, %v7263_v20  ;;  %v2105_v44 = vmul.f32 0.044715, %v1849_v47  ;;  %v7311_v21 = vadd.f32 %v929_v25, %v7216_v14  ;;  %v931_v19 = vpop.f32.mrb[9].mxu1  ;;  %v7313_v11 = vpack.c.bf16 %v404_v13, %v402_v0 }
 0x193   : > { %11350 = vst [vmem:[#allocation64_spill] sm:$0xff] %v7305_v32  ;;  %11351 = vst [vmem:[#allocation65_spill] sm:$0xff] %v7307_v24  ;;  %v2358_v59 = vadd.f32 %v2102_v31, %v7268_v50  ;;  %v2106_v16 = vmul.f32 0.044715, %v1850_v40  ;;  %v7317_v56 = vadd.f32 %v931_v19, %v7220_v26  ;;  %v933_v8 = vpop.f32.mrb[10].mxu1  ;;  %6029 = vtanh.f32 %v2610_v39  ;;  %v401_v39 = vld [vmem:[%s6923_s17 + $0x3e0] sm:$0xff] }
 0x194   : > { %11352 = vst [vmem:[#allocation66_spill] sm:$0xff] %v7313_v11  ;;  %v2613_v5 = vmul.f32 0.7978846, %v2357_v30  ;;  %v2361_v12 = vadd.f32 %v2105_v44, %v7277_v29  ;;  %v1597_v25 = vmul.f32 %v7311_v21, %v7311_v21  ;;  %v7323_v48 = vadd.f32 %v933_v8, %v7216_v14  ;;  %v935_v1 = vpop.f32.mrb[11].mxu1  ;;  %v403_v30 = vld [vmem:[%s6923_s17 + $0x3f0] sm:$0xff]  ;;  %s6626_s17 = sshll.u32 %s6701_s13, 4  ;;  %s6627_s17 = int_to_ptr.vmem [resolvable:$false] %s6626_s17 }
 0x195   : > { %v2614_v60 = vmul.f32 0.7978846, %v2358_v59  ;;  %v2362_v0 = vadd.f32 %v2106_v16, %v7282_v62  ;;  %v1598_v40 = vmul.f32 %v7317_v56, %v7317_v56  ;;  %v7329_v31 = vadd.f32 %v935_v1, %v7220_v26  ;;  %s6628_s26 = scalar_lea.vmem %s6627_s17, 32768  ;;  %p6629_p5 = scmp.lt.s32.totalorder %s11172_s7, %s6627_s17 }
 0x196   : > { %6031 = vtanh.f32 %v2613_v5  ;;  %v2617_v13 = vmul.f32 0.7978846, %v2361_v12  ;;  %v1853_v49 = vmul.f32 %v1597_v25, %v7311_v21  ;;  %v1601_v47 = vmul.f32 %v7323_v48, %v7323_v48  ;;  %1198 = vmatmul.mubr.bf16.gmra.mrb[116].mxu1 %v7302_v42  ;;  %p6630_p9 = scmp.lt.s32.totalorder %s6628_s26, %s6622_s9 }
 0x197   : > { %6033 = vtanh.f32 %v2614_v60  ;;  %v2618_v44 = vmul.f32 0.7978846, %v2362_v0  ;;  %v1854_v19 = vmul.f32 %v1598_v40, %v7317_v56  ;;  %v1602_v59 = vmul.f32 %v7329_v31, %v7329_v31  ;;  %1207 = vmatprep.mubr.bf16.mxu1 %v7305_v32 }
 0x198   : > { %v6024_v16 = vpop.eup %6023  ;;  %6035 = vtanh.f32 %v2617_v13  ;;  %v2109_v8 = vmul.f32 0.044715, %v1853_v49  ;;  %v1857_v5 = vmul.f32 %v1601_v47, %v7323_v48  ;;  %v7342_v12 = vpack.c.bf16 %v403_v30, %v401_v39  ;;  %p6631_p12 = por %p6630_p9, %p6629_p5 }
 0x199   : > { %v6026_v25 = vpop.eup %6025  ;;  %6037 = vtanh.f32 %v2618_v44  ;;  %v2110_v1 = vmul.f32 0.044715, %v1854_v19  ;;  %v1858_v60 = vmul.f32 %v1602_v59, %v7329_v31  ;;  %v939_v0 = vpop.f32.mrb[12].mxu1  ;;  %v7345_v42 = vadd.f32 1.0, %v6024_v16 }
 0x19a   : > { %11353 = vst [vmem:[#allocation67_spill] sm:$0xff] %v7342_v12  ;;  %v6028_v40 = vpop.eup %6027  ;;  %v2365_v4 = vadd.f32 %v2109_v8, %v7311_v21  ;;  %v2113_v3 = vmul.f32 0.044715, %v1857_v5  ;;  %v7349_v32 = vadd.f32 %v939_v0, %v7216_v14  ;;  %v941_v13 = vpop.f32.mrb[13].mxu1  ;;  %v3118_v49 = vadd.f32 1.0, %v6026_v25  ;;  %p6632_p1 = pnand %p6631_p12, %p6625_p3 }
 0x19b   : > { %v2366_v39 = vadd.f32 %v2110_v1, %v7317_v56  ;;  %v2114_v30 = vmul.f32 0.044715, %v1858_v60  ;;  %v7353_v47 = vadd.f32 %v941_v13, %v7220_v26  ;;  %v943_v44 = vpop.f32.mrb[14].mxu1  ;;  %v7355_v19 = vadd.f32 1.0, %v6028_v40 }
 0x19c   : > { %v2621_v59 = vmul.f32 0.7978846, %v2365_v4  ;;  %v2369_v16 = vadd.f32 %v2113_v3, %v7323_v48  ;;  %v1605_v8 = vmul.f32 %v7349_v32, %v7349_v32  ;;  %v7361_v5 = vadd.f32 %v943_v44, %v7216_v14  ;;  %v945_v0 = vpop.f32.mrb[15].mxu1 }
 0x19d   : > { %v6030_v25 = vpop.eup %6029  ;;  %v2622_v54 = vmul.f32 0.7978846, %v2366_v39  ;;  %v2370_v1 = vadd.f32 %v2114_v30, %v7329_v31  ;;  %v1606_v60 = vmul.f32 %v7353_v47, %v7353_v47  ;;  %v7367_v40 = vadd.f32 %v945_v0, %v7220_v26 }
 0x19e   : > { %6039 = vtanh.f32 %v2621_v59  ;;  %v2625_v4 = vmul.f32 0.7978846, %v2369_v16  ;;  %v1861_v3 = vmul.f32 %v1605_v8, %v7349_v32  ;;  %v1609_v13 = vmul.f32 %v7361_v5, %v7361_v5  ;;  %1208 = vmatmul.mubr.bf16.gmra.mrb[120].mxu1 %v7307_v24 }
 0x19f   : > { %6041 = vtanh.f32 %v2622_v54  ;;  %v2626_v44 = vmul.f32 0.7978846, %v2370_v1  ;;  %v1862_v39 = vmul.f32 %v1606_v60, %v7353_v47  ;;  %v1610_v30 = vmul.f32 %v7367_v40, %v7367_v40  ;;  %1217 = vmatprep.mubr.bf16.mxu1 %v7313_v11 }
 0x1a0   : > { %v7377_v0 = vpop.eup %6031  ;;  %6043 = vtanh.f32 %v2625_v4  ;;  %v2117_v59 = vmul.f32 0.044715, %v1861_v3  ;;  %v1865_v16 = vmul.f32 %v1609_v13, %v7361_v5  ;;  %v3122_v8 = vadd.f32 1.0, %v6030_v25 }
 0x1a1   : > { %v7380_v52 = vpop.eup %6033  ;;  %6045 = vtanh.f32 %v2626_v44  ;;  %v2118_v24 = vmul.f32 0.044715, %v1862_v39  ;;  %v1866_v54 = vmul.f32 %v1610_v30, %v7367_v40  ;;  %v949_v1 = vpop.f32.mrb[16].mxu1  ;;  %v3374_v60 = vmul.f32 0.5, %v3118_v49 }
 0x1a2   : > { %v7383_v38 = vpop.eup %6035  ;;  %v2373_v37 = vadd.f32 %v2117_v59, %v7349_v32  ;;  %v2121_v11 = vmul.f32 0.044715, %v1865_v16  ;;  %v7387_v23 = vadd.f32 %v949_v1, %v7216_v14  ;;  %v951_v4 = vpop.f32.mrb[17].mxu1  ;;  %v3378_v3 = vmul.f32 0.5, %v3122_v8 }
 0x1a3   : > { %v7389_v13 = vpop.eup %6037  ;;  %v2374_v25 = vadd.f32 %v2118_v24, %v7353_v47  ;;  %v2122_v44 = vmul.f32 0.044715, %v1866_v54  ;;  %v7393_v39 = vadd.f32 %v951_v4, %v7220_v26  ;;  %v953_v30 = vpop.f32.mrb[18].mxu1  ;;  %v3630_v49 = vmul.f32 %v3374_v60, %v7233_v55 }
 0x1a4   : > { %v2629_v22 = vmul.f32 0.7978846, %v2373_v37  ;;  %v2377_v59 = vadd.f32 %v2121_v11, %v7361_v5  ;;  %v1613_v16 = vmul.f32 %v7387_v23, %v7387_v23  ;;  %v7400_v1 = vadd.f32 %v953_v30, %v7216_v14  ;;  %v955_v8 = vpop.f32.mrb[19].mxu1 }
 0x1a5   : > { %v2630_v10 = vmul.f32 0.7978846, %v2374_v25  ;;  %v2378_v24 = vadd.f32 %v2122_v44, %v7367_v40  ;;  %v1614_v54 = vmul.f32 %v7393_v39, %v7393_v39  ;;  %v7406_v4 = vadd.f32 %v955_v8, %v7220_v26 }
 0x1a6   : > { %6047 = vtanh.f32 %v2629_v22  ;;  %v2633_v37 = vmul.f32 0.7978846, %v2377_v59  ;;  %v1869_v55 = vmul.f32 %v1613_v16, %v7387_v23  ;;  %v1617_v11 = vmul.f32 %v7400_v1, %v7400_v1  ;;  %1218 = vmatmul.mubr.bf16.gmra.mrb[124].mxu1 %v7342_v12 }
 0x1a7   : > { %6049 = vtanh.f32 %v2630_v10  ;;  %v2634_v60 = vmul.f32 0.7978846, %v2378_v24  ;;  %v1870_v25 = vmul.f32 %v1614_v54, %v7393_v39  ;;  %v1618_v44 = vmul.f32 %v7406_v4, %v7406_v4  ;;  %1260 = vmatprep.mubr.bf16.mxu1 %v6935_v15 }
 0x1a8   : > { %v7416_v30 = vpop.eup %6039  ;;  %6051 = vtanh.f32 %v2633_v37  ;;  %v2125_v22 = vmul.f32 0.044715, %v1869_v55  ;;  %v1873_v59 = vmul.f32 %v1617_v11, %v7400_v1  ;;  %v3634_v16 = vmul.f32 %v3378_v3, %v7245_v33 }
 0x1a9   : > { %v7420_v8 = vpop.eup %6041  ;;  %6053 = vtanh.f32 %v2634_v60  ;;  %v2126_v10 = vmul.f32 0.044715, %v1870_v25  ;;  %v1874_v24 = vmul.f32 %v1618_v44, %v7406_v4  ;;  %v3373_v54 = vmul.f32 0.5, %v7345_v42  ;;  %v959_v12 = vpop.f32.mrb[20].mxu1 }
 0x1aa   : > { %v7424_v9 = vpop.eup %6043  ;;  %v2381_v15 = vadd.f32 %v2125_v22, %v7387_v23  ;;  %v2129_v58 = vmul.f32 0.044715, %v1873_v59  ;;  %v3950_v37 = vpack.c.bf16 %v3634_v16, %v3630_v49  ;;  %v3377_v55 = vmul.f32 0.5, %v7355_v19  ;;  %v961_v11 = vpop.f32.mrb[21].mxu1 }
 0x1ab   : > { %v7428_v57 = vpop.eup %6045  ;;  %v2382_v33 = vadd.f32 %v2126_v10, %v7393_v39  ;;  %v2130_v3 = vmul.f32 0.044715, %v1874_v24  ;;  %v3629_v60 = vmul.f32 %v3373_v54, %v7228_v36  ;;  %v7433_v25 = vadd.f32 %v959_v12, %v7216_v14  ;;  %v963_v42 = vpop.f32.mrb[22].mxu1  ;;  %v5975_v10 = vld [vmem:[#allocation9 + $0x100] ss:$8 sps:$4 sm:$0xff]  }
 0x1ac   : > { %v2637_v44 = vmul.f32 0.7978846, %v2381_v15  ;;  %v2385_v46 = vadd.f32 %v2129_v58, %v7400_v1  ;;  %4441 = vmatprep.mubr.bf16.mxu0 %v3950_v37  ;;  %v3633_v49 = vmul.f32 %v3377_v55, %v7240_v2  ;;  %v7438_v19 = vadd.f32 %v961_v11, %v7220_v26  ;;  %v965_v22 = vpop.f32.mrb[23].mxu1  ;;  %v5980_v54 = vld [vmem:[#allocation9 + $0x114] ss:$8 sps:$4 sm:$0xff]  }
 0x1ad   : > { %v2638_v59 = vmul.f32 0.7978846, %v2382_v33  ;;  %v2386_v16 = vadd.f32 %v2130_v3, %v7406_v4  ;;  %v1621_v36 = vmul.f32 %v7433_v25, %v7433_v25  ;;  %v7444_v12 = vadd.f32 %v963_v42, %v7216_v14  ;;  %v5978_v3 = vld [vmem:[#allocation9 + $0x110] ss:$8 sps:$4 sm:$0xff]  }
 0x1ae   : > { %6055 = vtanh.f32 %v2637_v44  ;;  %v2641_v24 = vmul.f32 0.7978846, %v2385_v46  ;;  %v3949_v58 = vpack.c.bf16 %v3633_v49, %v3629_v60  ;;  %v1622_v2 = vmul.f32 %v7438_v19, %v7438_v19  ;;  %1261 = vmatmul.mubr.bf16.vlgmr.msra.gmra.mrb[128].mxu1 %v6942_v41 }
 0x1af   : > { %6057 = vtanh.f32 %v2638_v59  ;;  %v2642_v15 = vmul.f32 0.7978846, %v2386_v16  ;;  %v1877_v37 = vmul.f32 %v1621_v36, %v7433_v25  ;;  %v1625_v55 = vmul.f32 %v7444_v12, %v7444_v12  ;;  %1270 = vmatprep.mubr.bf16.mxu1 %v6944_v43  ;;  %v5983_v59 = vld [vmem:[#allocation9 + $0x124] ss:$8 sps:$4 sm:$0xff]  }
 0x1b0   : > { %v7453_v11 = vpop.eup %6047  ;;  %6059 = vtanh.f32 %v2641_v24  ;;  %4442 = vmatmul.mubr.bf16.vlgmr.msra.gmra.mrb[0].mxu0 %v3949_v58  ;;  %v1878_v46 = vmul.f32 %v1622_v2, %v7438_v19  ;;  %v7457_v33 = vadd.f32 %v965_v22, %v7220_v26  ;;  %v3126_v41 = vadd.f32 1.0, %v7380_v52 }
 0x1b1   : > { %v7460_v60 = vpop.eup %6049  ;;  %6061 = vtanh.f32 %v2642_v15  ;;  %4763 = vmatpush1.bf16.msra.mxu0 %v5975_v10  ;;  %v2133_v42 = vmul.f32 0.044715, %v1877_v37  ;;  %v1881_v44 = vmul.f32 %v1625_v55, %v7444_v12  ;;  %v3130_v43 = vadd.f32 1.0, %v7389_v13  ;;  %v969_v49 = vpop.f32.mrb[24].mxu1 }
 0x1b2   : > { %v7464_v16 = vpop.eup %6051  ;;  %v2134_v36 = vmul.f32 0.044715, %v1878_v46  ;;  %v1626_v22 = vmul.f32 %v7457_v33, %v7457_v33  ;;  %v3382_v24 = vmul.f32 0.5, %v3126_v41  ;;  %v3125_v52 = vadd.f32 1.0, %v7377_v0  ;;  %v971_v58 = vpop.f32.mrb[25].mxu1  ;;  %4764 = vmatprep.subr.bf16.mxu0 %v5980_v54 }
 0x1b3   : > { %v7469_v2 = vpop.eup %6053  ;;  %v2389_v10 = vadd.f32 %v2133_v42, %v7433_v25  ;;  %v2137_v15 = vmul.f32 0.044715, %v1881_v44  ;;  %v3386_v37 = vmul.f32 0.5, %v3130_v43  ;;  %v3129_v13 = vadd.f32 1.0, %v7383_v38  ;;  %v973_v55 = vpop.f32.mrb[26].mxu1 }
 0x1b4   : > { %v2390_v45 = vadd.f32 %v2134_v36, %v7438_v19  ;;  %v1882_v46 = vmul.f32 %v1626_v22, %v7457_v33  ;;  %v3638_v35 = vmul.f32 %v3382_v24, %v7268_v50  ;;  %v3381_v41 = vmul.f32 0.5, %v3125_v52  ;;  %v975_v34 = vpop.f32.mrb[27].mxu1  ;;  %v5981_v42 = vld [vmem:[#allocation9 + $0x120] ss:$8 sps:$4 sm:$0xff]   ;;  %v5986_v50 = vld [vmem:[#allocation9 + $0x134] ss:$8 sps:$4 sm:$0xff]  }
 0x1b5   : > { %v2645_v0 = vmul.f32 0.7978846, %v2389_v10  ;;  %v2393_v54 = vadd.f32 %v2137_v15, %v7444_v12  ;;  %v3642_v28 = vmul.f32 %v3386_v37, %v7282_v62  ;;  %v3385_v27 = vmul.f32 0.5, %v3129_v13  ;;  %4765 = vmatpush1.bf16.msra.mxu0 %v5978_v3  ;;  %v5989_v13 = vld [vmem:[#allocation9 + $0x144] ss:$8 sps:$4 sm:$0xff]  }
 0x1b6   : > { %v2646_v44 = vmul.f32 0.7978846, %v2390_v45  ;;  %v2138_v43 = vmul.f32 0.044715, %v1882_v46  ;;  %v3637_v38 = vmul.f32 %v3381_v41, %v7263_v20  ;;  %v7480_v36 = vadd.f32 %v969_v49, %v7216_v14  ;;  %1271 = vmatmul.mubr.bf16.gmra.mrb[132].mxu1 %v6952_v51  ;;  %4766 = vmatprep.subr.bf16.mxu0 %v5983_v59 }
 0x1b7   : > { %6063 = vtanh.f32 %v2645_v0  ;;  %v2649_v22 = vmul.f32 0.7978846, %v2393_v54  ;;  %v3954_v24 = vpack.c.bf16 %v3642_v28, %v3638_v35  ;;  %v3641_v52 = vmul.f32 %v3385_v27, %v7277_v29  ;;  %1280 = vmatprep.mubr.bf16.mxu1 %v6954_v53  ;;  %v5984_v29 = vld [vmem:[#allocation9 + $0x130] ss:$8 sps:$4 sm:$0xff]  }
 0x1b8   : > { %v7485_v62 = vpop.eup %6055  ;;  %6065 = vtanh.f32 %v2646_v44  ;;  %v2394_v45 = vadd.f32 %v2138_v43, %v7457_v33  ;;  %v1629_v20 = vmul.f32 %v7480_v36, %v7480_v36  ;;  %v7491_v3 = vadd.f32 %v971_v58, %v7220_v26 }
 0x1b9   : > { %v7493_v51 = vpop.eup %6057  ;;  %6067 = vtanh.f32 %v2649_v22  ;;  %4451 = vmatprep.mubr.bf16.mxu0 %v3954_v24  ;;  %v3953_v28 = vpack.c.bf16 %v3641_v52, %v3637_v38  ;;  %v7496_v27 = vadd.f32 %v973_v55, %v7216_v14  ;;  %v7499_v53 = vadd.f32 %v975_v34, %v7220_v26  ;;  %v979_v35 = vpop.f32.mrb[28].mxu1  ;;  %4767 = vmatpush1.bf16.msra.mxu0 %v5981_v42  ;;  %v5987_v52 = vld [vmem:[#allocation9 + $0x140] ss:$8 sps:$4 sm:$0xff]  }
 0x1ba   : > { %v7501_v49 = vpop.eup %6059  ;;  %v2650_v59 = vmul.f32 0.7978846, %v2394_v45  ;;  %v1885_v58 = vmul.f32 %v1629_v20, %v7480_v36  ;;  %v1630_v10 = vmul.f32 %v7491_v3, %v7491_v3  ;;  %v3134_v15 = vadd.f32 1.0, %v7420_v8  ;;  %v981_v37 = vpop.f32.mrb[29].mxu1  ;;  %4768 = vmatprep.subr.bf16.mxu0 %v5986_v50 }
 0x1bb   : > { %v7507_v55 = vpop.eup %6061  ;;  %4452 = vmatmul.mubr.bf16.gmra.mrb[4].mxu0 %v3953_v28  ;;  %v1633_v34 = vmul.f32 %v7496_v27, %v7496_v27  ;;  %v1634_v46 = vmul.f32 %v7499_v53, %v7499_v53  ;;  %v3138_v41 = vadd.f32 1.0, %v7428_v57  ;;  %v3133_v0 = vadd.f32 1.0, %v7416_v30  ;;  %v983_v54 = vpop.f32.mrb[30].mxu1  ;;  %v5992_v28 = vld [vmem:[#allocation9 + $0x154] ss:$8 sps:$4 sm:$0xff]  }
 0x1bc   : > { %6069 = vtanh.f32 %v2650_v59  ;;  %v2141_v42 = vmul.f32 0.044715, %v1885_v58  ;;  %v1886_v8 = vmul.f32 %v1630_v10, %v7491_v3  ;;  %v3390_v44 = vmul.f32 0.5, %v3134_v15  ;;  %v985_v43 = vpop.f32.mrb[31].mxu1 }
 0x1bd   : > { %v1889_v38 = vmul.f32 %v1633_v34, %v7496_v27  ;;  %v1890_v50 = vmul.f32 %v1634_v46, %v7499_v53  ;;  %v3394_v22 = vmul.f32 0.5, %v3138_v41  ;;  %v3137_v24 = vadd.f32 1.0, %v7424_v9  ;;  %4769 = vmatpush1.bf16.msra.mxu0 %v5984_v29 }
 0x1be   : > { %v2397_v57 = vadd.f32 %v2141_v42, %v7480_v36  ;;  %v2142_v45 = vmul.f32 0.044715, %v1886_v8  ;;  %v3646_v30 = vmul.f32 %v3390_v44, %v7317_v56  ;;  %v3389_v20 = vmul.f32 0.5, %v3133_v0  ;;  %1281 = vmatmul.mubr.bf16.gmra.mrb[136].mxu1 %v6962_v61  ;;  %4770 = vmatprep.subr.bf16.mxu0 %v5989_v13 }
 0x1bf   : > { %v2145_v59 = vmul.f32 0.044715, %v1889_v38  ;;  %v2146_v58 = vmul.f32 0.044715, %v1890_v50  ;;  %v3650_v10 = vmul.f32 %v3394_v22, %v7329_v31  ;;  %v3393_v15 = vmul.f32 0.5, %v3137_v24  ;;  %1290 = vmatprep.mubr.bf16.mxu1 %v6964_v63 }
 0x1c0   : > { %v2653_v9 = vmul.f32 0.7978846, %v2397_v57  ;;  %v2398_v29 = vadd.f32 %v2142_v45, %v7491_v3  ;;  %v3645_v34 = vmul.f32 %v3389_v20, %v7311_v21  ;;  %v7527_v46 = vadd.f32 %v979_v35, %v7216_v14  ;;  %v5990_v63 = vld [vmem:[#allocation9 + $0x150] ss:$8 sps:$4 sm:$0xff]   ;;  %v5995_v38 = vld [vmem:[#allocation9 + $0x164] ss:$8 sps:$4 sm:$0xff]  }
 0x1c1   : > { %v7529_v56 = vpop.eup %6063  ;;  %v2401_v61 = vadd.f32 %v2145_v59, %v7496_v27  ;;  %v2402_v13 = vadd.f32 %v2146_v58, %v7499_v53  ;;  %v3958_v41 = vpack.c.bf16 %v3650_v10, %v3646_v30  ;;  %v3649_v31 = vmul.f32 %v3393_v15, %v7323_v48  ;;  %v989_v0 = vpop.f32.mrb[32].mxu1  ;;  %4771 = vmatpush1.bf16.msra.mxu0 %v5987_v52 }
 0x1c2   : > { %v7534_v42 = vpop.eup %6065  ;;  %6071 = vtanh.f32 %v2653_v9  ;;  %v2654_v8 = vmul.f32 0.7978846, %v2398_v29  ;;  %v1637_v21 = vmul.f32 %v7527_v46, %v7527_v46  ;;  %v7539_v35 = vadd.f32 %v981_v37, %v7220_v26  ;;  %v7541_v44 = vpop.f32.mrb[33].mxu1  ;;  %4772 = vmatprep.subr.bf16.mxu0 %v5992_v28  ;;  %v5993_v9 = vld [vmem:[#allocation9 + $0x160] ss:$8 sps:$4 sm:$0xff]  }
 0x1c3   : > { %v7543_v50 = vpop.eup %6067  ;;  %v2657_v48 = vmul.f32 0.7978846, %v2401_v61  ;;  %v2658_v22 = vmul.f32 0.7978846, %v2402_v13  ;;  %4461 = vmatprep.mubr.bf16.mxu0 %v3958_v41  ;;  %v3957_v24 = vpack.c.bf16 %v3649_v31, %v3645_v34  ;;  %v7546_v52 = vadd.f32 %v983_v54, %v7216_v14  ;;  %v993_v57 = vpop.f32.mrb[34].mxu1 }
 0x1c4   : > { %6073 = vtanh.f32 %v2654_v8  ;;  %v1893_v45 = vmul.f32 %v1637_v21, %v7527_v46  ;;  %v1638_v37 = vmul.f32 %v7539_v35, %v7539_v35  ;;  %v7552_v30 = vadd.f32 %v985_v43, %v7220_v26  ;;  %v995_v20 = vpop.f32.mrb[35].mxu1 }
 0x1c5   : > { %6075 = vtanh.f32 %v2657_v48  ;;  %4462 = vmatmul.mubr.bf16.gmra.mrb[8].mxu0 %v3957_v24  ;;  %v1641_v28 = vmul.f32 %v7546_v52, %v7546_v52  ;;  %v3142_v59 = vadd.f32 1.0, %v7460_v60  ;;  %v3146_v54 = vadd.f32 1.0, %v7469_v2  ;;  %v5998_v2 = vld [vmem:[#allocation9 + $0x174] ss:$8 sps:$4 sm:$0xff]  }
 0x1c6   : > { %v7558_v58 = vpop.eup %6069  ;;  %6077 = vtanh.f32 %v2658_v22  ;;  %v2149_v10 = vmul.f32 0.044715, %v1893_v45  ;;  %v1894_v15 = vmul.f32 %v1638_v37, %v7539_v35  ;;  %v1642_v43 = vmul.f32 %v7552_v30, %v7552_v30  ;;  %1291 = vmatmul.mubr.bf16.gmra.mrb[140].mxu1 %v6972_v6  ;;  %4773 = vmatpush1.bf16.msra.mxu0 %v5990_v63 }
 0x1c7   : > { %v1897_v29 = vmul.f32 %v1641_v28, %v7546_v52  ;;  %v3398_v34 = vmul.f32 0.5, %v3142_v59  ;;  %v3402_v61 = vmul.f32 0.5, %v3146_v54  ;;  %v3141_v60 = vadd.f32 1.0, %v7453_v11  ;;  %1300 = vmatprep.mubr.bf16.mxu1 %v6974_v7  ;;  %4774 = vmatprep.subr.bf16.mxu0 %v5995_v38  ;;  %v5996_v11 = vld [vmem:[#allocation9 + $0x170] ss:$8 sps:$4 sm:$0xff]  }
 0x1c8   : > { %v2405_v13 = vadd.f32 %v2149_v10, %v7527_v46  ;;  %v2150_v41 = vmul.f32 0.044715, %v1894_v15  ;;  %v1898_v31 = vmul.f32 %v1642_v43, %v7552_v30  ;;  %v3145_v8 = vadd.f32 1.0, %v7464_v16 }
 0x1c9   : > { %v2153_v6 = vmul.f32 0.044715, %v1897_v29  ;;  %v3654_v63 = vmul.f32 %v3398_v34, %v7353_v47  ;;  %v3658_v21 = vmul.f32 %v3402_v61, %v7367_v40  ;;  %v3397_v48 = vmul.f32 0.5, %v3141_v60  ;;  %v7572_v22 = vpop.f32.mrb[36].mxu1 }
 0x1ca   : > { %v2661_v24 = vmul.f32 0.7978846, %v2405_v13  ;;  %v2406_v7 = vadd.f32 %v2150_v41, %v7539_v35  ;;  %v2154_v38 = vmul.f32 0.044715, %v1898_v31  ;;  %v3401_v45 = vmul.f32 0.5, %v3145_v8  ;;  %v7575_v37 = vpop.f32.mrb[37].mxu1  ;;  %4775 = vmatpush1.bf16.msra.mxu0 %v5993_v9 }
 0x1cb   : > { %v2409_v28 = vadd.f32 %v2153_v6, %v7546_v52  ;;  %v3962_v16 = vpack.c.bf16 %v3658_v21, %v3654_v63  ;;  %v3653_v59 = vmul.f32 %v3397_v48, %v7349_v32  ;;  %v7580_v47 = vadd.f32 %v989_v0, %v7216_v14  ;;  %v7582_v40 = vpop.f32.mrb[38].mxu1  ;;  %4776 = vmatprep.subr.bf16.mxu0 %v5998_v2 }
 0x1cc   : > { %v7584_v54 = vpop.eup %6071  ;;  %6079 = vtanh.f32 %v2661_v24  ;;  %v2662_v10 = vmul.f32 0.7978846, %v2406_v7  ;;  %v2410_v15 = vadd.f32 %v2154_v38, %v7552_v30  ;;  %v3657_v43 = vmul.f32 %v3401_v45, %v7361_v5  ;;  %v7588_v9 = vpop.f32.mrb[39].mxu1 }
 0x1cd   : > { %v2665_v29 = vmul.f32 0.7978846, %v2409_v28  ;;  %4471 = vmatprep.mubr.bf16.mxu0 %v3962_v16  ;;  %v1645_v32 = vmul.f32 %v7580_v47, %v7580_v47  ;;  %v7594_v0 = vadd.f32 %v7541_v44, %v7220_v26  ;;  %v7597_v34 = vadd.f32 %v993_v57, %v7216_v14 }
 0x1ce   : > { %v7599_v61 = vpop.eup %6073  ;;  %6081 = vtanh.f32 %v2662_v10  ;;  %v2666_v60 = vmul.f32 0.7978846, %v2410_v15  ;;  %v3961_v2 = vpack.c.bf16 %v3657_v43, %v3653_v59  ;;  %v7602_v5 = vadd.f32 %v995_v20, %v7220_v26  ;;  %1301 = vmatmul.mubr.bf16.gmra.mrb[144].mxu1 %v6982_v17  ;;  %4777 = vmatpush1.bf16.msra.mxu0 %v5996_v11 }
 0x1cf   : > { %v7605_v13 = vpop.eup %6075  ;;  %6083 = vtanh.f32 %v2665_v29  ;;  %v1901_v44 = vmul.f32 %v1645_v32, %v7580_v47  ;;  %v1646_v57 = vmul.f32 %v7594_v0, %v7594_v0  ;;  %v1649_v41 = vmul.f32 %v7597_v34, %v7597_v34  ;;  %1310 = vmatprep.mubr.bf16.mxu1 %v6984_v18 }
 0x1d0   : > { %v7613_v31 = vpop.eup %6077  ;;  %6085 = vtanh.f32 %v2666_v60  ;;  %4472 = vmatmul.mubr.bf16.gmra.mrb[12].mxu0 %v3961_v2  ;;  %v1650_v17 = vmul.f32 %v7602_v5, %v7602_v5  ;;  %v3150_v20 = vadd.f32 1.0, %v7493_v51  ;;  %v3154_v8 = vadd.f32 1.0, %v7507_v55 }
 0x1d1   : > { %v2157_v6 = vmul.f32 0.044715, %v1901_v44  ;;  %v1902_v63 = vmul.f32 %v1646_v57, %v7594_v0  ;;  %v1905_v21 = vmul.f32 %v1649_v41, %v7597_v34  ;;  %v3149_v48 = vadd.f32 1.0, %v7485_v62  ;;  %v7622_v11 = vpop.f32.mrb[40].mxu1 }
 0x1d2   : > { %v1906_v18 = vmul.f32 %v1650_v17, %v7602_v5  ;;  %v3406_v24 = vmul.f32 0.5, %v3150_v20  ;;  %v3410_v7 = vmul.f32 0.5, %v3154_v8  ;;  %v3153_v38 = vadd.f32 1.0, %v7501_v49  ;;  %v7626_v45 = vpop.f32.mrb[41].mxu1 }
 0x1d3   : > { %v2413_v51 = vadd.f32 %v2157_v6, %v7580_v47  ;;  %v2158_v55 = vmul.f32 0.044715, %v1902_v63  ;;  %v2161_v28 = vmul.f32 0.044715, %v1905_v21  ;;  %v3405_v16 = vmul.f32 0.5, %v3149_v48  ;;  %v7629_v59 = vpop.f32.mrb[42].mxu1 }
 0x1d4   : > { %v2162_v10 = vmul.f32 0.044715, %v1906_v18  ;;  %v3662_v62 = vmul.f32 %v3406_v24, %v7393_v39  ;;  %v3666_v15 = vmul.f32 %v3410_v7, %v7406_v4  ;;  %v3409_v43 = vmul.f32 0.5, %v3153_v38  ;;  %v7633_v29 = vpop.f32.mrb[43].mxu1  ;;  %v11354_v4 = vld [vmem:[#allocation14_spill] sm:$0xff] }
 0x1d5   : > { %v2669_v32 = vmul.f32 0.7978846, %v2413_v51  ;;  %v2414_v49 = vadd.f32 %v2158_v55, %v7594_v0  ;;  %v2417_v60 = vadd.f32 %v2161_v28, %v7597_v34  ;;  %v3661_v2 = vmul.f32 %v3405_v16, %v7387_v23  ;;  %v11355_v23 = vld [vmem:[#allocation15_spill] sm:$0xff] }
 0x1d6   : > { %v7638_v44 = vpop.eup %6079  ;;  %v2418_v57 = vadd.f32 %v2162_v10, %v7602_v5  ;;  %v3966_v41 = vpack.c.bf16 %v3666_v15, %v3662_v62  ;;  %v3665_v17 = vmul.f32 %v3409_v43, %v7400_v1  ;;  %v7644_v39 = vadd.f32 %v7572_v22, %v7216_v14  ;;  %1311 = vmatmul.mubr.bf16.gmra.mrb[148].mxu1 %v11354_v4  ;;  %v5999_v51 = vld [vmem:[#allocation9 + $0x180] ss:$8 sps:$4 sm:$0xff]   ;;  %v6001_v55 = vld [vmem:[#allocation9 + $0x184] ss:$8 sps:$4 sm:$0xff]  }
 0x1d7   : > { %6087 = vtanh.f32 %v2669_v32  ;;  %v2670_v20 = vmul.f32 0.7978846, %v2414_v49  ;;  %v2673_v8 = vmul.f32 0.7978846, %v2417_v60  ;;  %v7649_v6 = vadd.f32 %v7575_v37, %v7220_v26  ;;  %1320 = vmatprep.mubr.bf16.mxu1 %v11355_v23  ;;  %4778 = vmatprep.subr.bf16.mxu0 %v6001_v55 }
 0x1d8   : > { %v7652_v63 = vpop.eup %6081  ;;  %v2674_v21 = vmul.f32 0.7978846, %v2418_v57  ;;  %4481 = vmatprep.mubr.bf16.mxu0 %v3966_v41  ;;  %v3965_v1 = vpack.c.bf16 %v3665_v17, %v3661_v2  ;;  %v1653_v22 = vmul.f32 %v7644_v39, %v7644_v39  ;;  %v7658_v48 = vadd.f32 %v7582_v40, %v7216_v14  ;;  %4779 = vmatpush1.bf16.msra.mxu0 %v5999_v51  ;;  %v11357_v51 = vld [vmem:[#allocation17_spill] sm:$0xff] }
 0x1d9   : > { %v7660_v18 = vpop.eup %6083  ;;  %6089 = vtanh.f32 %v2670_v20  ;;  %v1654_v37 = vmul.f32 %v7649_v6, %v7649_v6  ;;  %v7666_v24 = vadd.f32 %v7588_v9, %v7220_v26  ;;  %v3158_v7 = vadd.f32 1.0, %v7534_v42  ;;  %v7669_v38 = vpop.f32.mrb[44].mxu1 }
 0x1da   : > { %v7671_v28 = vpop.eup %6085  ;;  %6091 = vtanh.f32 %v2673_v8  ;;  %4482 = vmatmul.mubr.bf16.gmra.mrb[16].mxu0 %v3965_v1  ;;  %v1909_v40 = vmul.f32 %v1653_v22, %v7644_v39  ;;  %v1657_v16 = vmul.f32 %v7658_v48, %v7658_v48  ;;  %v3162_v10 = vadd.f32 1.0, %v7558_v58  ;;  %v7677_v62 = vpop.f32.mrb[45].mxu1  ;;  %v11356_v1 = vld [vmem:[#allocation16_spill] sm:$0xff] }
 0x1db   : > { %6093 = vtanh.f32 %v2674_v21  ;;  %v1910_v42 = vmul.f32 %v1654_v37, %v7649_v6  ;;  %v1658_v9 = vmul.f32 %v7666_v24, %v7666_v24  ;;  %v3414_v15 = vmul.f32 0.5, %v3158_v7  ;;  %v7682_v43 = vpop.f32.mrb[46].mxu1 }
 0x1dc   : > { %v2165_v32 = vmul.f32 0.044715, %v1909_v40  ;;  %v1913_v49 = vmul.f32 %v1657_v16, %v7658_v48  ;;  %v3418_v60 = vmul.f32 0.5, %v3162_v10  ;;  %v3157_v2 = vadd.f32 1.0, %v7529_v56  ;;  %v7686_v57 = vpop.f32.mrb[47].mxu1 }
 0x1dd   : > { %v2166_v58 = vmul.f32 0.044715, %v1910_v42  ;;  %v1914_v41 = vmul.f32 %v1658_v9, %v7666_v24  ;;  %v3670_v17 = vmul.f32 %v3414_v15, %v7438_v19  ;;  %v3161_v4 = vadd.f32 1.0, %v7543_v50 }
 0x1de   : > { %v2421_v20 = vadd.f32 %v2165_v32, %v7644_v39  ;;  %v2169_v8 = vmul.f32 0.044715, %v1913_v49  ;;  %v3674_v23 = vmul.f32 %v3418_v60, %v7457_v33  ;;  %v3413_v21 = vmul.f32 0.5, %v3157_v2  ;;  %1321 = vmatmul.mubr.bf16.gmra.mrb[152].mxu1 %v11356_v1 }
 0x1df   : > { %v2422_v56 = vadd.f32 %v2166_v58, %v7649_v6  ;;  %v2170_v22 = vmul.f32 0.044715, %v1914_v41  ;;  %v3417_v37 = vmul.f32 0.5, %v3161_v4  ;;  %v7697_v7 = vadd.f32 %v7622_v11, %v7216_v14  ;;  %1330 = vmatprep.mubr.bf16.mxu1 %v11357_v51  ;;  %v11358_v51 = vld [vmem:[#allocation18_spill] sm:$0xff] }
 0x1e0   : > { %v2677_v19 = vmul.f32 0.7978846, %v2421_v20  ;;  %v2425_v50 = vadd.f32 %v2169_v8, %v7658_v48  ;;  %v3970_v55 = vpack.c.bf16 %v3674_v23, %v3670_v17  ;;  %v3669_v40 = vmul.f32 %v3413_v21, %v7433_v25 }
 0x1e1   : > { %v7702_v33 = vpop.eup %6087  ;;  %v2678_v16 = vmul.f32 0.7978846, %v2422_v56  ;;  %v2426_v10 = vadd.f32 %v2170_v22, %v7666_v24  ;;  %v3673_v42 = vmul.f32 %v3417_v37, %v7444_v12  ;;  %v1661_v9 = vmul.f32 %v7697_v7, %v7697_v7  ;;  %v7708_v11 = vpop.f32.mrb[48].mxu1 }
 0x1e2   : > { %6095 = vtanh.f32 %v2677_v19  ;;  %v2681_v15 = vmul.f32 0.7978846, %v2425_v50  ;;  %4491 = vmatprep.mubr.bf16.mxu0 %v3970_v55  ;;  %v7712_v32 = vadd.f32 %v7626_v45, %v7220_v26  ;;  %v7716_v25 = vadd.f32 %v7629_v59, %v7216_v14  ;;  %v7718_v49 = vpop.f32.mrb[49].mxu1 }
 0x1e3   : > { %v7720_v60 = vpop.eup %6089  ;;  %6097 = vtanh.f32 %v2678_v16  ;;  %v2682_v12 = vmul.f32 0.7978846, %v2426_v10  ;;  %v3969_v2 = vpack.c.bf16 %v3673_v42, %v3669_v40  ;;  %v1917_v58 = vmul.f32 %v1661_v9, %v7697_v7  ;;  %v7723_v41 = vpop.f32.mrb[50].mxu1 }
 0x1e4   : > { %v7725_v17 = vpop.eup %6091  ;;  %6099 = vtanh.f32 %v2681_v15  ;;  %v1662_v45 = vmul.f32 %v7712_v32, %v7712_v32  ;;  %v1665_v59 = vmul.f32 %v7716_v25, %v7716_v25  ;;  %v7733_v4 = vadd.f32 %v7633_v29, %v7220_v26  ;;  %v7735_v20 = vpop.f32.mrb[51].mxu1 }
 0x1e5   : > { %v7737_v8 = vpop.eup %6093  ;;  %6101 = vtanh.f32 %v2682_v12  ;;  %4492 = vmatmul.mubr.bf16.gmra.mrb[20].mxu0 %v3969_v2  ;;  %v2173_v23 = vmul.f32 0.044715, %v1917_v58  ;;  %v3166_v21 = vadd.f32 1.0, %v7599_v61  ;;  %v3170_v1 = vadd.f32 1.0, %v7613_v31  ;;  %v11359_v61 = vld [vmem:[#allocation19_spill] sm:$0xff] }
 0x1e6   : > { %v1918_v56 = vmul.f32 %v1662_v45, %v7712_v32  ;;  %v1921_v22 = vmul.f32 %v1665_v59, %v7716_v25  ;;  %v1666_v37 = vmul.f32 %v7733_v4, %v7733_v4  ;;  %v3165_v29 = vadd.f32 1.0, %v7584_v54  ;;  %1331 = vmatmul.mubr.bf16.gmra.mrb[156].mxu1 %v11358_v51 }
 0x1e7   : > { %v2429_v19 = vadd.f32 %v2173_v23, %v7697_v7  ;;  %v3422_v50 = vmul.f32 0.5, %v3166_v21  ;;  %v3426_v55 = vmul.f32 0.5, %v3170_v1  ;;  %v3169_v40 = vadd.f32 1.0, %v7605_v13  ;;  %1340 = vmatprep.mubr.bf16.mxu1 %v11359_v61 }
 0x1e8   : > { %v2174_v31 = vmul.f32 0.044715, %v1918_v56  ;;  %v2177_v16 = vmul.f32 0.044715, %v1921_v22  ;;  %v1922_v10 = vmul.f32 %v1666_v37, %v7733_v4  ;;  %v3421_v42 = vmul.f32 0.5, %v3165_v29 }
 0x1e9   : > { %v2685_v9 = vmul.f32 0.7978846, %v2429_v19  ;;  %v3678_v15 = vmul.f32 %v3422_v50, %v7491_v3  ;;  %v3682_v54 = vmul.f32 %v3426_v55, %v7499_v53  ;;  %v3425_v12 = vmul.f32 0.5, %v3169_v40  ;;  %v7753_v2 = vpop.f32.mrb[52].mxu1 }
 0x1ea   : > { %v2430_v58 = vadd.f32 %v2174_v31, %v7712_v32  ;;  %v2433_v45 = vadd.f32 %v2177_v16, %v7716_v25  ;;  %v2178_v13 = vmul.f32 0.044715, %v1922_v10  ;;  %v3677_v59 = vmul.f32 %v3421_v42, %v7480_v36  ;;  %v7758_v23 = vpop.f32.mrb[53].mxu1  ;;  %v11360_v16 = vld [vmem:[#allocation20_spill] sm:$0xff] }
 0x1eb   : > { %6103 = vtanh.f32 %v2685_v9  ;;  %v3974_v21 = vpack.c.bf16 %v3682_v54, %v3678_v15  ;;  %v3681_v1 = vmul.f32 %v3425_v12, %v7496_v27  ;;  %v7763_v3 = vadd.f32 %v7669_v38, %v7216_v14  ;;  %v7765_v53 = vpop.f32.mrb[54].mxu1  ;;  %v6002_v10 = vld [vmem:[#allocation9 + $0x190] ss:$8 sps:$4 sm:$0xff]   ;;  %v6004_v54 = vld [vmem:[#allocation9 + $0x194] ss:$8 sps:$4 sm:$0xff]  }
 0x1ec   : > { %v7767_v56 = vpop.eup %6095  ;;  %v2686_v22 = vmul.f32 0.7978846, %v2430_v58  ;;  %v2689_v37 = vmul.f32 0.7978846, %v2433_v45  ;;  %v2434_v29 = vadd.f32 %v2178_v13, %v7733_v4  ;;  %v7772_v36 = vadd.f32 %v7677_v62, %v7220_v26  ;;  %v7774_v51 = vpop.f32.mrb[55].mxu1  ;;  %v11361_v15 = vld [vmem:[#allocation21_spill] sm:$0xff]  ;;  %4780 = vmatprep.subr.bf16.mxu0 %v6004_v54 }
 0x1ed   : > { %v7776_v19 = vpop.eup %6097  ;;  %4501 = vmatprep.mubr.bf16.mxu0 %v3974_v21  ;;  %v3973_v27 = vpack.c.bf16 %v3681_v1, %v3677_v59  ;;  %v1669_v38 = vmul.f32 %v7763_v3, %v7763_v3  ;;  %v7782_v50 = vadd.f32 %v7682_v43, %v7216_v14  ;;  %v7786_v55 = vadd.f32 %v7686_v57, %v7220_v26 }
 0x1ee   : > { %v7788_v40 = vpop.eup %6099  ;;  %6105 = vtanh.f32 %v2686_v22  ;;  %v2690_v62 = vmul.f32 0.7978846, %v2434_v29  ;;  %v1670_v61 = vmul.f32 %v7772_v36, %v7772_v36  ;;  %v3174_v31 = vadd.f32 1.0, %v7652_v63  ;;  %1341 = vmatmul.mubr.bf16.gmra.mrb[160].mxu1 %v11360_v16  ;;  %4781 = vmatpush1.bf16.msra.mxu0 %v6002_v10 }
 0x1ef   : > { %v7794_v42 = vpop.eup %6101  ;;  %6107 = vtanh.f32 %v2689_v37  ;;  %4502 = vmatmul.mubr.bf16.gmra.mrb[24].mxu0 %v3973_v27  ;;  %v1925_v43 = vmul.f32 %v1669_v38, %v7763_v3  ;;  %v1673_v57 = vmul.f32 %v7782_v50, %v7782_v50  ;;  %v1674_v9 = vmul.f32 %v7786_v55, %v7786_v55  ;;  %1350 = vmatprep.mubr.bf16.mxu1 %v11361_v15 }
 0x1f0   : > { %6109 = vtanh.f32 %v2690_v62  ;;  %v1926_v63 = vmul.f32 %v1670_v61, %v7772_v36  ;;  %v3178_v12 = vadd.f32 1.0, %v7671_v28  ;;  %v3430_v58 = vmul.f32 0.5, %v3174_v31 }
 0x1f1   : > { %v2181_v45 = vmul.f32 0.044715, %v1925_v43  ;;  %v1929_v13 = vmul.f32 %v1673_v57, %v7782_v50  ;;  %v1930_v59 = vmul.f32 %v1674_v9, %v7786_v55  ;;  %v3173_v21 = vadd.f32 1.0, %v7638_v44  ;;  %v7807_v1 = vpop.f32.mrb[56].mxu1 }
 0x1f2   : > { %v2182_v22 = vmul.f32 0.044715, %v1926_v63  ;;  %v3434_v37 = vmul.f32 0.5, %v3178_v12  ;;  %v3686_v29 = vmul.f32 %v3430_v58, %v7539_v35  ;;  %v3177_v27 = vadd.f32 1.0, %v7660_v18  ;;  %v7811_v38 = vpop.f32.mrb[57].mxu1 }
 0x1f3   : > { %v2437_v28 = vadd.f32 %v2181_v45, %v7763_v3  ;;  %v2185_v62 = vmul.f32 0.044715, %v1929_v13  ;;  %v2186_v61 = vmul.f32 0.044715, %v1930_v59  ;;  %v3429_v31 = vmul.f32 0.5, %v3173_v21  ;;  %v7814_v16 = vpop.f32.mrb[58].mxu1 }
 0x1f4   : > { %v2438_v44 = vadd.f32 %v2182_v22, %v7772_v36  ;;  %v3690_v43 = vmul.f32 %v3434_v37, %v7552_v30  ;;  %v3433_v57 = vmul.f32 0.5, %v3177_v27  ;;  %v7820_v35 = vadd.f32 %v7708_v11, %v7216_v14  ;;  %v7822_v18 = vpop.f32.mrb[59].mxu1  ;;  %v11362_v11 = vld [vmem:[#allocation22_spill] sm:$0xff]  ;;  %v11363_v22 = vld [vmem:[#allocation23_spill] sm:$0xff] }
 0x1f5   : > { %v7824_v9 = vpop.eup %6103  ;;  %v2693_v10 = vmul.f32 0.7978846, %v2437_v28  ;;  %v2441_v15 = vadd.f32 %v2185_v62, %v7782_v50  ;;  %v2442_v54 = vadd.f32 %v2186_v61, %v7786_v55  ;;  %v3685_v63 = vmul.f32 %v3429_v31, %v7527_v46 }
 0x1f6   : > { %v2694_v12 = vmul.f32 0.7978846, %v2438_v44  ;;  %v3978_v58 = vpack.c.bf16 %v3690_v43, %v3686_v29  ;;  %v3689_v30 = vmul.f32 %v3433_v57, %v7546_v52  ;;  %v1677_v45 = vmul.f32 %v7820_v35, %v7820_v35  ;;  %1351 = vmatmul.mubr.bf16.gmra.mrb[164].mxu1 %v11362_v11 }
 0x1f7   : > { %6111 = vtanh.f32 %v2693_v10  ;;  %v2697_v13 = vmul.f32 0.7978846, %v2441_v15  ;;  %v2698_v59 = vmul.f32 0.7978846, %v2442_v54  ;;  %v7835_v21 = vadd.f32 %v7718_v49, %v7220_v26  ;;  %1360 = vmatprep.mubr.bf16.mxu1 %v11363_v22 }
 0x1f8   : > { %v7838_v37 = vpop.eup %6105  ;;  %6113 = vtanh.f32 %v2694_v12  ;;  %4511 = vmatprep.mubr.bf16.mxu0 %v3978_v58  ;;  %v3977_v46 = vpack.c.bf16 %v3689_v30, %v3685_v63  ;;  %v1933_v52 = vmul.f32 %v1677_v45, %v7820_v35  ;;  %v7843_v29 = vadd.f32 %v7723_v41, %v7216_v14 }
 0x1f9   : > { %v7845_v27 = vpop.eup %6107  ;;  %6115 = vtanh.f32 %v2697_v13  ;;  %v1678_v49 = vmul.f32 %v7835_v21, %v7835_v21  ;;  %v7851_v28 = vadd.f32 %v7735_v20, %v7220_v26  ;;  %v3182_v62 = vadd.f32 1.0, %v7720_v60  ;;  %v7854_v61 = vpop.f32.mrb[60].mxu1 }
 0x1fa   : > { %11364 = vst [vmem:[#allocation14_spill] sm:$0xff] %v7843_v29  ;;  %v7856_v31 = vpop.eup %6109  ;;  %6117 = vtanh.f32 %v2698_v59  ;;  %4512 = vmatmul.mubr.bf16.gmra.mrb[28].mxu0 %v3977_v46  ;;  %v2189_v41 = vmul.f32 0.044715, %v1933_v52  ;;  %v1681_v44 = vmul.f32 %v7843_v29, %v7843_v29  ;;  %v3186_v43 = vadd.f32 1.0, %v7737_v8  ;;  %v7861_v57 = vpop.f32.mrb[61].mxu1 }
 0x1fb   : > { %v1934_v10 = vmul.f32 %v1678_v49, %v7835_v21  ;;  %v1682_v20 = vmul.f32 %v7851_v28, %v7851_v28  ;;  %v3438_v60 = vmul.f32 0.5, %v3182_v62  ;;  %v3181_v15 = vadd.f32 1.0, %v7702_v33  ;;  %v7867_v54 = vpop.f32.mrb[62].mxu1  ;;  %v11365_v49 = vld [vmem:[#allocation24_spill] sm:$0xff] }
 0x1fc   : > { %v2445_v63 = vadd.f32 %v2189_v41, %v7820_v35  ;;  %v1937_v12 = vmul.f32 %v1681_v44, %v7843_v29  ;;  %v3442_v58 = vmul.f32 0.5, %v3186_v43  ;;  %v3185_v30 = vadd.f32 1.0, %v7725_v17  ;;  %v7872_v8 = vpop.f32.mrb[63].mxu1  ;;  %v11366_v43 = vld [vmem:[#allocation25_spill] sm:$0xff] }
 0x1fd   : > { %v2190_v45 = vmul.f32 0.044715, %v1934_v10  ;;  %v1938_v11 = vmul.f32 %v1682_v20, %v7851_v28  ;;  %v3694_v13 = vmul.f32 %v3438_v60, %v7594_v0  ;;  %v3437_v59 = vmul.f32 0.5, %v3181_v15 }
 0x1fe   : > { %v2701_v22 = vmul.f32 0.7978846, %v2445_v63  ;;  %v2193_v46 = vmul.f32 0.044715, %v1937_v12  ;;  %v3698_v33 = vmul.f32 %v3442_v58, %v7602_v5  ;;  %v3441_v52 = vmul.f32 0.5, %v3185_v30  ;;  %1361 = vmatmul.mubr.bf16.gmra.mrb[168].mxu1 %v11365_v49 }
 0x1ff   : > { %v2446_v62 = vadd.f32 %v2190_v45, %v7835_v21  ;;  %v2194_v41 = vmul.f32 0.044715, %v1938_v11  ;;  %v3693_v17 = vmul.f32 %v3437_v59, %v7580_v47  ;;  %v7882_v44 = vadd.f32 %v7753_v2, %v7216_v14  ;;  %1370 = vmatprep.mubr.bf16.mxu1 %v11366_v43 }
 0x200   : > { %6119 = vtanh.f32 %v2701_v22  ;;  %v2449_v0 = vadd.f32 %v2193_v46, %v7843_v29  ;;  %v3982_v10 = vpack.c.bf16 %v3698_v33, %v3694_v13  ;;  %v3697_v5 = vmul.f32 %v3441_v52, %v7597_v34  ;;  %v6005_v33 = vld [vmem:[#allocation9 + $0x1a0] ss:$8 sps:$4 sm:$0xff]  }
 0x201   : > { %v7887_v20 = vpop.eup %6111  ;;  %v2702_v60 = vmul.f32 0.7978846, %v2446_v62  ;;  %v2450_v15 = vadd.f32 %v2194_v41, %v7851_v28  ;;  %v1685_v47 = vmul.f32 %v7882_v44, %v7882_v44  ;;  %v7894_v2 = vadd.f32 %v7758_v23, %v7220_v26  ;;  %v7896_v63 = vpop.f32.mrb[64].mxu1  ;;  %v6007_v41 = vld [vmem:[#allocation9 + $0x1a4] ss:$8 sps:$4 sm:$0xff]  }
 0x202   : > { %v7898_v12 = vpop.eup %6113  ;;  %v2705_v58 = vmul.f32 0.7978846, %v2449_v0  ;;  %4521 = vmatprep.mubr.bf16.mxu0 %v3982_v10  ;;  %v3981_v30 = vpack.c.bf16 %v3697_v5, %v3693_v17  ;;  %v7902_v34 = vadd.f32 %v7765_v53, %v7216_v14  ;;  %v7906_v45 = vadd.f32 %v7774_v51, %v7220_v26  ;;  %v7908_v11 = vpop.f32.mrb[65].mxu1  ;;  %4782 = vmatprep.subr.bf16.mxu0 %v6007_v41 }
 0x203   : > { %v7910_v13 = vpop.eup %6115  ;;  %6121 = vtanh.f32 %v2702_v60  ;;  %v2706_v23 = vmul.f32 0.7978846, %v2450_v15  ;;  %v1941_v59 = vmul.f32 %v1685_v47, %v7882_v44  ;;  %v1686_v22 = vmul.f32 %v7894_v2, %v7894_v2  ;;  %v7915_v46 = vpop.f32.mrb[66].mxu1  ;;  %v11367_v47 = vld [vmem:[#allocation26_spill] sm:$0xff]  ;;  %4783 = vmatpush1.bf16.msra.mxu0 %v6005_v33 }
 0x204   : > { %v7917_v53 = vpop.eup %6117  ;;  %6123 = vtanh.f32 %v2705_v58  ;;  %4522 = vmatmul.mubr.bf16.gmra.mrb[32].mxu0 %v3981_v30  ;;  %v1689_v51 = vmul.f32 %v7902_v34, %v7902_v34  ;;  %v1690_v52 = vmul.f32 %v7906_v45, %v7906_v45  ;;  %v3190_v49 = vadd.f32 1.0, %v7776_v19  ;;  %v7924_v62 = vpop.f32.mrb[67].mxu1 }
 0x205   : > { %6125 = vtanh.f32 %v2706_v23  ;;  %v2197_v17 = vmul.f32 0.044715, %v1941_v59  ;;  %v1942_v43 = vmul.f32 %v1686_v22, %v7894_v2  ;;  %v3194_v0 = vadd.f32 1.0, %v7794_v42  ;;  %v11368_v59 = vld [vmem:[#allocation27_spill] sm:$0xff] }
 0x206   : > { %v1945_v10 = vmul.f32 %v1689_v51, %v7902_v34  ;;  %v1946_v5 = vmul.f32 %v1690_v52, %v7906_v45  ;;  %v3446_v60 = vmul.f32 0.5, %v3190_v49  ;;  %v3189_v15 = vadd.f32 1.0, %v7767_v56  ;;  %1371 = vmatmul.mubr.bf16.gmra.mrb[172].mxu1 %v11367_v47 }
 0x207   : > { %v2453_v19 = vadd.f32 %v2197_v17, %v7882_v44  ;;  %v2198_v58 = vmul.f32 0.044715, %v1942_v43  ;;  %v3450_v30 = vmul.f32 0.5, %v3194_v0  ;;  %v3193_v23 = vadd.f32 1.0, %v7788_v40  ;;  %1380 = vmatprep.mubr.bf16.mxu1 %v11368_v59 }
 0x208   : > { %v2201_v42 = vmul.f32 0.044715, %v1945_v10  ;;  %v2202_v22 = vmul.f32 0.044715, %v1946_v5  ;;  %v3702_v51 = vmul.f32 %v3446_v60, %v7649_v6  ;;  %v3445_v52 = vmul.f32 0.5, %v3189_v15 }
 0x209   : > { %v2709_v49 = vmul.f32 0.7978846, %v2453_v19  ;;  %v2454_v56 = vadd.f32 %v2198_v58, %v7894_v2  ;;  %v3706_v47 = vmul.f32 %v3450_v30, %v7666_v24  ;;  %v3449_v41 = vmul.f32 0.5, %v3193_v23  ;;  %v7938_v29 = vpop.f32.mrb[68].mxu1 }
 0x20a   : > { %v7940_v17 = vpop.eup %6119  ;;  %v2457_v40 = vadd.f32 %v2201_v42, %v7902_v34  ;;  %v2458_v43 = vadd.f32 %v2202_v22, %v7906_v45  ;;  %v3701_v33 = vmul.f32 %v3445_v52, %v7644_v39  ;;  %v7947_v6 = vadd.f32 %v7807_v1, %v7216_v14  ;;  %v7949_v0 = vpop.f32.mrb[69].mxu1  ;;  %v11369_v52 = vld [vmem:[#allocation28_spill] sm:$0xff] }
 0x20b   : > { %6127 = vtanh.f32 %v2709_v49  ;;  %v2710_v10 = vmul.f32 0.7978846, %v2454_v56  ;;  %v3986_v24 = vpack.c.bf16 %v3706_v47, %v3702_v51  ;;  %v3705_v5 = vmul.f32 %v3449_v41, %v7658_v48  ;;  %v7952_v60 = vpop.f32.mrb[70].mxu1  ;;  %v11370_v47 = vld [vmem:[#allocation29_spill] sm:$0xff] }
 0x20c   : > { %v2713_v15 = vmul.f32 0.7978846, %v2457_v40  ;;  %v2714_v19 = vmul.f32 0.7978846, %v2458_v43  ;;  %v1693_v58 = vmul.f32 %v7947_v6, %v7947_v6  ;;  %v7958_v39 = vadd.f32 %v7811_v38, %v7220_v26  ;;  %v7960_v1 = vpop.f32.mrb[71].mxu1 }
 0x20d   : > { %v7962_v30 = vpop.eup %6121  ;;  %6129 = vtanh.f32 %v2710_v10  ;;  %4531 = vmatprep.mubr.bf16.mxu0 %v3986_v24  ;;  %v3985_v23 = vpack.c.bf16 %v3705_v5, %v3701_v33  ;;  %v7966_v48 = vadd.f32 %v7814_v16, %v7216_v14  ;;  %v7970_v59 = vadd.f32 %v7822_v18, %v7220_v26 }
 0x20e   : > { %v7972_v42 = vpop.eup %6123  ;;  %6131 = vtanh.f32 %v2713_v15  ;;  %v1949_v38 = vmul.f32 %v1693_v58, %v7947_v6  ;;  %v1694_v22 = vmul.f32 %v7958_v39, %v7958_v39  ;;  %v3198_v51 = vadd.f32 1.0, %v7838_v37  ;;  %1381 = vmatmul.mubr.bf16.gmra.mrb[176].mxu1 %v11369_v52 }
 0x20f   : > { %v7979_v49 = vpop.eup %6125  ;;  %6133 = vtanh.f32 %v2714_v19  ;;  %4532 = vmatmul.mubr.bf16.gmra.mrb[36].mxu0 %v3985_v23  ;;  %v1697_v16 = vmul.f32 %v7966_v48, %v7966_v48  ;;  %v1698_v18 = vmul.f32 %v7970_v59, %v7970_v59  ;;  %v3202_v56 = vadd.f32 1.0, %v7856_v31  ;;  %1390 = vmatprep.mubr.bf16.mxu1 %v11370_v47 }
 0x210   : > { %v2205_v41 = vmul.f32 0.044715, %v1949_v38  ;;  %v1950_v40 = vmul.f32 %v1694_v22, %v7958_v39  ;;  %v3454_v37 = vmul.f32 0.5, %v3198_v51  ;;  %v3197_v43 = vadd.f32 1.0, %v7824_v9 }
 0x211   : > { %v1953_v33 = vmul.f32 %v1697_v16, %v7966_v48  ;;  %v1954_v10 = vmul.f32 %v1698_v18, %v7970_v59  ;;  %v3458_v24 = vmul.f32 0.5, %v3202_v56  ;;  %v3201_v5 = vadd.f32 1.0, %v7845_v27  ;;  %v7992_v15 = vpop.f32.mrb[72].mxu1 }
 0x212   : > { %v2461_v19 = vadd.f32 %v2205_v41, %v7947_v6  ;;  %v2206_v31 = vmul.f32 0.044715, %v1950_v40  ;;  %v3710_v58 = vmul.f32 %v3454_v37, %v7712_v32  ;;  %v3453_v23 = vmul.f32 0.5, %v3197_v43  ;;  %v7996_v38 = vpop.f32.mrb[73].mxu1 }
 0x213   : > { %v2209_v22 = vmul.f32 0.044715, %v1953_v33  ;;  %v2210_v51 = vmul.f32 0.044715, %v1954_v10  ;;  %v3714_v9 = vmul.f32 %v3458_v24, %v7733_v4  ;;  %v3457_v52 = vmul.f32 0.5, %v3201_v5  ;;  %v7999_v16 = vpop.f32.mrb[74].mxu1 }
 0x214   : > { %v2717_v18 = vmul.f32 0.7978846, %v2461_v19  ;;  %v2462_v27 = vadd.f32 %v2206_v31, %v7958_v39  ;;  %v3709_v56 = vmul.f32 %v3453_v23, %v7697_v7  ;;  %v8005_v47 = vadd.f32 %v7854_v61, %v7216_v14  ;;  %v8007_v32 = vpop.f32.mrb[75].mxu1  ;;  %v11371_v10 = vld [vmem:[#allocation30_spill] sm:$0xff] }
 0x215   : > { %v8009_v41 = vpop.eup %6127  ;;  %v2465_v40 = vadd.f32 %v2209_v22, %v7966_v48  ;;  %v2466_v4 = vadd.f32 %v2210_v51, %v7970_v59  ;;  %v3990_v37 = vpack.c.bf16 %v3714_v9, %v3710_v58  ;;  %v3713_v43 = vmul.f32 %v3457_v52, %v7716_v25  ;;  %v11372_v58 = vld [vmem:[#allocation31_spill] sm:$0xff]  ;;  %v6008_v9 = vld [vmem:[#allocation9 + $0x1b0] ss:$8 sps:$4 sm:$0xff]   ;;  %v6010_v52 = vld [vmem:[#allocation9 + $0x1b4] ss:$8 sps:$4 sm:$0xff]  }
 0x216   : > { %6135 = vtanh.f32 %v2717_v18  ;;  %v2718_v33 = vmul.f32 0.7978846, %v2462_v27  ;;  %v1701_v7 = vmul.f32 %v8005_v47, %v8005_v47  ;;  %v8018_v61 = vadd.f32 %v7861_v57, %v7220_v26  ;;  %1391 = vmatmul.mubr.bf16.gmra.mrb[180].mxu1 %v11371_v10  ;;  %4784 = vmatprep.subr.bf16.mxu0 %v6010_v52 }
 0x217   : > { %v8021_v24 = vpop.eup %6129  ;;  %v2721_v5 = vmul.f32 0.7978846, %v2465_v40  ;;  %v2722_v19 = vmul.f32 0.7978846, %v2466_v4  ;;  %4541 = vmatprep.mubr.bf16.mxu0 %v3990_v37  ;;  %v3989_v31 = vpack.c.bf16 %v3713_v43, %v3709_v56  ;;  %v8025_v25 = vadd.f32 %v7867_v54, %v7216_v14  ;;  %1400 = vmatprep.mubr.bf16.mxu1 %v11372_v58 }
 0x218   : > { %v8028_v23 = vpop.eup %6131  ;;  %6137 = vtanh.f32 %v2718_v33  ;;  %v1957_v57 = vmul.f32 %v1701_v7, %v8005_v47  ;;  %v1702_v22 = vmul.f32 %v8018_v61, %v8018_v61  ;;  %v8035_v51 = vadd.f32 %v7872_v8, %v7220_v26  ;;  %4785 = vmatpush1.bf16.msra.mxu0 %v6008_v9 }
 0x219   : > { %v8037_v18 = vpop.eup %6133  ;;  %6139 = vtanh.f32 %v2721_v5  ;;  %4542 = vmatmul.mubr.bf16.gmra.mrb[40].mxu0 %v3989_v31  ;;  %v1705_v54 = vmul.f32 %v8025_v25, %v8025_v25  ;;  %v3206_v27 = vadd.f32 1.0, %v7898_v12  ;;  %v3210_v56 = vadd.f32 1.0, %v7917_v53  ;;  %v8043_v40 = vpop.f32.mrb[76].mxu1 }
 0x21a   : > { %6141 = vtanh.f32 %v2722_v19  ;;  %v2213_v4 = vmul.f32 0.044715, %v1957_v57  ;;  %v1958_v8 = vmul.f32 %v1702_v22, %v8018_v61  ;;  %v1706_v37 = vmul.f32 %v8035_v51, %v8035_v51  ;;  %v8048_v43 = vpop.f32.mrb[77].mxu1 }
 0x21b   : > { %11373 = vst [vmem:[#allocation15_spill] sm:$0xff] %v8048_v43  ;;  %v1961_v33 = vmul.f32 %v1705_v54, %v8025_v25  ;;  %v3462_v7 = vmul.f32 0.5, %v3206_v27  ;;  %v3466_v10 = vmul.f32 0.5, %v3210_v56  ;;  %v3205_v12 = vadd.f32 1.0, %v7887_v20  ;;  %v8052_v5 = vpop.f32.mrb[78].mxu1  ;;  %v11375_v43 = vld [vmem:[#allocation32_spill] sm:$0xff] }
 0x21c   : > { %11374 = vst [vmem:[#allocation16_spill] sm:$0xff] %v8052_v5  ;;  %v2469_v53 = vadd.f32 %v2213_v4, %v8005_v47  ;;  %v2214_v19 = vmul.f32 0.044715, %v1958_v8  ;;  %v1962_v31 = vmul.f32 %v1706_v37, %v8035_v51  ;;  %v3209_v58 = vadd.f32 1.0, %v7910_v13  ;;  %v8057_v57 = vpop.f32.mrb[79].mxu1 }
 0x21d   : > { %v2217_v22 = vmul.f32 0.044715, %v1961_v33  ;;  %v3718_v52 = vmul.f32 %v3462_v7, %v7772_v36  ;;  %v3722_v54 = vmul.f32 %v3466_v10, %v7786_v55  ;;  %v3461_v27 = vmul.f32 0.5, %v3205_v12  ;;  %v11376_v36 = vld [vmem:[#allocation33_spill] sm:$0xff] }
 0x21e   : > { %v2725_v56 = vmul.f32 0.7978846, %v2469_v53  ;;  %v2470_v20 = vadd.f32 %v2214_v19, %v8018_v61  ;;  %v2218_v5 = vmul.f32 0.044715, %v1962_v31  ;;  %v3465_v9 = vmul.f32 0.5, %v3209_v58  ;;  %1401 = vmatmul.mubr.bf16.gmra.mrb[184].mxu1 %v11375_v43 }
 0x21f   : > { %v2473_v4 = vadd.f32 %v2217_v22, %v8025_v25  ;;  %v3994_v8 = vpack.c.bf16 %v3722_v54, %v3718_v52  ;;  %v3717_v13 = vmul.f32 %v3461_v27, %v7763_v3  ;;  %v8067_v37 = vadd.f32 %v7896_v63, %v7216_v14  ;;  %1410 = vmatprep.mubr.bf16.mxu1 %v11376_v36 }
 0x220   : > { %v8070_v55 = vpop.eup %6135  ;;  %6143 = vtanh.f32 %v2725_v56  ;;  %v2726_v33 = vmul.f32 0.7978846, %v2470_v20  ;;  %v2474_v7 = vadd.f32 %v2218_v5, %v8035_v51  ;;  %v3721_v10 = vmul.f32 %v3465_v9, %v7782_v50 }
 0x221   : > { %v2729_v43 = vmul.f32 0.7978846, %v2473_v4  ;;  %4551 = vmatprep.mubr.bf16.mxu0 %v3994_v8  ;;  %v1709_v12 = vmul.f32 %v8067_v37, %v8067_v37  ;;  %v8078_v3 = vadd.f32 %v7908_v11, %v7220_v26  ;;  %v8082_v63 = vadd.f32 %v7915_v46, %v7216_v14  ;;  %v8084_v53 = vpop.f32.mrb[80].mxu1 }
 0x222   : > { %v8086_v19 = vpop.eup %6137  ;;  %6145 = vtanh.f32 %v2726_v33  ;;  %v2730_v5 = vmul.f32 0.7978846, %v2474_v7  ;;  %v3993_v50 = vpack.c.bf16 %v3721_v10, %v3717_v13  ;;  %v8090_v31 = vadd.f32 %v7924_v62, %v7220_v26  ;;  %v8092_v58 = vpop.f32.mrb[81].mxu1 }
 0x223   : > { %v8094_v22 = vpop.eup %6139  ;;  %6147 = vtanh.f32 %v2729_v43  ;;  %v1965_v11 = vmul.f32 %v1709_v12, %v8067_v37  ;;  %v1710_v46 = vmul.f32 %v8078_v3, %v8078_v3  ;;  %v1713_v52 = vmul.f32 %v8082_v63, %v8082_v63  ;;  %v8101_v54 = vpop.f32.mrb[82].mxu1  ;;  %v11378_v12 = vld [vmem:[#allocation34_spill] sm:$0xff] }
 0x224   : > { %v8103_v27 = vpop.eup %6141  ;;  %6149 = vtanh.f32 %v2730_v5  ;;  %4552 = vmatmul.mubr.bf16.gmra.mrb[44].mxu0 %v3993_v50  ;;  %v1714_v62 = vmul.f32 %v8090_v31, %v8090_v31  ;;  %v3214_v56 = vadd.f32 1.0, %v7962_v30  ;;  %v3218_v20 = vadd.f32 1.0, %v7979_v49  ;;  %v8109_v9 = vpop.f32.mrb[83].mxu1 }
 0x225   : > { %11377 = vst [vmem:[#allocation17_spill] sm:$0xff] %v8109_v9  ;;  %v2221_v4 = vmul.f32 0.044715, %v1965_v11  ;;  %v1966_v8 = vmul.f32 %v1710_v46, %v8078_v3  ;;  %v1969_v13 = vmul.f32 %v1713_v52, %v8082_v63  ;;  %v3213_v36 = vadd.f32 1.0, %v7940_v17  ;;  %v11379_v11 = vld [vmem:[#allocation35_spill] sm:$0xff] }
 0x226   : > { %v1970_v33 = vmul.f32 %v1714_v62, %v8090_v31  ;;  %v3470_v7 = vmul.f32 0.5, %v3214_v56  ;;  %v3474_v10 = vmul.f32 0.5, %v3218_v20  ;;  %v3217_v43 = vadd.f32 1.0, %v7972_v42  ;;  %1411 = vmatmul.mubr.bf16.gmra.mrb[188].mxu1 %v11378_v12 }
 0x227   : > { %v2477_v30 = vadd.f32 %v2221_v4, %v8067_v37  ;;  %v2222_v49 = vmul.f32 0.044715, %v1966_v8  ;;  %v2225_v5 = vmul.f32 0.044715, %v1969_v13  ;;  %v3469_v50 = vmul.f32 0.5, %v3213_v36  ;;  %1420 = vmatprep.mubr.bf16.mxu1 %v11379_v11  ;;  %v11380_v36 = vld [vmem:[#allocation14_spill] sm:$0xff] }
 0x228   : > { %v2226_v46 = vmul.f32 0.044715, %v1970_v33  ;;  %v3726_v52 = vmul.f32 %v3470_v7, %v7835_v21  ;;  %v3730_v17 = vmul.f32 %v3474_v10, %v7851_v28  ;;  %v3473_v9 = vmul.f32 0.5, %v3217_v43 }
 0x229   : > { %v2733_v62 = vmul.f32 0.7978846, %v2477_v30  ;;  %v2478_v56 = vadd.f32 %v2222_v49, %v8078_v3  ;;  %v2481_v42 = vadd.f32 %v2225_v5, %v8082_v63  ;;  %v3725_v20 = vmul.f32 %v3469_v50, %v7820_v35  ;;  %v8124_v12 = vpop.f32.mrb[84].mxu1 }
 0x22a   : > { %v8126_v4 = vpop.eup %6143  ;;  %v2482_v8 = vadd.f32 %v2226_v46, %v8090_v31  ;;  %v3998_v13 = vpack.c.bf16 %v3730_v17, %v3726_v52  ;;  %v3729_v33 = vmul.f32 %v3473_v9, %v11380_v36  ;;  %v8132_v21 = vadd.f32 %v7938_v29, %v7216_v14  ;;  %v8134_v28 = vpop.f32.mrb[85].mxu1  ;;  %v6011_v17 = vld [vmem:[#allocation9 + $0x1c0] ss:$8 sps:$4 sm:$0xff]   ;;  %v11382_v36 = vld [vmem:[#allocation37_spill] sm:$0xff] }
 0x22b   : > { %6151 = vtanh.f32 %v2733_v62  ;;  %v2734_v7 = vmul.f32 0.7978846, %v2478_v56  ;;  %v2737_v10 = vmul.f32 0.7978846, %v2481_v42  ;;  %v8138_v35 = vadd.f32 %v7949_v0, %v7220_v26  ;;  %v8140_v43 = vpop.f32.mrb[86].mxu1 }
 0x22c   : > { %v8142_v30 = vpop.eup %6145  ;;  %v2738_v49 = vmul.f32 0.7978846, %v2482_v8  ;;  %4561 = vmatprep.mubr.bf16.mxu0 %v3998_v13  ;;  %v3997_v9 = vpack.c.bf16 %v3729_v33, %v3725_v20  ;;  %v1717_v29 = vmul.f32 %v8132_v21, %v8132_v21  ;;  %v8148_v5 = vadd.f32 %v7952_v60, %v7216_v14  ;;  %v8150_v50 = vpop.f32.mrb[87].mxu1  ;;  %v6013_v62 = vld [vmem:[#allocation9 + $0x1c4] ss:$8 sps:$4 sm:$0xff]   ;;  %v11381_v8 = vld [vmem:[#allocation36_spill] sm:$0xff] }
 0x22d   : > { %v8152_v11 = vpop.eup %6147  ;;  %6153 = vtanh.f32 %v2734_v7  ;;  %v1718_v0 = vmul.f32 %v8138_v35, %v8138_v35  ;;  %v8158_v46 = vadd.f32 %v7960_v1, %v7220_v26  ;;  %v3222_v52 = vadd.f32 1.0, %v8021_v24  ;;  %4786 = vmatprep.subr.bf16.mxu0 %v6013_v62 }
 0x22e   : > { %v8161_v56 = vpop.eup %6149  ;;  %6155 = vtanh.f32 %v2737_v10  ;;  %4562 = vmatmul.mubr.bf16.gmra.mrb[48].mxu0 %v3997_v9  ;;  %v1973_v60 = vmul.f32 %v1717_v29, %v8132_v21  ;;  %v1721_v42 = vmul.f32 %v8148_v5, %v8148_v5  ;;  %v3226_v20 = vadd.f32 1.0, %v8037_v18  ;;  %1421 = vmatmul.mubr.bf16.gmra.mrb[192].mxu1 %v11381_v8 }
 0x22f   : > { %6157 = vtanh.f32 %v2738_v49  ;;  %v1974_v1 = vmul.f32 %v1718_v0, %v8138_v35  ;;  %v1722_v24 = vmul.f32 %v8158_v46, %v8158_v46  ;;  %v3478_v13 = vmul.f32 0.5, %v3222_v52  ;;  %1430 = vmatprep.mubr.bf16.mxu1 %v11382_v36  ;;  %4787 = vmatpush1.bf16.msra.mxu0 %v6011_v17 }
 0x230   : > { %v2229_v33 = vmul.f32 0.044715, %v1973_v60  ;;  %v1977_v7 = vmul.f32 %v1721_v42, %v8148_v5  ;;  %v3482_v10 = vmul.f32 0.5, %v3226_v20  ;;  %v3221_v9 = vadd.f32 1.0, %v8009_v41 }
 0x231   : > { %v2230_v18 = vmul.f32 0.044715, %v1974_v1  ;;  %v1978_v29 = vmul.f32 %v1722_v24, %v8158_v46  ;;  %v3734_v49 = vmul.f32 %v3478_v13, %v7894_v2  ;;  %v3225_v0 = vadd.f32 1.0, %v8028_v23  ;;  %v8177_v8 = vpop.f32.mrb[88].mxu1 }
 0x232   : > { %v2485_v52 = vadd.f32 %v2229_v33, %v8132_v21  ;;  %v2233_v36 = vmul.f32 0.044715, %v1977_v7  ;;  %v3738_v62 = vmul.f32 %v3482_v10, %v7906_v45  ;;  %v3477_v60 = vmul.f32 0.5, %v3221_v9  ;;  %v8181_v42 = vpop.f32.mrb[89].mxu1 }
 0x233   : > { %v2486_v41 = vadd.f32 %v2230_v18, %v8138_v35  ;;  %v2234_v17 = vmul.f32 0.044715, %v1978_v29  ;;  %v3481_v20 = vmul.f32 0.5, %v3225_v0  ;;  %v8186_v1 = vadd.f32 %v7992_v15, %v7216_v14  ;;  %v8188_v2 = vpop.f32.mrb[90].mxu1  ;;  %v11384_v0 = vld [vmem:[#allocation38_spill] sm:$0xff] }
 0x234   : > { %v2741_v23 = vmul.f32 0.7978846, %v2485_v52  ;;  %v2489_v24 = vadd.f32 %v2233_v36, %v8148_v5  ;;  %v4002_v13 = vpack.c.bf16 %v3738_v62, %v3734_v49  ;;  %v3733_v33 = vmul.f32 %v3477_v60, %v7882_v44  ;;  %v8192_v45 = vpop.f32.mrb[91].mxu1  ;;  %v11385_v60 = vld [vmem:[#allocation39_spill] sm:$0xff] }
 0x235   : > { %11383 = vst [vmem:[#allocation18_spill] sm:$0xff] %v8192_v45  ;;  %v8194_v7 = vpop.eup %6151  ;;  %v2742_v10 = vmul.f32 0.7978846, %v2486_v41  ;;  %v2490_v9 = vadd.f32 %v2234_v17, %v8158_v46  ;;  %v3737_v18 = vmul.f32 %v3481_v20, %v7902_v34  ;;  %v1725_v15 = vmul.f32 %v8186_v1, %v8186_v1 }
 0x236   : > { %6159 = vtanh.f32 %v2741_v23  ;;  %v2745_v29 = vmul.f32 0.7978846, %v2489_v24  ;;  %4571 = vmatprep.mubr.bf16.mxu0 %v4002_v13  ;;  %v8202_v49 = vadd.f32 %v7996_v38, %v7220_v26  ;;  %v8206_v44 = vadd.f32 %v7999_v16, %v7216_v14  ;;  %1431 = vmatmul.mubr.bf16.gmra.mrb[196].mxu1 %v11384_v0 }
 0x237   : > { %v8209_v52 = vpop.eup %6153  ;;  %6161 = vtanh.f32 %v2742_v10  ;;  %v2746_v34 = vmul.f32 0.7978846, %v2490_v9  ;;  %v4001_v36 = vpack.c.bf16 %v3737_v18, %v3733_v33  ;;  %v1981_v62 = vmul.f32 %v1725_v15, %v8186_v1  ;;  %1440 = vmatprep.mubr.bf16.mxu1 %v11385_v60 }
 0x238   : > { %v8213_v41 = vpop.eup %6155  ;;  %6163 = vtanh.f32 %v2745_v29  ;;  %v1726_v38 = vmul.f32 %v8202_v49, %v8202_v49  ;;  %v1729_v16 = vmul.f32 %v8206_v44, %v8206_v44  ;;  %v8221_v17 = vadd.f32 %v8007_v32, %v7220_v26 }
 0x239   : > { %v8223_v20 = vpop.eup %6157  ;;  %6165 = vtanh.f32 %v2746_v34  ;;  %4572 = vmatmul.mubr.bf16.gmra.mrb[52].mxu0 %v4001_v36  ;;  %v2237_v23 = vmul.f32 0.044715, %v1981_v62  ;;  %v3230_v24 = vadd.f32 1.0, %v8086_v19  ;;  %v3234_v13 = vadd.f32 1.0, %v8103_v27  ;;  %v8227_v33 = vpop.f32.mrb[92].mxu1 }
 0x23a   : > { %11386 = vst [vmem:[#allocation19_spill] sm:$0xff] %v8227_v33  ;;  %v1982_v10 = vmul.f32 %v1726_v38, %v8202_v49  ;;  %v1985_v9 = vmul.f32 %v1729_v16, %v8206_v44  ;;  %v1730_v18 = vmul.f32 %v8221_v17, %v8221_v17  ;;  %v3229_v32 = vadd.f32 1.0, %v8070_v55  ;;  %v8234_v15 = vpop.f32.mrb[93].mxu1 }
 0x23b   : > { %11387 = vst [vmem:[#allocation20_spill] sm:$0xff] %v8234_v15  ;;  %v2493_v29 = vadd.f32 %v2237_v23, %v8186_v1  ;;  %v3486_v0 = vmul.f32 0.5, %v3230_v24  ;;  %v3490_v34 = vmul.f32 0.5, %v3234_v13  ;;  %v3233_v19 = vadd.f32 1.0, %v8094_v22  ;;  %v8238_v27 = vpop.f32.mrb[94].mxu1 }
 0x23c   : > { %v2238_v36 = vmul.f32 0.044715, %v1982_v10  ;;  %v2241_v62 = vmul.f32 0.044715, %v1985_v9  ;;  %v1986_v60 = vmul.f32 %v1730_v18, %v8221_v17  ;;  %v3485_v38 = vmul.f32 0.5, %v3229_v32  ;;  %v8241_v16 = vpop.f32.mrb[95].mxu1 }
 0x23d   : > { %v2749_v33 = vmul.f32 0.7978846, %v2493_v29  ;;  %v3742_v55 = vmul.f32 %v3486_v0, %v7958_v39  ;;  %v3746_v15 = vmul.f32 %v3490_v34, %v7970_v59  ;;  %v3489_v45 = vmul.f32 0.5, %v3233_v19  ;;  %v11388_v10 = vld [vmem:[#allocation40_spill] sm:$0xff]  ;;  %v11389_v39 = vld [vmem:[#allocation41_spill] sm:$0xff] }
 0x23e   : > { %v2494_v23 = vadd.f32 %v2238_v36, %v8202_v49  ;;  %v2497_v24 = vadd.f32 %v2241_v62, %v8206_v44  ;;  %v2242_v22 = vmul.f32 0.044715, %v1986_v60  ;;  %v3741_v13 = vmul.f32 %v3485_v38, %v7947_v6  ;;  %1441 = vmatmul.mubr.bf16.gmra.mrb[200].mxu1 %v11388_v10  ;;  %v11390_v6 = vld [vmem:[#allocation15_spill] sm:$0xff] }
 0x23f   : > { %6167 = vtanh.f32 %v2749_v33  ;;  %v4006_v9 = vpack.c.bf16 %v3746_v15, %v3742_v55  ;;  %v3745_v18 = vmul.f32 %v3489_v45, %v7966_v48  ;;  %v8252_v32 = vadd.f32 %v8043_v40, %v7216_v14  ;;  %1450 = vmatprep.mubr.bf16.mxu1 %v11389_v39  ;;  %v11391_v45 = vld [vmem:[#allocation16_spill] sm:$0xff] }
 0x240   : > { %v8255_v59 = vpop.eup %6159  ;;  %v2750_v29 = vmul.f32 0.7978846, %v2494_v23  ;;  %v2753_v0 = vmul.f32 0.7978846, %v2497_v24  ;;  %v2498_v34 = vadd.f32 %v2242_v22, %v8221_v17  ;;  %v8260_v19 = vadd.f32 %v11390_v6, %v7220_v26  ;;  %v6014_v22 = vld [vmem:[#allocation9 + $0x1d0] ss:$8 sps:$4 sm:$0xff]  }
 0x241   : > { %v8262_v33 = vpop.eup %6161  ;;  %4581 = vmatprep.mubr.bf16.mxu0 %v4006_v9  ;;  %v4005_v48 = vpack.c.bf16 %v3745_v18, %v3741_v13  ;;  %v1733_v40 = vmul.f32 %v8252_v32, %v8252_v32  ;;  %v8268_v15 = vadd.f32 %v11391_v45, %v7216_v14  ;;  %v8272_v36 = vadd.f32 %v8057_v57, %v7220_v26  ;;  %v8274_v62 = vpop.f32.mrb[96].mxu1  ;;  %v6016_v39 = vld [vmem:[#allocation9 + $0x1d4] ss:$8 sps:$4 sm:$0xff]  }
 0x242   : > { %11392 = vst [vmem:[#allocation21_spill] sm:$0xff] %v8274_v62  ;;  %v8276_v60 = vpop.eup %6163  ;;  %6169 = vtanh.f32 %v2750_v29  ;;  %v2754_v38 = vmul.f32 0.7978846, %v2498_v34  ;;  %v1734_v55 = vmul.f32 %v8260_v19, %v8260_v19  ;;  %v3238_v23 = vadd.f32 1.0, %v8142_v30  ;;  %v8281_v24 = vpop.f32.mrb[97].mxu1  ;;  %4788 = vmatprep.subr.bf16.mxu0 %v6016_v39 }
 0x243   : > { %11393 = vst [vmem:[#allocation22_spill] sm:$0xff] %v8281_v24  ;;  %v8283_v13 = vpop.eup %6165  ;;  %6171 = vtanh.f32 %v2753_v0  ;;  %4582 = vmatmul.mubr.bf16.gmra.mrb[56].mxu0 %v4005_v48  ;;  %v1989_v57 = vmul.f32 %v1733_v40, %v8252_v32  ;;  %v1737_v10 = vmul.f32 %v8268_v15, %v8268_v15  ;;  %v1738_v9 = vmul.f32 %v8272_v36, %v8272_v36  ;;  %v8290_v18 = vpop.f32.mrb[98].mxu1 }
 0x244   : > { %11394 = vst [vmem:[#allocation23_spill] sm:$0xff] %v8290_v18  ;;  %6173 = vtanh.f32 %v2754_v38  ;;  %v1990_v30 = vmul.f32 %v1734_v55, %v8260_v19  ;;  %v3242_v29 = vadd.f32 1.0, %v8161_v56  ;;  %v3494_v34 = vmul.f32 0.5, %v3238_v23  ;;  %v8294_v6 = vpop.f32.mrb[99].mxu1  ;;  %v11396_v55 = vld [vmem:[#allocation42_spill] sm:$0xff]  ;;  %4789 = vmatpush1.bf16.msra.mxu0 %v6014_v22 }
 0x245   : > { %11395 = vst [vmem:[#allocation24_spill] sm:$0xff] %v8294_v6  ;;  %v2245_v0 = vmul.f32 0.044715, %v1989_v57  ;;  %v1993_v48 = vmul.f32 %v1737_v10, %v8268_v15  ;;  %v1994_v40 = vmul.f32 %v1738_v9, %v8272_v36  ;;  %v3237_v45 = vadd.f32 1.0, %v8126_v4  ;;  %v11397_v10 = vld [vmem:[#allocation43_spill] sm:$0xff] }
 0x246   : > { %v2246_v24 = vmul.f32 0.044715, %v1990_v30  ;;  %v3498_v62 = vmul.f32 0.5, %v3242_v29  ;;  %v3750_v18 = vmul.f32 %v3494_v34, %v8018_v61  ;;  %v3241_v38 = vadd.f32 1.0, %v8152_v11  ;;  %1451 = vmatmul.mubr.bf16.gmra.mrb[204].mxu1 %v11396_v55 }
 0x247   : > { %v2501_v56 = vadd.f32 %v2245_v0, %v8252_v32  ;;  %v2249_v23 = vmul.f32 0.044715, %v1993_v48  ;;  %v2250_v57 = vmul.f32 0.044715, %v1994_v40  ;;  %v3493_v6 = vmul.f32 0.5, %v3237_v45  ;;  %1460 = vmatprep.mubr.bf16.mxu1 %v11397_v10 }
 0x248   : > { %v2502_v9 = vadd.f32 %v2246_v24, %v8260_v19  ;;  %v3754_v4 = vmul.f32 %v3498_v62, %v8035_v51  ;;  %v3497_v39 = vmul.f32 0.5, %v3241_v38  ;;  %v8308_v61 = vadd.f32 %v8084_v53, %v7216_v14 }
 0x249   : > { %v8310_v11 = vpop.eup %6167  ;;  %v2757_v30 = vmul.f32 0.7978846, %v2501_v56  ;;  %v2505_v22 = vadd.f32 %v2249_v23, %v8268_v15  ;;  %v2506_v29 = vadd.f32 %v2250_v57, %v8272_v36  ;;  %v3749_v34 = vmul.f32 %v3493_v6, %v8005_v47  ;;  %v8315_v0 = vpop.f32.mrb[100].mxu1  ;;  %v11399_v57 = vld [vmem:[#allocation17_spill] sm:$0xff] }
 0x24a   : > { %v2758_v48 = vmul.f32 0.7978846, %v2502_v9  ;;  %v4010_v24 = vpack.c.bf16 %v3754_v4, %v3750_v18  ;;  %v3753_v51 = vmul.f32 %v3497_v39, %v8025_v25  ;;  %v1741_v62 = vmul.f32 %v8308_v61, %v8308_v61  ;;  %v8320_v53 = vpop.f32.mrb[101].mxu1 }
 0x24b   : > { %6175 = vtanh.f32 %v2757_v30  ;;  %v2761_v40 = vmul.f32 0.7978846, %v2505_v22  ;;  %v2762_v45 = vmul.f32 0.7978846, %v2506_v29  ;;  %v8324_v38 = vadd.f32 %v8092_v58, %v7220_v26  ;;  %v8326_v55 = vpop.f32.mrb[102].mxu1  ;;  %v11400_v22 = vld [vmem:[#allocation44_spill] sm:$0xff] }
 0x24c   : > { %v8328_v47 = vpop.eup %6169  ;;  %6177 = vtanh.f32 %v2758_v48  ;;  %4591 = vmatprep.mubr.bf16.mxu0 %v4010_v24  ;;  %v4009_v18 = vpack.c.bf16 %v3753_v51, %v3749_v34  ;;  %v1997_v25 = vmul.f32 %v1741_v62, %v8308_v61  ;;  %v8333_v6 = vadd.f32 %v8101_v54, %v7216_v14  ;;  %v8335_v56 = vpop.f32.mrb[103].mxu1  ;;  %v11401_v24 = vld [vmem:[#allocation45_spill] sm:$0xff] }
 0x24d   : > { %11398 = vst [vmem:[#allocation25_spill] sm:$0xff] %v8335_v56  ;;  %v8337_v23 = vpop.eup %6171  ;;  %6179 = vtanh.f32 %v2761_v40  ;;  %v1742_v58 = vmul.f32 %v8324_v38, %v8324_v38  ;;  %v8343_v10 = vadd.f32 %v11399_v57, %v7220_v26  ;;  %v3246_v9 = vadd.f32 1.0, %v8209_v52 }
 0x24e   : > { %v8346_v4 = vpop.eup %6173  ;;  %6181 = vtanh.f32 %v2762_v45  ;;  %4592 = vmatmul.mubr.bf16.gmra.mrb[60].mxu0 %v4009_v18  ;;  %v2253_v54 = vmul.f32 0.044715, %v1997_v25  ;;  %v1745_v39 = vmul.f32 %v8333_v6, %v8333_v6  ;;  %v3250_v30 = vadd.f32 1.0, %v8223_v20  ;;  %1461 = vmatmul.mubr.bf16.gmra.mrb[208].mxu1 %v11400_v22 }
 0x24f   : > { %v1998_v29 = vmul.f32 %v1742_v58, %v8324_v38  ;;  %v1746_v34 = vmul.f32 %v8343_v10, %v8343_v10  ;;  %v3502_v48 = vmul.f32 0.5, %v3246_v9  ;;  %v3245_v52 = vadd.f32 1.0, %v8194_v7  ;;  %1470 = vmatprep.mubr.bf16.mxu1 %v11401_v24 }
 0x250   : > { %v2509_v51 = vadd.f32 %v2253_v54, %v8308_v61  ;;  %v2001_v62 = vmul.f32 %v1745_v39, %v8333_v6  ;;  %v3506_v40 = vmul.f32 0.5, %v3250_v30  ;;  %v3249_v45 = vadd.f32 1.0, %v8213_v41 }
 0x251   : > { %v2254_v20 = vmul.f32 0.044715, %v1998_v29  ;;  %v2002_v18 = vmul.f32 %v1746_v34, %v8343_v10  ;;  %v3758_v25 = vmul.f32 %v3502_v48, %v8078_v3  ;;  %v3501_v58 = vmul.f32 0.5, %v3245_v52  ;;  %v8362_v57 = vpop.f32.mrb[104].mxu1 }
 0x252   : > { %v2765_v9 = vmul.f32 0.7978846, %v2509_v51  ;;  %v2257_v22 = vmul.f32 0.044715, %v2001_v62  ;;  %v3762_v7 = vmul.f32 %v3506_v40, %v8090_v31  ;;  %v3505_v24 = vmul.f32 0.5, %v3249_v45  ;;  %v8365_v56 = vpop.f32.mrb[105].mxu1 }
 0x253   : > { %v2510_v54 = vadd.f32 %v2254_v20, %v8324_v38  ;;  %v2258_v39 = vmul.f32 0.044715, %v2002_v18  ;;  %v3757_v41 = vmul.f32 %v3501_v58, %v8067_v37  ;;  %v8371_v30 = vadd.f32 %v8124_v12, %v7216_v14  ;;  %v8373_v3 = vpop.f32.mrb[106].mxu1 }
 0x254   : > { %6183 = vtanh.f32 %v2765_v9  ;;  %v2513_v29 = vadd.f32 %v2257_v22, %v8333_v6  ;;  %v4014_v34 = vpack.c.bf16 %v3762_v7, %v3758_v25  ;;  %v3761_v31 = vmul.f32 %v3505_v24, %v8082_v63  ;;  %v8377_v48 = vpop.f32.mrb[107].mxu1  ;;  %v11402_v25 = vld [vmem:[#allocation46_spill] sm:$0xff]  ;;  %v11403_v7 = vld [vmem:[#allocation47_spill] sm:$0xff] }
 0x255   : > { %v8379_v52 = vpop.eup %6175  ;;  %v2766_v51 = vmul.f32 0.7978846, %v2510_v54  ;;  %v2514_v62 = vadd.f32 %v2258_v39, %v8343_v10  ;;  %v1749_v37 = vmul.f32 %v8371_v30, %v8371_v30  ;;  %v8386_v12 = vadd.f32 %v8134_v28, %v7220_v26 }
 0x256   : > { %v8388_v40 = vpop.eup %6177  ;;  %v2769_v45 = vmul.f32 0.7978846, %v2513_v29  ;;  %4601 = vmatprep.mubr.bf16.mxu0 %v4014_v34  ;;  %v4013_v20 = vpack.c.bf16 %v3761_v31, %v3757_v41  ;;  %v8392_v63 = vadd.f32 %v8140_v43, %v7216_v14  ;;  %v8396_v18 = vadd.f32 %v8150_v50, %v7220_v26  ;;  %1471 = vmatmul.mubr.bf16.gmra.mrb[212].mxu1 %v11402_v25 }
 0x257   : > { %v8399_v58 = vpop.eup %6179  ;;  %6185 = vtanh.f32 %v2766_v51  ;;  %v2770_v28 = vmul.f32 0.7978846, %v2514_v62  ;;  %v2005_v9 = vmul.f32 %v1749_v37, %v8371_v30  ;;  %v1750_v22 = vmul.f32 %v8386_v12, %v8386_v12  ;;  %1480 = vmatprep.mubr.bf16.mxu1 %v11403_v7 }
 0x258   : > { %v8405_v24 = vpop.eup %6181  ;;  %6187 = vtanh.f32 %v2769_v45  ;;  %4602 = vmatmul.mubr.bf16.gmra.mrb[64].mxu0 %v4013_v20  ;;  %v1753_v43 = vmul.f32 %v8392_v63, %v8392_v63  ;;  %v1754_v50 = vmul.f32 %v8396_v18, %v8396_v18  ;;  %v3254_v54 = vadd.f32 1.0, %v8262_v33 }
 0x259   : > { %6189 = vtanh.f32 %v2770_v28  ;;  %v2261_v39 = vmul.f32 0.044715, %v2005_v9  ;;  %v2006_v41 = vmul.f32 %v1750_v22, %v8386_v12  ;;  %v3258_v29 = vadd.f32 1.0, %v8283_v13  ;;  %v8414_v34 = vpop.f32.mrb[108].mxu1 }
 0x25a   : > { %11404 = vst [vmem:[#allocation26_spill] sm:$0xff] %v8414_v34  ;;  %v2009_v31 = vmul.f32 %v1753_v43, %v8392_v63  ;;  %v2010_v51 = vmul.f32 %v1754_v50, %v8396_v18  ;;  %v3510_v62 = vmul.f32 0.5, %v3254_v54  ;;  %v3253_v37 = vadd.f32 1.0, %v8255_v59  ;;  %v8419_v45 = vpop.f32.mrb[109].mxu1 }
 0x25b   : > { %11405 = vst [vmem:[#allocation27_spill] sm:$0xff] %v8419_v45  ;;  %v2517_v20 = vadd.f32 %v2261_v39, %v8371_v30  ;;  %v2262_v33 = vmul.f32 0.044715, %v2006_v41  ;;  %v3514_v25 = vmul.f32 0.5, %v3258_v29  ;;  %v3257_v28 = vadd.f32 1.0, %v8276_v60  ;;  %v8423_v9 = vpop.f32.mrb[110].mxu1 }
 0x25c   : > { %v2265_v13 = vmul.f32 0.044715, %v2009_v31  ;;  %v2266_v22 = vmul.f32 0.044715, %v2010_v51  ;;  %v3766_v7 = vmul.f32 %v3510_v62, %v8138_v35  ;;  %v3509_v43 = vmul.f32 0.5, %v3253_v37  ;;  %v8426_v34 = vpop.f32.mrb[111].mxu1 }
 0x25d   : > { %v2773_v50 = vmul.f32 0.7978846, %v2517_v20  ;;  %v2518_v59 = vadd.f32 %v2262_v33, %v8386_v12  ;;  %v3770_v54 = vmul.f32 %v3514_v25, %v8158_v46  ;;  %v3513_v45 = vmul.f32 0.5, %v3257_v28  ;;  %v11406_v31 = vld [vmem:[#allocation48_spill] sm:$0xff]  ;;  %v11407_v37 = vld [vmem:[#allocation49_spill] sm:$0xff] }
 0x25e   : > { %v8430_v39 = vpop.eup %6183  ;;  %v2521_v41 = vadd.f32 %v2265_v13, %v8392_v63  ;;  %v2522_v60 = vadd.f32 %v2266_v22, %v8396_v18  ;;  %v3765_v29 = vmul.f32 %v3509_v43, %v8132_v21  ;;  %v8437_v35 = vadd.f32 %v8177_v8, %v7216_v14  ;;  %1481 = vmatmul.mubr.bf16.gmra.mrb[216].mxu1 %v11406_v31 }
 0x25f   : > { %6191 = vtanh.f32 %v2773_v50  ;;  %v2774_v51 = vmul.f32 0.7978846, %v2518_v59  ;;  %v4018_v62 = vpack.c.bf16 %v3770_v54, %v3766_v7  ;;  %v3769_v46 = vmul.f32 %v3513_v45, %v8148_v5  ;;  %1490 = vmatprep.mubr.bf16.mxu1 %v11407_v37  ;;  %v11408_v5 = vld [vmem:[#allocation18_spill] sm:$0xff] }
 0x260   : > { %v2777_v20 = vmul.f32 0.7978846, %v2521_v41  ;;  %v2778_v33 = vmul.f32 0.7978846, %v2522_v60  ;;  %v1757_v25 = vmul.f32 %v8437_v35, %v8437_v35  ;;  %v8446_v21 = vadd.f32 %v8181_v42, %v7220_v26 }
 0x261   : > { %v8448_v8 = vpop.eup %6185  ;;  %6193 = vtanh.f32 %v2774_v51  ;;  %4611 = vmatprep.mubr.bf16.mxu0 %v4018_v62  ;;  %v4017_v28 = vpack.c.bf16 %v3769_v46, %v3765_v29  ;;  %v8452_v13 = vadd.f32 %v8188_v2, %v7216_v14  ;;  %v8456_v45 = vadd.f32 %v11408_v5, %v7220_v26  ;;  %v8458_v22 = vpop.f32.mrb[112].mxu1 }
 0x262   : > { %v8460_v7 = vpop.eup %6187  ;;  %6195 = vtanh.f32 %v2777_v20  ;;  %v2013_v42 = vmul.f32 %v1757_v25, %v8437_v35  ;;  %v1758_v43 = vmul.f32 %v8446_v21, %v8446_v21  ;;  %v3262_v50 = vadd.f32 1.0, %v8328_v47  ;;  %v8466_v59 = vpop.f32.mrb[113].mxu1 }
 0x263   : > { %11409 = vst [vmem:[#allocation28_spill] sm:$0xff] %v8466_v59  ;;  %v8468_v2 = vpop.eup %6189  ;;  %6197 = vtanh.f32 %v2778_v33  ;;  %4612 = vmatmul.mubr.bf16.gmra.mrb[68].mxu0 %v4017_v28  ;;  %v1761_v54 = vmul.f32 %v8452_v13, %v8452_v13  ;;  %v1762_v41 = vmul.f32 %v8456_v45, %v8456_v45  ;;  %v3266_v60 = vadd.f32 1.0, %v8346_v4  ;;  %v8475_v29 = vpop.f32.mrb[114].mxu1  ;;  %v11413_v59 = vld [vmem:[#allocation51_spill] sm:$0xff] }
 0x264   : > { %11410 = vst [vmem:[#allocation29_spill] sm:$0xff] %v8475_v29  ;;  %v2269_v31 = vmul.f32 0.044715, %v2013_v42  ;;  %v2014_v51 = vmul.f32 %v1758_v43, %v8446_v21  ;;  %v3518_v47 = vmul.f32 0.5, %v3262_v50  ;;  %v3261_v62 = vadd.f32 1.0, %v8310_v11  ;;  %v8479_v46 = vpop.f32.mrb[115].mxu1 }
 0x265   : > { %11411 = vst [vmem:[#allocation30_spill] sm:$0xff] %v8479_v46  ;;  %v2017_v37 = vmul.f32 %v1761_v54, %v8452_v13  ;;  %v2018_v20 = vmul.f32 %v1762_v41, %v8456_v45  ;;  %v3522_v33 = vmul.f32 0.5, %v3266_v60  ;;  %v3265_v25 = vadd.f32 1.0, %v8337_v23  ;;  %v11412_v29 = vld [vmem:[#allocation50_spill] sm:$0xff]  ;;  %v11414_v60 = vld [vmem:[#allocation19_spill] sm:$0xff] }
 0x266   : > { %v2525_v28 = vadd.f32 %v2269_v31, %v8437_v35  ;;  %v2270_v4 = vmul.f32 0.044715, %v2014_v51  ;;  %v3774_v5 = vmul.f32 %v3518_v47, %v8202_v49  ;;  %v3517_v42 = vmul.f32 0.5, %v3261_v62  ;;  %1491 = vmatmul.mubr.bf16.gmra.mrb[220].mxu1 %v11412_v29 }
 0x267   : > { %v2273_v43 = vmul.f32 0.044715, %v2017_v37  ;;  %v2274_v50 = vmul.f32 0.044715, %v2018_v20  ;;  %v3778_v11 = vmul.f32 %v3522_v33, %v8221_v17  ;;  %v3521_v46 = vmul.f32 0.5, %v3265_v25  ;;  %1500 = vmatprep.mubr.bf16.mxu1 %v11413_v59  ;;  %v11415_v33 = vld [vmem:[#allocation20_spill] sm:$0xff] }
 0x268   : > { %v2781_v54 = vmul.f32 0.7978846, %v2525_v28  ;;  %v2526_v41 = vadd.f32 %v2270_v4, %v8446_v21  ;;  %v3773_v23 = vmul.f32 %v3517_v42, %v8186_v1  ;;  %v8493_v31 = vadd.f32 %v11414_v60, %v7216_v14  ;;  %v6017_v59 = vld [vmem:[#allocation9 + $0x1e0] ss:$8 sps:$4 sm:$0xff]   ;;  %v6019_v37 = vld [vmem:[#allocation9 + $0x1e4] ss:$8 sps:$4 sm:$0xff]  }
 0x269   : > { %v8495_v49 = vpop.eup %6191  ;;  %v2529_v29 = vadd.f32 %v2273_v43, %v8452_v13  ;;  %v2530_v51 = vadd.f32 %v2274_v50, %v8456_v45  ;;  %v4022_v47 = vpack.c.bf16 %v3778_v11, %v3774_v5  ;;  %v3777_v17 = vmul.f32 %v3521_v46, %v8206_v44  ;;  %v8500_v62 = vpop.f32.mrb[116].mxu1  ;;  %4790 = vmatprep.subr.bf16.mxu0 %v6019_v37  ;;  %v11418_v37 = vld [vmem:[#allocation52_spill] sm:$0xff] }
 0x26a   : > { %6199 = vtanh.f32 %v2781_v54  ;;  %v2782_v20 = vmul.f32 0.7978846, %v2526_v41  ;;  %v1765_v1 = vmul.f32 %v8493_v31, %v8493_v31  ;;  %v8506_v25 = vadd.f32 %v11415_v33, %v7220_v26  ;;  %v8508_v28 = vpop.f32.mrb[117].mxu1  ;;  %4791 = vmatpush1.bf16.msra.mxu0 %v6017_v59 }
 0x26b   : > { %v8510_v4 = vpop.eup %6193  ;;  %v2785_v5 = vmul.f32 0.7978846, %v2529_v29  ;;  %v2786_v42 = vmul.f32 0.7978846, %v2530_v51  ;;  %4621 = vmatprep.mubr.bf16.mxu0 %v4022_v47  ;;  %v4021_v44 = vpack.c.bf16 %v3777_v17, %v3773_v23  ;;  %v8514_v46 = vadd.f32 %v8238_v27, %v7216_v14  ;;  %v8516_v43 = vpop.f32.mrb[118].mxu1 }
 0x26c   : > { %11416 = vst [vmem:[#allocation31_spill] sm:$0xff] %v8516_v43  ;;  %v8518_v50 = vpop.eup %6195  ;;  %6201 = vtanh.f32 %v2782_v20  ;;  %v2021_v11 = vmul.f32 %v1765_v1, %v8493_v31  ;;  %v1766_v54 = vmul.f32 %v8506_v25, %v8506_v25  ;;  %v8525_v41 = vadd.f32 %v8241_v16, %v7220_v26  ;;  %v8527_v23 = vpop.f32.mrb[119].mxu1 }
 0x26d   : > { %11417 = vst [vmem:[#allocation32_spill] sm:$0xff] %v8527_v23  ;;  %v8529_v27 = vpop.eup %6197  ;;  %6203 = vtanh.f32 %v2785_v5  ;;  %4622 = vmatmul.mubr.bf16.gmra.mrb[72].mxu0 %v4021_v44  ;;  %v1769_v60 = vmul.f32 %v8514_v46, %v8514_v46  ;;  %v3270_v29 = vadd.f32 1.0, %v8388_v40  ;;  %v3274_v51 = vadd.f32 1.0, %v8405_v24  ;;  %v11419_v5 = vld [vmem:[#allocation53_spill] sm:$0xff] }
 0x26e   : > { %6205 = vtanh.f32 %v2786_v42  ;;  %v2277_v47 = vmul.f32 0.044715, %v2021_v11  ;;  %v2022_v17 = vmul.f32 %v1766_v54, %v8506_v25  ;;  %v1770_v16 = vmul.f32 %v8525_v41, %v8525_v41  ;;  %1501 = vmatmul.mubr.bf16.gmra.mrb[224].mxu1 %v11418_v37  ;;  %v6020_v11 = vld [vmem:[#allocation9 + $0x1f0] ss:$8 sps:$4 sm:$0xff]  }
 0x26f   : > { %v2025_v59 = vmul.f32 %v1769_v60, %v8514_v46  ;;  %v3526_v20 = vmul.f32 0.5, %v3270_v29  ;;  %v3530_v1 = vmul.f32 0.5, %v3274_v51  ;;  %v3269_v33 = vadd.f32 1.0, %v8379_v52  ;;  %1510 = vmatprep.mubr.bf16.mxu1 %v11419_v5  ;;  %v6022_v51 = vld [vmem:[#allocation9 + $0x1f4] ss:$8 sps:$4 sm:$0xff]  }
 0x270   : > { %v2533_v40 = vadd.f32 %v2277_v47, %v8493_v31  ;;  %v2278_v24 = vmul.f32 0.044715, %v2022_v17  ;;  %v2026_v42 = vmul.f32 %v1770_v16, %v8525_v41  ;;  %v3273_v44 = vadd.f32 1.0, %v8399_v58  ;;  %4792 = vmatprep.subr.bf16.mxu0 %v6022_v51 }
 0x271   : > { %v2281_v54 = vmul.f32 0.044715, %v2025_v59  ;;  %v3782_v23 = vmul.f32 %v3526_v20, %v8260_v19  ;;  %v3786_v37 = vmul.f32 %v3530_v1, %v8272_v36  ;;  %v3525_v60 = vmul.f32 0.5, %v3269_v33  ;;  %v8547_v29 = vpop.f32.mrb[120].mxu1  ;;  %v11422_v19 = vld [vmem:[#allocation21_spill] sm:$0xff]  ;;  %4793 = vmatpush1.bf16.msra.mxu0 %v6020_v11  ;;  %v11427_v11 = vld [vmem:[#allocation24_spill] sm:$0xff] }
 0x272   : > { %11420 = vst [vmem:[#allocation33_spill] sm:$0xff] %v8547_v29  ;;  %v2789_v52 = vmul.f32 0.7978846, %v2533_v40  ;;  %v2534_v5 = vadd.f32 %v2278_v24, %v8506_v25  ;;  %v2282_v43 = vmul.f32 0.044715, %v2026_v42  ;;  %v3529_v47 = vmul.f32 0.5, %v3273_v44 }
 0x273   : > { %v8550_v17 = vpop.f32.mrb[121].mxu1  ;;  %v2537_v16 = vadd.f32 %v2281_v54, %v8514_v46  ;;  %v4026_v58 = vpack.c.bf16 %v3786_v37, %v3782_v23  ;;  %v3781_v59 = vmul.f32 %v3525_v60, %v8252_v32  ;;  %v8556_v20 = vadd.f32 %v11422_v19, %v7216_v14  ;;  %v11425_v44 = vld [vmem:[#allocation22_spill] sm:$0xff]  ;;  %v11426_v37 = vld [vmem:[#allocation23_spill] sm:$0xff] }
 0x274   : > { %11421 = vst [vmem:[#allocation34_spill] sm:$0xff] %v8550_v17  ;;  %v8558_v36 = vpop.f32.mrb[122].mxu1  ;;  %v8560_v1 = vpop.eup %6199  ;;  %6207 = vtanh.f32 %v2789_v52  ;;  %v2790_v33 = vmul.f32 0.7978846, %v2534_v5  ;;  %v2538_v40 = vadd.f32 %v2282_v43, %v8525_v41  ;;  %v3785_v24 = vmul.f32 %v3529_v47, %v8268_v15  ;;  %v11428_v5 = vld [vmem:[#allocation54_spill] sm:$0xff] }
 0x275   : > { %11423 = vst [vmem:[#allocation35_spill] sm:$0xff] %v8558_v36  ;;  %v8564_v42 = vpop.f32.mrb[123].mxu1  ;;  %v2793_v23 = vmul.f32 0.7978846, %v2537_v16  ;;  %4631 = vmatprep.mubr.bf16.mxu0 %v4026_v58  ;;  %v1773_v32 = vmul.f32 %v8556_v20, %v8556_v20  ;;  %v8570_v54 = vadd.f32 %v11425_v44, %v7220_v26  ;;  %v8574_v60 = vadd.f32 %v11426_v37, %v7216_v14 }
 0x276   : > { %11424 = vst [vmem:[#allocation14_spill] sm:$0xff] %v8564_v42  ;;  %v8576_v51 = vpop.eup %6201  ;;  %6209 = vtanh.f32 %v2790_v33  ;;  %v2794_v15 = vmul.f32 0.7978846, %v2538_v40  ;;  %v4025_v43 = vpack.c.bf16 %v3785_v24, %v3781_v59  ;;  %v8580_v52 = vadd.f32 %v11427_v11, %v7220_v26  ;;  %1511 = vmatmul.mubr.bf16.gmra.mrb[228].mxu1 %v11428_v5  ;;  %v11429_v33 = vld [vmem:[#allocation55_spill] sm:$0xff] }
 0x277   : > { %v8583_v47 = vpop.eup %6203  ;;  %6211 = vtanh.f32 %v2793_v23  ;;  %v2029_v16 = vmul.f32 %v1773_v32, %v8556_v20  ;;  %v1774_v58 = vmul.f32 %v8570_v54, %v8570_v54  ;;  %v1777_v19 = vmul.f32 %v8574_v60, %v8574_v60  ;;  %1520 = vmatprep.mubr.bf16.mxu1 %v11429_v33 }
 0x278   : > { %v8591_v59 = vpop.eup %6205  ;;  %6213 = vtanh.f32 %v2794_v15  ;;  %4632 = vmatmul.mubr.bf16.gmra.mrb[76].mxu0 %v4025_v43  ;;  %v1778_v40 = vmul.f32 %v8580_v52, %v8580_v52  ;;  %v3278_v24 = vadd.f32 1.0, %v8448_v8  ;;  %v3282_v23 = vadd.f32 1.0, %v8468_v2 }
 0x279   : > { %v2285_v32 = vmul.f32 0.044715, %v2029_v16  ;;  %v2030_v44 = vmul.f32 %v1774_v58, %v8570_v54  ;;  %v2033_v37 = vmul.f32 %v1777_v19, %v8574_v60  ;;  %v3277_v11 = vadd.f32 1.0, %v8430_v39  ;;  %v8600_v5 = vpop.f32.mrb[124].mxu1 }
 0x27a   : > { %11430 = vst [vmem:[#allocation36_spill] sm:$0xff] %v8600_v5  ;;  %v2034_v33 = vmul.f32 %v1778_v40, %v8580_v52  ;;  %v3534_v15 = vmul.f32 0.5, %v3278_v24  ;;  %v3538_v43 = vmul.f32 0.5, %v3282_v23  ;;  %v3281_v42 = vadd.f32 1.0, %v8460_v7  ;;  %v8604_v36 = vpop.f32.mrb[125].mxu1 }
 0x27b   : > { %v2541_v8 = vadd.f32 %v2285_v32, %v8556_v20  ;;  %v2286_v2 = vmul.f32 0.044715, %v2030_v44  ;;  %v2289_v16 = vmul.f32 0.044715, %v2033_v37  ;;  %v3533_v17 = vmul.f32 0.5, %v3277_v11  ;;  %v8607_v58 = vpop.f32.mrb[126].mxu1 }
 0x27c   : > { %v2290_v19 = vmul.f32 0.044715, %v2034_v33  ;;  %v3790_v39 = vmul.f32 %v3534_v15, %v8324_v38  ;;  %v3794_v5 = vmul.f32 %v3538_v43, %v8343_v10  ;;  %v3537_v29 = vmul.f32 0.5, %v3281_v42  ;;  %v8611_v40 = vpop.f32.mrb[127].mxu1  ;;  %v11431_v10 = vld [vmem:[#allocation57_spill] sm:$0xff] }
 0x27d   : > { %v2797_v24 = vmul.f32 0.7978846, %v2541_v8  ;;  %v2542_v7 = vadd.f32 %v2286_v2, %v8570_v54  ;;  %v2545_v23 = vadd.f32 %v2289_v16, %v8574_v60  ;;  %v3789_v32 = vmul.f32 %v3533_v17, %v8308_v61  ;;  %v11432_v61 = vld [vmem:[#allocation58_spill] sm:$0xff]  ;;  %v11433_v2 = vld [vmem:[#allocation25_spill] sm:$0xff] }
 0x27e   : > { %v8616_v44 = vpop.eup %6207  ;;  %v2546_v37 = vadd.f32 %v2290_v19, %v8580_v52  ;;  %v4030_v11 = vpack.c.bf16 %v3794_v5, %v3790_v39  ;;  %v3793_v33 = vmul.f32 %v3537_v29, %v8333_v6  ;;  %v8622_v38 = vadd.f32 %v8315_v0, %v7216_v14  ;;  %1521 = vmatmul.mubr.bf16.gmra.mrb[232].mxu1 %v11431_v10 }
 0x27f   : > { %6215 = vtanh.f32 %v2797_v24  ;;  %v2798_v42 = vmul.f32 0.7978846, %v2542_v7  ;;  %v2801_v15 = vmul.f32 0.7978846, %v2545_v23  ;;  %v8627_v43 = vadd.f32 %v8320_v53, %v7220_v26  ;;  %1530 = vmatprep.mubr.bf16.mxu1 %v11432_v61 }
 0x280   : > { %v8630_v17 = vpop.eup %6209  ;;  %v2802_v5 = vmul.f32 0.7978846, %v2546_v37  ;;  %4641 = vmatprep.mubr.bf16.mxu0 %v4030_v11  ;;  %v4029_v6 = vpack.c.bf16 %v3793_v33, %v3789_v32  ;;  %v1781_v0 = vmul.f32 %v8622_v38, %v8622_v38  ;;  %v8636_v29 = vadd.f32 %v8326_v55, %v7216_v14 }
 0x281   : > { %v8638_v8 = vpop.eup %6211  ;;  %6217 = vtanh.f32 %v2798_v42  ;;  %v1782_v53 = vmul.f32 %v8627_v43, %v8627_v43  ;;  %v8644_v16 = vadd.f32 %v11433_v2, %v7220_v26  ;;  %v3286_v19 = vadd.f32 1.0, %v8510_v4  ;;  %v8647_v39 = vpop.f32.mrb[128].mxu1 }
 0x282   : > { %v8649_v24 = vpop.eup %6213  ;;  %6219 = vtanh.f32 %v2801_v15  ;;  %4642 = vmatmul.mubr.bf16.gmra.mrb[80].mxu0 %v4029_v6  ;;  %v2037_v55 = vmul.f32 %v1781_v0, %v8622_v38  ;;  %v1785_v7 = vmul.f32 %v8636_v29, %v8636_v29  ;;  %v3290_v23 = vadd.f32 1.0, %v8529_v27  ;;  %v8655_v32 = vpop.f32.mrb[129].mxu1 }
 0x283   : > { %11434 = vst [vmem:[#allocation37_spill] sm:$0xff] %v8655_v32  ;;  %6221 = vtanh.f32 %v2802_v5  ;;  %v2038_v37 = vmul.f32 %v1782_v53, %v8627_v43  ;;  %v1786_v4 = vmul.f32 %v8644_v16, %v8644_v16  ;;  %v3542_v11 = vmul.f32 0.5, %v3286_v19  ;;  %v8660_v33 = vpop.f32.mrb[130].mxu1 }
 0x284   : > { %11435 = vst [vmem:[#allocation38_spill] sm:$0xff] %v8660_v33  ;;  %v2293_v10 = vmul.f32 0.044715, %v2037_v55  ;;  %v2041_v42 = vmul.f32 %v1785_v7, %v8636_v29  ;;  %v3546_v15 = vmul.f32 0.5, %v3290_v23  ;;  %v3285_v61 = vadd.f32 1.0, %v8495_v49  ;;  %v8664_v6 = vpop.f32.mrb[131].mxu1 }
 0x285   : > { %v2294_v27 = vmul.f32 0.044715, %v2038_v37  ;;  %v2042_v0 = vmul.f32 %v1786_v4, %v8644_v16  ;;  %v3798_v5 = vmul.f32 %v3542_v11, %v8386_v12  ;;  %v3289_v53 = vadd.f32 1.0, %v8518_v50  ;;  %v11436_v33 = vld [vmem:[#allocation59_spill] sm:$0xff]  ;;  %v11437_v4 = vld [vmem:[#allocation60_spill] sm:$0xff] }
 0x286   : > { %v2549_v2 = vadd.f32 %v2293_v10, %v8622_v38  ;;  %v2297_v19 = vmul.f32 0.044715, %v2041_v42  ;;  %v3802_v32 = vmul.f32 %v3546_v15, %v8396_v18  ;;  %v3541_v55 = vmul.f32 0.5, %v3285_v61  ;;  %1531 = vmatmul.mubr.bf16.gmra.mrb[236].mxu1 %v11436_v33 }
 0x287   : > { %v2550_v7 = vadd.f32 %v2294_v27, %v8627_v43  ;;  %v2298_v49 = vmul.f32 0.044715, %v2042_v0  ;;  %v3545_v23 = vmul.f32 0.5, %v3289_v53  ;;  %v8675_v37 = vadd.f32 %v8362_v57, %v7216_v14  ;;  %1540 = vmatprep.mubr.bf16.mxu1 %v11437_v4 }
 0x288   : > { %v2805_v12 = vmul.f32 0.7978846, %v2549_v2  ;;  %v2553_v50 = vadd.f32 %v2297_v19, %v8636_v29  ;;  %v4034_v11 = vpack.c.bf16 %v3802_v32, %v3798_v5  ;;  %v3797_v10 = vmul.f32 %v3541_v55, %v8371_v30 }
 0x289   : > { %v8680_v18 = vpop.eup %6215  ;;  %v2806_v42 = vmul.f32 0.7978846, %v2550_v7  ;;  %v2554_v33 = vadd.f32 %v2298_v49, %v8644_v16  ;;  %v3801_v15 = vmul.f32 %v3545_v23, %v8392_v63  ;;  %v1789_v61 = vmul.f32 %v8675_v37, %v8675_v37  ;;  %v8686_v57 = vpop.f32.mrb[132].mxu1 }
 0x28a   : > { %6223 = vtanh.f32 %v2805_v12  ;;  %v2809_v27 = vmul.f32 0.7978846, %v2553_v50  ;;  %4651 = vmatprep.mubr.bf16.mxu0 %v4034_v11  ;;  %v8690_v32 = vadd.f32 %v8365_v56, %v7220_v26  ;;  %v8694_v30 = vadd.f32 %v8373_v3, %v7216_v14  ;;  %v8696_v0 = vpop.f32.mrb[133].mxu1 }
 0x28b   : > { %v8698_v5 = vpop.eup %6217  ;;  %6225 = vtanh.f32 %v2806_v42  ;;  %v2810_v63 = vmul.f32 0.7978846, %v2554_v33  ;;  %v4033_v53 = vpack.c.bf16 %v3801_v15, %v3797_v10  ;;  %v2045_v2 = vmul.f32 %v1789_v61, %v8675_v37  ;;  %v8701_v19 = vpop.f32.mrb[134].mxu1  ;;  %v11440_v33 = vld [vmem:[#allocation61_spill] sm:$0xff] }
 0x28c   : > { %11438 = vst [vmem:[#allocation39_spill] sm:$0xff] %v8701_v19  ;;  %v8703_v55 = vpop.eup %6219  ;;  %6227 = vtanh.f32 %v2809_v27  ;;  %v1790_v56 = vmul.f32 %v8690_v32, %v8690_v32  ;;  %v1793_v3 = vmul.f32 %v8694_v30, %v8694_v30  ;;  %v8711_v7 = vadd.f32 %v8377_v48, %v7220_v26  ;;  %v8713_v49 = vpop.f32.mrb[135].mxu1 }
 0x28d   : > { %11439 = vst [vmem:[#allocation40_spill] sm:$0xff] %v8713_v49  ;;  %v8715_v23 = vpop.eup %6221  ;;  %6229 = vtanh.f32 %v2810_v63  ;;  %4652 = vmatmul.mubr.bf16.gmra.mrb[84].mxu0 %v4033_v53  ;;  %v2301_v4 = vmul.f32 0.044715, %v2045_v2  ;;  %v3294_v12 = vadd.f32 1.0, %v8576_v51  ;;  %v3298_v50 = vadd.f32 1.0, %v8591_v59  ;;  %v11441_v51 = vld [vmem:[#allocation62_spill] sm:$0xff] }
 0x28e   : > { %v2046_v11 = vmul.f32 %v1790_v56, %v8690_v32  ;;  %v2049_v10 = vmul.f32 %v1793_v3, %v8694_v30  ;;  %v1794_v42 = vmul.f32 %v8711_v7, %v8711_v7  ;;  %v3293_v48 = vadd.f32 1.0, %v8560_v1  ;;  %1541 = vmatmul.mubr.bf16.gmra.mrb[240].mxu1 %v11440_v33 }
 0x28f   : > { %v2557_v15 = vadd.f32 %v2301_v4, %v8675_v37  ;;  %v3550_v61 = vmul.f32 0.5, %v3294_v12  ;;  %v3554_v27 = vmul.f32 0.5, %v3298_v50  ;;  %v3297_v63 = vadd.f32 1.0, %v8583_v47  ;;  %1550 = vmatprep.mubr.bf16.mxu1 %v11441_v51 }
 0x290   : > { %v2302_v59 = vmul.f32 0.044715, %v2046_v11  ;;  %v2305_v53 = vmul.f32 0.044715, %v2049_v10  ;;  %v2050_v2 = vmul.f32 %v1794_v42, %v8711_v7  ;;  %v3549_v56 = vmul.f32 0.5, %v3293_v48 }
 0x291   : > { %v2813_v3 = vmul.f32 0.7978846, %v2557_v15  ;;  %v3806_v49 = vmul.f32 %v3550_v61, %v8446_v21  ;;  %v3810_v1 = vmul.f32 %v3554_v27, %v8456_v45  ;;  %v3553_v19 = vmul.f32 0.5, %v3297_v63  ;;  %v8731_v33 = vpop.f32.mrb[136].mxu1  ;;  %v11442_v21 = vld [vmem:[#allocation26_spill] sm:$0xff] }
 0x292   : > { %v2558_v4 = vadd.f32 %v2302_v59, %v8690_v32  ;;  %v2561_v12 = vadd.f32 %v2305_v53, %v8694_v30  ;;  %v2306_v47 = vmul.f32 0.044715, %v2050_v2  ;;  %v3805_v50 = vmul.f32 %v3549_v56, %v8437_v35  ;;  %v8736_v11 = vpop.f32.mrb[137].mxu1  ;;  %v11443_v35 = vld [vmem:[#allocation27_spill] sm:$0xff] }
 0x293   : > { %6231 = vtanh.f32 %v2813_v3  ;;  %v4038_v10 = vpack.c.bf16 %v3810_v1, %v3806_v49  ;;  %v3809_v42 = vmul.f32 %v3553_v19, %v8452_v13  ;;  %v8741_v48 = vadd.f32 %v11442_v21, %v7216_v14  ;;  %v8743_v45 = vpop.f32.mrb[138].mxu1 }
 0x294   : > { %v8745_v15 = vpop.eup %6223  ;;  %v2814_v61 = vmul.f32 0.7978846, %v2558_v4  ;;  %v2817_v27 = vmul.f32 0.7978846, %v2561_v12  ;;  %v2562_v63 = vadd.f32 %v2306_v47, %v8711_v7  ;;  %v8750_v51 = vadd.f32 %v11443_v35, %v7220_v26  ;;  %v8752_v59 = vpop.f32.mrb[139].mxu1  ;;  %v11445_v12 = vld [vmem:[#allocation63_spill] sm:$0xff] }
 0x295   : > { %11444 = vst [vmem:[#allocation41_spill] sm:$0xff] %v8752_v59  ;;  %v8754_v49 = vpop.eup %6225  ;;  %4661 = vmatprep.mubr.bf16.mxu0 %v4038_v10  ;;  %v4037_v13 = vpack.c.bf16 %v3809_v42, %v3805_v50  ;;  %v1797_v19 = vmul.f32 %v8741_v48, %v8741_v48  ;;  %v8760_v53 = vadd.f32 %v8423_v9, %v7216_v14  ;;  %v3302_v4 = vadd.f32 1.0, %v8630_v17  ;;  %v11446_v10 = vld [vmem:[#allocation64_spill] sm:$0xff] }
 0x296   : > { %v8764_v2 = vadd.f32 %v8426_v34, %v7220_v26  ;;  %v8766_v56 = vpop.eup %6227  ;;  %6233 = vtanh.f32 %v2814_v61  ;;  %v2818_v3 = vmul.f32 0.7978846, %v2562_v63  ;;  %v1798_v1 = vmul.f32 %v8750_v51, %v8750_v51  ;;  %1551 = vmatmul.mubr.bf16.gmra.mrb[244].mxu1 %v11445_v12 }
 0x297   : > { %v8772_v47 = vpop.eup %6229  ;;  %6235 = vtanh.f32 %v2817_v27  ;;  %4662 = vmatmul.mubr.bf16.gmra.mrb[88].mxu0 %v4037_v13  ;;  %v2053_v9 = vmul.f32 %v1797_v19, %v8741_v48  ;;  %v1801_v34 = vmul.f32 %v8760_v53, %v8760_v53  ;;  %1560 = vmatprep.mubr.bf16.mxu1 %v11446_v10  ;;  %v3306_v17 = vadd.f32 1.0, %v8649_v24 }
 0x298   : > { %v1802_v50 = vmul.f32 %v8764_v2, %v8764_v2  ;;  %6237 = vtanh.f32 %v2818_v3  ;;  %v2054_v42 = vmul.f32 %v1798_v1, %v8750_v51  ;;  %v3558_v21 = vmul.f32 0.5, %v3302_v4 }
 0x299   : > { %v2309_v61 = vmul.f32 0.044715, %v2053_v9  ;;  %v2057_v27 = vmul.f32 %v1801_v34, %v8760_v53  ;;  %v3301_v35 = vadd.f32 1.0, %v8616_v44  ;;  %v8785_v13 = vpop.f32.mrb[140].mxu1  ;;  %v3562_v12 = vmul.f32 0.5, %v3306_v17 }
 0x29a   : > { %v2058_v63 = vmul.f32 %v1802_v50, %v8764_v2  ;;  %11447 = vst [vmem:[#allocation15_spill] sm:$0xff] %v8785_v13  ;;  %v2310_v19 = vmul.f32 0.044715, %v2054_v42  ;;  %v3814_v59 = vmul.f32 %v3558_v21, %v8506_v25  ;;  %v3305_v3 = vadd.f32 1.0, %v8638_v8  ;;  %v8789_v10 = vpop.f32.mrb[141].mxu1 }
 0x29b   : > { %11448 = vst [vmem:[#allocation16_spill] sm:$0xff] %v8789_v10  ;;  %v2565_v24 = vadd.f32 %v2309_v61, %v8741_v48  ;;  %v2313_v1 = vmul.f32 0.044715, %v2057_v27  ;;  %v3557_v9 = vmul.f32 0.5, %v3301_v35  ;;  %v8792_v34 = vpop.f32.mrb[142].mxu1  ;;  %v3818_v44 = vmul.f32 %v3562_v12, %v8525_v41  ;;  %v11459_v10 = vld [vmem:[#allocation67_spill] sm:$0xff] }
 0x29c   : > { %v2314_v4 = vmul.f32 0.044715, %v2058_v63  ;;  %11449 = vst [vmem:[#allocation42_spill] sm:$0xff] %v8792_v34  ;;  %v2566_v50 = vadd.f32 %v2310_v19, %v8750_v51  ;;  %v3561_v13 = vmul.f32 0.5, %v3305_v3  ;;  %v8798_v42 = vadd.f32 %v8458_v22, %v7216_v14  ;;  %v8800_v25 = vpop.f32.mrb[143].mxu1  ;;  %v11451_v22 = vld [vmem:[#allocation65_spill] sm:$0xff] }
 0x29d   : > { %11450 = vst [vmem:[#allocation43_spill] sm:$0xff] %v8800_v25  ;;  %v8802_v8 = vpop.eup %6231  ;;  %v2821_v17 = vmul.f32 0.7978846, %v2565_v24  ;;  %v2569_v21 = vadd.f32 %v2313_v1, %v8760_v53  ;;  %v3813_v27 = vmul.f32 %v3557_v9, %v8493_v31  ;;  %v4042_v35 = vpack.c.bf16 %v3818_v44, %v3814_v59  ;;  %v11452_v24 = vld [vmem:[#allocation28_spill] sm:$0xff]  ;;  %v11453_v1 = vld [vmem:[#allocation66_spill] sm:$0xff]  ;;  %v11454_v59 = vld [vmem:[#allocation29_spill] sm:$0xff] }
 0x29e   : > { %v2570_v61 = vadd.f32 %v2314_v4, %v8764_v2  ;;  %v2822_v63 = vmul.f32 0.7978846, %v2566_v50  ;;  %v3817_v41 = vmul.f32 %v3561_v13, %v8514_v46  ;;  %v1805_v19 = vmul.f32 %v8798_v42, %v8798_v42  ;;  %1561 = vmatmul.mubr.bf16.gmra.mrb[248].mxu1 %v11451_v22  ;;  %v11455_v44 = vld [vmem:[#allocation30_spill] sm:$0xff] }
 0x29f   : > { %6239 = vtanh.f32 %v2821_v17  ;;  %v2825_v12 = vmul.f32 0.7978846, %v2569_v21  ;;  %v8813_v25 = vadd.f32 %v11452_v24, %v7220_v26  ;;  %1570 = vmatprep.mubr.bf16.mxu1 %v11453_v1  ;;  %4671 = vmatprep.mubr.bf16.mxu0 %v4042_v35  ;;  %v8821_v13 = vadd.f32 %v11454_v59, %v7216_v14 }
 0x2a0   : > { %v2826_v3 = vmul.f32 0.7978846, %v2570_v61  ;;  %v8816_v4 = vpop.eup %6233  ;;  %6241 = vtanh.f32 %v2822_v63  ;;  %v4041_v31 = vpack.c.bf16 %v3817_v41, %v3813_v27  ;;  %v2061_v46 = vmul.f32 %v1805_v19, %v8798_v42 }
 0x2a1   : > { %v8823_v9 = vpop.eup %6235  ;;  %6243 = vtanh.f32 %v2825_v12  ;;  %v1806_v50 = vmul.f32 %v8813_v25, %v8813_v25  ;;  %v8829_v17 = vadd.f32 %v11455_v44, %v7220_v26  ;;  %v3310_v21 = vadd.f32 1.0, %v8698_v5  ;;  %v8832_v61 = vpop.f32.mrb[144].mxu1 }
 0x2a2   : > { %11456 = vst [vmem:[#allocation17_spill] sm:$0xff] %v8832_v61  ;;  %v8834_v27 = vpop.eup %6237  ;;  %6245 = vtanh.f32 %v2826_v3  ;;  %4672 = vmatmul.mubr.bf16.gmra.mrb[92].mxu0 %v4041_v31  ;;  %v2317_v63 = vmul.f32 0.044715, %v2061_v46  ;;  %v1809_v35 = vmul.f32 %v8821_v13, %v8821_v13  ;;  %v3314_v41 = vadd.f32 1.0, %v8715_v23  ;;  %v8839_v19 = vpop.f32.mrb[145].mxu1 }
 0x2a3   : > { %11457 = vst [vmem:[#allocation44_spill] sm:$0xff] %v8839_v19  ;;  %v2062_v22 = vmul.f32 %v1806_v50, %v8813_v25  ;;  %v1810_v12 = vmul.f32 %v8829_v17, %v8829_v17  ;;  %v3566_v5 = vmul.f32 0.5, %v3310_v21  ;;  %v3309_v24 = vadd.f32 1.0, %v8680_v18  ;;  %v8845_v1 = vpop.f32.mrb[146].mxu1 }
 0x2a4   : > { %11458 = vst [vmem:[#allocation45_spill] sm:$0xff] %v8845_v1  ;;  %v2573_v3 = vadd.f32 %v2317_v63, %v8798_v42  ;;  %v2065_v31 = vmul.f32 %v1809_v35, %v8821_v13  ;;  %v3570_v46 = vmul.f32 0.5, %v3314_v41  ;;  %v3313_v59 = vadd.f32 1.0, %v8703_v55  ;;  %v8850_v23 = vpop.f32.mrb[147].mxu1 }
 0x2a5   : > { %v2318_v44 = vmul.f32 0.044715, %v2062_v22  ;;  %v2066_v50 = vmul.f32 %v1810_v12, %v8829_v17  ;;  %v3822_v19 = vmul.f32 %v3566_v5, %v8570_v54  ;;  %v3565_v61 = vmul.f32 0.5, %v3309_v24 }
 0x2a6   : > { %v2829_v21 = vmul.f32 0.7978846, %v2573_v3  ;;  %v2321_v34 = vmul.f32 0.044715, %v2065_v31  ;;  %v3826_v18 = vmul.f32 %v3570_v46, %v8580_v52  ;;  %v3569_v1 = vmul.f32 0.5, %v3313_v59  ;;  %1571 = vmatmul.mubr.bf16.gmra.mrb[252].mxu1 %v11459_v10  ;;  %v11461_v3 = vld [vmem:[#allocation32_spill] sm:$0xff] }
 0x2a7   : > { %v2574_v63 = vadd.f32 %v2318_v44, %v8813_v25  ;;  %v2322_v35 = vmul.f32 0.044715, %v2066_v50  ;;  %v3821_v55 = vmul.f32 %v3565_v61, %v8556_v20  ;;  %v8860_v41 = vadd.f32 %v8500_v62, %v7216_v14 }
 0x2a8   : > { %6247 = vtanh.f32 %v2829_v21  ;;  %v2577_v54 = vadd.f32 %v2321_v34, %v8821_v13  ;;  %v4046_v22 = vpack.c.bf16 %v3826_v18, %v3822_v19  ;;  %v3825_v12 = vmul.f32 %v3569_v1, %v8574_v60  ;;  %v11460_v60 = vld [vmem:[#allocation31_spill] sm:$0xff] }
 0x2a9   : > { %v8864_v5 = vpop.eup %6239  ;;  %v2830_v52 = vmul.f32 0.7978846, %v2574_v63  ;;  %v2578_v10 = vadd.f32 %v2322_v35, %v8829_v17  ;;  %v1813_v24 = vmul.f32 %v8860_v41, %v8860_v41  ;;  %v8871_v20 = vadd.f32 %v8508_v28, %v7220_v26  ;;  %v8873_v62 = vpop.f32.mrb[148].mxu1 }
 0x2aa   : > { %v8875_v61 = vpop.eup %6241  ;;  %v2833_v34 = vmul.f32 0.7978846, %v2577_v54  ;;  %4681 = vmatprep.mubr.bf16.mxu0 %v4046_v22  ;;  %v4045_v19 = vpack.c.bf16 %v3825_v12, %v3821_v55  ;;  %v8879_v1 = vadd.f32 %v11460_v60, %v7216_v14  ;;  %v8883_v31 = vadd.f32 %v11461_v3, %v7220_v26  ;;  %v8885_v46 = vpop.f32.mrb[149].mxu1 }
 0x2ab   : > { %11462 = vst [vmem:[#allocation46_spill] sm:$0xff] %v8885_v46  ;;  %v8887_v59 = vpop.eup %6243  ;;  %6249 = vtanh.f32 %v2830_v52  ;;  %v2834_v28 = vmul.f32 0.7978846, %v2578_v10  ;;  %v2069_v44 = vmul.f32 %v1813_v24, %v8860_v41  ;;  %v1814_v50 = vmul.f32 %v8871_v20, %v8871_v20  ;;  %v8892_v21 = vpop.f32.mrb[150].mxu1 }
 0x2ac   : > { %11463 = vst [vmem:[#allocation47_spill] sm:$0xff] %v8892_v21  ;;  %v8894_v18 = vpop.eup %6245  ;;  %6251 = vtanh.f32 %v2833_v34  ;;  %4682 = vmatmul.mubr.bf16.gmra.mrb[96].mxu0 %v4045_v19  ;;  %v1817_v63 = vmul.f32 %v8879_v1, %v8879_v1  ;;  %v1818_v35 = vmul.f32 %v8883_v31, %v8883_v31  ;;  %v3318_v55 = vadd.f32 1.0, %v8754_v49  ;;  %v8901_v54 = vpop.f32.mrb[151].mxu1 }
 0x2ad   : > { %11464 = vst [vmem:[#allocation48_spill] sm:$0xff] %v8901_v54  ;;  %6253 = vtanh.f32 %v2834_v28  ;;  %v2325_v22 = vmul.f32 0.044715, %v2069_v44  ;;  %v2070_v12 = vmul.f32 %v1814_v50, %v8871_v20  ;;  %v3322_v52 = vadd.f32 1.0, %v8772_v47 }
 0x2ae   : > { %v2073_v10 = vmul.f32 %v1817_v63, %v8879_v1  ;;  %v2074_v24 = vmul.f32 %v1818_v35, %v8883_v31  ;;  %v3574_v34 = vmul.f32 0.5, %v3318_v55  ;;  %v3317_v19 = vadd.f32 1.0, %v8745_v15 }
 0x2af   : > { %v2581_v60 = vadd.f32 %v2325_v22, %v8860_v41  ;;  %v2326_v3 = vmul.f32 0.044715, %v2070_v12  ;;  %v3578_v21 = vmul.f32 0.5, %v3322_v52  ;;  %v3321_v49 = vadd.f32 1.0, %v8766_v56  ;;  %v11466_v52 = vld [vmem:[#allocation33_spill] sm:$0xff] }
 0x2b0   : > { %v2329_v54 = vmul.f32 0.044715, %v2073_v10  ;;  %v2330_v28 = vmul.f32 0.044715, %v2074_v24  ;;  %v3830_v44 = vmul.f32 %v3574_v34, %v8627_v43  ;;  %v3573_v50 = vmul.f32 0.5, %v3317_v19 }
 0x2b1   : > { %v2837_v46 = vmul.f32 0.7978846, %v2581_v60  ;;  %v2582_v47 = vadd.f32 %v2326_v3, %v8871_v20  ;;  %v3834_v63 = vmul.f32 %v3578_v21, %v8644_v16  ;;  %v3577_v35 = vmul.f32 0.5, %v3321_v49  ;;  %v8913_v55 = vpop.f32.mrb[152].mxu1 }
 0x2b2   : > { %11465 = vst [vmem:[#allocation49_spill] sm:$0xff] %v8913_v55  ;;  %v8915_v15 = vpop.eup %6247  ;;  %v2585_v22 = vadd.f32 %v2329_v54, %v8879_v1  ;;  %v2586_v12 = vadd.f32 %v2330_v28, %v8883_v31  ;;  %v3829_v56 = vmul.f32 %v3573_v50, %v8622_v38  ;;  %v8922_v43 = vadd.f32 %v11466_v52, %v7216_v14  ;;  %v8924_v10 = vpop.f32.mrb[153].mxu1  ;;  %v11469_v38 = vld [vmem:[#allocation34_spill] sm:$0xff] }
 0x2b3   : > { %11467 = vst [vmem:[#allocation18_spill] sm:$0xff] %v8924_v10  ;;  %6255 = vtanh.f32 %v2837_v46  ;;  %v2838_v24 = vmul.f32 0.7978846, %v2582_v47  ;;  %v4050_v16 = vpack.c.bf16 %v3834_v63, %v3830_v44  ;;  %v3833_v21 = vmul.f32 %v3577_v35, %v8636_v29  ;;  %v8927_v34 = vpop.f32.mrb[154].mxu1  ;;  %v11471_v29 = vld [vmem:[#allocation35_spill] sm:$0xff]  ;;  %v11472_v50 = vld [vmem:[#allocation14_spill] sm:$0xff] }
 0x2b4   : > { %11468 = vst [vmem:[#allocation50_spill] sm:$0xff] %v8927_v34  ;;  %v2841_v19 = vmul.f32 0.7978846, %v2585_v22  ;;  %v2842_v60 = vmul.f32 0.7978846, %v2586_v12  ;;  %v1821_v54 = vmul.f32 %v8922_v43, %v8922_v43  ;;  %v8933_v3 = vadd.f32 %v11469_v38, %v7220_v26  ;;  %v8935_v49 = vpop.f32.mrb[155].mxu1 }
 0x2b5   : > { %11470 = vst [vmem:[#allocation51_spill] sm:$0xff] %v8935_v49  ;;  %v8937_v28 = vpop.eup %6249  ;;  %6257 = vtanh.f32 %v2838_v24  ;;  %4691 = vmatprep.mubr.bf16.mxu0 %v4050_v16  ;;  %v4049_v46 = vpack.c.bf16 %v3833_v21, %v3829_v56  ;;  %v8941_v44 = vadd.f32 %v11471_v29, %v7216_v14  ;;  %v8945_v47 = vadd.f32 %v11472_v50, %v7220_v26 }
 0x2b6   : > { %v8947_v63 = vpop.eup %6251  ;;  %6259 = vtanh.f32 %v2841_v19  ;;  %v2077_v35 = vmul.f32 %v1821_v54, %v8922_v43  ;;  %v1822_v22 = vmul.f32 %v8933_v3, %v8933_v3  ;;  %v3326_v12 = vadd.f32 1.0, %v8816_v4 }
 0x2b7   : > { %v8953_v52 = vpop.eup %6253  ;;  %6261 = vtanh.f32 %v2842_v60  ;;  %4692 = vmatmul.mubr.bf16.gmra.mrb[100].mxu0 %v4049_v46  ;;  %v1825_v56 = vmul.f32 %v8941_v44, %v8941_v44  ;;  %v1826_v24 = vmul.f32 %v8945_v47, %v8945_v47  ;;  %v3330_v16 = vadd.f32 1.0, %v8834_v27 }
 0x2b8   : > { %v2333_v21 = vmul.f32 0.044715, %v2077_v35  ;;  %v2078_v19 = vmul.f32 %v1822_v22, %v8933_v3  ;;  %v3582_v54 = vmul.f32 0.5, %v3326_v12  ;;  %v3325_v38 = vadd.f32 1.0, %v8802_v8 }
 0x2b9   : > { %v2081_v4 = vmul.f32 %v1825_v56, %v8941_v44  ;;  %v2082_v29 = vmul.f32 %v1826_v24, %v8945_v47  ;;  %v3586_v60 = vmul.f32 0.5, %v3330_v16  ;;  %v3329_v46 = vadd.f32 1.0, %v8823_v9  ;;  %v8965_v50 = vpop.f32.mrb[156].mxu1 }
 0x2ba   : > { %v2589_v49 = vadd.f32 %v2333_v21, %v8922_v43  ;;  %v2334_v34 = vmul.f32 0.044715, %v2078_v19  ;;  %v3838_v27 = vmul.f32 %v3582_v54, %v8690_v32  ;;  %v3581_v35 = vmul.f32 0.5, %v3325_v38  ;;  %v8969_v10 = vpop.f32.mrb[157].mxu1  ;;  %v11473_v21 = vld [vmem:[#allocation36_spill] sm:$0xff] }
 0x2bb   : > { %v2337_v22 = vmul.f32 0.044715, %v2081_v4  ;;  %v2338_v12 = vmul.f32 0.044715, %v2082_v29  ;;  %v3842_v8 = vmul.f32 %v3586_v60, %v8711_v7  ;;  %v3585_v56 = vmul.f32 0.5, %v3329_v46  ;;  %v8972_v55 = vpop.f32.mrb[158].mxu1 }
 0x2bc   : > { %v2845_v24 = vmul.f32 0.7978846, %v2589_v49  ;;  %v2590_v9 = vadd.f32 %v2334_v34, %v8933_v3  ;;  %v3837_v16 = vmul.f32 %v3581_v35, %v8675_v37  ;;  %v8978_v19 = vadd.f32 %v11473_v21, %v7216_v14  ;;  %v8980_v32 = vpop.f32.mrb[159].mxu1 }
 0x2bd   : > { %v8982_v54 = vpop.eup %6255  ;;  %v2593_v38 = vadd.f32 %v2337_v22, %v8941_v44  ;;  %v2594_v7 = vadd.f32 %v2338_v12, %v8945_v47  ;;  %v4054_v4 = vpack.c.bf16 %v3842_v8, %v3838_v27  ;;  %v3841_v29 = vmul.f32 %v3585_v56, %v8694_v30 }
 0x2be   : > { %6263 = vtanh.f32 %v2845_v24  ;;  %v2846_v49 = vmul.f32 0.7978846, %v2590_v9  ;;  %v1829_v37 = vmul.f32 %v8978_v19, %v8978_v19  ;;  %v8991_v34 = vadd.f32 %v8604_v36, %v7220_v26 }
 0x2bf   : > { %v8993_v60 = vpop.eup %6257  ;;  %v2849_v46 = vmul.f32 0.7978846, %v2593_v38  ;;  %v2850_v35 = vmul.f32 0.7978846, %v2594_v7  ;;  %4701 = vmatprep.mubr.bf16.mxu0 %v4054_v4  ;;  %v4053_v22 = vpack.c.bf16 %v3841_v29, %v3837_v16  ;;  %v8997_v27 = vadd.f32 %v8607_v58, %v7216_v14 }
 0x2c0   : > { %v8999_v30 = vpop.eup %6259  ;;  %6265 = vtanh.f32 %v2846_v49  ;;  %v2085_v12 = vmul.f32 %v1829_v37, %v8978_v19  ;;  %v1830_v8 = vmul.f32 %v8991_v34, %v8991_v34  ;;  %v9006_v36 = vadd.f32 %v8611_v40, %v7220_v26 }
 0x2c1   : > { %v9008_v56 = vpop.eup %6261  ;;  %6267 = vtanh.f32 %v2849_v46  ;;  %4702 = vmatmul.mubr.bf16.gmra.mrb[104].mxu0 %v4053_v22  ;;  %v1833_v14 = vmul.f32 %v8997_v27, %v8997_v27  ;;  %v3334_v58 = vadd.f32 1.0, %v8875_v61  ;;  %v3338_v24 = vadd.f32 1.0, %v8894_v18  ;;  %v9014_v9 = vpop.f32.mrb[160].mxu1 }
 0x2c2   : > { %11474 = vst [vmem:[#allocation19_spill] sm:$0xff] %v9014_v9  ;;  %6269 = vtanh.f32 %v2850_v35  ;;  %v2341_v16 = vmul.f32 0.044715, %v2085_v12  ;;  %v2086_v21 = vmul.f32 %v1830_v8, %v8991_v34  ;;  %v1834_v26 = vmul.f32 %v9006_v36, %v9006_v36  ;;  %v9019_v40 = vpop.f32.mrb[161].mxu1 }
 0x2c3   : > { %11475 = vst [vmem:[#allocation20_spill] sm:$0xff] %v9019_v40  ;;  %v2089_v38 = vmul.f32 %v1833_v14, %v8997_v27  ;;  %v3590_v7 = vmul.f32 0.5, %v3334_v58  ;;  %v3594_v4 = vmul.f32 0.5, %v3338_v24  ;;  %v3333_v29 = vadd.f32 1.0, %v8864_v5  ;;  %v9023_v61 = vpop.f32.mrb[162].mxu1  ;;  %v11477_v40 = vld [vmem:[#allocation56_spill] sm:$0xff] }
 0x2c4   : > { %11476 = vst [vmem:[#allocation52_spill] sm:$0xff] %v9023_v61  ;;  %v2597_v18 = vadd.f32 %v2341_v16, %v8978_v19  ;;  %v2342_v49 = vmul.f32 0.044715, %v2086_v21  ;;  %v2090_v37 = vmul.f32 %v1834_v26, %v9006_v36  ;;  %v3337_v46 = vadd.f32 1.0, %v8887_v59  ;;  %v9028_v35 = vpop.f32.mrb[163].mxu1 }
 0x2c5   : > { %v2345_v22 = vmul.f32 0.044715, %v2089_v38  ;;  %v3846_v12 = vmul.f32 %v3590_v7, %v8750_v51  ;;  %v3850_v8 = vmul.f32 %v3594_v4, %v8764_v2  ;;  %v3589_v14 = vmul.f32 0.5, %v3333_v29  ;;  %v6535_v4 = vld [vmem:[%s11223_s3] sm:$0xf] }
 0x2c6   : > { %v2853_v58 = vmul.f32 0.7978846, %v2597_v18  ;;  %v2598_v5 = vadd.f32 %v2342_v49, %v8991_v34  ;;  %v2346_v24 = vmul.f32 0.044715, %v2090_v37  ;;  %v3593_v61 = vmul.f32 0.5, %v3337_v46 }
 0x2c7   : > { %v2601_v16 = vadd.f32 %v2345_v22, %v8997_v27  ;;  %v4058_v21 = vpack.c.bf16 %v3850_v8, %v3846_v12  ;;  %v3845_v26 = vmul.f32 %v3589_v14, %v8741_v48  ;;  %v545_v59 = vsub.s32 2, %v11477_v40 }
 0x2c8   : > { %v9036_v9 = vpop.eup %6263  ;;  %6271 = vtanh.f32 %v2853_v58  ;;  %v2854_v38 = vmul.f32 0.7978846, %v2598_v5  ;;  %v2602_v51 = vadd.f32 %v2346_v24, %v9006_v36  ;;  %v3849_v2 = vmul.f32 %v3593_v61, %v8760_v53 }
 0x2c9   : > { %v2857_v7 = vmul.f32 0.7978846, %v2601_v16  ;;  %4711 = vmatprep.mubr.bf16.mxu0 %v4058_v21  ;;  %v9043_v29 = vrot.slane %v6535_v4, %v545_v59  ;;  %v549_v48 = vsub.s32 3, %v11477_v40  ;;  %v3342_v18 = vadd.f32 1.0, %v8937_v28  ;;  %v9047_v49 = vpop.f32.mrb[164].mxu1  ;;  %v11478_v28 = vld [vmem:[#allocation38_spill] sm:$0xff] }
 0x2ca   : > { %v9049_v37 = vpop.eup %6265  ;;  %6273 = vtanh.f32 %v2854_v38  ;;  %v2858_v46 = vmul.f32 0.7978846, %v2602_v51  ;;  %v4057_v22 = vpack.c.bf16 %v3849_v2, %v3845_v26  ;;  %v3346_v53 = vadd.f32 1.0, %v8953_v52  ;;  %v9052_v61 = vpop.f32.mrb[165].mxu1  ;;  %v11481_v59 = vld [vmem:[#allocation37_spill] sm:$0xff] }
 0x2cb   : > { %v9054_v12 = vpop.eup %6267  ;;  %6275 = vtanh.f32 %v2857_v7  ;;  %v9058_v8 = vadd.f32 %v8647_v39, %v9043_v29  ;;  %v9060_v14 = vrot.slane %v6535_v4, %v549_v48  ;;  %v9064_v58 = vadd.f32 %v11478_v28, %v9043_v29  ;;  %v9066_v5 = vpop.f32.mrb[166].mxu1 }
 0x2cc   : > { %11479 = vst [vmem:[#allocation53_spill] sm:$0xff] %v9066_v5  ;;  %v9068_v24 = vpop.eup %6269  ;;  %6277 = vtanh.f32 %v2858_v46  ;;  %4712 = vmatmul.mubr.bf16.gmra.mrb[108].mxu0 %v4057_v22  ;;  %v3598_v52 = vmul.f32 0.5, %v3342_v18  ;;  %v3602_v16 = vmul.f32 0.5, %v3346_v53  ;;  %v3341_v21 = vadd.f32 1.0, %v8915_v15  ;;  %v9071_v26 = vpop.f32.mrb[167].mxu1 }
 0x2cd   : > { %11480 = vst [vmem:[#allocation21_spill] sm:$0xff] %v9071_v26  ;;  %v1583_v39 = vmul.f32 %v9058_v8, %v9058_v8  ;;  %v9077_v38 = vadd.f32 %v11481_v59, %v9060_v14  ;;  %v1587_v51 = vmul.f32 %v9064_v58, %v9064_v58  ;;  %v9083_v2 = vadd.f32 %v8664_v6, %v9060_v14 }
 0x2ce   : > { %v3854_v7 = vmul.f32 %v3598_v52, %v8813_v25  ;;  %v3858_v15 = vmul.f32 %v3602_v16, %v8829_v17  ;;  %v3345_v4 = vadd.f32 1.0, %v8947_v63  ;;  %v3597_v48 = vmul.f32 0.5, %v3341_v21 }
 0x2cf   : > { %v1839_v18 = vmul.f32 %v1583_v39, %v9058_v8  ;;  %v1584_v46 = vmul.f32 %v9077_v38, %v9077_v38  ;;  %v1843_v22 = vmul.f32 %v1587_v51, %v9064_v58  ;;  %v1588_v53 = vmul.f32 %v9083_v2, %v9083_v2 }
 0x2d0   : > { %v4062_v28 = vpack.c.bf16 %v3858_v15, %v3854_v7  ;;  %v3601_v6 = vmul.f32 0.5, %v3345_v4  ;;  %v3853_v59 = vmul.f32 %v3597_v48, %v8798_v42  ;;  %v9097_v25 = vadd.f32 %v8686_v57, %v9043_v29  ;;  %v11483_v7 = vld [vmem:[#allocation39_spill] sm:$0xff] }
 0x2d1   : > { %v2095_v17 = vmul.f32 0.044715, %v1839_v18  ;;  %v1840_v63 = vmul.f32 %v1584_v46, %v9077_v38  ;;  %v2099_v52 = vmul.f32 0.044715, %v1843_v22  ;;  %v1844_v16 = vmul.f32 %v1588_v53, %v9083_v2  ;;  %v9101_v21 = vpop.f32.mrb[168].mxu1 }
 0x2d2   : > { %11482 = vst [vmem:[#allocation22_spill] sm:$0xff] %v9101_v21  ;;  %v9103_v39 = vpop.eup %6271  ;;  %4721 = vmatprep.mubr.bf16.mxu0 %v4062_v28  ;;  %v3857_v51 = vmul.f32 %v3601_v6, %v8821_v13  ;;  %v1591_v42 = vmul.f32 %v9097_v25, %v9097_v25  ;;  %v9110_v57 = vadd.f32 %v8696_v0, %v9060_v14  ;;  %v9116_v4 = vpop.f32.mrb[169].mxu1  ;;  %v11487_v21 = vld [vmem:[#allocation40_spill] sm:$0xff] }
 0x2d3   : > { %v9114_v15 = vadd.f32 %v11483_v7, %v9043_v29  ;;  %11484 = vst [vmem:[#allocation23_spill] sm:$0xff] %v9116_v4  ;;  %v2351_v48 = vadd.f32 %v2095_v17, %v9058_v8  ;;  %v2096_v18 = vmul.f32 0.044715, %v1840_v63  ;;  %v2355_v46 = vadd.f32 %v2099_v52, %v9064_v58  ;;  %v9120_v13 = vpop.f32.mrb[170].mxu1 }
 0x2d4   : > { %v2100_v22 = vmul.f32 0.044715, %v1844_v16  ;;  %11485 = vst [vmem:[#allocation24_spill] sm:$0xff] %v9120_v13  ;;  %v9122_v53 = vpop.eup %6273  ;;  %v4061_v28 = vpack.c.bf16 %v3857_v51, %v3853_v59  ;;  %v1847_v0 = vmul.f32 %v1591_v42, %v9097_v25  ;;  %v1592_v6 = vmul.f32 %v9110_v57, %v9110_v57  ;;  %v9129_v40 = vpop.f32.mrb[171].mxu1 }
 0x2d5   : > { %v1595_v7 = vmul.f32 %v9114_v15, %v9114_v15  ;;  %11486 = vst [vmem:[#allocation54_spill] sm:$0xff] %v9129_v40  ;;  %v9131_v17 = vpop.eup %6275  ;;  %v2607_v63 = vmul.f32 0.7978846, %v2351_v48  ;;  %v2352_v52 = vadd.f32 %v2096_v18, %v9077_v38  ;;  %v2611_v16 = vmul.f32 0.7978846, %v2355_v46 }
 0x2d6   : > { %v2356_v13 = vadd.f32 %v2100_v22, %v9083_v2  ;;  %v9135_v4 = vpop.eup %6277  ;;  %4722 = vmatmul.mubr.bf16.gmra.mrb[112].mxu0 %v4061_v28  ;;  %v2103_v59 = vmul.f32 0.044715, %v1847_v0  ;;  %v1848_v51 = vmul.f32 %v1592_v6, %v9110_v57  ;;  %v9141_v26 = vadd.f32 %v11487_v21, %v9060_v14 }
 0x2d7   : > { %v1851_v42 = vmul.f32 %v1595_v7, %v9114_v15  ;;  %6279 = vtanh.f32 %v2607_v63  ;;  %v2608_v40 = vmul.f32 0.7978846, %v2352_v52  ;;  %v3350_v18 = vadd.f32 1.0, %v8993_v60 }
 0x2d8   : > { %v2612_v48 = vmul.f32 0.7978846, %v2356_v13  ;;  %6281 = vtanh.f32 %v2611_v16  ;;  %v2359_v46 = vadd.f32 %v2103_v59, %v9097_v25  ;;  %v2104_v22 = vmul.f32 0.044715, %v1848_v51 }
 0x2d9   : > { %v2107_v5 = vmul.f32 0.044715, %v1851_v42  ;;  %6283 = vtanh.f32 %v2608_v40  ;;  %v1596_v28 = vmul.f32 %v9141_v26, %v9141_v26  ;;  %v3354_v0 = vadd.f32 1.0, %v9008_v56  ;;  %v9148_v7 = vpop.f32.mrb[172].mxu1 }
 0x2da   : > { %v3606_v6 = vmul.f32 0.5, %v3350_v18  ;;  %6285 = vtanh.f32 %v2612_v48  ;;  %v2615_v21 = vmul.f32 0.7978846, %v2359_v46  ;;  %v2360_v13 = vadd.f32 %v2104_v22, %v9110_v57  ;;  %v9152_v63 = vpop.f32.mrb[173].mxu1 }
 0x2db   : > { %v2363_v60 = vadd.f32 %v2107_v5, %v9114_v15  ;;  %v1852_v52 = vmul.f32 %v1596_v28, %v9141_v26  ;;  %v3610_v16 = vmul.f32 0.5, %v3354_v0  ;;  %v3349_v59 = vadd.f32 1.0, %v8982_v54  ;;  %v9157_v51 = vpop.f32.mrb[174].mxu1 }
 0x2dc   : > { %v3862_v40 = vmul.f32 %v3606_v6, %v8871_v20  ;;  %6287 = vtanh.f32 %v2615_v21  ;;  %v2616_v56 = vmul.f32 0.7978846, %v2360_v13  ;;  %v3353_v48 = vadd.f32 1.0, %v8999_v30  ;;  %v9160_v18 = vpop.f32.mrb[175].mxu1 }
 0x2dd   : > { %v2619_v42 = vmul.f32 0.7978846, %v2363_v60  ;;  %v2108_v46 = vmul.f32 0.044715, %v1852_v52  ;;  %v3866_v5 = vmul.f32 %v3610_v16, %v8883_v31  ;;  %v3605_v22 = vmul.f32 0.5, %v3349_v59  ;;  %v11488_v52 = vld [vmem:[#allocation41_spill] sm:$0xff] }
 0x2de   : > { %v9165_v28 = vadd.f32 %v8731_v33, %v9043_v29  ;;  %6289 = vtanh.f32 %v2616_v56  ;;  %v3609_v20 = vmul.f32 0.5, %v3353_v48  ;;  %v9169_v54 = vadd.f32 %v8736_v11, %v9060_v14 }
 0x2df   : > { %v9173_v0 = vadd.f32 %v8743_v45, %v9043_v29  ;;  %6291 = vtanh.f32 %v2619_v42  ;;  %v2364_v30 = vadd.f32 %v2108_v46, %v9141_v26  ;;  %v4066_v6 = vpack.c.bf16 %v3866_v5, %v3862_v40 }
 0x2e0   : > { %v3861_v31 = vmul.f32 %v3605_v22, %v8860_v41  ;;  %v3865_v21 = vmul.f32 %v3609_v20, %v8879_v1  ;;  %v1599_v33 = vmul.f32 %v9165_v28, %v9165_v28  ;;  %v1600_v13 = vmul.f32 %v9169_v54, %v9169_v54 }
 0x2e1   : > { %v1603_v11 = vmul.f32 %v9173_v0, %v9173_v0  ;;  %v6280_v60 = vpop.eup %6279  ;;  %v2620_v45 = vmul.f32 0.7978846, %v2364_v30  ;;  %4731 = vmatprep.mubr.bf16.mxu0 %v4066_v6  ;;  %v9186_v16 = vadd.f32 %v11488_v52, %v9060_v14  ;;  %v3358_v41 = vadd.f32 1.0, %v9049_v37  ;;  %v9190_v40 = vpop.f32.mrb[176].mxu1 }
 0x2e2   : > { %v3362_v1 = vadd.f32 1.0, %v9068_v24  ;;  %11489 = vst [vmem:[#allocation55_spill] sm:$0xff] %v9190_v40  ;;  %v6282_v59 = vpop.eup %6281  ;;  %v3119_v56 = vadd.f32 1.0, %v6280_v60  ;;  %v4065_v42 = vpack.c.bf16 %v3865_v21, %v3861_v31  ;;  %v1855_v48 = vmul.f32 %v1599_v33, %v9165_v28  ;;  %v9194_v5 = vpop.f32.mrb[177].mxu1 }
 0x2e3   : > { %v1856_v46 = vmul.f32 %v1600_v13, %v9169_v54  ;;  %11490 = vst [vmem:[#allocation57_spill] sm:$0xff] %v9194_v5  ;;  %v9196_v22 = vpop.eup %6283  ;;  %v3123_v20 = vadd.f32 1.0, %v6282_v59  ;;  %6293 = vtanh.f32 %v2620_v45  ;;  %v1859_v30 = vmul.f32 %v1603_v11, %v9173_v0  ;;  %v9201_v24 = vpop.f32.mrb[178].mxu1 }
 0x2e4   : > { %v1604_v37 = vmul.f32 %v9186_v16, %v9186_v16  ;;  %11491 = vst [vmem:[#allocation58_spill] sm:$0xff] %v9201_v24  ;;  %v9203_v6 = vpop.eup %6285  ;;  %v3375_v31 = vmul.f32 0.5, %v3119_v56  ;;  %4732 = vmatmul.mubr.bf16.gmra.mrb[116].mxu0 %v4065_v42  ;;  %v2111_v21 = vmul.f32 0.044715, %v1855_v48  ;;  %v3614_v13 = vmul.f32 0.5, %v3358_v41  ;;  %v9206_v45 = vpop.f32.mrb[179].mxu1 }
 0x2e5   : > { %v2112_v33 = vmul.f32 0.044715, %v1856_v46  ;;  %v3379_v60 = vmul.f32 0.5, %v3123_v20  ;;  %v2115_v52 = vmul.f32 0.044715, %v1859_v30  ;;  %v3618_v59 = vmul.f32 0.5, %v3362_v1 }
 0x2e6   : > { %v1860_v5 = vmul.f32 %v1604_v37, %v9186_v16  ;;  %v9208_v11 = vpop.eup %6287  ;;  %v9211_v40 = vmul.f32 %v3375_v31, %v9058_v8  ;;  %v2367_v24 = vadd.f32 %v2111_v21, %v9165_v28  ;;  %v3870_v42 = vmul.f32 %v3614_v13, %v8933_v3 }
 0x2e7   : > { %v2368_v56 = vadd.f32 %v2112_v33, %v9169_v54  ;;  %v9217_v41 = vmul.f32 %v3379_v60, %v9064_v58  ;;  %v2371_v48 = vadd.f32 %v2115_v52, %v9173_v0  ;;  %v3874_v1 = vmul.f32 %v3618_v59, %v8945_v47  ;;  %v11495_v59 = vld [vmem:[#allocation16_spill] sm:$0xff] }
 0x2e8   : > { %v2116_v46 = vmul.f32 0.044715, %v1860_v5  ;;  %v9221_v20 = vpop.eup %6289  ;;  %v2623_v30 = vmul.f32 0.7978846, %v2367_v24  ;;  %v3357_v8 = vadd.f32 1.0, %v9036_v9  ;;  %v3361_v31 = vadd.f32 1.0, %v9054_v12 }
 0x2e9   : > { %v2624_v37 = vmul.f32 0.7978846, %v2368_v56  ;;  %v9225_v21 = vpop.eup %6291  ;;  %v2627_v58 = vmul.f32 0.7978846, %v2371_v48  ;;  %v4070_v13 = vpack.c.bf16 %v3874_v1, %v3870_v42  ;;  %v9230_v5 = vpop.f32.mrb[180].mxu1  ;;  %v11493_v24 = vld [vmem:[#allocation15_spill] sm:$0xff]  ;;  %v9240_v56 = vadd.f32 %v11495_v59, %v9060_v14 }
 0x2ea   : > { %v2372_v33 = vadd.f32 %v2116_v46, %v9186_v16  ;;  %11492 = vst [vmem:[#allocation25_spill] sm:$0xff] %v9230_v5  ;;  %6295 = vtanh.f32 %v2623_v30  ;;  %v3613_v47 = vmul.f32 0.5, %v3357_v8  ;;  %v3617_v60 = vmul.f32 0.5, %v3361_v31  ;;  %v9236_v9 = vpop.f32.mrb[181].mxu1  ;;  %v11496_v42 = vld [vmem:[#allocation42_spill] sm:$0xff] }
 0x2eb   : > { %v9234_v52 = vadd.f32 %v11493_v24, %v9043_v29  ;;  %11494 = vst [vmem:[#allocation59_spill] sm:$0xff] %v9236_v9  ;;  %6297 = vtanh.f32 %v2624_v37  ;;  %4741 = vmatprep.mubr.bf16.mxu0 %v4070_v13  ;;  %v9244_v48 = vadd.f32 %v11496_v42, %v9043_v29  ;;  %v9246_v46 = vpop.f32.mrb[182].mxu1  ;;  %v3365_v3 = vadd.f32 1.0, %v9103_v39 }
 0x2ec   : > { %v2628_v12 = vmul.f32 0.7978846, %v2372_v33  ;;  %11497 = vst [vmem:[#allocation60_spill] sm:$0xff] %v9246_v46  ;;  %6299 = vtanh.f32 %v2627_v58  ;;  %v3869_v1 = vmul.f32 %v3613_v47, %v8922_v43  ;;  %v3873_v30 = vmul.f32 %v3617_v60, %v8941_v44  ;;  %v9252_v8 = vpop.f32.mrb[183].mxu1  ;;  %v11499_v58 = vld [vmem:[#allocation43_spill] sm:$0xff] }
 0x2ed   : > { %v1607_v37 = vmul.f32 %v9234_v52, %v9234_v52  ;;  %11498 = vst [vmem:[#allocation61_spill] sm:$0xff] %v9252_v8  ;;  %v9254_v31 = vpop.eup %6293  ;;  %v1608_v33 = vmul.f32 %v9240_v56, %v9240_v56  ;;  %v1611_v13 = vmul.f32 %v9244_v48, %v9244_v48  ;;  %v9262_v24 = vadd.f32 %v11499_v58, %v9060_v14 }
 0x2ee   : > { %6301 = vtanh.f32 %v2628_v12  ;;  %v4069_v43 = vpack.c.bf16 %v3873_v30, %v3869_v1  ;;  %v3366_v47 = vadd.f32 1.0, %v9122_v53  ;;  %v3370_v60 = vadd.f32 1.0, %v9135_v4 }
 0x2ef   : > { %v1863_v44 = vmul.f32 %v1607_v37, %v9234_v52  ;;  %v1864_v59 = vmul.f32 %v1608_v33, %v9240_v56  ;;  %v1867_v12 = vmul.f32 %v1611_v13, %v9244_v48  ;;  %v1612_v42 = vmul.f32 %v9262_v24, %v9262_v24 }
 0x2f0   : > { %4742 = vmatmul.mubr.bf16.gmra.mrb[120].mxu0 %v4069_v43  ;;  %v3622_v58 = vmul.f32 0.5, %v3366_v47  ;;  %v3626_v46 = vmul.f32 0.5, %v3370_v60  ;;  %v3369_v1 = vadd.f32 1.0, %v9131_v17  ;;  %v3621_v4 = vmul.f32 0.5, %v3365_v3 }
 0x2f1   : > { %v2119_v8 = vmul.f32 0.044715, %v1863_v44  ;;  %v2120_v30 = vmul.f32 0.044715, %v1864_v59  ;;  %v2123_v37 = vmul.f32 0.044715, %v1867_v12  ;;  %v1868_v53 = vmul.f32 %v1612_v42, %v9262_v24 }
 0x2f2   : > { %v9274_v9 = vpop.f32.mrb[184].mxu1  ;;  %v3878_v13 = vmul.f32 %v3622_v58, %v8991_v34  ;;  %v3882_v5 = vmul.f32 %v3626_v46, %v9006_v36  ;;  %v3625_v39 = vmul.f32 0.5, %v3369_v1  ;;  %v3877_v60 = vmul.f32 %v3621_v4, %v8978_v19  ;;  %v11503_v36 = vld [vmem:[#allocation17_spill] sm:$0xff] }
 0x2f3   : > { %11500 = vst [vmem:[#allocation62_spill] sm:$0xff] %v9274_v9  ;;  %v2375_v33 = vadd.f32 %v2119_v8, %v9234_v52  ;;  %v9279_v43 = vpop.f32.mrb[185].mxu1  ;;  %v2376_v44 = vadd.f32 %v2120_v30, %v9240_v56  ;;  %v2379_v17 = vadd.f32 %v2123_v37, %v9244_v48  ;;  %v2124_v47 = vmul.f32 0.044715, %v1868_v53  ;;  %v11505_v37 = vld [vmem:[#allocation44_spill] sm:$0xff] }
 0x2f4   : > { %11501 = vst [vmem:[#allocation26_spill] sm:$0xff] %v9279_v43  ;;  %v9284_v59 = vpop.f32.mrb[186].mxu1  ;;  %v9286_v3 = vpop.eup %6295  ;;  %v4074_v8 = vpack.c.bf16 %v3882_v5, %v3878_v13  ;;  %v3881_v34 = vmul.f32 %v3625_v39, %v8997_v27  ;;  %v9291_v46 = vadd.f32 %v11503_v36, %v9043_v29  ;;  %v9300_v53 = vadd.f32 %v11505_v37, %v9060_v14 }
 0x2f5   : > { %11502 = vst [vmem:[#allocation27_spill] sm:$0xff] %v9284_v59  ;;  %v2631_v12 = vmul.f32 0.7978846, %v2375_v33  ;;  %v9293_v42 = vpop.f32.mrb[187].mxu1  ;;  %v9295_v58 = vpop.eup %6297  ;;  %v2632_v1 = vmul.f32 0.7978846, %v2376_v44  ;;  %v2380_v19 = vadd.f32 %v2124_v47, %v9262_v24  ;;  %v9316_v47 = vadd.f32 %v8850_v23, %v9060_v14 }
 0x2f6   : > { %11504 = vst [vmem:[#allocation63_spill] sm:$0xff] %v9293_v42  ;;  %v2635_v30 = vmul.f32 0.7978846, %v2379_v17  ;;  %v9302_v4 = vpop.eup %6299  ;;  %4751 = vmatprep.mubr.bf16.mxu0 %v4074_v8  ;;  %v4073_v27 = vpack.c.bf16 %v3881_v34, %v3877_v60  ;;  %v1615_v5 = vmul.f32 %v9291_v46, %v9291_v46  ;;  %v11506_v33 = vld [vmem:[#allocation45_spill] sm:$0xff]  ;;  %v1616_v17 = vmul.f32 %v9300_v53, %v9300_v53 }
 0x2f7   : > { %6303 = vtanh.f32 %v2631_v12  ;;  %v9308_v13 = vadd.f32 %v11506_v33, %v9043_v29  ;;  %v2636_v44 = vmul.f32 0.7978846, %v2380_v19  ;;  %v3120_v8 = vadd.f32 1.0, %v9196_v22 }
 0x2f8   : > { %v9310_v39 = vpop.eup %6301  ;;  %6305 = vtanh.f32 %v2632_v1  ;;  %4752 = vmatmul.mubr.bf16.gmra.mrb[124].mxu0 %v4073_v27  ;;  %v1871_v60 = vmul.f32 %v1615_v5, %v9291_v46  ;;  %v1872_v34 = vmul.f32 %v1616_v17, %v9300_v53  ;;  %v1620_v36 = vmul.f32 %v9316_v47, %v9316_v47  ;;  %v11509_v17 = vld [vmem:[#allocation46_spill] sm:$0xff] }
 0x2f9   : > { %6307 = vtanh.f32 %v2635_v30  ;;  %v1619_v12 = vmul.f32 %v9308_v13, %v9308_v13  ;;  %v3124_v1 = vadd.f32 1.0, %v9203_v6  ;;  %v9326_v19 = vpop.f32.mrb[188].mxu1  ;;  %v3376_v37 = vmul.f32 0.5, %v3120_v8 }
 0x2fa   : > { %6309 = vtanh.f32 %v2636_v44  ;;  %11507 = vst [vmem:[#allocation64_spill] sm:$0xff] %v9326_v19  ;;  %v2127_v23 = vmul.f32 0.044715, %v1871_v60  ;;  %v9331_v27 = vadd.f32 %v8873_v62, %v9043_v29  ;;  %v9333_v5 = vpop.f32.mrb[189].mxu1  ;;  %v2128_v22 = vmul.f32 0.044715, %v1872_v34 }
 0x2fb   : > { %v1875_v30 = vmul.f32 %v1619_v12, %v9308_v13  ;;  %11508 = vst [vmem:[#allocation65_spill] sm:$0xff] %v9333_v5  ;;  %v1876_v33 = vmul.f32 %v1620_v36, %v9316_v47  ;;  %v3380_v44 = vmul.f32 0.5, %v3124_v1  ;;  %v9338_v42 = vadd.f32 %v11509_v17, %v9060_v14  ;;  %v9340_v6 = vpop.f32.mrb[190].mxu1 }
 0x2fc   : > { %11510 = vst [vmem:[#allocation28_spill] sm:$0xff] %v9340_v6  ;;  %v2383_v60 = vadd.f32 %v2127_v23, %v9291_v46  ;;  %v3632_v8 = vmul.f32 %v3376_v37, %v9077_v38  ;;  %v1623_v62 = vmul.f32 %v9331_v27, %v9331_v27  ;;  %v9346_v19 = vpop.f32.mrb[191].mxu1  ;;  %v2384_v34 = vadd.f32 %v2128_v22, %v9300_v53  ;;  %v11512_v38 = vld [vmem:[#allocation47_spill] sm:$0xff] }
 0x2fd   : > { %v2131_v12 = vmul.f32 0.044715, %v1875_v30  ;;  %11511 = vst [vmem:[#allocation66_spill] sm:$0xff] %v9346_v19  ;;  %v2132_v36 = vmul.f32 0.044715, %v1876_v33  ;;  %v3636_v1 = vmul.f32 %v3380_v44, %v9083_v2  ;;  %v1624_v17 = vmul.f32 %v9338_v42, %v9338_v42 }
 0x2fe   : > { %v2639_v5 = vmul.f32 0.7978846, %v2383_v60  ;;  %v1879_v23 = vmul.f32 %v1623_v62, %v9331_v27  ;;  %v9356_v30 = vadd.f32 %v11512_v38, %v9043_v29  ;;  %v2640_v37 = vmul.f32 0.7978846, %v2384_v34  ;;  %v11513_v34 = vld [vmem:[#allocation48_spill] sm:$0xff] }
 0x2ff   : > { %v2387_v6 = vadd.f32 %v2131_v12, %v9308_v13  ;;  %v2388_v19 = vadd.f32 %v2132_v36, %v9316_v47  ;;  %v3952_v59 = vpack.c.bf16 %v3636_v1, %v3632_v8  ;;  %v1880_v22 = vmul.f32 %v1624_v17, %v9338_v42 }
 0x300   : > { %6311 = vtanh.f32 %v2639_v5  ;;  %v2135_v44 = vmul.f32 0.044715, %v1879_v23  ;;  %v1627_v60 = vmul.f32 %v9356_v30, %v9356_v30  ;;  %v9368_v36 = vadd.f32 %v11513_v34, %v9060_v14 }
 0x301   : > { %v9360_v33 = vpop.eup %6303  ;;  %v2643_v2 = vmul.f32 0.7978846, %v2387_v6  ;;  %6313 = vtanh.f32 %v2640_v37  ;;  %v2644_v62 = vmul.f32 0.7978846, %v2388_v19  ;;  %4794 = vmatprep.mubr.bf16.mxu0 %v3952_v59  ;;  %v2136_v38 = vmul.f32 0.044715, %v1880_v22 }
 0x302   : > { %v9364_v12 = vpop.eup %6305  ;;  %v9370_v8 = vpop.f32.mrb[192].mxu1  ;;  %v11515_v5 = vpack.c.bf16 %v9217_v41, %v9211_v40  ;;  %v2391_v6 = vadd.f32 %v2135_v44, %v9331_v27  ;;  %v1883_v17 = vmul.f32 %v1627_v60, %v9356_v30  ;;  %v3128_v59 = vadd.f32 1.0, %v9221_v20 }
 0x303   : > { %11514 = vst [vmem:[#allocation29_spill] sm:$0xff] %v9370_v8  ;;  %v9372_v1 = vpop.eup %6307  ;;  %6315 = vtanh.f32 %v2643_v2  ;;  %v9380_v19 = vpop.f32.mrb[193].mxu1  ;;  %v2392_v37 = vadd.f32 %v2136_v38, %v9338_v42  ;;  %v1628_v22 = vmul.f32 %v9368_v36, %v9368_v36  ;;  %v3132_v2 = vadd.f32 1.0, %v9254_v31 }
 0x304   : > { %4795 = vmatmul.mubr.bf16.vlgmr.msra.gmra.mrb[0].mxu0 %v11515_v5  ;;  %11516 = vst [vmem:[#allocation30_spill] sm:$0xff] %v9380_v19  ;;  %v9382_v23 = vpop.eup %6309  ;;  %6317 = vtanh.f32 %v2644_v62  ;;  %v9388_v40 = vpop.f32.mrb[194].mxu1  ;;  %v2647_v41 = vmul.f32 0.7978846, %v2391_v6  ;;  %v2139_v44 = vmul.f32 0.044715, %v1883_v17 }
 0x305   : > { %11517 = vst [vmem:[#allocation67_spill] sm:$0xff] %v9388_v40  ;;  %v3384_v34 = vmul.f32 0.5, %v3128_v59  ;;  %v3127_v60 = vadd.f32 1.0, %v9208_v11  ;;  %v2648_v20 = vmul.f32 0.7978846, %v2392_v37  ;;  %v1884_v5 = vmul.f32 %v1628_v22, %v9368_v36  ;;  %v9393_v8 = vpop.f32.mrb[195].mxu1 }
 0x306   : > { %v3388_v19 = vmul.f32 0.5, %v3132_v2  ;;  %v3131_v62 = vadd.f32 1.0, %v9225_v21  ;;  %11518 = vst [vmem:[#allocation31_spill] sm:$0xff] %v9393_v8  ;;  %6319 = vtanh.f32 %v2647_v41  ;;  %v2395_v38 = vadd.f32 %v2139_v44, %v9356_v30  ;;  %v11519_v22 = vld [vmem:[#allocation49_spill] sm:$0xff]  ;;  %v11520_v21 = vld [vmem:[#allocation18_spill] sm:$0xff] }
 0x307   : > { %v3640_v31 = vmul.f32 %v3384_v34, %v9110_v57  ;;  %v3383_v43 = vmul.f32 0.5, %v3127_v60  ;;  %6321 = vtanh.f32 %v2648_v20  ;;  %v2140_v6 = vmul.f32 0.044715, %v1884_v5  ;;  %v11521_v60 = vld [vmem:[#allocation50_spill] sm:$0xff]  ;;  %v11523_v5 = vld [vmem:[#allocation51_spill] sm:$0xff] }
 0x308   : > { %v3644_v17 = vmul.f32 %v3388_v19, %v9141_v26  ;;  %v3387_v59 = vmul.f32 0.5, %v3131_v62  ;;  %v2651_v11 = vmul.f32 0.7978846, %v2395_v38  ;;  %v9401_v2 = vadd.f32 %v11519_v22, %v9043_v29 }
 0x309   : > { %v3639_v37 = vmul.f32 %v3383_v43, %v9097_v25  ;;  %v9405_v41 = vadd.f32 %v11520_v21, %v9060_v14  ;;  %v2396_v44 = vadd.f32 %v2140_v6, %v9368_v36  ;;  %v9411_v26 = vadd.f32 %v11521_v60, %v9043_v29  ;;  %v9413_v19 = vpop.f32.mrb[196].mxu1 }
 0x30a   : > { %v3956_v57 = vpack.c.bf16 %v3644_v17, %v3640_v31  ;;  %v3643_v34 = vmul.f32 %v3387_v59, %v9114_v15  ;;  %11522 = vst [vmem:[#allocation32_spill] sm:$0xff] %v9413_v19  ;;  %v9415_v25 = vpop.eup %6311  ;;  %6323 = vtanh.f32 %v2651_v11  ;;  %v1631_v43 = vmul.f32 %v9401_v2, %v9401_v2  ;;  %v9425_v15 = vpop.f32.mrb[197].mxu1 }
 0x30b   : > { %v1632_v20 = vmul.f32 %v9405_v41, %v9405_v41  ;;  %v9423_v62 = vadd.f32 %v11523_v5, %v9060_v14  ;;  %11524 = vst [vmem:[#allocation33_spill] sm:$0xff] %v9425_v15  ;;  %v9427_v38 = vpop.eup %6313  ;;  %v2652_v31 = vmul.f32 0.7978846, %v2396_v44  ;;  %v1635_v17 = vmul.f32 %v9411_v26, %v9411_v26  ;;  %v9432_v11 = vpop.f32.mrb[198].mxu1 }
 0x30c   : > { %4804 = vmatprep.mubr.bf16.mxu0 %v3956_v57  ;;  %v3955_v6 = vpack.c.bf16 %v3643_v34, %v3639_v37  ;;  %v3136_v59 = vadd.f32 1.0, %v9295_v58  ;;  %11525 = vst [vmem:[#allocation34_spill] sm:$0xff] %v9432_v11  ;;  %v1887_v21 = vmul.f32 %v1631_v43, %v9401_v2  ;;  %v3140_v44 = vadd.f32 1.0, %v9310_v39  ;;  %v9441_v57 = vpop.f32.mrb[199].mxu1 }
 0x30d   : > { %v9434_v22 = vpop.eup %6315  ;;  %v1888_v60 = vmul.f32 %v1632_v20, %v9405_v41  ;;  %v1636_v5 = vmul.f32 %v9423_v62, %v9423_v62  ;;  %11526 = vst [vmem:[#allocation35_spill] sm:$0xff] %v9441_v57  ;;  %6325 = vtanh.f32 %v2652_v31  ;;  %v1891_v58 = vmul.f32 %v1635_v17, %v9411_v26 }
 0x30e   : > { %v9443_v37 = vpop.eup %6317  ;;  %4805 = vmatmul.mubr.bf16.gmra.mrb[4].mxu0 %v3955_v6  ;;  %v3392_v34 = vmul.f32 0.5, %v3136_v59  ;;  %v3135_v11 = vadd.f32 1.0, %v9286_v3  ;;  %v2143_v15 = vmul.f32 0.044715, %v1887_v21  ;;  %v3396_v19 = vmul.f32 0.5, %v3140_v44 }
 0x30f   : > { %v2144_v43 = vmul.f32 0.044715, %v1888_v60  ;;  %v1892_v20 = vmul.f32 %v1636_v5, %v9423_v62  ;;  %v2147_v8 = vmul.f32 0.044715, %v1891_v58  ;;  %v3139_v39 = vadd.f32 1.0, %v9302_v4 }
 0x310   : > { %v3648_v40 = vmul.f32 %v3392_v34, %v9169_v54  ;;  %v3391_v57 = vmul.f32 0.5, %v3135_v11  ;;  %v9450_v9 = vpop.eup %6319  ;;  %v2399_v31 = vadd.f32 %v2143_v15, %v9401_v2  ;;  %v3652_v3 = vmul.f32 %v3396_v19, %v9186_v16 }
 0x311   : > { %v2400_v6 = vadd.f32 %v2144_v43, %v9405_v41  ;;  %v2148_v17 = vmul.f32 0.044715, %v1892_v20  ;;  %v9455_v59 = vpop.eup %6321  ;;  %v2403_v21 = vadd.f32 %v2147_v8, %v9411_v26  ;;  %v3395_v60 = vmul.f32 0.5, %v3139_v39  ;;  %v9463_v4 = vpop.f32.mrb[200].mxu1 }
 0x312   : > { %v3647_v5 = vmul.f32 %v3391_v57, %v9165_v28  ;;  %v9461_v54 = vadd.f32 %v8965_v50, %v9043_v29  ;;  %v2655_v11 = vmul.f32 0.7978846, %v2399_v31  ;;  %v3960_v58 = vpack.c.bf16 %v3652_v3, %v3648_v40  ;;  %v9466_v34 = vpop.f32.mrb[201].mxu1 }
 0x313   : > { %v2656_v15 = vmul.f32 0.7978846, %v2400_v6  ;;  %v2404_v44 = vadd.f32 %v2148_v17, %v9423_v62  ;;  %v2659_v16 = vmul.f32 0.7978846, %v2403_v21  ;;  %v3651_v19 = vmul.f32 %v3395_v60, %v9173_v0  ;;  %v9475_v50 = vpop.f32.mrb[202].mxu1 }
 0x314   : > { %v1639_v8 = vmul.f32 %v9461_v54, %v9461_v54  ;;  %v9473_v28 = vadd.f32 %v8969_v10, %v9060_v14  ;;  %v9477_v57 = vpop.eup %6323  ;;  %6327 = vtanh.f32 %v2655_v11  ;;  %4814 = vmatprep.mubr.bf16.mxu0 %v3960_v58  ;;  %v9481_v40 = vadd.f32 %v8972_v55, %v9043_v29  ;;  %v9487_v20 = vpop.f32.mrb[203].mxu1 }
 0x315   : > { %v2660_v43 = vmul.f32 0.7978846, %v2404_v44  ;;  %v9485_v0 = vadd.f32 %v8980_v32, %v9060_v14  ;;  %6329 = vtanh.f32 %v2656_v15  ;;  %v3959_v10 = vpack.c.bf16 %v3651_v19, %v3647_v5 }
 0x316   : > { %v1895_v39 = vmul.f32 %v1639_v8, %v9461_v54  ;;  %v1640_v31 = vmul.f32 %v9473_v28, %v9473_v28  ;;  %6331 = vtanh.f32 %v2659_v16  ;;  %v1643_v6 = vmul.f32 %v9481_v40, %v9481_v40 }
 0x317   : > { %v1644_v55 = vmul.f32 %v9485_v0, %v9485_v0  ;;  %v3144_v17 = vadd.f32 1.0, %v9364_v12  ;;  %v9497_v32 = vpop.eup %6325  ;;  %6333 = vtanh.f32 %v2660_v43  ;;  %4815 = vmatmul.mubr.bf16.gmra.mrb[8].mxu0 %v3959_v10  ;;  %v3148_v60 = vadd.f32 1.0, %v9382_v23 }
 0x318   : > { %v2151_v3 = vmul.f32 0.044715, %v1895_v39  ;;  %v1896_v21 = vmul.f32 %v1640_v31, %v9473_v28  ;;  %v1899_v5 = vmul.f32 %v1643_v6, %v9481_v40  ;;  %v3143_v44 = vadd.f32 1.0, %v9360_v33 }
 0x319   : > { %v1900_v11 = vmul.f32 %v1644_v55, %v9485_v0  ;;  %v3400_v15 = vmul.f32 0.5, %v3144_v17  ;;  %v3404_v12 = vmul.f32 0.5, %v3148_v60  ;;  %v3147_v19 = vadd.f32 1.0, %v9372_v1  ;;  %v9506_v8 = vpop.f32.mrb[204].mxu1  ;;  %v11527_v1 = vld [vmem:[#allocation19_spill] sm:$0xff] }
 0x31a   : > { %v2407_v58 = vadd.f32 %v2151_v3, %v9461_v54  ;;  %v2152_v16 = vmul.f32 0.044715, %v1896_v21  ;;  %v2155_v43 = vmul.f32 0.044715, %v1899_v5  ;;  %v3399_v23 = vmul.f32 0.5, %v3143_v44  ;;  %v9518_v5 = vpop.f32.mrb[205].mxu1 }
 0x31b   : > { %v2156_v10 = vmul.f32 0.044715, %v1900_v11  ;;  %v3656_v39 = vmul.f32 %v3400_v15, %v9240_v56  ;;  %v3660_v55 = vmul.f32 %v3404_v12, %v9262_v24  ;;  %v3403_v17 = vmul.f32 0.5, %v3147_v19  ;;  %11528 = vst [vmem:[#allocation14_spill] sm:$0xff] %v9518_v5  ;;  %v9521_v44 = vpop.f32.mrb[206].mxu1  ;;  %v11530_v12 = vld [vmem:[#allocation20_spill] sm:$0xff] }
 0x31c   : > { %v2663_v31 = vmul.f32 0.7978846, %v2407_v58  ;;  %v2408_v6 = vadd.f32 %v2152_v16, %v9473_v28  ;;  %v2411_v33 = vadd.f32 %v2155_v43, %v9481_v40  ;;  %v3655_v21 = vmul.f32 %v3399_v23, %v9234_v52  ;;  %11529 = vst [vmem:[#allocation36_spill] sm:$0xff] %v9521_v44  ;;  %v9531_v43 = vpop.f32.mrb[207].mxu1 }
 0x31d   : > { %v2412_v3 = vadd.f32 %v2156_v10, %v9485_v0  ;;  %v9516_v60 = vadd.f32 %v11527_v1, %v9043_v29  ;;  %v3964_v11 = vpack.c.bf16 %v3660_v55, %v3656_v39  ;;  %v3659_v15 = vmul.f32 %v3403_v17, %v9244_v48  ;;  %11531 = vst [vmem:[#allocation38_spill] sm:$0xff] %v9531_v43  ;;  %v11532_v39 = vld [vmem:[#allocation52_spill] sm:$0xff] }
 0x31e   : > { %6335 = vtanh.f32 %v2663_v31  ;;  %v2664_v56 = vmul.f32 0.7978846, %v2408_v6  ;;  %v9523_v24 = vpop.eup %6327  ;;  %v2667_v58 = vmul.f32 0.7978846, %v2411_v33  ;;  %v9529_v19 = vadd.f32 %v11530_v12, %v9060_v14 }
 0x31f   : > { %v2668_v16 = vmul.f32 0.7978846, %v2412_v3  ;;  %v1647_v52 = vmul.f32 %v9516_v60, %v9516_v60  ;;  %v9533_v10 = vpop.eup %6329  ;;  %4824 = vmatprep.mubr.bf16.mxu0 %v3964_v11  ;;  %v3963_v48 = vpack.c.bf16 %v3659_v15, %v3655_v21  ;;  %v9537_v23 = vadd.f32 %v11532_v39, %v9043_v29 }
 0x320   : > { %6337 = vtanh.f32 %v2664_v56  ;;  %v9541_v31 = vadd.f32 %v9028_v35, %v9060_v14  ;;  %v9543_v6 = vpop.eup %6331  ;;  %v1648_v17 = vmul.f32 %v9529_v19, %v9529_v19  ;;  %v3152_v33 = vadd.f32 1.0, %v9427_v38 }
 0x321   : > { %6339 = vtanh.f32 %v2667_v58  ;;  %v1903_v55 = vmul.f32 %v1647_v52, %v9516_v60  ;;  %v9549_v3 = vpop.eup %6333  ;;  %4825 = vmatmul.mubr.bf16.gmra.mrb[12].mxu0 %v3963_v48  ;;  %v1651_v21 = vmul.f32 %v9537_v23, %v9537_v23  ;;  %v3156_v1 = vadd.f32 1.0, %v9443_v37  ;;  %v9556_v56 = vpop.f32.mrb[208].mxu1 }
 0x322   : > { %6341 = vtanh.f32 %v2668_v16  ;;  %v1652_v35 = vmul.f32 %v9541_v31, %v9541_v31  ;;  %11533 = vst [vmem:[#allocation37_spill] sm:$0xff] %v9556_v56  ;;  %v1904_v15 = vmul.f32 %v1648_v17, %v9529_v19  ;;  %v3408_v58 = vmul.f32 0.5, %v3152_v33  ;;  %v9566_v5 = vpop.f32.mrb[209].mxu1 }
 0x323   : > { %v2159_v11 = vmul.f32 0.044715, %v1903_v55  ;;  %v3151_v38 = vadd.f32 1.0, %v9415_v25  ;;  %v1907_v52 = vmul.f32 %v1651_v21, %v9537_v23  ;;  %v3412_v12 = vmul.f32 0.5, %v3156_v1 }
 0x324   : > { %v1908_v16 = vmul.f32 %v1652_v35, %v9541_v31  ;;  %v3155_v48 = vadd.f32 1.0, %v9434_v22  ;;  %v2160_v43 = vmul.f32 0.044715, %v1904_v15  ;;  %v3664_v37 = vmul.f32 %v3408_v58, %v9300_v53 }
 0x325   : > { %v2415_v39 = vadd.f32 %v2159_v11, %v9516_v60  ;;  %v3407_v44 = vmul.f32 0.5, %v3151_v38  ;;  %v2163_v56 = vmul.f32 0.044715, %v1907_v52  ;;  %v3668_v17 = vmul.f32 %v3412_v12, %v9316_v47 }
 0x326   : > { %v2164_v55 = vmul.f32 0.044715, %v1908_v16  ;;  %v3411_v33 = vmul.f32 0.5, %v3155_v48  ;;  %v2416_v21 = vadd.f32 %v2160_v43, %v9529_v19  ;;  %v9572_v22 = vadd.f32 %v9047_v49, %v9043_v29  ;;  %v9585_v49 = vpop.f32.mrb[210].mxu1  ;;  %v11534_v16 = vld [vmem:[#allocation53_spill] sm:$0xff] }
 0x327   : > { %v2671_v25 = vmul.f32 0.7978846, %v2415_v39  ;;  %v3663_v35 = vmul.f32 %v3407_v44, %v9291_v46  ;;  %v2419_v53 = vadd.f32 %v2163_v56, %v9537_v23  ;;  %v3968_v15 = vpack.c.bf16 %v3668_v17, %v3664_v37  ;;  %v9593_v12 = vpop.f32.mrb[211].mxu1  ;;  %v11536_v37 = vld [vmem:[#allocation21_spill] sm:$0xff] }
 0x328   : > { %v9574_v1 = vpop.eup %6335  ;;  %v2420_v11 = vadd.f32 %v2164_v55, %v9541_v31  ;;  %v3667_v47 = vmul.f32 %v3411_v33, %v9308_v13  ;;  %v2672_v58 = vmul.f32 0.7978846, %v2416_v21  ;;  %v1655_v43 = vmul.f32 %v9572_v22, %v9572_v22  ;;  %11535 = vst [vmem:[#allocation39_spill] sm:$0xff] %v9593_v12 }
 0x329   : > { %6343 = vtanh.f32 %v2671_v25  ;;  %v9583_v46 = vadd.f32 %v9052_v61, %v9060_v14  ;;  %v2675_v38 = vmul.f32 0.7978846, %v2419_v53  ;;  %4834 = vmatprep.mubr.bf16.mxu0 %v3968_v15  ;;  %v9591_v13 = vadd.f32 %v11534_v16, %v9043_v29  ;;  %v9604_v17 = vpop.f32.mrb[212].mxu1 }
 0x32a   : > { %v9587_v44 = vpop.eup %6337  ;;  %v2676_v56 = vmul.f32 0.7978846, %v2420_v11  ;;  %v3967_v52 = vpack.c.bf16 %v3667_v47, %v3663_v35  ;;  %6345 = vtanh.f32 %v2672_v58  ;;  %v1911_v61 = vmul.f32 %v1655_v43, %v9572_v22  ;;  %11537 = vst [vmem:[#allocation40_spill] sm:$0xff] %v9604_v17 }
 0x32b   : > { %v9595_v48 = vpop.eup %6339  ;;  %v1656_v39 = vmul.f32 %v9583_v46, %v9583_v46  ;;  %v9602_v55 = vadd.f32 %v11536_v37, %v9060_v14  ;;  %6347 = vtanh.f32 %v2675_v38  ;;  %v1659_v25 = vmul.f32 %v9591_v13, %v9591_v13 }
 0x32c   : > { %v9606_v33 = vpop.eup %6341  ;;  %4835 = vmatmul.mubr.bf16.gmra.mrb[16].mxu0 %v3967_v52  ;;  %v3160_v21 = vadd.f32 1.0, %v9455_v59  ;;  %v3164_v35 = vadd.f32 1.0, %v9497_v32  ;;  %6349 = vtanh.f32 %v2676_v56  ;;  %v2167_v53 = vmul.f32 0.044715, %v1911_v61 }
 0x32d   : > { %v1912_v11 = vmul.f32 %v1656_v39, %v9583_v46  ;;  %v1660_v15 = vmul.f32 %v9602_v55, %v9602_v55  ;;  %v1915_v47 = vmul.f32 %v1659_v25, %v9591_v13  ;;  %v3159_v38 = vadd.f32 1.0, %v9450_v9 }
 0x32e   : > { %v3416_v58 = vmul.f32 0.5, %v3160_v21  ;;  %v3420_v43 = vmul.f32 0.5, %v3164_v35  ;;  %v2423_v52 = vadd.f32 %v2167_v53, %v9572_v22  ;;  %v3163_v32 = vadd.f32 1.0, %v9477_v57  ;;  %v9629_v57 = vpop.f32.mrb[213].mxu1 }
 0x32f   : > { %v2168_v16 = vmul.f32 0.044715, %v1912_v11  ;;  %v1916_v59 = vmul.f32 %v1660_v15, %v9602_v55  ;;  %v2171_v56 = vmul.f32 0.044715, %v1915_v47  ;;  %v3415_v37 = vmul.f32 0.5, %v3159_v38  ;;  %v11538_v11 = vld [vmem:[#allocation22_spill] sm:$0xff] }
 0x330   : > { %v3672_v61 = vmul.f32 %v3416_v58, %v9338_v42  ;;  %v3676_v39 = vmul.f32 %v3420_v43, %v9368_v36  ;;  %v2679_v17 = vmul.f32 0.7978846, %v2423_v52  ;;  %v3419_v35 = vmul.f32 0.5, %v3163_v32  ;;  %11539 = vst [vmem:[#allocation41_spill] sm:$0xff] %v9629_v57  ;;  %v9635_v43 = vpop.f32.mrb[214].mxu1  ;;  %v11541_v52 = vld [vmem:[#allocation23_spill] sm:$0xff] }
 0x331   : > { %v2424_v25 = vadd.f32 %v2168_v16, %v9583_v46  ;;  %v2172_v21 = vmul.f32 0.044715, %v1916_v59  ;;  %v2427_v9 = vadd.f32 %v2171_v56, %v9591_v13  ;;  %v3671_v53 = vmul.f32 %v3415_v37, %v9331_v27  ;;  %11540 = vst [vmem:[#allocation15_spill] sm:$0xff] %v9635_v43  ;;  %v11542_v59 = vld [vmem:[#allocation24_spill] sm:$0xff] }
 0x332   : > { %v3972_v12 = vpack.c.bf16 %v3676_v39, %v3672_v61  ;;  %v9627_v15 = vadd.f32 %v11538_v11, %v9043_v29  ;;  %6351 = vtanh.f32 %v2679_v17  ;;  %v3675_v58 = vmul.f32 %v3419_v35, %v9356_v30  ;;  %v9647_v17 = vpop.f32.mrb[215].mxu1 }
 0x333   : > { %v9631_v42 = vpop.eup %6343  ;;  %v2680_v36 = vmul.f32 0.7978846, %v2424_v25  ;;  %v2428_v47 = vadd.f32 %v2172_v21, %v9602_v55  ;;  %v2683_v38 = vmul.f32 0.7978846, %v2427_v9  ;;  %v9641_v16 = vadd.f32 %v11541_v52, %v9060_v14  ;;  %11543 = vst [vmem:[#allocation16_spill] sm:$0xff] %v9647_v17  ;;  %v9655_v37 = vpop.f32.mrb[216].mxu1 }
 0x334   : > { %4844 = vmatprep.mubr.bf16.mxu0 %v3972_v12  ;;  %v1663_v27 = vmul.f32 %v9627_v15, %v9627_v15  ;;  %v9645_v32 = vadd.f32 %v11542_v59, %v9043_v29  ;;  %v9649_v56 = vpop.eup %6345  ;;  %v3971_v61 = vpack.c.bf16 %v3675_v58, %v3671_v53  ;;  %v11544_v12 = vld [vmem:[#allocation54_spill] sm:$0xff]  ;;  %11545 = vst [vmem:[#allocation42_spill] sm:$0xff] %v9655_v37  ;;  %v3167_v52 = vadd.f32 1.0, %v9523_v24 }
 0x335   : > { %6353 = vtanh.f32 %v2680_v36  ;;  %v2684_v30 = vmul.f32 0.7978846, %v2428_v47  ;;  %v9653_v39 = vadd.f32 %v11544_v12, %v9060_v14  ;;  %v9657_v25 = vpop.eup %6347  ;;  %v1664_v35 = vmul.f32 %v9641_v16, %v9641_v16 }
 0x336   : > { %6355 = vtanh.f32 %v2683_v38  ;;  %v1919_v21 = vmul.f32 %v1663_v27, %v9627_v15  ;;  %v1667_v9 = vmul.f32 %v9645_v32, %v9645_v32  ;;  %v9664_v11 = vpop.eup %6349  ;;  %4845 = vmatmul.mubr.bf16.gmra.mrb[20].mxu0 %v3971_v61  ;;  %v3168_v36 = vadd.f32 1.0, %v9533_v10 }
 0x337   : > { %6357 = vtanh.f32 %v2684_v30  ;;  %v1668_v53 = vmul.f32 %v9653_v39, %v9653_v39  ;;  %v3172_v47 = vadd.f32 1.0, %v9549_v3  ;;  %v1920_v38 = vmul.f32 %v1664_v35, %v9641_v16 }
 0x338   : > { %v2175_v58 = vmul.f32 0.044715, %v1919_v21  ;;  %v1923_v27 = vmul.f32 %v1667_v9, %v9645_v32  ;;  %v3424_v12 = vmul.f32 0.5, %v3168_v36  ;;  %v3171_v30 = vadd.f32 1.0, %v9543_v6  ;;  %v9678_v9 = vpop.f32.mrb[217].mxu1 }
 0x339   : > { %v1924_v59 = vmul.f32 %v1668_v53, %v9653_v39  ;;  %v3428_v37 = vmul.f32 0.5, %v3172_v47  ;;  %v2176_v17 = vmul.f32 0.044715, %v1920_v38  ;;  %v3423_v10 = vmul.f32 0.5, %v3167_v52 }
 0x33a   : > { %v2431_v61 = vadd.f32 %v2175_v58, %v9627_v15  ;;  %v2179_v43 = vmul.f32 0.044715, %v1923_v27  ;;  %v3680_v3 = vmul.f32 %v3424_v12, %v9405_v41  ;;  %v3427_v35 = vmul.f32 0.5, %v3171_v30 }
 0x33b   : > { %v2180_v57 = vmul.f32 0.044715, %v1924_v59  ;;  %v3684_v21 = vmul.f32 %v3428_v37, %v9423_v62  ;;  %v2432_v53 = vadd.f32 %v2176_v17, %v9641_v16  ;;  %v3679_v6 = vmul.f32 %v3423_v10, %v9401_v2 }
 0x33c   : > { %v2687_v24 = vmul.f32 0.7978846, %v2431_v61  ;;  %v2435_v36 = vadd.f32 %v2179_v43, %v9645_v32  ;;  %v9683_v47 = vpop.eup %6351  ;;  %v3683_v27 = vmul.f32 %v3427_v35, %v9411_v26  ;;  %v9689_v41 = vadd.f32 %v9148_v7, %v9043_v29  ;;  %v9695_v43 = vpop.f32.mrb[218].mxu1 }
 0x33d   : > { %v2436_v58 = vadd.f32 %v2180_v57, %v9653_v39  ;;  %v3976_v38 = vpack.c.bf16 %v3684_v21, %v3680_v3  ;;  %v2688_v62 = vmul.f32 0.7978846, %v2432_v53  ;;  %v9693_v17 = vadd.f32 %v9152_v63, %v9060_v14  ;;  %v9705_v59 = vpop.f32.mrb[219].mxu1 }
 0x33e   : > { %6359 = vtanh.f32 %v2687_v24  ;;  %v2691_v37 = vmul.f32 0.7978846, %v2435_v36  ;;  %v3975_v57 = vpack.c.bf16 %v3683_v27, %v3679_v6  ;;  %v1671_v26 = vmul.f32 %v9689_v41, %v9689_v41  ;;  %v9716_v10 = vpop.f32.mrb[220].mxu1 }
 0x33f   : > { %v9697_v2 = vpop.eup %6353  ;;  %v2692_v52 = vmul.f32 0.7978846, %v2436_v58  ;;  %4854 = vmatprep.mubr.bf16.mxu0 %v3976_v38  ;;  %v9703_v7 = vadd.f32 %v9157_v51, %v9043_v29  ;;  %6361 = vtanh.f32 %v2688_v62  ;;  %v1672_v63 = vmul.f32 %v9693_v17, %v9693_v17 }
 0x340   : > { %v9707_v12 = vpop.eup %6355  ;;  %v9713_v30 = vadd.f32 %v9160_v18, %v9060_v14  ;;  %v3176_v61 = vadd.f32 1.0, %v9587_v44  ;;  %6363 = vtanh.f32 %v2691_v37  ;;  %4855 = vmatmul.mubr.bf16.gmra.mrb[24].mxu0 %v3975_v57  ;;  %v1927_v51 = vmul.f32 %v1671_v26, %v9689_v41 }
 0x341   : > { %v9718_v3 = vpop.eup %6357  ;;  %v1675_v21 = vmul.f32 %v9703_v7, %v9703_v7  ;;  %v3180_v35 = vadd.f32 1.0, %v9606_v33  ;;  %6365 = vtanh.f32 %v2692_v52  ;;  %v1928_v24 = vmul.f32 %v1672_v63, %v9693_v17 }
 0x342   : > { %v1676_v18 = vmul.f32 %v9713_v30, %v9713_v30  ;;  %v3432_v44 = vmul.f32 0.5, %v3176_v61  ;;  %v2183_v53 = vmul.f32 0.044715, %v1927_v51  ;;  %v3175_v58 = vadd.f32 1.0, %v9574_v1 }
 0x343   : > { %v1931_v36 = vmul.f32 %v1675_v21, %v9703_v7  ;;  %v3436_v6 = vmul.f32 0.5, %v3180_v35  ;;  %v2184_v38 = vmul.f32 0.044715, %v1928_v24  ;;  %v3179_v33 = vadd.f32 1.0, %v9595_v48  ;;  %v11546_v21 = vld [vmem:[#allocation55_spill] sm:$0xff]  ;;  %v9739_v35 = vpop.f32.mrb[221].mxu1 }
 0x344   : > { %v1932_v27 = vmul.f32 %v1676_v18, %v9713_v30  ;;  %v3688_v62 = vmul.f32 %v3432_v44, %v9473_v28  ;;  %v2439_v37 = vadd.f32 %v2183_v53, %v9689_v41  ;;  %v3431_v26 = vmul.f32 0.5, %v3175_v58  ;;  %v9749_v58 = vpop.f32.mrb[222].mxu1 }
 0x345   : > { %v2187_v52 = vmul.f32 0.044715, %v1931_v36  ;;  %v3692_v57 = vmul.f32 %v3436_v6, %v9485_v0  ;;  %v2440_v63 = vadd.f32 %v2184_v38, %v9693_v17  ;;  %v3435_v51 = vmul.f32 0.5, %v3179_v33  ;;  %11547 = vst [vmem:[#allocation43_spill] sm:$0xff] %v9749_v58 }
 0x346   : > { %v2188_v61 = vmul.f32 0.044715, %v1932_v27  ;;  %v9737_v1 = vadd.f32 %v11546_v21, %v9043_v29  ;;  %v2695_v24 = vmul.f32 0.7978846, %v2439_v37  ;;  %v3687_v18 = vmul.f32 %v3431_v26, %v9461_v54  ;;  %v11548_v27 = vld [vmem:[#allocation57_spill] sm:$0xff]  ;;  %v11549_v54 = vld [vmem:[#allocation58_spill] sm:$0xff] }
 0x347   : > { %v2443_v28 = vadd.f32 %v2187_v52, %v9703_v7  ;;  %v3980_v48 = vpack.c.bf16 %v3692_v57, %v3688_v62  ;;  %v2696_v0 = vmul.f32 0.7978846, %v2440_v63  ;;  %v3691_v36 = vmul.f32 %v3435_v51, %v9481_v40  ;;  %v9759_v37 = vpop.f32.mrb[223].mxu1 }
 0x348   : > { %v9743_v44 = vpop.eup %6359  ;;  %v2444_v53 = vadd.f32 %v2188_v61, %v9713_v30  ;;  %v1679_v6 = vmul.f32 %v9737_v1, %v9737_v1  ;;  %6367 = vtanh.f32 %v2695_v24  ;;  %v9753_v62 = vadd.f32 %v11548_v27, %v9060_v14  ;;  %11550 = vst [vmem:[#allocation17_spill] sm:$0xff] %v9759_v37  ;;  %v9764_v63 = vpop.f32.mrb[224].mxu1 }
 0x349   : > { %v2699_v38 = vmul.f32 0.7978846, %v2443_v28  ;;  %4864 = vmatprep.mubr.bf16.mxu0 %v3980_v48  ;;  %v9757_v33 = vadd.f32 %v11549_v54, %v9043_v29  ;;  %v9761_v52 = vpop.eup %6361  ;;  %6369 = vtanh.f32 %v2696_v0  ;;  %v3979_v57 = vpack.c.bf16 %v3691_v36, %v3687_v18  ;;  %11551 = vst [vmem:[#allocation44_spill] sm:$0xff] %v9764_v63 }
 0x34a   : > { %v2700_v40 = vmul.f32 0.7978846, %v2444_v53  ;;  %v1935_v26 = vmul.f32 %v1679_v6, %v9737_v1  ;;  %v9766_v61 = vpop.eup %6363  ;;  %v1680_v51 = vmul.f32 %v9753_v62, %v9753_v62  ;;  %v9774_v24 = vadd.f32 %v9206_v45, %v9060_v14 }
 0x34b   : > { %6371 = vtanh.f32 %v2699_v38  ;;  %v1683_v21 = vmul.f32 %v9757_v33, %v9757_v33  ;;  %v9776_v28 = vpop.eup %6365  ;;  %4865 = vmatmul.mubr.bf16.gmra.mrb[28].mxu0 %v3979_v57  ;;  %v3184_v18 = vadd.f32 1.0, %v9649_v56  ;;  %v3188_v0 = vadd.f32 1.0, %v9664_v11 }
 0x34c   : > { %6373 = vtanh.f32 %v2700_v40  ;;  %v2191_v48 = vmul.f32 0.044715, %v1935_v26  ;;  %v1936_v53 = vmul.f32 %v1680_v51, %v9753_v62  ;;  %v1684_v6 = vmul.f32 %v9774_v24, %v9774_v24 }
 0x34d   : > { %v1939_v36 = vmul.f32 %v1683_v21, %v9757_v33  ;;  %v3183_v38 = vadd.f32 1.0, %v9631_v42  ;;  %v3440_v27 = vmul.f32 0.5, %v3184_v18  ;;  %v3444_v54 = vmul.f32 0.5, %v3188_v0  ;;  %v9793_v0 = vpop.f32.mrb[225].mxu1 }
 0x34e   : > { %v2447_v45 = vadd.f32 %v2191_v48, %v9737_v1  ;;  %v3187_v40 = vadd.f32 1.0, %v9657_v25  ;;  %v2192_v57 = vmul.f32 0.044715, %v1936_v53  ;;  %v1940_v56 = vmul.f32 %v1684_v6, %v9774_v24  ;;  %11552 = vst [vmem:[#allocation45_spill] sm:$0xff] %v9793_v0 }
 0x34f   : > { %v2195_v26 = vmul.f32 0.044715, %v1939_v36  ;;  %v3439_v11 = vmul.f32 0.5, %v3183_v38  ;;  %v3696_v51 = vmul.f32 %v3440_v27, %v9529_v19  ;;  %v3700_v21 = vmul.f32 %v3444_v54, %v9541_v31  ;;  %v11553_v36 = vld [vmem:[#allocation25_spill] sm:$0xff]  ;;  %v11554_v27 = vld [vmem:[#allocation59_spill] sm:$0xff] }
 0x350   : > { %v2703_v63 = vmul.f32 0.7978846, %v2447_v45  ;;  %v3443_v37 = vmul.f32 0.5, %v3187_v40  ;;  %v2448_v58 = vadd.f32 %v2192_v57, %v9753_v62  ;;  %v2196_v48 = vmul.f32 0.044715, %v1940_v56  ;;  %v11556_v40 = vld [vmem:[#allocation60_spill] sm:$0xff] }
 0x351   : > { %v2451_v42 = vadd.f32 %v2195_v26, %v9757_v33  ;;  %v3695_v18 = vmul.f32 %v3439_v11, %v9516_v60  ;;  %v3984_v25 = vpack.c.bf16 %v3700_v21, %v3696_v51  ;;  %v9798_v6 = vadd.f32 %v11553_v36, %v9043_v29  ;;  %v9807_v60 = vpop.f32.mrb[226].mxu1 }
 0x352   : > { %6375 = vtanh.f32 %v2703_v63  ;;  %v3699_v53 = vmul.f32 %v3443_v37, %v9537_v23  ;;  %v9800_v19 = vpop.eup %6367  ;;  %v2704_v31 = vmul.f32 0.7978846, %v2448_v58  ;;  %v2452_v45 = vadd.f32 %v2196_v48, %v9774_v24  ;;  %11555 = vst [vmem:[#allocation46_spill] sm:$0xff] %v9807_v60  ;;  %v11557_v58 = vld [vmem:[#allocation61_spill] sm:$0xff]  ;;  %v9821_v56 = vpop.f32.mrb[227].mxu1 }
 0x353   : > { %v2707_v38 = vmul.f32 0.7978846, %v2451_v42  ;;  %v9805_v54 = vadd.f32 %v11554_v27, %v9060_v14  ;;  %v9809_v63 = vpop.eup %6369  ;;  %4874 = vmatprep.mubr.bf16.mxu0 %v3984_v25  ;;  %v1687_v37 = vmul.f32 %v9798_v6, %v9798_v6  ;;  %v9815_v57 = vadd.f32 %v11556_v40, %v9043_v29  ;;  %11558 = vst [vmem:[#allocation47_spill] sm:$0xff] %v9821_v56  ;;  %v9828_v48 = vpop.f32.mrb[228].mxu1 }
 0x354   : > { %v3983_v23 = vpack.c.bf16 %v3699_v53, %v3695_v18  ;;  %v9819_v26 = vadd.f32 %v11557_v58, %v9060_v14  ;;  %6377 = vtanh.f32 %v2704_v31  ;;  %v2708_v51 = vmul.f32 0.7978846, %v2452_v45  ;;  %11559 = vst [vmem:[#allocation48_spill] sm:$0xff] %v9828_v48 }
 0x355   : > { %v9823_v11 = vpop.eup %6371  ;;  %v1688_v21 = vmul.f32 %v9805_v54, %v9805_v54  ;;  %v3192_v42 = vadd.f32 1.0, %v9697_v2  ;;  %6379 = vtanh.f32 %v2707_v38  ;;  %v1943_v25 = vmul.f32 %v1687_v37, %v9798_v6 }
 0x356   : > { %v9830_v18 = vpop.eup %6373  ;;  %4875 = vmatmul.mubr.bf16.gmra.mrb[32].mxu0 %v3983_v23  ;;  %v1691_v53 = vmul.f32 %v9815_v57, %v9815_v57  ;;  %v1692_v36 = vmul.f32 %v9819_v26, %v9819_v26  ;;  %6381 = vtanh.f32 %v2708_v51  ;;  %v3196_v45 = vadd.f32 1.0, %v9718_v3 }
 0x357   : > { %v1944_v31 = vmul.f32 %v1688_v21, %v9805_v54  ;;  %v3448_v2 = vmul.f32 0.5, %v3192_v42  ;;  %v2199_v27 = vmul.f32 0.044715, %v1943_v25  ;;  %v3191_v23 = vadd.f32 1.0, %v9683_v47  ;;  %v9851_v47 = vpop.f32.mrb[229].mxu1 }
 0x358   : > { %v1947_v40 = vmul.f32 %v1691_v53, %v9815_v57  ;;  %v1948_v38 = vmul.f32 %v1692_v36, %v9819_v26  ;;  %v3452_v58 = vmul.f32 0.5, %v3196_v45  ;;  %v3195_v56 = vadd.f32 1.0, %v9707_v12  ;;  %v11560_v53 = vld [vmem:[#allocation62_spill] sm:$0xff]  ;;  %11561 = vst [vmem:[#allocation49_spill] sm:$0xff] %v9851_v47 }
 0x359   : > { %v2200_v37 = vmul.f32 0.044715, %v1944_v31  ;;  %v3704_v48 = vmul.f32 %v3448_v2, %v9583_v46  ;;  %v2455_v51 = vadd.f32 %v2199_v27, %v9798_v6  ;;  %v3447_v0 = vmul.f32 0.5, %v3191_v23 }
 0x35a   : > { %v2203_v60 = vmul.f32 0.044715, %v1947_v40  ;;  %v2204_v21 = vmul.f32 0.044715, %v1948_v38  ;;  %v3708_v42 = vmul.f32 %v3452_v58, %v9602_v55  ;;  %v3451_v25 = vmul.f32 0.5, %v3195_v56  ;;  %v9861_v38 = vpop.f32.mrb[230].mxu1 }
 0x35b   : > { %v2456_v3 = vadd.f32 %v2200_v37, %v9805_v54  ;;  %v9849_v36 = vadd.f32 %v11560_v53, %v9043_v29  ;;  %v2711_v46 = vmul.f32 0.7978846, %v2455_v51  ;;  %v3703_v2 = vmul.f32 %v3447_v0, %v9572_v22  ;;  %11562 = vst [vmem:[#allocation18_spill] sm:$0xff] %v9861_v38  ;;  %v11563_v58 = vld [vmem:[#allocation26_spill] sm:$0xff]  ;;  %v11565_v0 = vld [vmem:[#allocation27_spill] sm:$0xff] }
 0x35c   : > { %v9853_v31 = vpop.eup %6375  ;;  %v2459_v12 = vadd.f32 %v2203_v60, %v9815_v57  ;;  %v2460_v45 = vadd.f32 %v2204_v21, %v9819_v26  ;;  %v3988_v40 = vpack.c.bf16 %v3708_v42, %v3704_v48  ;;  %v3707_v55 = vmul.f32 %v3451_v25, %v9591_v13  ;;  %v9867_v60 = vpop.f32.mrb[231].mxu1  ;;  %v11567_v53 = vld [vmem:[#allocation63_spill] sm:$0xff] }
 0x35d   : > { %v2712_v27 = vmul.f32 0.7978846, %v2456_v3  ;;  %v1695_v56 = vmul.f32 %v9849_v36, %v9849_v36  ;;  %6383 = vtanh.f32 %v2711_v46  ;;  %v9865_v51 = vadd.f32 %v11563_v58, %v9060_v14  ;;  %11564 = vst [vmem:[#allocation50_spill] sm:$0xff] %v9867_v60  ;;  %v9876_v3 = vpop.f32.mrb[232].mxu1 }
 0x35e   : > { %v2715_v23 = vmul.f32 0.7978846, %v2459_v12  ;;  %v2716_v37 = vmul.f32 0.7978846, %v2460_v45  ;;  %v9869_v21 = vpop.eup %6377  ;;  %4884 = vmatprep.mubr.bf16.mxu0 %v3988_v40  ;;  %v3987_v22 = vpack.c.bf16 %v3707_v55, %v3703_v2  ;;  %v9874_v48 = vadd.f32 %v11565_v0, %v9043_v29  ;;  %11566 = vst [vmem:[#allocation51_spill] sm:$0xff] %v9876_v3 }
 0x35f   : > { %6385 = vtanh.f32 %v2712_v27  ;;  %v1951_v13 = vmul.f32 %v1695_v56, %v9849_v36  ;;  %v9878_v42 = vpop.eup %6379  ;;  %v1696_v25 = vmul.f32 %v9865_v51, %v9865_v51  ;;  %v9884_v46 = vadd.f32 %v11567_v53, %v9060_v14 }
 0x360   : > { %6387 = vtanh.f32 %v2715_v23  ;;  %v3200_v12 = vadd.f32 1.0, %v9761_v52  ;;  %v9887_v45 = vpop.eup %6381  ;;  %4885 = vmatmul.mubr.bf16.gmra.mrb[36].mxu0 %v3987_v22  ;;  %v1699_v27 = vmul.f32 %v9874_v48, %v9874_v48  ;;  %v3204_v40 = vadd.f32 1.0, %v9776_v28 }
 0x361   : > { %6389 = vtanh.f32 %v2716_v37  ;;  %v2207_v2 = vmul.f32 0.044715, %v1951_v13  ;;  %v1952_v55 = vmul.f32 %v1696_v25, %v9865_v51  ;;  %v1700_v56 = vmul.f32 %v9884_v46, %v9884_v46 }
 0x362   : > { %v3456_v23 = vmul.f32 0.5, %v3200_v12  ;;  %v3199_v58 = vadd.f32 1.0, %v9743_v44  ;;  %v1955_v0 = vmul.f32 %v1699_v27, %v9874_v48  ;;  %v3460_v37 = vmul.f32 0.5, %v3204_v40  ;;  %v11568_v27 = vld [vmem:[#allocation64_spill] sm:$0xff] }
 0x363   : > { %v2463_v52 = vadd.f32 %v2207_v2, %v9849_v36  ;;  %v3203_v22 = vadd.f32 1.0, %v9766_v61  ;;  %v2208_v13 = vmul.f32 0.044715, %v1952_v55  ;;  %v1956_v53 = vmul.f32 %v1700_v56, %v9884_v46  ;;  %v9908_v61 = vpop.f32.mrb[233].mxu1 }
 0x364   : > { %v3712_v28 = vmul.f32 %v3456_v23, %v9641_v16  ;;  %v3455_v3 = vmul.f32 0.5, %v3199_v58  ;;  %v2211_v60 = vmul.f32 0.044715, %v1955_v0  ;;  %v3716_v38 = vmul.f32 %v3460_v37, %v9653_v39  ;;  %11569 = vst [vmem:[#allocation19_spill] sm:$0xff] %v9908_v61  ;;  %v9921_v0 = vpop.f32.mrb[234].mxu1 }
 0x365   : > { %v2719_v25 = vmul.f32 0.7978846, %v2463_v52  ;;  %v3459_v12 = vmul.f32 0.5, %v3203_v22  ;;  %v2464_v44 = vadd.f32 %v2208_v13, %v9865_v51  ;;  %v2212_v47 = vmul.f32 0.044715, %v1956_v53  ;;  %11571 = vst [vmem:[#allocation20_spill] sm:$0xff] %v9921_v0 }
 0x366   : > { %v3711_v2 = vmul.f32 %v3455_v3, %v9627_v15  ;;  %v9906_v40 = vadd.f32 %v11568_v27, %v9043_v29  ;;  %v2467_v16 = vadd.f32 %v2211_v60, %v9874_v48  ;;  %v3992_v55 = vpack.c.bf16 %v3716_v38, %v3712_v28  ;;  %v11570_v3 = vld [vmem:[#allocation65_spill] sm:$0xff]  ;;  %v9933_v53 = vpop.f32.mrb[235].mxu1 }
 0x367   : > { %6391 = vtanh.f32 %v2719_v25  ;;  %v3715_v56 = vmul.f32 %v3459_v12, %v9645_v32  ;;  %v9912_v23 = vpop.eup %6383  ;;  %v2720_v39 = vmul.f32 0.7978846, %v2464_v44  ;;  %v2468_v58 = vadd.f32 %v2212_v47, %v9884_v46  ;;  %v11572_v32 = vld [vmem:[#allocation28_spill] sm:$0xff]  ;;  %v11573_v47 = vld [vmem:[#allocation66_spill] sm:$0xff]  ;;  %11574 = vst [vmem:[#allocation52_spill] sm:$0xff] %v9933_v53 }
 0x368   : > { %v1703_v15 = vmul.f32 %v9906_v40, %v9906_v40  ;;  %v9919_v52 = vadd.f32 %v11570_v3, %v9060_v14  ;;  %v2723_v60 = vmul.f32 0.7978846, %v2467_v16  ;;  %4894 = vmatprep.mubr.bf16.mxu0 %v3992_v55  ;;  %v9927_v22 = vadd.f32 %v11572_v32, %v9043_v29 }
 0x369   : > { %v9923_v37 = vpop.eup %6385  ;;  %v3991_v38 = vpack.c.bf16 %v3715_v56, %v3711_v2  ;;  %v9931_v13 = vadd.f32 %v11573_v47, %v9060_v14  ;;  %6393 = vtanh.f32 %v2720_v39  ;;  %v2724_v25 = vmul.f32 0.7978846, %v2468_v58  ;;  %v9940_v2 = vpop.f32.mrb[236].mxu1 }
 0x36a   : > { %v9935_v28 = vpop.eup %6387  ;;  %v1959_v12 = vmul.f32 %v1703_v15, %v9906_v40  ;;  %v1704_v44 = vmul.f32 %v9919_v52, %v9919_v52  ;;  %11575 = vst [vmem:[#allocation53_spill] sm:$0xff] %v9940_v2  ;;  %6395 = vtanh.f32 %v2723_v60  ;;  %v1707_v16 = vmul.f32 %v9927_v22, %v9927_v22 }
 0x36b   : > { %v9942_v27 = vpop.eup %6389  ;;  %4895 = vmatmul.mubr.bf16.gmra.mrb[40].mxu0 %v3991_v38  ;;  %v1708_v55 = vmul.f32 %v9931_v13, %v9931_v13  ;;  %v3208_v56 = vadd.f32 1.0, %v9809_v63  ;;  %6397 = vtanh.f32 %v2724_v25  ;;  %v3212_v15 = vadd.f32 1.0, %v9830_v18 }
 0x36c   : > { %v2215_v39 = vmul.f32 0.044715, %v1959_v12  ;;  %v1960_v58 = vmul.f32 %v1704_v44, %v9919_v52  ;;  %v1963_v3 = vmul.f32 %v1707_v16, %v9927_v22  ;;  %v3207_v38 = vadd.f32 1.0, %v9800_v19 }
 0x36d   : > { %v1964_v32 = vmul.f32 %v1708_v55, %v9931_v13  ;;  %v3464_v60 = vmul.f32 0.5, %v3208_v56  ;;  %v3468_v53 = vmul.f32 0.5, %v3212_v15  ;;  %v3211_v0 = vadd.f32 1.0, %v9823_v11  ;;  %v11576_v11 = vld [vmem:[#allocation29_spill] sm:$0xff] }
 0x36e   : > { %v2471_v47 = vadd.f32 %v2215_v39, %v9906_v40  ;;  %v2216_v2 = vmul.f32 0.044715, %v1960_v58  ;;  %v2219_v63 = vmul.f32 0.044715, %v1963_v3  ;;  %v3463_v44 = vmul.f32 0.5, %v3207_v38 }
 0x36f   : > { %v2220_v25 = vmul.f32 0.044715, %v1964_v32  ;;  %v3720_v12 = vmul.f32 %v3464_v60, %v9693_v17  ;;  %v3724_v16 = vmul.f32 %v3468_v53, %v9713_v30  ;;  %v3467_v55 = vmul.f32 0.5, %v3211_v0  ;;  %v9968_v17 = vpop.f32.mrb[237].mxu1 }
 0x370   : > { %v2727_v61 = vmul.f32 0.7978846, %v2471_v47  ;;  %v2472_v18 = vadd.f32 %v2216_v2, %v9919_v52  ;;  %v2475_v19 = vadd.f32 %v2219_v63, %v9927_v22  ;;  %v3719_v58 = vmul.f32 %v3463_v44, %v9689_v41  ;;  %11577 = vst [vmem:[#allocation21_spill] sm:$0xff] %v9968_v17  ;;  %v9971_v0 = vpop.f32.mrb[238].mxu1  ;;  %v11579_v41 = vld [vmem:[#allocation30_spill] sm:$0xff] }
 0x371   : > { %v9959_v56 = vpop.eup %6391  ;;  %v2476_v39 = vadd.f32 %v2220_v25, %v9931_v13  ;;  %v9966_v15 = vadd.f32 %v11576_v11, %v9043_v29  ;;  %v3996_v2 = vpack.c.bf16 %v3724_v16, %v3720_v12  ;;  %v3723_v30 = vmul.f32 %v3467_v55, %v9703_v7  ;;  %11578 = vst [vmem:[#allocation22_spill] sm:$0xff] %v9971_v0  ;;  %v9979_v47 = vpop.f32.mrb[239].mxu1  ;;  %v11581_v7 = vld [vmem:[#allocation67_spill] sm:$0xff] }
 0x372   : > { %6399 = vtanh.f32 %v2727_v61  ;;  %v2728_v3 = vmul.f32 0.7978846, %v2472_v18  ;;  %v2731_v53 = vmul.f32 0.7978846, %v2475_v19  ;;  %v9977_v38 = vadd.f32 %v11579_v41, %v9060_v14  ;;  %11580 = vst [vmem:[#allocation23_spill] sm:$0xff] %v9979_v47  ;;  %v11582_v12 = vld [vmem:[#allocation31_spill] sm:$0xff] }
 0x373   : > { %v2732_v32 = vmul.f32 0.7978846, %v2476_v39  ;;  %v1711_v60 = vmul.f32 %v9966_v15, %v9966_v15  ;;  %v9981_v63 = vpop.eup %6393  ;;  %4904 = vmatprep.mubr.bf16.mxu0 %v3996_v2  ;;  %v3995_v61 = vpack.c.bf16 %v3723_v30, %v3719_v58  ;;  %v9985_v25 = vadd.f32 %v11581_v7, %v9043_v29  ;;  %v9991_v18 = vpop.f32.mrb[240].mxu1 }
 0x374   : > { %6401 = vtanh.f32 %v2728_v3  ;;  %v9989_v44 = vadd.f32 %v11582_v12, %v9060_v14  ;;  %11583 = vst [vmem:[#allocation24_spill] sm:$0xff] %v9991_v18  ;;  %v9993_v16 = vpop.eup %6395  ;;  %v1712_v19 = vmul.f32 %v9977_v38, %v9977_v38  ;;  %v3216_v39 = vadd.f32 1.0, %v9869_v21  ;;  %v10014_v17 = vpop.f32.mrb[241].mxu1 }
 0x375   : > { %6403 = vtanh.f32 %v2731_v53  ;;  %v1967_v55 = vmul.f32 %v1711_v60, %v9966_v15  ;;  %v9999_v58 = vpop.eup %6397  ;;  %4905 = vmatmul.mubr.bf16.gmra.mrb[44].mxu0 %v3995_v61  ;;  %v1715_v11 = vmul.f32 %v9985_v25, %v9985_v25  ;;  %v3220_v2 = vadd.f32 1.0, %v9887_v45  ;;  %11584 = vst [vmem:[#allocation54_spill] sm:$0xff] %v10014_v17 }
 0x376   : > { %6405 = vtanh.f32 %v2732_v32  ;;  %v1716_v3 = vmul.f32 %v9989_v44, %v9989_v44  ;;  %v1968_v53 = vmul.f32 %v1712_v19, %v9977_v38  ;;  %v3472_v60 = vmul.f32 0.5, %v3216_v39 }
 0x377   : > { %v2223_v30 = vmul.f32 0.044715, %v1967_v55  ;;  %v3215_v41 = vadd.f32 1.0, %v9853_v31  ;;  %v1971_v21 = vmul.f32 %v1715_v11, %v9985_v25  ;;  %v3476_v32 = vmul.f32 0.5, %v3220_v2 }
 0x378   : > { %v1972_v7 = vmul.f32 %v1716_v3, %v9989_v44  ;;  %v3219_v61 = vadd.f32 1.0, %v9878_v42  ;;  %v2224_v18 = vmul.f32 0.044715, %v1968_v53  ;;  %v3728_v47 = vmul.f32 %v3472_v60, %v9753_v62  ;;  %v11585_v42 = vld [vmem:[#allocation32_spill] sm:$0xff] }
 0x379   : > { %v2479_v12 = vadd.f32 %v2223_v30, %v9966_v15  ;;  %v3471_v0 = vmul.f32 0.5, %v3215_v41  ;;  %v2227_v45 = vmul.f32 0.044715, %v1971_v21  ;;  %v3732_v19 = vmul.f32 %v3476_v32, %v9774_v24  ;;  %v10033_v21 = vpop.f32.mrb[242].mxu1 }
 0x37a   : > { %v2228_v55 = vmul.f32 0.044715, %v1972_v7  ;;  %v3475_v39 = vmul.f32 0.5, %v3219_v61  ;;  %v2480_v11 = vadd.f32 %v2224_v18, %v9977_v38  ;;  %v10020_v2 = vadd.f32 %v11585_v42, %v9043_v29  ;;  %11587 = vst [vmem:[#allocation55_spill] sm:$0xff] %v10033_v21 }
 0x37b   : > { %v2735_v31 = vmul.f32 0.7978846, %v2479_v12  ;;  %v3727_v3 = vmul.f32 %v3471_v0, %v9737_v1  ;;  %v2483_v62 = vadd.f32 %v2227_v45, %v9985_v25  ;;  %v4000_v60 = vpack.c.bf16 %v3732_v19, %v3728_v47  ;;  %v11586_v1 = vld [vmem:[#allocation33_spill] sm:$0xff]  ;;  %v11588_v47 = vld [vmem:[#allocation34_spill] sm:$0xff]  ;;  %v10041_v45 = vpop.f32.mrb[243].mxu1 }
 0x37c   : > { %v10022_v30 = vpop.eup %6399  ;;  %v2484_v53 = vadd.f32 %v2228_v55, %v9989_v44  ;;  %v3731_v24 = vmul.f32 %v3475_v39, %v9757_v33  ;;  %v2736_v41 = vmul.f32 0.7978846, %v2480_v11  ;;  %v1719_v18 = vmul.f32 %v10020_v2, %v10020_v2  ;;  %11589 = vst [vmem:[#allocation57_spill] sm:$0xff] %v10041_v45  ;;  %v10052_v42 = vpop.f32.mrb[244].mxu1 }
 0x37d   : > { %6407 = vtanh.f32 %v2735_v31  ;;  %v10031_v0 = vadd.f32 %v11586_v1, %v9060_v14  ;;  %v2739_v32 = vmul.f32 0.7978846, %v2483_v62  ;;  %4914 = vmatprep.mubr.bf16.mxu0 %v4000_v60  ;;  %v10039_v33 = vadd.f32 %v11588_v47, %v9043_v29  ;;  %v11590_v31 = vld [vmem:[#allocation35_spill] sm:$0xff]  ;;  %11591 = vst [vmem:[#allocation58_spill] sm:$0xff] %v10052_v42 }
 0x37e   : > { %v10035_v7 = vpop.eup %6401  ;;  %v2740_v61 = vmul.f32 0.7978846, %v2484_v53  ;;  %v3999_v12 = vpack.c.bf16 %v3731_v24, %v3727_v3  ;;  %6409 = vtanh.f32 %v2736_v41  ;;  %v1975_v19 = vmul.f32 %v1719_v18, %v10020_v2 }
 0x37f   : > { %v10043_v55 = vpop.eup %6403  ;;  %v1720_v39 = vmul.f32 %v10031_v0, %v10031_v0  ;;  %v10050_v11 = vadd.f32 %v11590_v31, %v9060_v14  ;;  %6411 = vtanh.f32 %v2739_v32  ;;  %v1723_v62 = vmul.f32 %v10039_v33, %v10039_v33 }
 0x380   : > { %v10054_v3 = vpop.eup %6405  ;;  %4915 = vmatmul.mubr.bf16.gmra.mrb[48].mxu0 %v3999_v12  ;;  %v3224_v53 = vadd.f32 1.0, %v9923_v37  ;;  %v3228_v60 = vadd.f32 1.0, %v9942_v27  ;;  %6413 = vtanh.f32 %v2740_v61  ;;  %v2231_v24 = vmul.f32 0.044715, %v1975_v19 }
 0x381   : > { %v1976_v41 = vmul.f32 %v1720_v39, %v10031_v0  ;;  %v1724_v18 = vmul.f32 %v10050_v11, %v10050_v11  ;;  %v1979_v1 = vmul.f32 %v1723_v62, %v10039_v33  ;;  %v3223_v32 = vadd.f32 1.0, %v9912_v23 }
 0x382   : > { %v3480_v47 = vmul.f32 0.5, %v3224_v53  ;;  %v3484_v31 = vmul.f32 0.5, %v3228_v60  ;;  %v2487_v12 = vadd.f32 %v2231_v24, %v10020_v2  ;;  %v3227_v27 = vadd.f32 1.0, %v9935_v28  ;;  %v10077_v28 = vpop.f32.mrb[245].mxu1 }
 0x383   : > { %v2232_v42 = vmul.f32 0.044715, %v1976_v41  ;;  %v1980_v37 = vmul.f32 %v1724_v18, %v10050_v11  ;;  %v2235_v61 = vmul.f32 0.044715, %v1979_v1  ;;  %v3479_v45 = vmul.f32 0.5, %v3223_v32  ;;  %v10083_v1 = vpop.f32.mrb[246].mxu1 }
 0x384   : > { %v3736_v19 = vmul.f32 %v3480_v47, %v9805_v54  ;;  %v3740_v39 = vmul.f32 %v3484_v31, %v9819_v26  ;;  %v2743_v21 = vmul.f32 0.7978846, %v2487_v12  ;;  %v3483_v60 = vmul.f32 0.5, %v3227_v27 }
 0x385   : > { %v2488_v62 = vadd.f32 %v2232_v42, %v10031_v0  ;;  %v2236_v53 = vmul.f32 0.044715, %v1980_v37  ;;  %v2491_v23 = vadd.f32 %v2235_v61, %v10039_v33  ;;  %v3735_v24 = vmul.f32 %v3479_v45, %v9798_v6 }
 0x386   : > { %v4004_v17 = vpack.c.bf16 %v3740_v39, %v3736_v19  ;;  %v10075_v41 = vadd.f32 %v9463_v4, %v9043_v29  ;;  %6415 = vtanh.f32 %v2743_v21  ;;  %v3739_v42 = vmul.f32 %v3483_v60, %v9815_v57  ;;  %v10095_v21 = vpop.f32.mrb[247].mxu1 }
 0x387   : > { %v10079_v54 = vpop.eup %6407  ;;  %v2744_v26 = vmul.f32 0.7978846, %v2488_v62  ;;  %v2492_v18 = vadd.f32 %v2236_v53, %v10050_v11  ;;  %v2747_v47 = vmul.f32 0.7978846, %v2491_v23  ;;  %v10089_v4 = vadd.f32 %v9466_v34, %v9060_v14  ;;  %v10103_v12 = vpop.f32.mrb[248].mxu1 }
 0x388   : > { %4924 = vmatprep.mubr.bf16.mxu0 %v4004_v17  ;;  %v1727_v6 = vmul.f32 %v10075_v41, %v10075_v41  ;;  %v10093_v45 = vadd.f32 %v9475_v50, %v9043_v29  ;;  %v10097_v31 = vpop.eup %6409  ;;  %v4003_v32 = vpack.c.bf16 %v3739_v42, %v3735_v24  ;;  %v10101_v17 = vadd.f32 %v9487_v20, %v9060_v14 }
 0x389   : > { %6417 = vtanh.f32 %v2744_v26  ;;  %v2748_v57 = vmul.f32 0.7978846, %v2492_v18  ;;  %v10105_v37 = vpop.eup %6411  ;;  %v1728_v50 = vmul.f32 %v10089_v4, %v10089_v4  ;;  %v3232_v19 = vadd.f32 1.0, %v9981_v63 }
 0x38a   : > { %6419 = vtanh.f32 %v2747_v47  ;;  %v1983_v34 = vmul.f32 %v1727_v6, %v10075_v41  ;;  %v1731_v27 = vmul.f32 %v10093_v45, %v10093_v45  ;;  %v10112_v61 = vpop.eup %6413  ;;  %4925 = vmatmul.mubr.bf16.gmra.mrb[52].mxu0 %v4003_v32  ;;  %v1732_v20 = vmul.f32 %v10101_v17, %v10101_v17 }
 0x38b   : > { %6421 = vtanh.f32 %v2748_v57  ;;  %v3236_v39 = vadd.f32 1.0, %v9999_v58  ;;  %v1984_v53 = vmul.f32 %v1728_v50, %v10089_v4  ;;  %v3231_v23 = vadd.f32 1.0, %v9959_v56 }
 0x38c   : > { %v2239_v62 = vmul.f32 0.044715, %v1983_v34  ;;  %v1987_v60 = vmul.f32 %v1731_v27, %v10093_v45  ;;  %v1988_v24 = vmul.f32 %v1732_v20, %v10101_v17  ;;  %v3488_v26 = vmul.f32 0.5, %v3232_v19  ;;  %v10126_v27 = vpop.f32.mrb[249].mxu1 }
 0x38d   : > { %v3492_v18 = vmul.f32 0.5, %v3236_v39  ;;  %v3235_v42 = vadd.f32 1.0, %v9993_v16  ;;  %v2240_v6 = vmul.f32 0.044715, %v1984_v53  ;;  %v3487_v63 = vmul.f32 0.5, %v3231_v23 }
 0x38e   : > { %v2495_v47 = vadd.f32 %v2239_v62, %v10075_v41  ;;  %v2243_v57 = vmul.f32 0.044715, %v1987_v60  ;;  %v2244_v32 = vmul.f32 0.044715, %v1988_v24  ;;  %v3744_v58 = vmul.f32 %v3488_v26, %v9865_v51  ;;  %v11592_v24 = vld [vmem:[#allocation14_spill] sm:$0xff] }
 0x38f   : > { %v3748_v34 = vmul.f32 %v3492_v18, %v9884_v46  ;;  %v3491_v50 = vmul.f32 0.5, %v3235_v42  ;;  %v2496_v20 = vadd.f32 %v2240_v6, %v10089_v4  ;;  %v3743_v16 = vmul.f32 %v3487_v63, %v9849_v36  ;;  %v10143_v18 = vpop.f32.mrb[250].mxu1 }
 0x390   : > { %v2751_v56 = vmul.f32 0.7978846, %v2495_v47  ;;  %v2499_v19 = vadd.f32 %v2243_v57, %v10093_v45  ;;  %v10131_v39 = vpop.eup %6415  ;;  %v2500_v62 = vadd.f32 %v2244_v32, %v10101_v17  ;;  %v10137_v51 = vadd.f32 %v9506_v8, %v9043_v29  ;;  %v11593_v8 = vld [vmem:[#allocation36_spill] sm:$0xff]  ;;  %v10153_v57 = vpop.f32.mrb[251].mxu1 }
 0x391   : > { %v4008_v53 = vpack.c.bf16 %v3748_v34, %v3744_v58  ;;  %v3747_v60 = vmul.f32 %v3491_v50, %v9874_v48  ;;  %v2752_v46 = vmul.f32 0.7978846, %v2496_v20  ;;  %v10141_v26 = vadd.f32 %v11592_v24, %v9060_v14  ;;  %11594 = vst [vmem:[#allocation25_spill] sm:$0xff] %v10153_v57  ;;  %v11595_v58 = vld [vmem:[#allocation38_spill] sm:$0xff] }
 0x392   : > { %6423 = vtanh.f32 %v2751_v56  ;;  %v2755_v23 = vmul.f32 0.7978846, %v2499_v19  ;;  %v2756_v42 = vmul.f32 0.7978846, %v2500_v62  ;;  %v1735_v48 = vmul.f32 %v10137_v51, %v10137_v51  ;;  %v10164_v56 = vpop.f32.mrb[252].mxu1 }
 0x393   : > { %v10145_v36 = vpop.eup %6417  ;;  %4934 = vmatprep.mubr.bf16.mxu0 %v4008_v53  ;;  %v4007_v47 = vpack.c.bf16 %v3747_v60, %v3743_v16  ;;  %v10151_v6 = vadd.f32 %v11593_v8, %v9043_v29  ;;  %6425 = vtanh.f32 %v2752_v46  ;;  %v1736_v32 = vmul.f32 %v10141_v26, %v10141_v26  ;;  %11596 = vst [vmem:[#allocation59_spill] sm:$0xff] %v10164_v56 }
 0x394   : > { %v10155_v63 = vpop.eup %6419  ;;  %v10161_v34 = vadd.f32 %v11595_v58, %v9060_v14  ;;  %v3240_v50 = vadd.f32 1.0, %v10035_v7  ;;  %6427 = vtanh.f32 %v2755_v23  ;;  %v1991_v19 = vmul.f32 %v1735_v48, %v10137_v51 }
 0x395   : > { %v10166_v20 = vpop.eup %6421  ;;  %4935 = vmatmul.mubr.bf16.gmra.mrb[56].mxu0 %v4007_v47  ;;  %v1739_v16 = vmul.f32 %v10151_v6, %v10151_v6  ;;  %v3244_v62 = vadd.f32 1.0, %v10054_v3  ;;  %6429 = vtanh.f32 %v2756_v42  ;;  %v1992_v53 = vmul.f32 %v1736_v32, %v10141_v26 }
 0x396   : > { %v1740_v60 = vmul.f32 %v10161_v34, %v10161_v34  ;;  %v3496_v7 = vmul.f32 0.5, %v3240_v50  ;;  %v2247_v46 = vmul.f32 0.044715, %v1991_v19  ;;  %v3239_v23 = vadd.f32 1.0, %v10022_v30 }
 0x397   : > { %v1995_v24 = vmul.f32 %v1739_v16, %v10151_v6  ;;  %v3500_v8 = vmul.f32 0.5, %v3244_v62  ;;  %v2248_v47 = vmul.f32 0.044715, %v1992_v53  ;;  %v3243_v3 = vadd.f32 1.0, %v10043_v55  ;;  %v11597_v62 = vld [vmem:[#allocation37_spill] sm:$0xff] }
 0x398   : > { %v1996_v48 = vmul.f32 %v1740_v60, %v10161_v34  ;;  %v3752_v58 = vmul.f32 %v3496_v7, %v9919_v52  ;;  %v2503_v42 = vadd.f32 %v2247_v46, %v10137_v51  ;;  %v3495_v57 = vmul.f32 0.5, %v3239_v23  ;;  %v10189_v7 = vpop.f32.mrb[253].mxu1 }
 0x399   : > { %v2251_v32 = vmul.f32 0.044715, %v1995_v24  ;;  %v3756_v56 = vmul.f32 %v3500_v8, %v9931_v13  ;;  %v2504_v50 = vadd.f32 %v2248_v47, %v10141_v26  ;;  %v3499_v16 = vmul.f32 0.5, %v3243_v3  ;;  %v10197_v47 = vpop.f32.mrb[254].mxu1 }
 0x39a   : > { %v2252_v19 = vmul.f32 0.044715, %v1996_v48  ;;  %v10185_v30 = vadd.f32 %v11597_v62, %v9043_v29  ;;  %v2759_v53 = vmul.f32 0.7978846, %v2503_v42  ;;  %v3751_v55 = vmul.f32 %v3495_v57, %v9906_v40  ;;  %11598 = vst [vmem:[#allocation60_spill] sm:$0xff] %v10197_v47 }
 0x39b   : > { %v2507_v60 = vadd.f32 %v2251_v32, %v10151_v6  ;;  %v4012_v52 = vpack.c.bf16 %v3756_v56, %v3752_v58  ;;  %v2760_v13 = vmul.f32 0.7978846, %v2504_v50  ;;  %v3755_v8 = vmul.f32 %v3499_v16, %v9927_v22  ;;  %v10207_v56 = vpop.f32.mrb[255].mxu1 }
 0x39c   : > { %v10191_v46 = vpop.eup %6423  ;;  %v2508_v24 = vadd.f32 %v2252_v19, %v10161_v34  ;;  %v1743_v23 = vmul.f32 %v10185_v30, %v10185_v30  ;;  %6431 = vtanh.f32 %v2759_v53  ;;  %v10201_v40 = vadd.f32 %v9566_v5, %v9060_v14  ;;  %11599 = vst [vmem:[#allocation61_spill] sm:$0xff] %v10207_v56 }
 0x39d   : > { %v2763_v48 = vmul.f32 0.7978846, %v2507_v60  ;;  %4944 = vmatprep.mubr.bf16.mxu0 %v4012_v52  ;;  %v10205_v57 = vadd.f32 %v9585_v49, %v9043_v29  ;;  %v10209_v58 = vpop.eup %6425  ;;  %6433 = vtanh.f32 %v2760_v13  ;;  %v4011_v3 = vpack.c.bf16 %v3755_v8, %v3751_v55  ;;  %v11600_v49 = vld [vmem:[#allocation39_spill] sm:$0xff] }
 0x39e   : > { %v2764_v22 = vmul.f32 0.7978846, %v2508_v24  ;;  %v1999_v42 = vmul.f32 %v1743_v23, %v10185_v30  ;;  %v10212_v32 = vpop.eup %6427  ;;  %v1744_v5 = vmul.f32 %v10201_v40, %v10201_v40  ;;  %v10220_v19 = vadd.f32 %v11600_v49, %v9060_v14 }
 0x39f   : > { %6435 = vtanh.f32 %v2763_v48  ;;  %v1747_v50 = vmul.f32 %v10205_v57, %v10205_v57  ;;  %v10222_v16 = vpop.eup %6429  ;;  %4945 = vmatmul.mubr.bf16.gmra.mrb[60].mxu0 %v4011_v3  ;;  %v3248_v53 = vadd.f32 1.0, %v10097_v31  ;;  %v3252_v60 = vadd.f32 1.0, %v10112_v61 }
 0x3a0   : > { %6437 = vtanh.f32 %v2764_v22  ;;  %v2255_v62 = vmul.f32 0.044715, %v1999_v42  ;;  %v2000_v52 = vmul.f32 %v1744_v5, %v10201_v40  ;;  %v1748_v13 = vmul.f32 %v10220_v19, %v10220_v19 }
 0x3a1   : > { %v2003_v55 = vmul.f32 %v1747_v50, %v10205_v57  ;;  %v3247_v24 = vadd.f32 1.0, %v10079_v54  ;;  %v3504_v23 = vmul.f32 0.5, %v3248_v53  ;;  %v3508_v48 = vmul.f32 0.5, %v3252_v60 }
 0x3a2   : > { %v2511_v8 = vadd.f32 %v2255_v62, %v10185_v30  ;;  %v3251_v22 = vadd.f32 1.0, %v10105_v37  ;;  %v2256_v3 = vmul.f32 0.044715, %v2000_v52  ;;  %v2004_v31 = vmul.f32 %v1748_v13, %v10220_v19  ;;  %v11601_v52 = vld [vmem:[#allocation40_spill] sm:$0xff] }
 0x3a3   : > { %v2259_v42 = vmul.f32 0.044715, %v2003_v55  ;;  %v3503_v61 = vmul.f32 0.5, %v3247_v24  ;;  %v3760_v5 = vmul.f32 %v3504_v23, %v9977_v38  ;;  %v3764_v50 = vmul.f32 %v3508_v48, %v9989_v44 }
 0x3a4   : > { %v2767_v49 = vmul.f32 0.7978846, %v2511_v8  ;;  %v3507_v56 = vmul.f32 0.5, %v3251_v22  ;;  %v2512_v47 = vadd.f32 %v2256_v3, %v10201_v40  ;;  %v2260_v62 = vmul.f32 0.044715, %v2004_v31  ;;  %v11602_v8 = vld [vmem:[#allocation41_spill] sm:$0xff] }
 0x3a5   : > { %v2515_v54 = vadd.f32 %v2259_v42, %v10205_v57  ;;  %v3759_v53 = vmul.f32 %v3503_v61, %v9966_v15  ;;  %v4016_v37 = vpack.c.bf16 %v3764_v50, %v3760_v5  ;;  %v10242_v55 = vadd.f32 %v11601_v52, %v9043_v29 }
 0x3a6   : > { %6439 = vtanh.f32 %v2767_v49  ;;  %v3763_v60 = vmul.f32 %v3507_v56, %v9985_v25  ;;  %v10244_v13 = vpop.eup %6431  ;;  %v2768_v38 = vmul.f32 0.7978846, %v2512_v47  ;;  %v2516_v24 = vadd.f32 %v2260_v62, %v10220_v19  ;;  %v11603_v56 = vld [vmem:[#allocation15_spill] sm:$0xff]  ;;  %v11604_v47 = vld [vmem:[#allocation16_spill] sm:$0xff] }
 0x3a7   : > { %v2771_v44 = vmul.f32 0.7978846, %v2515_v54  ;;  %v10249_v23 = vadd.f32 %v11602_v8, %v9060_v14  ;;  %v10251_v48 = vpop.eup %6433  ;;  %4954 = vmatprep.mubr.bf16.mxu0 %v4016_v37  ;;  %v1751_v25 = vmul.f32 %v10242_v55, %v10242_v55  ;;  %v10257_v22 = vadd.f32 %v11603_v56, %v9043_v29 }
 0x3a8   : > { %v4015_v15 = vpack.c.bf16 %v3763_v60, %v3759_v53  ;;  %v10261_v3 = vadd.f32 %v11604_v47, %v9060_v14  ;;  %6441 = vtanh.f32 %v2768_v38  ;;  %v2772_v31 = vmul.f32 0.7978846, %v2516_v24 }
 0x3a9   : > { %v10263_v42 = vpop.eup %6435  ;;  %v1752_v61 = vmul.f32 %v10249_v23, %v10249_v23  ;;  %v3256_v49 = vadd.f32 1.0, %v10145_v36  ;;  %6443 = vtanh.f32 %v2771_v44  ;;  %v2007_v50 = vmul.f32 %v1751_v25, %v10242_v55 }
 0x3aa   : > { %v10268_v5 = vpop.eup %6437  ;;  %4955 = vmatmul.mubr.bf16.gmra.mrb[64].mxu0 %v4015_v15  ;;  %v1755_v54 = vmul.f32 %v10257_v22, %v10257_v22  ;;  %v1756_v62 = vmul.f32 %v10261_v3, %v10261_v3  ;;  %6445 = vtanh.f32 %v2772_v31  ;;  %v3260_v37 = vadd.f32 1.0, %v10166_v20 }
 0x3ab   : > { %v2008_v53 = vmul.f32 %v1752_v61, %v10249_v23  ;;  %v3512_v60 = vmul.f32 0.5, %v3256_v49  ;;  %v2263_v52 = vmul.f32 0.044715, %v2007_v50  ;;  %v3255_v44 = vadd.f32 1.0, %v10131_v39 }
 0x3ac   : > { %v2011_v36 = vmul.f32 %v1755_v54, %v10257_v22  ;;  %v2012_v38 = vmul.f32 %v1756_v62, %v10261_v3  ;;  %v3516_v8 = vmul.f32 0.5, %v3260_v37  ;;  %v3259_v25 = vadd.f32 1.0, %v10155_v63  ;;  %v11605_v54 = vld [vmem:[#allocation42_spill] sm:$0xff] }
 0x3ad   : > { %v2264_v24 = vmul.f32 0.044715, %v2008_v53  ;;  %v3768_v15 = vmul.f32 %v3512_v60, %v10031_v0  ;;  %v2519_v56 = vadd.f32 %v2263_v52, %v10242_v55  ;;  %v3511_v61 = vmul.f32 0.5, %v3255_v44 }
 0x3ae   : > { %v2267_v47 = vmul.f32 0.044715, %v2011_v36  ;;  %v2268_v31 = vmul.f32 0.044715, %v2012_v38  ;;  %v3772_v49 = vmul.f32 %v3516_v8, %v10050_v11  ;;  %v3515_v50 = vmul.f32 0.5, %v3259_v25 }
 0x3af   : > { %v2520_v20 = vadd.f32 %v2264_v24, %v10249_v23  ;;  %v10287_v62 = vadd.f32 %v11605_v54, %v9043_v29  ;;  %v2775_v53 = vmul.f32 0.7978846, %v2519_v56  ;;  %v3767_v37 = vmul.f32 %v3511_v61, %v10020_v2 }
 0x3b0   : > { %v10289_v39 = vpop.eup %6439  ;;  %v2523_v0 = vadd.f32 %v2267_v47, %v10257_v22  ;;  %v2524_v63 = vadd.f32 %v2268_v31, %v10261_v3  ;;  %v4020_v52 = vpack.c.bf16 %v3772_v49, %v3768_v15  ;;  %v3771_v36 = vmul.f32 %v3515_v50, %v10039_v33 }
 0x3b1   : > { %v2776_v60 = vmul.f32 0.7978846, %v2520_v20  ;;  %v1759_v11 = vmul.f32 %v10287_v62, %v10287_v62  ;;  %6447 = vtanh.f32 %v2775_v53  ;;  %v10299_v24 = vadd.f32 %v9678_v9, %v9060_v14 }
 0x3b2   : > { %v2779_v38 = vmul.f32 0.7978846, %v2523_v0  ;;  %v2780_v44 = vmul.f32 0.7978846, %v2524_v63  ;;  %v10301_v8 = vpop.eup %6441  ;;  %4964 = vmatprep.mubr.bf16.mxu0 %v4020_v52  ;;  %v4019_v25 = vpack.c.bf16 %v3771_v36, %v3767_v37  ;;  %v10306_v33 = vadd.f32 %v9695_v43, %v9043_v29 }
 0x3b3   : > { %6449 = vtanh.f32 %v2776_v60  ;;  %v2015_v2 = vmul.f32 %v1759_v11, %v10287_v62  ;;  %v10308_v15 = vpop.eup %6443  ;;  %v1760_v56 = vmul.f32 %v10299_v24, %v10299_v24  ;;  %v10314_v9 = vadd.f32 %v9705_v59, %v9060_v14 }
 0x3b4   : > { %6451 = vtanh.f32 %v2779_v38  ;;  %v3264_v47 = vadd.f32 1.0, %v10209_v58  ;;  %v10317_v31 = vpop.eup %6445  ;;  %4965 = vmatmul.mubr.bf16.gmra.mrb[68].mxu0 %v4019_v25  ;;  %v1763_v43 = vmul.f32 %v10306_v33, %v10306_v33  ;;  %v3268_v20 = vadd.f32 1.0, %v10222_v16 }
 0x3b5   : > { %6453 = vtanh.f32 %v2780_v44  ;;  %v2271_v61 = vmul.f32 0.044715, %v2015_v2  ;;  %v2016_v49 = vmul.f32 %v1760_v56, %v10299_v24  ;;  %v1764_v50 = vmul.f32 %v10314_v9, %v10314_v9 }
 0x3b6   : > { %v3520_v54 = vmul.f32 0.5, %v3264_v47  ;;  %v3263_v59 = vadd.f32 1.0, %v10191_v46  ;;  %v2019_v53 = vmul.f32 %v1763_v43, %v10306_v33  ;;  %v3524_v0 = vmul.f32 0.5, %v3268_v20 }
 0x3b7   : > { %v2527_v58 = vadd.f32 %v2271_v61, %v10287_v62  ;;  %v3267_v63 = vadd.f32 1.0, %v10212_v32  ;;  %v2272_v37 = vmul.f32 0.044715, %v2016_v49  ;;  %v2020_v60 = vmul.f32 %v1764_v50, %v10314_v9 }
 0x3b8   : > { %v3776_v16 = vmul.f32 %v3520_v54, %v10089_v4  ;;  %v3519_v52 = vmul.f32 0.5, %v3263_v59  ;;  %v2275_v11 = vmul.f32 0.044715, %v2019_v53  ;;  %v3780_v38 = vmul.f32 %v3524_v0, %v10101_v17  ;;  %v11606_v54 = vld [vmem:[#allocation43_spill] sm:$0xff]  ;;  %v11607_v59 = vld [vmem:[#allocation17_spill] sm:$0xff] }
 0x3b9   : > { %v2783_v36 = vmul.f32 0.7978846, %v2527_v58  ;;  %v3523_v44 = vmul.f32 0.5, %v3267_v63  ;;  %v2528_v46 = vadd.f32 %v2272_v37, %v10299_v24  ;;  %v2276_v25 = vmul.f32 0.044715, %v2020_v60 }
 0x3ba   : > { %v3775_v2 = vmul.f32 %v3519_v52, %v10075_v41  ;;  %v10336_v56 = vadd.f32 %v9716_v10, %v9043_v29  ;;  %v2531_v32 = vadd.f32 %v2275_v11, %v10306_v33  ;;  %v4024_v47 = vpack.c.bf16 %v3780_v38, %v3776_v16 }
 0x3bb   : > { %6455 = vtanh.f32 %v2783_v36  ;;  %v3779_v4 = vmul.f32 %v3523_v44, %v10093_v45  ;;  %v10340_v61 = vpop.eup %6447  ;;  %v2784_v43 = vmul.f32 0.7978846, %v2528_v46  ;;  %v2532_v17 = vadd.f32 %v2276_v25, %v10314_v9 }
 0x3bc   : > { %v1767_v20 = vmul.f32 %v10336_v56, %v10336_v56  ;;  %v10347_v41 = vadd.f32 %v9739_v35, %v9060_v14  ;;  %v2787_v49 = vmul.f32 0.7978846, %v2531_v32  ;;  %4974 = vmatprep.mubr.bf16.mxu0 %v4024_v47  ;;  %v10353_v45 = vadd.f32 %v11606_v54, %v9043_v29 }
 0x3bd   : > { %v10349_v10 = vpop.eup %6449  ;;  %v4023_v50 = vpack.c.bf16 %v3779_v4, %v3775_v2  ;;  %v10357_v58 = vadd.f32 %v11607_v59, %v9060_v14  ;;  %6457 = vtanh.f32 %v2784_v43  ;;  %v2788_v0 = vmul.f32 0.7978846, %v2532_v17 }
 0x3be   : > { %v10359_v53 = vpop.eup %6451  ;;  %v2023_v35 = vmul.f32 %v1767_v20, %v10336_v56  ;;  %v1768_v63 = vmul.f32 %v10347_v41, %v10347_v41  ;;  %6459 = vtanh.f32 %v2787_v49  ;;  %v1771_v60 = vmul.f32 %v10353_v45, %v10353_v45 }
 0x3bf   : > { %v10364_v37 = vpop.eup %6453  ;;  %4975 = vmatmul.mubr.bf16.gmra.mrb[72].mxu0 %v4023_v50  ;;  %v1772_v16 = vmul.f32 %v10357_v58, %v10357_v58  ;;  %v3272_v52 = vadd.f32 1.0, %v10251_v48  ;;  %6461 = vtanh.f32 %v2788_v0  ;;  %v3276_v38 = vadd.f32 1.0, %v10268_v5 }
 0x3c0   : > { %v2279_v36 = vmul.f32 0.044715, %v2023_v35  ;;  %v2024_v11 = vmul.f32 %v1768_v63, %v10347_v41  ;;  %v2027_v44 = vmul.f32 %v1771_v60, %v10353_v45  ;;  %v3271_v2 = vadd.f32 1.0, %v10244_v13 }
 0x3c1   : > { %v2028_v46 = vmul.f32 %v1772_v16, %v10357_v58  ;;  %v3528_v25 = vmul.f32 0.5, %v3272_v52  ;;  %v3532_v4 = vmul.f32 0.5, %v3276_v38  ;;  %v3275_v43 = vadd.f32 1.0, %v10263_v42  ;;  %v11608_v42 = vld [vmem:[#allocation44_spill] sm:$0xff]  ;;  %v11609_v38 = vld [vmem:[#allocation45_spill] sm:$0xff] }
 0x3c2   : > { %v2535_v32 = vadd.f32 %v2279_v36, %v10336_v56  ;;  %v2280_v47 = vmul.f32 0.044715, %v2024_v11  ;;  %v2283_v48 = vmul.f32 0.044715, %v2027_v44  ;;  %v3527_v49 = vmul.f32 0.5, %v3271_v2 }
 0x3c3   : > { %v2284_v17 = vmul.f32 0.044715, %v2028_v46  ;;  %v3784_v20 = vmul.f32 %v3528_v25, %v10141_v26  ;;  %v3788_v54 = vmul.f32 %v3532_v4, %v10161_v34  ;;  %v3531_v59 = vmul.f32 0.5, %v3275_v43  ;;  %v11610_v25 = vld [vmem:[#allocation46_spill] sm:$0xff] }
 0x3c4   : > { %v2791_v50 = vmul.f32 0.7978846, %v2535_v32  ;;  %v2536_v5 = vadd.f32 %v2280_v47, %v10347_v41  ;;  %v2539_v13 = vadd.f32 %v2283_v48, %v10353_v45  ;;  %v3783_v63 = vmul.f32 %v3527_v49, %v10137_v51 }
 0x3c5   : > { %v10381_v0 = vpop.eup %6455  ;;  %v2540_v35 = vadd.f32 %v2284_v17, %v10357_v58  ;;  %v10388_v60 = vadd.f32 %v11608_v42, %v9043_v29  ;;  %v4028_v16 = vpack.c.bf16 %v3788_v54, %v3784_v20  ;;  %v3787_v52 = vmul.f32 %v3531_v59, %v10151_v6  ;;  %v11611_v6 = vld [vmem:[#allocation47_spill] sm:$0xff] }
 0x3c6   : > { %6463 = vtanh.f32 %v2791_v50  ;;  %v2792_v26 = vmul.f32 0.7978846, %v2536_v5  ;;  %v2795_v36 = vmul.f32 0.7978846, %v2539_v13  ;;  %v10395_v44 = vadd.f32 %v11609_v38, %v9060_v14 }
 0x3c7   : > { %v2796_v34 = vmul.f32 0.7978846, %v2540_v35  ;;  %v1775_v11 = vmul.f32 %v10388_v60, %v10388_v60  ;;  %v10397_v46 = vpop.eup %6457  ;;  %4984 = vmatprep.mubr.bf16.mxu0 %v4028_v16  ;;  %v4027_v51 = vpack.c.bf16 %v3787_v52, %v3783_v63  ;;  %v10401_v2 = vadd.f32 %v11610_v25, %v9043_v29 }
 0x3c8   : > { %6465 = vtanh.f32 %v2792_v26  ;;  %v10405_v32 = vadd.f32 %v11611_v6, %v9060_v14  ;;  %v10407_v47 = vpop.eup %6459  ;;  %v1776_v43 = vmul.f32 %v10395_v44, %v10395_v44  ;;  %v3280_v48 = vadd.f32 1.0, %v10301_v8  ;;  %v11612_v6 = vld [vmem:[#allocation48_spill] sm:$0xff] }
 0x3c9   : > { %6467 = vtanh.f32 %v2795_v36  ;;  %v2031_v4 = vmul.f32 %v1775_v11, %v10388_v60  ;;  %v10413_v17 = vpop.eup %6461  ;;  %4985 = vmatmul.mubr.bf16.gmra.mrb[76].mxu0 %v4027_v51  ;;  %v1779_v20 = vmul.f32 %v10401_v2, %v10401_v2  ;;  %v3284_v50 = vadd.f32 1.0, %v10317_v31 }
 0x3ca   : > { %6469 = vtanh.f32 %v2796_v34  ;;  %v1780_v49 = vmul.f32 %v10405_v32, %v10405_v32  ;;  %v2032_v54 = vmul.f32 %v1776_v43, %v10395_v44  ;;  %v3536_v59 = vmul.f32 0.5, %v3280_v48 }
 0x3cb   : > { %v2287_v5 = vmul.f32 0.044715, %v2031_v4  ;;  %v3279_v13 = vadd.f32 1.0, %v10289_v39  ;;  %v2035_v8 = vmul.f32 %v1779_v20, %v10401_v2  ;;  %v3540_v63 = vmul.f32 0.5, %v3284_v50 }
 0x3cc   : > { %v2036_v35 = vmul.f32 %v1780_v49, %v10405_v32  ;;  %v3283_v42 = vadd.f32 1.0, %v10308_v15  ;;  %v2288_v16 = vmul.f32 0.044715, %v2032_v54  ;;  %v3792_v52 = vmul.f32 %v3536_v59, %v10201_v40 }
 0x3cd   : > { %v2543_v26 = vadd.f32 %v2287_v5, %v10388_v60  ;;  %v3535_v36 = vmul.f32 0.5, %v3279_v13  ;;  %v2291_v31 = vmul.f32 0.044715, %v2035_v8  ;;  %v3796_v11 = vmul.f32 %v3540_v63, %v10220_v19  ;;  %v11614_v8 = vld [vmem:[#allocation18_spill] sm:$0xff] }
 0x3ce   : > { %v2292_v34 = vmul.f32 0.044715, %v2036_v35  ;;  %v3539_v38 = vmul.f32 0.5, %v3283_v42  ;;  %v2544_v39 = vadd.f32 %v2288_v16, %v10395_v44  ;;  %v10432_v4 = vadd.f32 %v11612_v6, %v9043_v29 }
 0x3cf   : > { %v2799_v51 = vmul.f32 0.7978846, %v2543_v26  ;;  %v3791_v25 = vmul.f32 %v3535_v36, %v10185_v30  ;;  %v2547_v43 = vadd.f32 %v2291_v31, %v10401_v2  ;;  %v4032_v48 = vpack.c.bf16 %v3796_v11, %v3792_v52  ;;  %v11613_v30 = vld [vmem:[#allocation49_spill] sm:$0xff]  ;;  %v11615_v26 = vld [vmem:[#allocation50_spill] sm:$0xff] }
 0x3d0   : > { %v10434_v15 = vpop.eup %6463  ;;  %v2548_v40 = vadd.f32 %v2292_v34, %v10405_v32  ;;  %v3795_v20 = vmul.f32 %v3539_v38, %v10205_v57  ;;  %v2800_v19 = vmul.f32 0.7978846, %v2544_v39  ;;  %v1783_v49 = vmul.f32 %v10432_v4, %v10432_v4 }
 0x3d1   : > { %6471 = vtanh.f32 %v2799_v51  ;;  %v10443_v50 = vadd.f32 %v11613_v30, %v9060_v14  ;;  %v2803_v54 = vmul.f32 0.7978846, %v2547_v43  ;;  %4994 = vmatprep.mubr.bf16.mxu0 %v4032_v48  ;;  %v10449_v35 = vadd.f32 %v11614_v8, %v9043_v29 }
 0x3d2   : > { %v10445_v5 = vpop.eup %6465  ;;  %v2804_v59 = vmul.f32 0.7978846, %v2548_v40  ;;  %v4031_v13 = vpack.c.bf16 %v3795_v20, %v3791_v25  ;;  %6473 = vtanh.f32 %v2800_v19  ;;  %v2039_v63 = vmul.f32 %v1783_v49, %v10432_v4 }
 0x3d3   : > { %v10451_v57 = vpop.eup %6467  ;;  %v1784_v42 = vmul.f32 %v10443_v50, %v10443_v50  ;;  %v10458_v16 = vadd.f32 %v11615_v26, %v9060_v14  ;;  %6475 = vtanh.f32 %v2803_v54  ;;  %v1787_v36 = vmul.f32 %v10449_v35, %v10449_v35 }
 0x3d4   : > { %v10460_v52 = vpop.eup %6469  ;;  %4995 = vmatmul.mubr.bf16.gmra.mrb[80].mxu0 %v4031_v13  ;;  %v3288_v31 = vadd.f32 1.0, %v10349_v10  ;;  %v3292_v34 = vadd.f32 1.0, %v10364_v37  ;;  %6477 = vtanh.f32 %v2804_v59  ;;  %v2295_v11 = vmul.f32 0.044715, %v2039_v63 }
 0x3d5   : > { %v2040_v38 = vmul.f32 %v1784_v42, %v10443_v50  ;;  %v1788_v51 = vmul.f32 %v10458_v16, %v10458_v16  ;;  %v2043_v39 = vmul.f32 %v1787_v36, %v10449_v35  ;;  %v3287_v43 = vadd.f32 1.0, %v10340_v61 }
 0x3d6   : > { %v3544_v25 = vmul.f32 0.5, %v3288_v31  ;;  %v3548_v6 = vmul.f32 0.5, %v3292_v34  ;;  %v2551_v48 = vadd.f32 %v2295_v11, %v10432_v4  ;;  %v3291_v20 = vadd.f32 1.0, %v10359_v53  ;;  %v11616_v34 = vld [vmem:[#allocation51_spill] sm:$0xff] }
 0x3d7   : > { %v10471_v40 = vpop.f32.mrb[0].mxu0  ;;  %v2296_v10 = vmul.f32 0.044715, %v2040_v38  ;;  %v2044_v37 = vmul.f32 %v1788_v51, %v10458_v16  ;;  %v2299_v49 = vmul.f32 0.044715, %v2043_v39  ;;  %v3543_v59 = vmul.f32 0.5, %v3287_v43 }
 0x3d8   : > { %v10476_v19 = vpop.f32.mrb[1].mxu0  ;;  %v3800_v30 = vmul.f32 %v3544_v25, %v10249_v23  ;;  %v3804_v54 = vmul.f32 %v3548_v6, %v10261_v3  ;;  %v2807_v61 = vmul.f32 0.7978846, %v2551_v48  ;;  %v3547_v42 = vmul.f32 0.5, %v3291_v20  ;;  %v11617_v6 = vld [vmem:[#allocation19_spill] sm:$0xff]  ;;  %v11618_v43 = vld [vmem:[#allocation20_spill] sm:$0xff] }
 0x3d9   : > { %v10480_v13 = vpop.f32.mrb[2].mxu0  ;;  %v2552_v8 = vadd.f32 %v2296_v10, %v10443_v50  ;;  %v2300_v63 = vmul.f32 0.044715, %v2044_v37  ;;  %v2555_v36 = vadd.f32 %v2299_v49, %v10449_v35  ;;  %v3799_v31 = vmul.f32 %v3543_v59, %v10242_v55 }
 0x3da   : > { %v10483_v26 = vpop.f32.mrb[3].mxu0  ;;  %v4036_v53 = vpack.c.bf16 %v3804_v54, %v3800_v30  ;;  %v10489_v23 = vadd.f32 %v11616_v34, %v9043_v29  ;;  %6479 = vtanh.f32 %v2807_v61  ;;  %v3803_v51 = vmul.f32 %v3547_v42, %v10257_v22  ;;  %v11619_v22 = vld [vmem:[#allocation52_spill] sm:$0xff] }
 0x3db   : > { %v10491_v3 = vpop.eup %6471  ;;  %v2808_v11 = vmul.f32 0.7978846, %v2552_v8  ;;  %v2556_v38 = vadd.f32 %v2300_v63, %v10458_v16  ;;  %v2811_v39 = vmul.f32 0.7978846, %v2555_v36  ;;  %v10499_v55 = vadd.f32 %v11617_v6, %v9060_v14 }
 0x3dc   : > { %5004 = vmatprep.mubr.bf16.mxu0 %v4036_v53  ;;  %v1791_v25 = vmul.f32 %v10489_v23, %v10489_v23  ;;  %v10503_v48 = vadd.f32 %v11618_v43, %v9043_v29  ;;  %v10505_v10 = vpop.eup %6473  ;;  %v4035_v20 = vpack.c.bf16 %v3803_v51, %v3799_v31  ;;  %v10509_v49 = vadd.f32 %v11619_v22, %v9060_v14 }
 0x3dd   : > { %6481 = vtanh.f32 %v2808_v11  ;;  %v2812_v37 = vmul.f32 0.7978846, %v2556_v38  ;;  %v10511_v30 = vpop.eup %6475  ;;  %v1792_v59 = vmul.f32 %v10499_v55, %v10499_v55  ;;  %v3296_v42 = vadd.f32 1.0, %v10397_v46 }
 0x3de   : > { %6483 = vtanh.f32 %v2811_v39  ;;  %v2047_v54 = vmul.f32 %v1791_v25, %v10489_v23  ;;  %v1795_v61 = vmul.f32 %v10503_v48, %v10503_v48  ;;  %v10518_v8 = vpop.eup %6477  ;;  %5005 = vmatmul.mubr.bf16.gmra.mrb[84].mxu0 %v4035_v20  ;;  %v1796_v63 = vmul.f32 %v10509_v49, %v10509_v49 }
 0x3df   : > { %6485 = vtanh.f32 %v2812_v37  ;;  %v3300_v36 = vadd.f32 1.0, %v10413_v17  ;;  %v2048_v31 = vmul.f32 %v1792_v59, %v10499_v55  ;;  %v3295_v11 = vadd.f32 1.0, %v10381_v0 }
 0x3e0   : > { %v2303_v53 = vmul.f32 0.044715, %v2047_v54  ;;  %v2051_v34 = vmul.f32 %v1795_v61, %v10503_v48  ;;  %v2052_v38 = vmul.f32 %v1796_v63, %v10509_v49  ;;  %v3552_v51 = vmul.f32 0.5, %v3296_v42 }
 0x3e1   : > { %v3556_v39 = vmul.f32 0.5, %v3300_v36  ;;  %v3299_v25 = vadd.f32 1.0, %v10407_v47  ;;  %v10529_v6 = vpop.f32.mrb[4].mxu0  ;;  %v2304_v46 = vmul.f32 0.044715, %v2048_v31  ;;  %v3551_v17 = vmul.f32 0.5, %v3295_v11 }
 0x3e2   : > { %v2559_v43 = vadd.f32 %v2303_v53, %v10489_v23  ;;  %v2307_v37 = vmul.f32 0.044715, %v2051_v34  ;;  %v10532_v20 = vpop.f32.mrb[5].mxu0  ;;  %v2308_v22 = vmul.f32 0.044715, %v2052_v38  ;;  %v3808_v54 = vmul.f32 %v3552_v51, %v10299_v24 }
 0x3e3   : > { %11620 = vst [vmem:[#allocation62_spill] sm:$0xff] %v10532_v20  ;;  %v3812_v0 = vmul.f32 %v3556_v39, %v10314_v9  ;;  %v3555_v59 = vmul.f32 0.5, %v3299_v25  ;;  %v10536_v61 = vpop.f32.mrb[6].mxu0  ;;  %v2560_v47 = vadd.f32 %v2304_v46, %v10499_v55  ;;  %v3807_v36 = vmul.f32 %v3551_v17, %v10287_v62  ;;  %v11623_v9 = vld [vmem:[#allocation53_spill] sm:$0xff] }
 0x3e4   : > { %11621 = vst [vmem:[#allocation26_spill] sm:$0xff] %v10536_v61  ;;  %v2815_v63 = vmul.f32 0.7978846, %v2559_v43  ;;  %v2563_v42 = vadd.f32 %v2307_v37, %v10503_v48  ;;  %v10541_v53 = vpop.f32.mrb[7].mxu0  ;;  %v10543_v31 = vpop.eup %6479  ;;  %v2564_v34 = vadd.f32 %v2308_v22, %v10509_v49  ;;  %v10549_v38 = vadd.f32 %v11623_v9, %v9043_v29  ;;  %v11624_v25 = vld [vmem:[#allocation21_spill] sm:$0xff] }
 0x3e5   : > { %11622 = vst [vmem:[#allocation27_spill] sm:$0xff] %v10541_v53  ;;  %v4040_v11 = vpack.c.bf16 %v3812_v0, %v3808_v54  ;;  %v3811_v24 = vmul.f32 %v3555_v59, %v10306_v33  ;;  %v2816_v51 = vmul.f32 0.7978846, %v2560_v47  ;;  %v10553_v43 = vadd.f32 %v11624_v25, %v9060_v14  ;;  %v11625_v33 = vld [vmem:[#allocation22_spill] sm:$0xff]  ;;  %v11626_v59 = vld [vmem:[#allocation23_spill] sm:$0xff] }
 0x3e6   : > { %6487 = vtanh.f32 %v2815_v63  ;;  %v2819_v39 = vmul.f32 0.7978846, %v2563_v42  ;;  %v2820_v46 = vmul.f32 0.7978846, %v2564_v34  ;;  %v1799_v17 = vmul.f32 %v10549_v38, %v10549_v38 }
 0x3e7   : > { %v10555_v62 = vpop.eup %6481  ;;  %5014 = vmatprep.mubr.bf16.mxu0 %v4040_v11  ;;  %v4039_v37 = vpack.c.bf16 %v3811_v24, %v3807_v36  ;;  %v10561_v22 = vadd.f32 %v11625_v33, %v9043_v29  ;;  %6489 = vtanh.f32 %v2816_v51  ;;  %v1800_v0 = vmul.f32 %v10553_v43, %v10553_v43 }
 0x3e8   : > { %v10563_v54 = vpop.eup %6483  ;;  %v10569_v63 = vadd.f32 %v11626_v59, %v9060_v14  ;;  %v3304_v47 = vadd.f32 1.0, %v10445_v5  ;;  %6491 = vtanh.f32 %v2819_v39  ;;  %v2055_v36 = vmul.f32 %v1799_v17, %v10549_v38 }
 0x3e9   : > { %v10572_v42 = vpop.eup %6485  ;;  %5015 = vmatmul.mubr.bf16.gmra.mrb[88].mxu0 %v4039_v37  ;;  %v1803_v34 = vmul.f32 %v10561_v22, %v10561_v22  ;;  %v3308_v11 = vadd.f32 1.0, %v10460_v52  ;;  %6493 = vtanh.f32 %v2820_v46  ;;  %v2056_v24 = vmul.f32 %v1800_v0, %v10553_v43 }
 0x3ea   : > { %v1804_v9 = vmul.f32 %v10569_v63, %v10569_v63  ;;  %v3560_v51 = vmul.f32 0.5, %v3304_v47  ;;  %v2311_v25 = vmul.f32 0.044715, %v2055_v36  ;;  %v3303_v39 = vadd.f32 1.0, %v10434_v15  ;;  %v10583_v37 = vpop.f32.mrb[8].mxu0 }
 0x3eb   : > { %v2059_v5 = vmul.f32 %v1803_v34, %v10561_v22  ;;  %v3564_v33 = vmul.f32 0.5, %v3308_v11  ;;  %11627 = vst [vmem:[#allocation63_spill] sm:$0xff] %v10583_v37  ;;  %v2312_v17 = vmul.f32 0.044715, %v2056_v24  ;;  %v3307_v46 = vadd.f32 1.0, %v10451_v57  ;;  %v10588_v0 = vpop.f32.mrb[9].mxu0 }
 0x3ec   : > { %v2060_v59 = vmul.f32 %v1804_v9, %v10569_v63  ;;  %v3816_v52 = vmul.f32 %v3560_v51, %v10347_v41  ;;  %11628 = vst [vmem:[#allocation64_spill] sm:$0xff] %v10588_v0  ;;  %v2567_v53 = vadd.f32 %v2311_v25, %v10549_v38  ;;  %v3559_v34 = vmul.f32 0.5, %v3303_v39  ;;  %v10592_v11 = vpop.f32.mrb[10].mxu0  ;;  %v11630_v9 = vld [vmem:[#allocation24_spill] sm:$0xff] }
 0x3ed   : > { %v2315_v47 = vmul.f32 0.044715, %v2059_v5  ;;  %v3820_v36 = vmul.f32 %v3564_v33, %v10357_v58  ;;  %11629 = vst [vmem:[#allocation65_spill] sm:$0xff] %v10592_v11  ;;  %v2568_v15 = vadd.f32 %v2312_v17, %v10553_v43  ;;  %v3563_v24 = vmul.f32 0.5, %v3307_v46  ;;  %v10599_v41 = vpop.f32.mrb[11].mxu0 }
 0x3ee   : > { %v2316_v37 = vmul.f32 0.044715, %v2060_v59  ;;  %v10597_v61 = vadd.f32 %v11630_v9, %v9043_v29  ;;  %11631 = vst [vmem:[#allocation28_spill] sm:$0xff] %v10599_v41  ;;  %v2823_v57 = vmul.f32 0.7978846, %v2567_v53  ;;  %v3815_v5 = vmul.f32 %v3559_v34, %v10336_v56  ;;  %v11632_v53 = vld [vmem:[#allocation54_spill] sm:$0xff] }
 0x3ef   : > { %v2571_v51 = vadd.f32 %v2315_v47, %v10561_v22  ;;  %v4044_v25 = vpack.c.bf16 %v3820_v36, %v3816_v52  ;;  %v2824_v33 = vmul.f32 0.7978846, %v2568_v15  ;;  %v3819_v17 = vmul.f32 %v3563_v24, %v10353_v45  ;;  %v11633_v52 = vld [vmem:[#allocation55_spill] sm:$0xff] }
 0x3f0   : > { %v10603_v58 = vpop.eup %6487  ;;  %v2572_v39 = vadd.f32 %v2316_v37, %v10569_v63  ;;  %v1807_v59 = vmul.f32 %v10597_v61, %v10597_v61  ;;  %6495 = vtanh.f32 %v2823_v57  ;;  %v10611_v9 = vadd.f32 %v11632_v53, %v9060_v14  ;;  %v11634_v57 = vld [vmem:[#allocation57_spill] sm:$0xff] }
 0x3f1   : > { %v2827_v46 = vmul.f32 0.7978846, %v2571_v51  ;;  %5024 = vmatprep.mubr.bf16.mxu0 %v4044_v25  ;;  %v10615_v56 = vadd.f32 %v11633_v52, %v9043_v29  ;;  %v10617_v47 = vpop.eup %6489  ;;  %6497 = vtanh.f32 %v2824_v33  ;;  %v4043_v36 = vpack.c.bf16 %v3819_v17, %v3815_v5 }
 0x3f2   : > { %v2828_v37 = vmul.f32 0.7978846, %v2572_v39  ;;  %v2063_v45 = vmul.f32 %v1807_v59, %v10597_v61  ;;  %v10620_v34 = vpop.eup %6491  ;;  %v1808_v15 = vmul.f32 %v10611_v9, %v10611_v9  ;;  %v10628_v51 = vadd.f32 %v11634_v57, %v9060_v14 }
 0x3f3   : > { %6499 = vtanh.f32 %v2827_v46  ;;  %v1811_v24 = vmul.f32 %v10615_v56, %v10615_v56  ;;  %v10630_v25 = vpop.eup %6493  ;;  %5025 = vmatmul.mubr.bf16.gmra.mrb[92].mxu0 %v4043_v36  ;;  %v3312_v33 = vadd.f32 1.0, %v10505_v10  ;;  %v3316_v39 = vadd.f32 1.0, %v10518_v8 }
 0x3f4   : > { %6501 = vtanh.f32 %v2828_v37  ;;  %v2319_v5 = vmul.f32 0.044715, %v2063_v45  ;;  %v2064_v17 = vmul.f32 %v1808_v15, %v10611_v9  ;;  %v1812_v46 = vmul.f32 %v10628_v51, %v10628_v51  ;;  %v10639_v52 = vpop.f32.mrb[12].mxu0 }
 0x3f5   : > { %v2067_v59 = vmul.f32 %v1811_v24, %v10615_v56  ;;  %v3311_v53 = vadd.f32 1.0, %v10491_v3  ;;  %11635 = vst [vmem:[#allocation66_spill] sm:$0xff] %v10639_v52  ;;  %v3568_v37 = vmul.f32 0.5, %v3312_v33  ;;  %v3572_v36 = vmul.f32 0.5, %v3316_v39  ;;  %v10643_v10 = vpop.f32.mrb[13].mxu0 }
 0x3f6   : > { %v2575_v57 = vadd.f32 %v2319_v5, %v10597_v61  ;;  %v3315_v45 = vadd.f32 1.0, %v10511_v30  ;;  %v2320_v8 = vmul.f32 0.044715, %v2064_v17  ;;  %v2068_v15 = vmul.f32 %v1812_v46, %v10628_v51  ;;  %v10646_v11 = vpop.f32.mrb[14].mxu0 }
 0x3f7   : > { %v2323_v41 = vmul.f32 0.044715, %v2067_v59  ;;  %v3567_v24 = vmul.f32 0.5, %v3311_v53  ;;  %v3824_v3 = vmul.f32 %v3568_v37, %v10395_v44  ;;  %v3828_v52 = vmul.f32 %v3572_v36, %v10405_v32  ;;  %v10650_v5 = vpop.f32.mrb[15].mxu0  ;;  %v11636_v53 = vld [vmem:[#allocation58_spill] sm:$0xff] }
 0x3f8   : > { %v2831_v0 = vmul.f32 0.7978846, %v2575_v57  ;;  %v3571_v20 = vmul.f32 0.5, %v3315_v45  ;;  %v2576_v33 = vadd.f32 %v2320_v8, %v10611_v9  ;;  %v2324_v39 = vmul.f32 0.044715, %v2068_v15 }
 0x3f9   : > { %v2579_v30 = vadd.f32 %v2323_v41, %v10615_v56  ;;  %v3823_v17 = vmul.f32 %v3567_v24, %v10388_v60  ;;  %v4048_v59 = vpack.c.bf16 %v3828_v52, %v3824_v3  ;;  %v10658_v57 = vadd.f32 %v11636_v53, %v9043_v29 }
 0x3fa   : > { %6503 = vtanh.f32 %v2831_v0  ;;  %v3827_v46 = vmul.f32 %v3571_v20, %v10401_v2  ;;  %v10660_v44 = vpop.eup %6495  ;;  %v2832_v32 = vmul.f32 0.7978846, %v2576_v33  ;;  %v2580_v36 = vadd.f32 %v2324_v39, %v10628_v51 }
 0x3fb   : > { %v2835_v37 = vmul.f32 0.7978846, %v2579_v30  ;;  %v10665_v41 = vadd.f32 %v10077_v28, %v9060_v14  ;;  %v10667_v45 = vpop.eup %6497  ;;  %5034 = vmatprep.mubr.bf16.mxu0 %v4048_v59  ;;  %v1815_v2 = vmul.f32 %v10658_v57, %v10658_v57  ;;  %v10673_v20 = vadd.f32 %v10083_v1, %v9043_v29 }
 0x3fc   : > { %v4047_v60 = vpack.c.bf16 %v3827_v46, %v3823_v17  ;;  %v10677_v0 = vadd.f32 %v10095_v21, %v9060_v14  ;;  %6505 = vtanh.f32 %v2832_v32  ;;  %v2836_v28 = vmul.f32 0.7978846, %v2580_v36 }
 0x3fd   : > { %v10679_v52 = vpop.eup %6499  ;;  %v1816_v8 = vmul.f32 %v10665_v41, %v10665_v41  ;;  %v3320_v15 = vadd.f32 1.0, %v10555_v62  ;;  %6507 = vtanh.f32 %v2835_v37  ;;  %v2071_v1 = vmul.f32 %v1815_v2, %v10658_v57 }
 0x3fe   : > { %v10684_v24 = vpop.eup %6501  ;;  %5035 = vmatmul.mubr.bf16.gmra.mrb[96].mxu0 %v4047_v60  ;;  %v1819_v3 = vmul.f32 %v10673_v20, %v10673_v20  ;;  %v1820_v21 = vmul.f32 %v10677_v0, %v10677_v0  ;;  %6509 = vtanh.f32 %v2836_v28  ;;  %v3324_v30 = vadd.f32 1.0, %v10572_v42 }
 0x3ff   : > { %v2072_v33 = vmul.f32 %v1816_v8, %v10665_v41  ;;  %v3576_v39 = vmul.f32 0.5, %v3320_v15  ;;  %v10693_v17 = vpop.f32.mrb[16].mxu0  ;;  %v2327_v62 = vmul.f32 0.044715, %v2071_v1  ;;  %v3319_v53 = vadd.f32 1.0, %v10543_v31 }
 0x400   : > { %v2075_v59 = vmul.f32 %v1819_v3, %v10673_v20  ;;  %v2076_v46 = vmul.f32 %v1820_v21, %v10677_v0  ;;  %v10698_v32 = vpop.f32.mrb[17].mxu0  ;;  %v3580_v36 = vmul.f32 0.5, %v3324_v30  ;;  %v3323_v2 = vadd.f32 1.0, %v10563_v54 }
 0x401   : > { %11637 = vst [vmem:[#allocation29_spill] sm:$0xff] %v10698_v32  ;;  %v2328_v37 = vmul.f32 0.044715, %v2072_v33  ;;  %v3832_v60 = vmul.f32 %v3576_v39, %v10443_v50  ;;  %v10702_v28 = vpop.f32.mrb[18].mxu0  ;;  %v2583_v42 = vadd.f32 %v2327_v62, %v10658_v57  ;;  %v3575_v1 = vmul.f32 0.5, %v3319_v53 }
 0x402   : > { %v2331_v8 = vmul.f32 0.044715, %v2075_v59  ;;  %v2332_v15 = vmul.f32 0.044715, %v2076_v46  ;;  %v10705_v3 = vpop.f32.mrb[19].mxu0  ;;  %v3836_v31 = vmul.f32 %v3580_v36, %v10458_v16  ;;  %v3579_v32 = vmul.f32 0.5, %v3323_v2 }
 0x403   : > { %v2584_v21 = vadd.f32 %v2328_v37, %v10665_v41  ;;  %v10711_v33 = vadd.f32 %v10103_v12, %v9043_v29  ;;  %v2839_v54 = vmul.f32 0.7978846, %v2583_v42  ;;  %v3831_v62 = vmul.f32 %v3575_v1, %v10432_v4 }
 0x404   : > { %v10713_v50 = vpop.eup %6503  ;;  %v2587_v30 = vadd.f32 %v2331_v8, %v10673_v20  ;;  %v2588_v39 = vadd.f32 %v2332_v15, %v10677_v0  ;;  %v4052_v46 = vpack.c.bf16 %v3836_v31, %v3832_v60  ;;  %v3835_v53 = vmul.f32 %v3579_v32, %v10449_v35 }
 0x405   : > { %11638 = vst [vmem:[#allocation30_spill] sm:$0xff] %v10711_v33  ;;  %v2840_v59 = vmul.f32 0.7978846, %v2584_v21  ;;  %v1823_v16 = vmul.f32 %v10711_v33, %v10711_v33  ;;  %6511 = vtanh.f32 %v2839_v54  ;;  %v10723_v36 = vadd.f32 %v10126_v27, %v9060_v14  ;;  %v11639_v27 = vld [vmem:[#allocation25_spill] sm:$0xff] }
 0x406   : > { %v2843_v37 = vmul.f32 0.7978846, %v2587_v30  ;;  %v2844_v12 = vmul.f32 0.7978846, %v2588_v39  ;;  %v10725_v2 = vpop.eup %6505  ;;  %5044 = vmatprep.mubr.bf16.mxu0 %v4052_v46  ;;  %v4051_v42 = vpack.c.bf16 %v3835_v53, %v3831_v62  ;;  %v10730_v35 = vadd.f32 %v10143_v18, %v9043_v29 }
 0x407   : > { %6513 = vtanh.f32 %v2840_v59  ;;  %v2079_v4 = vmul.f32 %v1823_v16, %v10711_v33  ;;  %v10732_v32 = vpop.eup %6507  ;;  %v1824_v60 = vmul.f32 %v10723_v36, %v10723_v36  ;;  %v10738_v8 = vadd.f32 %v11639_v27, %v9060_v14 }
 0x408   : > { %6515 = vtanh.f32 %v2843_v37  ;;  %v3328_v15 = vadd.f32 1.0, %v10617_v47  ;;  %v10741_v1 = vpop.eup %6509  ;;  %5045 = vmatmul.mubr.bf16.gmra.mrb[100].mxu0 %v4051_v42  ;;  %v1827_v18 = vmul.f32 %v10730_v35, %v10730_v35  ;;  %v3332_v31 = vadd.f32 1.0, %v10630_v25  ;;  %v4077_v25 = vld [vmem:[%s11225_s5] sm:$0x3] }
 0x409   : > { %6517 = vtanh.f32 %v2844_v12  ;;  %v2335_v21 = vmul.f32 0.044715, %v2079_v4  ;;  %v2080_v54 = vmul.f32 %v1824_v60, %v10723_v36  ;;  %v1828_v30 = vmul.f32 %v10738_v8, %v10738_v8  ;;  %v10750_v59 = vpop.f32.mrb[20].mxu0 }
 0x40a   : > { %v3584_v39 = vmul.f32 0.5, %v3328_v15  ;;  %v3327_v62 = vadd.f32 1.0, %v10603_v58  ;;  %11640 = vst [vmem:[#allocation67_spill] sm:$0xff] %v10750_v59  ;;  %v2083_v46 = vmul.f32 %v1827_v18, %v10730_v35  ;;  %v3588_v53 = vmul.f32 0.5, %v3332_v31  ;;  %v10758_v37 = vpop.f32.mrb[21].mxu0 }
 0x40b   : > { %v2591_v47 = vadd.f32 %v2335_v21, %v10711_v33  ;;  %v3331_v16 = vadd.f32 1.0, %v10620_v34  ;;  %11641 = vst [vmem:[#allocation31_spill] sm:$0xff] %v10758_v37  ;;  %v2336_v12 = vmul.f32 0.044715, %v2080_v54  ;;  %v2084_v42 = vmul.f32 %v1828_v30, %v10738_v8  ;;  %v10762_v60 = vpop.f32.mrb[22].mxu0  ;;  %v11642_v54 = vld [vmem:[#allocation56_spill] sm:$0xff] }
 0x40c   : > { %v3840_v58 = vmul.f32 %v3584_v39, %v10499_v55  ;;  %v3583_v4 = vmul.f32 0.5, %v3327_v62  ;;  %v2339_v15 = vmul.f32 0.044715, %v2083_v46  ;;  %v3844_v21 = vmul.f32 %v3588_v53, %v10509_v49  ;;  %v10765_v34 = vpop.f32.mrb[23].mxu0 }
 0x40d   : > { %v2847_v27 = vmul.f32 0.7978846, %v2591_v47  ;;  %v3587_v18 = vmul.f32 0.5, %v3331_v16  ;;  %v2592_v31 = vadd.f32 %v2336_v12, %v10723_v36  ;;  %v2340_v59 = vmul.f32 0.044715, %v2084_v42 }
 0x40e   : > { %v3839_v37 = vmul.f32 %v3583_v4, %v10489_v23  ;;  %v11643_v33 = vsub.s32 0, %v11642_v54  ;;  %v2595_v55 = vadd.f32 %v2339_v15, %v10730_v35  ;;  %v4056_v39 = vpack.c.bf16 %v3844_v21, %v3840_v58  ;;  %v11644_v23 = vld [vmem:[#allocation59_spill] sm:$0xff]  ;;  %v11646_v21 = vld [vmem:[#allocation60_spill] sm:$0xff] }
 0x40f   : > { %6519 = vtanh.f32 %v2847_v27  ;;  %v3843_v62 = vmul.f32 %v3587_v18, %v10503_v48  ;;  %v10775_v49 = vpop.eup %6511  ;;  %v2848_v47 = vmul.f32 0.7978846, %v2592_v31  ;;  %v2596_v46 = vadd.f32 %v2340_v59, %v10738_v8 }
 0x410   : > { %v10771_v30 = vrot.slane %v4077_v25, %v11643_v33  ;;  %v10782_v16 = vadd.f32 %v11644_v23, %v9043_v29  ;;  %v2851_v12 = vmul.f32 0.7978846, %v2595_v55  ;;  %5054 = vmatprep.mubr.bf16.mxu0 %v4056_v39  ;;  %v11645_v58 = vsub.s32 1, %v11642_v54  ;;  %v11647_v54 = vld [vmem:[#allocation61_spill] sm:$0xff] }
 0x411   : > { %v10784_v33 = vpop.eup %6513  ;;  %v4055_v42 = vpack.c.bf16 %v3843_v62, %v3839_v37  ;;  %v10792_v4 = vadd.f32 %v10189_v7, %v9060_v14  ;;  %6521 = vtanh.f32 %v2848_v47  ;;  %v10813_v18 = vadd.f32 %v11646_v21, %v9043_v29 }
 0x412   : > { %v5502_v53 = vadd.f32 %v10471_v40, %v10771_v30  ;;  %v10788_v48 = vrot.slane %v4077_v25, %v11645_v58  ;;  %v10794_v59 = vpop.eup %6515  ;;  %v2852_v40 = vmul.f32 0.7978846, %v2596_v46  ;;  %v1831_v37 = vmul.f32 %v10782_v16, %v10782_v16 }
 0x413   : > { %v5504_v25 = vadd.f32 %v10480_v13, %v10771_v30  ;;  %v10805_v27 = vpop.eup %6517  ;;  %6523 = vtanh.f32 %v2851_v12  ;;  %5055 = vmatmul.mubr.bf16.gmra.mrb[104].mxu0 %v4055_v42  ;;  %v1832_v15 = vmul.f32 %v10792_v4, %v10792_v4  ;;  %v10821_v55 = vadd.f32 %v11647_v54, %v9060_v14 }
 0x414   : > { %5115 = vst [vmem:[%s10798_s20] sm:$0xff] %v5502_v53  ;;  %v5503_v7 = vadd.f32 %v10476_v19, %v10788_v48  ;;  %6525 = vtanh.f32 %v2852_v40  ;;  %v2087_v31 = vmul.f32 %v1831_v37, %v10782_v16  ;;  %v5505_v13 = vadd.f32 %v10483_v26, %v10788_v48  ;;  %v10823_v19 = vpop.f32.mrb[24].mxu0 }
 0x415   : > { %5117 = vst [vmem:[%s10798_s20 + $0x10] sm:$0xff] %v5504_v25  ;;  %v2088_v39 = vmul.f32 %v1832_v15, %v10792_v4  ;;  %v1835_v29 = vmul.f32 %v10813_v18, %v10813_v18  ;;  %v3336_v62 = vadd.f32 1.0, %v10667_v45  ;;  %v3340_v47 = vadd.f32 1.0, %v10684_v24  ;;  %v10831_v46 = vpop.f32.mrb[25].mxu0 }
 0x416   : > { %5116 = vst [vmem:[%s10798_s20 + $0x8] sm:$0xff] %v5503_v7  ;;  %v2343_v53 = vmul.f32 0.044715, %v2087_v31  ;;  %5118 = vst [vmem:[%s10798_s20 + $0x18] sm:$0xff] %v5505_v13  ;;  %v1836_v14 = vmul.f32 %v10821_v55, %v10821_v55  ;;  %v3335_v26 = vadd.f32 1.0, %v10660_v44  ;;  %v3339_v23 = vadd.f32 1.0, %v10679_v52 }
 0x417   : > { %v10838_v12 = vpop.f32.mrb[26].mxu0  ;;  %v2344_v42 = vmul.f32 0.044715, %v2088_v39  ;;  %v2091_v58 = vmul.f32 %v1835_v29, %v10813_v18  ;;  %v3592_v40 = vmul.f32 0.5, %v3336_v62  ;;  %v3596_v45 = vmul.f32 0.5, %v3340_v47 }
 0x418   : > { %v10841_v37 = vpop.f32.mrb[27].mxu0  ;;  %v2599_v24 = vadd.f32 %v2343_v53, %v10782_v16  ;;  %v2092_v25 = vmul.f32 %v1836_v14, %v10821_v55  ;;  %v3591_v7 = vmul.f32 0.5, %v3335_v26  ;;  %v3595_v15 = vmul.f32 0.5, %v3339_v23 }
 0x419   : > { %v10845_v21 = vpop.eup %6519  ;;  %v2600_v44 = vadd.f32 %v2344_v42, %v10792_v4  ;;  %v2347_v52 = vmul.f32 0.044715, %v2091_v58  ;;  %v3848_v31 = vmul.f32 %v3592_v40, %v10553_v43  ;;  %v3852_v13 = vmul.f32 %v3596_v45, %v10569_v63  ;;  %v11648_v42 = vld [vmem:[#allocation62_spill] sm:$0xff]  ;;  %v11650_v45 = vld [vmem:[#allocation27_spill] sm:$0xff] }
 0x41a   : > { %v2855_v54 = vmul.f32 0.7978846, %v2599_v24  ;;  %v2348_v39 = vmul.f32 0.044715, %v2092_v25  ;;  %v3847_v29 = vmul.f32 %v3591_v7, %v10549_v38  ;;  %v3851_v62 = vmul.f32 %v3595_v15, %v10561_v22 }
 0x41b   : > { %v2856_v47 = vmul.f32 0.7978846, %v2600_v44  ;;  %v2603_v53 = vadd.f32 %v2347_v52, %v10813_v18  ;;  %v4060_v14 = vpack.c.bf16 %v3852_v13, %v3848_v31  ;;  %v5506_v26 = vadd.f32 %v10529_v6, %v10771_v30  ;;  %v10855_v23 = vpop.eup %6521  ;;  %v11649_v6 = vld [vmem:[#allocation26_spill] sm:$0xff]  ;;  %v11651_v13 = vld [vmem:[#allocation63_spill] sm:$0xff] }
 0x41c   : > { %6527 = vtanh.f32 %v2855_v54  ;;  %v2604_v43 = vadd.f32 %v2348_v39, %v10821_v55  ;;  %v4059_v63 = vpack.c.bf16 %v3851_v62, %v3847_v29  ;;  %v5507_v58 = vadd.f32 %v11648_v42, %v10788_v48  ;;  %v11652_v39 = vld [vmem:[#allocation64_spill] sm:$0xff] }
 0x41d   : > { %v10860_v38 = vpop.eup %6523  ;;  %6529 = vtanh.f32 %v2856_v47  ;;  %v2859_v22 = vmul.f32 0.7978846, %v2603_v53  ;;  %5064 = vmatprep.mubr.bf16.mxu0 %v4060_v14  ;;  %5119 = vst [vmem:[%s10798_s20 + $0x20] sm:$0xff] %v5506_v26  ;;  %v5508_v40 = vadd.f32 %v11649_v6, %v10771_v30  ;;  %v5509_v24 = vadd.f32 %v11650_v45, %v10788_v48  ;;  %v11654_v26 = vld [vmem:[#allocation28_spill] sm:$0xff] }
 0x41e   : > { %v6526_v25 = vpop.eup %6525  ;;  %v2860_v7 = vmul.f32 0.7978846, %v2604_v43  ;;  %5065 = vmatmul.mubr.bf16.gmra.mrb[108].mxu0 %v4059_v63  ;;  %5120 = vst [vmem:[%s10798_s20 + $0x28] sm:$0xff] %v5507_v58  ;;  %v3344_v15 = vadd.f32 1.0, %v10725_v2  ;;  %v3348_v44 = vadd.f32 1.0, %v10741_v1  ;;  %v3343_v52 = vadd.f32 1.0, %v10713_v50 }
 0x41f   : > { %6531 = vtanh.f32 %v2859_v22  ;;  %5121 = vst [vmem:[%s10798_s20 + $0x30] sm:$0xff] %v5508_v40  ;;  %5122 = vst [vmem:[%s10798_s20 + $0x38] sm:$0xff] %v5509_v24  ;;  %v3347_v31 = vadd.f32 1.0, %v10732_v32  ;;  %v5510_v54 = vadd.f32 %v11651_v13, %v10771_v30  ;;  %v5511_v29 = vadd.f32 %v11652_v39, %v10788_v48  ;;  %v10878_v62 = vpop.f32.mrb[28].mxu0  ;;  %v11653_v32 = vld [vmem:[#allocation65_spill] sm:$0xff] }
 0x420   : > { %6533 = vtanh.f32 %v2860_v7  ;;  %v3600_v2 = vmul.f32 0.5, %v3344_v15  ;;  %v3604_v47 = vmul.f32 0.5, %v3348_v44  ;;  %v3599_v1 = vmul.f32 0.5, %v3343_v52  ;;  %v10880_v50 = vpop.f32.mrb[29].mxu0 }
 0x421   : > { %v3603_v53 = vmul.f32 0.5, %v3347_v31  ;;  %5123 = vst [vmem:[%s10798_s20 + $0x40] sm:$0xff] %v5510_v54  ;;  %5124 = vst [vmem:[%s10798_s20 + $0x48] sm:$0xff] %v5511_v29  ;;  %v5512_v14 = vadd.f32 %v11653_v32, %v10771_v30  ;;  %v5513_v43 = vadd.f32 %v11654_v26, %v10788_v48  ;;  %v3352_v63 = vadd.f32 1.0, %v10784_v33  ;;  %v10889_v42 = vpop.f32.mrb[30].mxu0 }
 0x422   : > { %v3856_v58 = vmul.f32 %v3600_v2, %v10611_v9  ;;  %v3860_v22 = vmul.f32 %v3604_v47, %v10628_v51  ;;  %v3855_v6 = vmul.f32 %v3599_v1, %v10597_v61  ;;  %v3356_v40 = vadd.f32 1.0, %v10805_v27  ;;  %v10895_v45 = vpop.f32.mrb[31].mxu0  ;;  %v11655_v51 = vld [vmem:[#allocation66_spill] sm:$0xff] }
 0x423   : > { %v3859_v24 = vmul.f32 %v3603_v53, %v10615_v56  ;;  %5125 = vst [vmem:[%s10798_s20 + $0x50] sm:$0xff] %v5512_v14  ;;  %5126 = vst [vmem:[%s10798_s20 + $0x58] sm:$0xff] %v5513_v43  ;;  %v3608_v7 = vmul.f32 0.5, %v3352_v63  ;;  %v3351_v33 = vadd.f32 1.0, %v10775_v49  ;;  %v3355_v15 = vadd.f32 1.0, %v10794_v59 }
 0x424   : > { %v4064_v9 = vpack.c.bf16 %v3860_v22, %v3856_v58  ;;  %v3612_v44 = vmul.f32 0.5, %v3356_v40  ;;  %v5514_v61 = vadd.f32 %v11655_v51, %v10771_v30  ;;  %v5515_v27 = vadd.f32 %v10643_v10, %v10788_v48 }
 0x425   : > { %v4063_v52 = vpack.c.bf16 %v3859_v24, %v3855_v6  ;;  %v3864_v56 = vmul.f32 %v3608_v7, %v10665_v41  ;;  %v3607_v31 = vmul.f32 0.5, %v3351_v33  ;;  %v3611_v13 = vmul.f32 0.5, %v3355_v15  ;;  %v11657_v6 = vld [vmem:[#allocation30_spill] sm:$0xff] }
 0x426   : > { %v6528_v54 = vpop.eup %6527  ;;  %5074 = vmatprep.mubr.bf16.mxu0 %v4064_v9  ;;  %v3868_v49 = vmul.f32 %v3612_v44, %v10677_v0  ;;  %5127 = vst [vmem:[%s10798_s20 + $0x60] sm:$0xff] %v5514_v61  ;;  %5128 = vst [vmem:[%s10798_s20 + $0x68] sm:$0xff] %v5515_v27  ;;  %v5516_v59 = vadd.f32 %v10646_v11, %v10771_v30  ;;  %v5517_v39 = vadd.f32 %v10650_v5, %v10788_v48  ;;  %v11658_v9 = vld [vmem:[#allocation67_spill] sm:$0xff] }
 0x427   : > { %v3360_v10 = vadd.f32 1.0, %v10855_v23  ;;  %v6530_v29 = vpop.eup %6529  ;;  %5075 = vmatmul.mubr.bf16.gmra.mrb[112].mxu0 %v4063_v52  ;;  %v3863_v41 = vmul.f32 %v3607_v31, %v10658_v57  ;;  %v3867_v2 = vmul.f32 %v3611_v13, %v10673_v20  ;;  %v3364_v47 = vadd.f32 1.0, %v6526_v25  ;;  %v11656_v20 = vld [vmem:[#allocation29_spill] sm:$0xff]  ;;  %v11659_v27 = vld [vmem:[#allocation31_spill] sm:$0xff] }
 0x428   : > { %v3359_v1 = vadd.f32 1.0, %v10845_v21  ;;  %v4068_v0 = vpack.c.bf16 %v3868_v49, %v3864_v56  ;;  %5129 = vst [vmem:[%s10798_s20 + $0x70] sm:$0xff] %v5516_v59  ;;  %5130 = vst [vmem:[%s10798_s20 + $0x78] sm:$0xff] %v5517_v39  ;;  %v3363_v11 = vadd.f32 1.0, %v10860_v38  ;;  %v5518_v5 = vadd.f32 %v10693_v17, %v10771_v30 }
 0x429   : > { %v3616_v53 = vmul.f32 0.5, %v3360_v10  ;;  %v6532_v23 = vpop.eup %6531  ;;  %v4067_v32 = vpack.c.bf16 %v3867_v2, %v3863_v41  ;;  %v3620_v14 = vmul.f32 0.5, %v3364_v47  ;;  %v5519_v25 = vadd.f32 %v11656_v20, %v10788_v48  ;;  %v4876_v26 = vpop.f32.mrb[32].mxu0 }
 0x42a   : > { %v3615_v57 = vmul.f32 0.5, %v3359_v1  ;;  %v6534_v21 = vpop.eup %6533  ;;  %5084 = vmatprep.mubr.bf16.mxu0 %v4068_v0  ;;  %v3619_v63 = vmul.f32 0.5, %v3363_v11  ;;  %5131 = vst [vmem:[%s10798_s20 + $0x80] sm:$0xff] %v5518_v5  ;;  %v5520_v17 = vadd.f32 %v10702_v28, %v10771_v30  ;;  %v5521_v38 = vadd.f32 %v10705_v3, %v10788_v48  ;;  %v4878_v58 = vpop.f32.mrb[33].mxu0 }
 0x42b   : > { %v3872_v43 = vmul.f32 %v3616_v53, %v10723_v36  ;;  %v3876_v22 = vmul.f32 %v3620_v14, %v10738_v8  ;;  %5132 = vst [vmem:[%s10798_s20 + $0x88] sm:$0xff] %v5519_v25  ;;  %v3368_v24 = vadd.f32 1.0, %v6530_v29  ;;  %v3372_v7 = vadd.f32 1.0, %v6534_v21  ;;  %v4880_v33 = vpop.f32.mrb[34].mxu0 }
 0x42c   : > { %v3871_v40 = vmul.f32 %v3615_v57, %v11657_v6  ;;  %v3875_v36 = vmul.f32 %v3619_v63, %v10730_v35  ;;  %5133 = vst [vmem:[%s10798_s20 + $0x90] sm:$0xff] %v5520_v17  ;;  %5134 = vst [vmem:[%s10798_s20 + $0x98] sm:$0xff] %v5521_v38  ;;  %v3367_v15 = vadd.f32 1.0, %v6528_v54  ;;  %v3371_v28 = vadd.f32 1.0, %v6532_v23  ;;  %v4882_v44 = vpop.f32.mrb[35].mxu0 }
 0x42d   : > { %v5522_v3 = vadd.f32 %v11658_v9, %v10771_v30  ;;  %v4072_v51 = vpack.c.bf16 %v3876_v22, %v3872_v43  ;;  %v3624_v8 = vmul.f32 0.5, %v3368_v24  ;;  %v3628_v61 = vmul.f32 0.5, %v3372_v7 }
 0x42e   : > { %v5523_v52 = vadd.f32 %v11659_v27, %v10788_v48  ;;  %v4071_v56 = vpack.c.bf16 %v3875_v36, %v3871_v40  ;;  %v3623_v31 = vmul.f32 0.5, %v3367_v15  ;;  %v3627_v13 = vmul.f32 0.5, %v3371_v28 }
 0x42f   : > { %5135 = vst [vmem:[%s10798_s20 + $0xa0] sm:$0xff] %v5522_v3  ;;  %v5524_v35 = vadd.f32 %v10762_v60, %v10771_v30  ;;  %5085 = vmatmul.mubr.bf16.gmra.mrb[116].mxu0 %v4067_v32  ;;  %v3880_v54 = vmul.f32 %v3624_v8, %v10792_v4  ;;  %v3884_v49 = vmul.f32 %v3628_v61, %v10821_v55 }
 0x430   : > { %5136 = vst [vmem:[%s10798_s20 + $0xa8] sm:$0xff] %v5523_v52  ;;  %v5525_v59 = vadd.f32 %v10765_v34, %v10788_v48  ;;  %v5526_v39 = vadd.f32 %v10823_v19, %v10771_v30  ;;  %5094 = vmatprep.mubr.bf16.mxu0 %v4072_v51  ;;  %v3879_v10 = vmul.f32 %v3623_v31, %v10782_v16 }
 0x431   : > { %v3883_v29 = vmul.f32 %v3627_v13, %v10813_v18  ;;  %5137 = vst [vmem:[%s10798_s20 + $0xb0] sm:$0xff] %v5524_v35  ;;  %v5527_v60 = vadd.f32 %v10831_v46, %v10788_v48  ;;  %v5528_v4 = vadd.f32 %v10838_v12, %v10771_v30  ;;  %v4076_v34 = vpack.c.bf16 %v3884_v49, %v3880_v54 }
 0x432   : > { %5138 = vst [vmem:[%s10798_s20 + $0xb8] sm:$0xff] %v5525_v59  ;;  %5139 = vst [vmem:[%s10798_s20 + $0xc0] sm:$0xff] %v5526_v39  ;;  %v5529_v55 = vadd.f32 %v10841_v37, %v10788_v48  ;;  %v5530_v16 = vadd.f32 %v10878_v62, %v10771_v30  ;;  %v5531_v18 = vadd.f32 %v10880_v50, %v10788_v48 }
 0x433   : > { %v4075_v19 = vpack.c.bf16 %v3883_v29, %v3879_v10  ;;  %5140 = vst [vmem:[%s10798_s20 + $0xc8] sm:$0xff] %v5527_v60  ;;  %5141 = vst [vmem:[%s10798_s20 + $0xd0] sm:$0xff] %v5528_v4  ;;  %v5532_v46 = vadd.f32 %v10889_v42, %v10771_v30  ;;  %v5533_v12 = vadd.f32 %v10895_v45, %v10788_v48  ;;  %v4886_v42 = vpop.f32.mrb[36].mxu0 }
 0x434   : > { %v5534_v37 = vadd.f32 %v4876_v26, %v10771_v30  ;;  %5142 = vst [vmem:[%s10798_s20 + $0xd8] sm:$0xff] %v5529_v55  ;;  %5143 = vst [vmem:[%s10798_s20 + $0xe0] sm:$0xff] %v5530_v16  ;;  %v5535_v62 = vadd.f32 %v4878_v58, %v10788_v48  ;;  %v5536_v50 = vadd.f32 %v4880_v33, %v10771_v30  ;;  %v4888_v2 = vpop.f32.mrb[37].mxu0 }
 0x435   : > { %5144 = vst [vmem:[%s10798_s20 + $0xe8] sm:$0xff] %v5531_v18  ;;  %v5537_v41 = vadd.f32 %v4882_v44, %v10788_v48  ;;  %5145 = vst [vmem:[%s10798_s20 + $0xf0] sm:$0xff] %v5532_v46  ;;  %v5538_v45 = vadd.f32 %v4886_v42, %v10771_v30  ;;  %v5539_v47 = vadd.f32 %v4888_v2, %v10788_v48  ;;  %v4890_v1 = vpop.f32.mrb[38].mxu0 }
 0x436   : > { %5146 = vst [vmem:[%s10798_s20 + $0xf8] sm:$0xff] %v5533_v12  ;;  %5147 = vst [vmem:[%s10798_s20 + $0x100] sm:$0xff] %v5534_v37  ;;  %v5540_v0 = vadd.f32 %v4890_v1, %v10771_v30  ;;  %v4892_v53 = vpop.f32.mrb[39].mxu0 }
 0x437   : > { %5148 = vst [vmem:[%s10798_s20 + $0x108] sm:$0xff] %v5535_v62  ;;  %5149 = vst [vmem:[%s10798_s20 + $0x110] sm:$0xff] %v5536_v50  ;;  %5095 = vmatmul.mubr.bf16.gmra.mrb[120].mxu0 %v4071_v56  ;;  %v5541_v11 = vadd.f32 %v4892_v53, %v10788_v48 }
 0x438   : > { %5150 = vst [vmem:[%s10798_s20 + $0x118] sm:$0xff] %v5537_v41  ;;  %5151 = vst [vmem:[%s10798_s20 + $0x120] sm:$0xff] %v5538_v45  ;;  %5104 = vmatprep.mubr.bf16.mxu0 %v4076_v34 }
 0x439   : > { %5152 = vst [vmem:[%s10798_s20 + $0x128] sm:$0xff] %v5539_v47  ;;  %5153 = vst [vmem:[%s10798_s20 + $0x130] sm:$0xff] %v5540_v0 }
 0x43a   : > { %5154 = vst [vmem:[%s10798_s20 + $0x138] sm:$0xff] %v5541_v11 }
 0x43e   : > { %v4896_v5 = vpop.f32.mrb[40].mxu0 }
 0x43f   : > { %5105 = vmatmul.mubr.bf16.gmra.mrb[124].mxu0 %v4075_v19  ;;  %v5542_v23 = vadd.f32 %v4896_v5, %v10771_v30  ;;  %v4898_v32 = vpop.f32.mrb[41].mxu0 }
 0x440   : > { %v5543_v14 = vadd.f32 %v4898_v32, %v10788_v48  ;;  %v4900_v57 = vpop.f32.mrb[42].mxu0 }
 0x441   : > { %5155 = vst [vmem:[%s10798_s20 + $0x140] sm:$0xff] %v5542_v23  ;;  %v5544_v20 = vadd.f32 %v4900_v57, %v10771_v30  ;;  %v4902_v25 = vpop.f32.mrb[43].mxu0 }
 0x442   : > { %5156 = vst [vmem:[%s10798_s20 + $0x148] sm:$0xff] %v5543_v14  ;;  %v5545_v26 = vadd.f32 %v4902_v25, %v10788_v48 }
 0x443   : > { %5157 = vst [vmem:[%s10798_s20 + $0x150] sm:$0xff] %v5544_v20 }
 0x444   : > { %5158 = vst [vmem:[%s10798_s20 + $0x158] sm:$0xff] %v5545_v26 }
 0x448   : > { %v4906_v21 = vpop.f32.mrb[44].mxu0 }
 0x449   : > { %v5546_v43 = vadd.f32 %v4906_v21, %v10771_v30  ;;  %v4908_v63 = vpop.f32.mrb[45].mxu0 }
 0x44a   : > { %v5547_v17 = vadd.f32 %v4908_v63, %v10788_v48  ;;  %v4910_v38 = vpop.f32.mrb[46].mxu0 }
 0x44b   : > { %5159 = vst [vmem:[%s10798_s20 + $0x160] sm:$0xff] %v5546_v43  ;;  %v5548_v58 = vadd.f32 %v4910_v38, %v10771_v30  ;;  %v4912_v22 = vpop.f32.mrb[47].mxu0 }
 0x44c   : > { %5160 = vst [vmem:[%s10798_s20 + $0x168] sm:$0xff] %v5547_v17  ;;  %v5549_v6 = vadd.f32 %v4912_v22, %v10788_v48 }
 0x44d   : > { %5161 = vst [vmem:[%s10798_s20 + $0x170] sm:$0xff] %v5548_v58 }
 0x44e   : > { %5162 = vst [vmem:[%s10798_s20 + $0x178] sm:$0xff] %v5549_v6 }
 0x453   : > { %v4916_v40 = vpop.f32.mrb[48].mxu0 }
 0x454   : > { %v5550_v24 = vadd.f32 %v4916_v40, %v10771_v30  ;;  %v4918_v7 = vpop.f32.mrb[49].mxu0 }
 0x455   : > { %v5551_v33 = vadd.f32 %v4918_v7, %v10788_v48  ;;  %v4920_v36 = vpop.f32.mrb[50].mxu0 }
 0x456   : > { %5163 = vst [vmem:[%s10798_s20 + $0x180] sm:$0xff] %v5550_v24  ;;  %v5552_v15 = vadd.f32 %v4920_v36, %v10771_v30  ;;  %v4922_v28 = vpop.f32.mrb[51].mxu0 }
 0x457   : > { %5164 = vst [vmem:[%s10798_s20 + $0x188] sm:$0xff] %v5551_v33  ;;  %v5553_v9 = vadd.f32 %v4922_v28, %v10788_v48 }
 0x458   : > { %5165 = vst [vmem:[%s10798_s20 + $0x190] sm:$0xff] %v5552_v15 }
 0x459   : > { %5166 = vst [vmem:[%s10798_s20 + $0x198] sm:$0xff] %v5553_v9 }
 0x45d   : > { %v4926_v3 = vpop.f32.mrb[52].mxu0 }
 0x45e   : > { %v5554_v44 = vadd.f32 %v4926_v3, %v10771_v30  ;;  %v4928_v51 = vpop.f32.mrb[53].mxu0 }
 0x45f   : > { %v5555_v8 = vadd.f32 %v4928_v51, %v10788_v48  ;;  %v4930_v61 = vpop.f32.mrb[54].mxu0 }
 0x460   : > { %5167 = vst [vmem:[%s10798_s20 + $0x1a0] sm:$0xff] %v5554_v44  ;;  %v5556_v27 = vadd.f32 %v4930_v61, %v10771_v30  ;;  %v4932_v52 = vpop.f32.mrb[55].mxu0 }
 0x461   : > { %5168 = vst [vmem:[%s10798_s20 + $0x1a8] sm:$0xff] %v5555_v8  ;;  %v5557_v56 = vadd.f32 %v4932_v52, %v10788_v48 }
 0x462   : > { %5169 = vst [vmem:[%s10798_s20 + $0x1b0] sm:$0xff] %v5556_v27 }
 0x463   : > { %5170 = vst [vmem:[%s10798_s20 + $0x1b8] sm:$0xff] %v5557_v56 }
 0x468   : > { %v4936_v31 = vpop.f32.mrb[56].mxu0 }
 0x469   : > { %v5558_v13 = vadd.f32 %v4936_v31, %v10771_v30  ;;  %v4938_v35 = vpop.f32.mrb[57].mxu0 }
 0x46a   : > { %v5559_v54 = vadd.f32 %v4938_v35, %v10788_v48  ;;  %v4940_v49 = vpop.f32.mrb[58].mxu0 }
 0x46b   : > { %5171 = vst [vmem:[%s10798_s20 + $0x1c0] sm:$0xff] %v5558_v13  ;;  %v5560_v59 = vadd.f32 %v4940_v49, %v10771_v30  ;;  %v4942_v39 = vpop.f32.mrb[59].mxu0 }
 0x46c   : > { %5172 = vst [vmem:[%s10798_s20 + $0x1c8] sm:$0xff] %v5559_v54  ;;  %v5561_v10 = vadd.f32 %v4942_v39, %v10788_v48 }
 0x46d   : > { %5173 = vst [vmem:[%s10798_s20 + $0x1d0] sm:$0xff] %v5560_v59 }
 0x46e   : > { %5174 = vst [vmem:[%s10798_s20 + $0x1d8] sm:$0xff] %v5561_v10 }
 0x472   : > { %v4946_v29 = vpop.f32.mrb[60].mxu0 }
 0x473   : > { %v5562_v60 = vadd.f32 %v4946_v29, %v10771_v30  ;;  %v4948_v4 = vpop.f32.mrb[61].mxu0 }
 0x474   : > { %v5563_v34 = vadd.f32 %v4948_v4, %v10788_v48  ;;  %v4950_v55 = vpop.f32.mrb[62].mxu0 }
 0x475   : > { %5175 = vst [vmem:[%s10798_s20 + $0x1e0] sm:$0xff] %v5562_v60  ;;  %v5564_v16 = vadd.f32 %v4950_v55, %v10771_v30  ;;  %v4952_v18 = vpop.f32.mrb[63].mxu0 }
 0x476   : > { %5176 = vst [vmem:[%s10798_s20 + $0x1e8] sm:$0xff] %v5563_v34  ;;  %v5565_v19 = vadd.f32 %v4952_v18, %v10788_v48 }
 0x477   : > { %5177 = vst [vmem:[%s10798_s20 + $0x1f0] sm:$0xff] %v5564_v16 }
 0x478   : > { %5178 = vst [vmem:[%s10798_s20 + $0x1f8] sm:$0xff] %v5565_v19 }
 0x47d   : > { %v4956_v46 = vpop.f32.mrb[64].mxu0 }
 0x47e   : > { %v5566_v12 = vadd.f32 %v4956_v46, %v10771_v30  ;;  %v4958_v37 = vpop.f32.mrb[65].mxu0 }
 0x47f   : > { %v5567_v62 = vadd.f32 %v4958_v37, %v10788_v48  ;;  %v4960_v50 = vpop.f32.mrb[66].mxu0 }
 0x480   : > { %5179 = vst [vmem:[%s10798_s20 + $0x200] sm:$0xff] %v5566_v12  ;;  %v5568_v41 = vadd.f32 %v4960_v50, %v10771_v30  ;;  %v4962_v42 = vpop.f32.mrb[67].mxu0 }
 0x481   : > { %5180 = vst [vmem:[%s10798_s20 + $0x208] sm:$0xff] %v5567_v62  ;;  %v5569_v45 = vadd.f32 %v4962_v42, %v10788_v48 }
 0x482   : > { %5181 = vst [vmem:[%s10798_s20 + $0x210] sm:$0xff] %v5568_v41 }
 0x483   : > { %5182 = vst [vmem:[%s10798_s20 + $0x218] sm:$0xff] %v5569_v45 }
 0x487   : > { %v4966_v2 = vpop.f32.mrb[68].mxu0 }
 0x488   : > { %v5570_v47 = vadd.f32 %v4966_v2, %v10771_v30  ;;  %v4968_v1 = vpop.f32.mrb[69].mxu0 }
 0x489   : > { %v5571_v0 = vadd.f32 %v4968_v1, %v10788_v48  ;;  %v4970_v53 = vpop.f32.mrb[70].mxu0 }
 0x48a   : > { %5183 = vst [vmem:[%s10798_s20 + $0x220] sm:$0xff] %v5570_v47  ;;  %v5572_v11 = vadd.f32 %v4970_v53, %v10771_v30  ;;  %v4972_v5 = vpop.f32.mrb[71].mxu0 }
 0x48b   : > { %5184 = vst [vmem:[%s10798_s20 + $0x228] sm:$0xff] %v5571_v0  ;;  %v5573_v23 = vadd.f32 %v4972_v5, %v10788_v48 }
 0x48c   : > { %5185 = vst [vmem:[%s10798_s20 + $0x230] sm:$0xff] %v5572_v11 }
 0x48d   : > { %5186 = vst [vmem:[%s10798_s20 + $0x238] sm:$0xff] %v5573_v23 }
 0x492   : > { %v4976_v32 = vpop.f32.mrb[72].mxu0 }
 0x493   : > { %v5574_v14 = vadd.f32 %v4976_v32, %v10771_v30  ;;  %v4978_v57 = vpop.f32.mrb[73].mxu0 }
 0x494   : > { %v5575_v20 = vadd.f32 %v4978_v57, %v10788_v48  ;;  %v4980_v25 = vpop.f32.mrb[74].mxu0 }
 0x495   : > { %5187 = vst [vmem:[%s10798_s20 + $0x240] sm:$0xff] %v5574_v14  ;;  %v5576_v26 = vadd.f32 %v4980_v25, %v10771_v30  ;;  %v4982_v21 = vpop.f32.mrb[75].mxu0 }
 0x496   : > { %5188 = vst [vmem:[%s10798_s20 + $0x248] sm:$0xff] %v5575_v20  ;;  %v5577_v43 = vadd.f32 %v4982_v21, %v10788_v48 }
 0x497   : > { %5189 = vst [vmem:[%s10798_s20 + $0x250] sm:$0xff] %v5576_v26 }
 0x498   : > { %5190 = vst [vmem:[%s10798_s20 + $0x258] sm:$0xff] %v5577_v43 }
 0x49c   : > { %v4986_v63 = vpop.f32.mrb[76].mxu0 }
 0x49d   : > { %v5578_v17 = vadd.f32 %v4986_v63, %v10771_v30  ;;  %v4988_v38 = vpop.f32.mrb[77].mxu0 }
 0x49e   : > { %v5579_v58 = vadd.f32 %v4988_v38, %v10788_v48  ;;  %v4990_v22 = vpop.f32.mrb[78].mxu0 }
 0x49f   : > { %5191 = vst [vmem:[%s10798_s20 + $0x260] sm:$0xff] %v5578_v17  ;;  %v5580_v6 = vadd.f32 %v4990_v22, %v10771_v30  ;;  %v4992_v40 = vpop.f32.mrb[79].mxu0 }
 0x4a0   : > { %5192 = vst [vmem:[%s10798_s20 + $0x268] sm:$0xff] %v5579_v58  ;;  %v5581_v24 = vadd.f32 %v4992_v40, %v10788_v48 }
 0x4a1   : > { %5193 = vst [vmem:[%s10798_s20 + $0x270] sm:$0xff] %v5580_v6 }
 0x4a2   : > { %5194 = vst [vmem:[%s10798_s20 + $0x278] sm:$0xff] %v5581_v24 }
 0x4a7   : > { %v4996_v7 = vpop.f32.mrb[80].mxu0 }
 0x4a8   : > { %v5582_v33 = vadd.f32 %v4996_v7, %v10771_v30  ;;  %v4998_v36 = vpop.f32.mrb[81].mxu0 }
 0x4a9   : > { %v5583_v15 = vadd.f32 %v4998_v36, %v10788_v48  ;;  %v5000_v28 = vpop.f32.mrb[82].mxu0 }
 0x4aa   : > { %5195 = vst [vmem:[%s10798_s20 + $0x280] sm:$0xff] %v5582_v33  ;;  %v5584_v9 = vadd.f32 %v5000_v28, %v10771_v30  ;;  %v5002_v3 = vpop.f32.mrb[83].mxu0 }
 0x4ab   : > { %5196 = vst [vmem:[%s10798_s20 + $0x288] sm:$0xff] %v5583_v15  ;;  %v5585_v44 = vadd.f32 %v5002_v3, %v10788_v48 }
 0x4ac   : > { %5197 = vst [vmem:[%s10798_s20 + $0x290] sm:$0xff] %v5584_v9 }
 0x4ad   : > { %5198 = vst [vmem:[%s10798_s20 + $0x298] sm:$0xff] %v5585_v44 }
 0x4b1   : > { %v5006_v51 = vpop.f32.mrb[84].mxu0 }
 0x4b2   : > { %v5586_v8 = vadd.f32 %v5006_v51, %v10771_v30  ;;  %v5008_v61 = vpop.f32.mrb[85].mxu0 }
 0x4b3   : > { %v5587_v27 = vadd.f32 %v5008_v61, %v10788_v48  ;;  %v5010_v52 = vpop.f32.mrb[86].mxu0 }
 0x4b4   : > { %5199 = vst [vmem:[%s10798_s20 + $0x2a0] sm:$0xff] %v5586_v8  ;;  %v5588_v56 = vadd.f32 %v5010_v52, %v10771_v30  ;;  %v5012_v31 = vpop.f32.mrb[87].mxu0 }
 0x4b5   : > { %5200 = vst [vmem:[%s10798_s20 + $0x2a8] sm:$0xff] %v5587_v27  ;;  %v5589_v13 = vadd.f32 %v5012_v31, %v10788_v48 }
 0x4b6   : > { %5201 = vst [vmem:[%s10798_s20 + $0x2b0] sm:$0xff] %v5588_v56 }
 0x4b7   : > { %5202 = vst [vmem:[%s10798_s20 + $0x2b8] sm:$0xff] %v5589_v13 }
 0x4bc   : > { %v5016_v35 = vpop.f32.mrb[88].mxu0 }
 0x4bd   : > { %v5590_v54 = vadd.f32 %v5016_v35, %v10771_v30  ;;  %v5018_v49 = vpop.f32.mrb[89].mxu0 }
 0x4be   : > { %v5591_v59 = vadd.f32 %v5018_v49, %v10788_v48  ;;  %v5020_v39 = vpop.f32.mrb[90].mxu0 }
 0x4bf   : > { %5203 = vst [vmem:[%s10798_s20 + $0x2c0] sm:$0xff] %v5590_v54  ;;  %v5592_v10 = vadd.f32 %v5020_v39, %v10771_v30  ;;  %v5022_v29 = vpop.f32.mrb[91].mxu0 }
 0x4c0   : > { %5204 = vst [vmem:[%s10798_s20 + $0x2c8] sm:$0xff] %v5591_v59  ;;  %v5593_v60 = vadd.f32 %v5022_v29, %v10788_v48 }
 0x4c1   : > { %5205 = vst [vmem:[%s10798_s20 + $0x2d0] sm:$0xff] %v5592_v10 }
 0x4c2   : > { %5206 = vst [vmem:[%s10798_s20 + $0x2d8] sm:$0xff] %v5593_v60 }
 0x4c6   : > { %v5026_v4 = vpop.f32.mrb[92].mxu0 }
 0x4c7   : > { %v5594_v34 = vadd.f32 %v5026_v4, %v10771_v30  ;;  %v5028_v55 = vpop.f32.mrb[93].mxu0 }
 0x4c8   : > { %v5595_v16 = vadd.f32 %v5028_v55, %v10788_v48  ;;  %v5030_v18 = vpop.f32.mrb[94].mxu0 }
 0x4c9   : > { %5207 = vst [vmem:[%s10798_s20 + $0x2e0] sm:$0xff] %v5594_v34  ;;  %v5596_v19 = vadd.f32 %v5030_v18, %v10771_v30  ;;  %v5032_v46 = vpop.f32.mrb[95].mxu0 }
 0x4ca   : > { %5208 = vst [vmem:[%s10798_s20 + $0x2e8] sm:$0xff] %v5595_v16  ;;  %v5597_v12 = vadd.f32 %v5032_v46, %v10788_v48 }
 0x4cb   : > { %5209 = vst [vmem:[%s10798_s20 + $0x2f0] sm:$0xff] %v5596_v19 }
 0x4cc   : > { %5210 = vst [vmem:[%s10798_s20 + $0x2f8] sm:$0xff] %v5597_v12 }
 0x4d1   : > { %v5036_v37 = vpop.f32.mrb[96].mxu0 }
 0x4d2   : > { %v5598_v62 = vadd.f32 %v5036_v37, %v10771_v30  ;;  %v5038_v50 = vpop.f32.mrb[97].mxu0 }
 0x4d3   : > { %v5599_v41 = vadd.f32 %v5038_v50, %v10788_v48  ;;  %v5040_v42 = vpop.f32.mrb[98].mxu0 }
 0x4d4   : > { %5211 = vst [vmem:[%s10798_s20 + $0x300] sm:$0xff] %v5598_v62  ;;  %v5600_v45 = vadd.f32 %v5040_v42, %v10771_v30  ;;  %v5042_v2 = vpop.f32.mrb[99].mxu0 }
 0x4d5   : > { %5212 = vst [vmem:[%s10798_s20 + $0x308] sm:$0xff] %v5599_v41  ;;  %v5601_v47 = vadd.f32 %v5042_v2, %v10788_v48 }
 0x4d6   : > { %5213 = vst [vmem:[%s10798_s20 + $0x310] sm:$0xff] %v5600_v45 }
 0x4d7   : > { %5214 = vst [vmem:[%s10798_s20 + $0x318] sm:$0xff] %v5601_v47 }
 0x4db   : > { %v5046_v1 = vpop.f32.mrb[100].mxu0 }
 0x4dc   : > { %v5602_v0 = vadd.f32 %v5046_v1, %v10771_v30  ;;  %v5048_v53 = vpop.f32.mrb[101].mxu0 }
 0x4dd   : > { %v5603_v11 = vadd.f32 %v5048_v53, %v10788_v48  ;;  %v5050_v5 = vpop.f32.mrb[102].mxu0 }
 0x4de   : > { %5215 = vst [vmem:[%s10798_s20 + $0x320] sm:$0xff] %v5602_v0  ;;  %v5604_v23 = vadd.f32 %v5050_v5, %v10771_v30  ;;  %v5052_v32 = vpop.f32.mrb[103].mxu0 }
 0x4df   : > { %5216 = vst [vmem:[%s10798_s20 + $0x328] sm:$0xff] %v5603_v11  ;;  %v5605_v14 = vadd.f32 %v5052_v32, %v10788_v48 }
 0x4e0   : > { %5217 = vst [vmem:[%s10798_s20 + $0x330] sm:$0xff] %v5604_v23 }
 0x4e1   : > { %5218 = vst [vmem:[%s10798_s20 + $0x338] sm:$0xff] %v5605_v14 }
 0x4e6   : > { %v5056_v57 = vpop.f32.mrb[104].mxu0 }
 0x4e7   : > { %v5606_v20 = vadd.f32 %v5056_v57, %v10771_v30  ;;  %v5058_v25 = vpop.f32.mrb[105].mxu0 }
 0x4e8   : > { %v5607_v26 = vadd.f32 %v5058_v25, %v10788_v48  ;;  %v5060_v21 = vpop.f32.mrb[106].mxu0 }
 0x4e9   : > { %5219 = vst [vmem:[%s10798_s20 + $0x340] sm:$0xff] %v5606_v20  ;;  %v5608_v43 = vadd.f32 %v5060_v21, %v10771_v30  ;;  %v5062_v63 = vpop.f32.mrb[107].mxu0 }
 0x4ea   : > { %5220 = vst [vmem:[%s10798_s20 + $0x348] sm:$0xff] %v5607_v26  ;;  %v5609_v17 = vadd.f32 %v5062_v63, %v10788_v48 }
 0x4eb   : > { %5221 = vst [vmem:[%s10798_s20 + $0x350] sm:$0xff] %v5608_v43 }
 0x4ec   : > { %5222 = vst [vmem:[%s10798_s20 + $0x358] sm:$0xff] %v5609_v17 }
 0x4f1   : > { %v5066_v38 = vpop.f32.mrb[108].mxu0 }
 0x4f2   : > { %v5610_v58 = vadd.f32 %v5066_v38, %v10771_v30  ;;  %v5068_v22 = vpop.f32.mrb[109].mxu0 }
 0x4f3   : > { %v5611_v6 = vadd.f32 %v5068_v22, %v10788_v48  ;;  %v5070_v40 = vpop.f32.mrb[110].mxu0 }
 0x4f4   : > { %5223 = vst [vmem:[%s10798_s20 + $0x360] sm:$0xff] %v5610_v58  ;;  %v5612_v24 = vadd.f32 %v5070_v40, %v10771_v30  ;;  %v5072_v7 = vpop.f32.mrb[111].mxu0 }
 0x4f5   : > { %5224 = vst [vmem:[%s10798_s20 + $0x368] sm:$0xff] %v5611_v6  ;;  %v5613_v33 = vadd.f32 %v5072_v7, %v10788_v48 }
 0x4f6   : > { %5225 = vst [vmem:[%s10798_s20 + $0x370] sm:$0xff] %v5612_v24 }
 0x4f7   : > { %5226 = vst [vmem:[%s10798_s20 + $0x378] sm:$0xff] %v5613_v33 }
 0x4fa   : > { %v5076_v36 = vpop.f32.mrb[112].mxu0 }
 0x4fb   : > { %v5614_v15 = vadd.f32 %v5076_v36, %v10771_v30  ;;  %v5078_v28 = vpop.f32.mrb[113].mxu0 }
 0x4fc   : > { %v5615_v9 = vadd.f32 %v5078_v28, %v10788_v48  ;;  %v5080_v3 = vpop.f32.mrb[114].mxu0 }
 0x4fd   : > { %5227 = vst [vmem:[%s10798_s20 + $0x380] sm:$0xff] %v5614_v15  ;;  %v5616_v44 = vadd.f32 %v5080_v3, %v10771_v30  ;;  %v5082_v51 = vpop.f32.mrb[115].mxu0 }
 0x4fe   : > { %5228 = vst [vmem:[%s10798_s20 + $0x388] sm:$0xff] %v5615_v9  ;;  %v5617_v8 = vadd.f32 %v5082_v51, %v10788_v48 }
 0x4ff   : > { %5229 = vst [vmem:[%s10798_s20 + $0x390] sm:$0xff] %v5616_v44 }
 0x500   : > { %5230 = vst [vmem:[%s10798_s20 + $0x398] sm:$0xff] %v5617_v8 }
 0x502   : > { %v5086_v61 = vpop.f32.mrb[116].mxu0 }
 0x503   : > { %v5618_v27 = vadd.f32 %v5086_v61, %v10771_v30  ;;  %v5088_v52 = vpop.f32.mrb[117].mxu0 }
 0x504   : > { %v5619_v56 = vadd.f32 %v5088_v52, %v10788_v48  ;;  %v5090_v31 = vpop.f32.mrb[118].mxu0 }
 0x505   : > { %5231 = vst [vmem:[%s10798_s20 + $0x3a0] sm:$0xff] %v5618_v27  ;;  %v5620_v13 = vadd.f32 %v5090_v31, %v10771_v30  ;;  %v5092_v35 = vpop.f32.mrb[119].mxu0 }
 0x506   : > { %5232 = vst [vmem:[%s10798_s20 + $0x3a8] sm:$0xff] %v5619_v56  ;;  %v5621_v54 = vadd.f32 %v5092_v35, %v10788_v48 }
 0x507   : > { %5233 = vst [vmem:[%s10798_s20 + $0x3b0] sm:$0xff] %v5620_v13 }
 0x508   : > { %5234 = vst [vmem:[%s10798_s20 + $0x3b8] sm:$0xff] %v5621_v54 }
 0x50a   : > { %v5096_v49 = vpop.f32.mrb[120].mxu0 }
 0x50b   : > { %v5622_v59 = vadd.f32 %v5096_v49, %v10771_v30  ;;  %v5098_v39 = vpop.f32.mrb[121].mxu0 }
 0x50c   : > { %v5623_v10 = vadd.f32 %v5098_v39, %v10788_v48  ;;  %v5100_v29 = vpop.f32.mrb[122].mxu0 }
 0x50d   : > { %5235 = vst [vmem:[%s10798_s20 + $0x3c0] sm:$0xff] %v5622_v59  ;;  %v5624_v60 = vadd.f32 %v5100_v29, %v10771_v30  ;;  %v5102_v4 = vpop.f32.mrb[123].mxu0 }
 0x50e   : > { %5236 = vst [vmem:[%s10798_s20 + $0x3c8] sm:$0xff] %v5623_v10  ;;  %v5625_v34 = vadd.f32 %v5102_v4, %v10788_v48 }
 0x50f   : > { %5237 = vst [vmem:[%s10798_s20 + $0x3d0] sm:$0xff] %v5624_v60 }
 0x510   : > { %5238 = vst [vmem:[%s10798_s20 + $0x3d8] sm:$0xff] %v5625_v34 }
 0x512   : > { %v5106_v55 = vpop.f32.mrb[124].mxu0 }
 0x513   : > { %v5626_v16 = vadd.f32 %v5106_v55, %v10771_v30  ;;  %v5108_v18 = vpop.f32.mrb[125].mxu0 }
 0x514   : > { %v5627_v19 = vadd.f32 %v5108_v18, %v10788_v48  ;;  %v5110_v46 = vpop.f32.mrb[126].mxu0 }
 0x515   : > { %5239 = vst [vmem:[%s10798_s20 + $0x3e0] sm:$0xff] %v5626_v16  ;;  %v5628_v12 = vadd.f32 %v5110_v46, %v10771_v30  ;;  %v5112_v37 = vpop.f32.mrb[127].mxu0 }
 0x516   : > { %5240 = vst [vmem:[%s10798_s20 + $0x3e8] sm:$0xff] %v5627_v19  ;;  %v5629_v62 = vadd.f32 %v5112_v37, %v10788_v48 }
 0x517   : > { %5241 = vst [vmem:[%s10798_s20 + $0x3f0] sm:$0xff] %v5628_v12 }
 0x518   : > { %5242 = vst [vmem:[%s10798_s20 + $0x3f8] sm:$0xff] %v5629_v62 }
 0x519   : > { %6635 = shalt.err (!%p6632_p1)
}
 0x51a   : > { %s6636_s28 = scalar_lea.hbm %s11170_s12, 16384  ;;  %s6640_s30 = scalar_lea.hbm %s11226_s6, 32768 }
 0x51b   : > { %p6637_p13 = scmp.ne.s32.totalorder %s11170_s12, %s6636_s28  ;;  %p6641_p4 = scmp.lt.u32.totalorder %s11170_s12, %s11226_s6 }
 0x51c   : > { %p6642_p7 = scmp.lt.u32.totalorder %s6640_s30, %s6636_s28  ;;  %p6644_p11 = scmp.lt.u32.totalorder %s6636_s28, %s11170_s12 }
 0x51d   : > { %p6638_p6 = pnand %p6637_p13, %p11660_p0 }
 0x51e   : > { %p6643_p8 = por %p6642_p7, %p6641_p4 }
 0x51f   : > { %p6639_p10 = pneg %p6638_p6 }
 0x520   : > { %p6645_p2 = por %p6644_p11, %p6643_p8 }
 0x522   : > { %p6646_p3 = pnand %p6645_p2, %p6639_p10 }
 0x524   : > { %6649 = shalt.err (!%p6646_p3)
}
 0x525   : > { %s6702_s14 = smov 256   ;;  %s6703_s15 = smov 16  }
 0x526   : > { %5768 = dma.vmem_to_hbm [thread:$0]  (%p11660_p0), %s11172_s7, 16384, %s11170_s12, %s5244_s24, %s6702_s14, %s6702_s14, %s6703_s15  }
 0x527 PF: > { %s5273_s8 = sand.u32 1, %s6680_s0   ;;  %p11661_p5 = scmp.ne.s32.totalorder %s11291_s27, 0 }
 0x528   : > { %p11662_p9 = scmp.ge.s32.totalorder %s6692_s23, 2  ;;  %s5274_s9 = scalar_lea.sflag [#allocation6], %s5273_s8 }
 0x52a   : > { %p5782_p12 = pnand %p11662_p9, %p11661_p5 }
 0x52c   : > { %6675 = dma.done.wait (!%p5782_p12), %s5274_s9, 16384  }
 0x52d   : > { %6677 = vsyncadd (!%p5782_p12), %s5274_s9, 4294950912  ;;  %p21_p1 = scmp.ge.s32.totalorder %s6852_s25, 4   ;;  %s11663_s0 = smov %s6684_s21 }
 0x52e   : > { %s11664_s21 = smov %s6688_s22  ;;  %s11665_s22 = smov %s6861_s10 }
 0x52f   : > { %s11666_s23 = smov %s6852_s25  ;;  %23 = sbr.rel (!%p21_p1) target bundleno = 6 (0x6), region = 93 }
 0x536   :  { %5279 = vsyncpa [#allocation5], 1 }
 0x537   :  { %5281 = vsyncpa [#allocation5 + $0x1], 1 }
 0x538   :  { %5282 = vsyncpa [#allocation8], 1 }
 0x539   :  { %5283 = vsyncpa [#allocation6], 1 }
 0x53a   :  { %5285 = vsyncpa [#allocation6 + $0x1], 1 }

</bundles_post_ra>
